<compile_context>
chip_gen: v7x
topology: tpu7x:2x2x1
jax: 0.10.0
libtpu: 0.0.40
codegen_flags: <defaults>
</compile_context>

<pallas_src>
import functools

import jax
import jax.numpy as jnp
from jax.experimental import pallas as pl
from jax.experimental.pallas import tpu as pltpu


# ----------------------------------------------------------------------------
# VMEM-budget-aware tiling helpers
# ----------------------------------------------------------------------------
_TM_CANDIDATES = (1024, 512, 256, 128, 64, 32, 16, 8)


def _round_up(x, m):
    return ((x + m - 1) // m) * m


def _physical_vmem_bytes():
    try:
        cap = getattr(pltpu.get_tpu_info(), "vmem_capacity_bytes", None)
        if cap:
            return int(cap)
    except Exception:
        pass
    return 64 * 1024 * 1024          # conservative default (v7x per-TensorCore VMEM)


def _vmem_limit_bytes():
    # raise above the small scoped default but leave headroom below physical VMEM
    return max(32 * 1024 * 1024,
               min(int(0.80 * _physical_vmem_bytes()), 100 * 1024 * 1024))


def _vmem_budget_bytes():
    return int(0.55 * _physical_vmem_bytes())


def _pick_matmul_tiles(M, K, Nout, budget):
    """Largest (tm, tk) whose blocks fit the VMEM budget.

    K and Nout are assumed 128-multiples (caller pads), so every block below is
    exactly as large in VMEM as counted here (no silent lane/sublane padding).
    tm is additionally capped so the M grid has >= ~4 tiles (megacore + pipelining).
    """
    m_cap = max(8, _round_up(-(-M // 4), 8))
    tk_cands = sorted(
        {K} | {K // n for n in range(2, K // 128 + 1)
               if K % n == 0 and (K // n) % 128 == 0},
        reverse=True)
    for tm in _TM_CANDIDATES:
        tm_eff = min(tm, m_cap)
        for tk in tk_cands:
            total = 2 * (tm_eff * tk * 2       # patches block (bf16), double-buffered
                         + tk * Nout * 2       # weight block (bf16)
                         + 8 * Nout * 4        # bias row (f32, sublane-padded to 8)
                         + tm_eff * Nout * 4)  # resident f32 output block
            if total <= budget:
                return tm_eff, tk
    return 8, min(tk_cands)


# ----------------------------------------------------------------------------
# Pallas kernel: K-tiled matmul, bias + optional 2*sigmoid epilogue,
# accumulating directly into the resident f32 output block.
# ----------------------------------------------------------------------------
def _matmul_bias_act_kernel(p_ref, w_ref, b_ref, o_ref, *, act_start):
    """One (M-tile, K-tile) step of   out = act(patches @ w + bias).

    p_ref: (tm, tk)   bf16 patches / deformable-im2col columns
    w_ref: (tk, Nout) bf16 weights (lane-padded)
    b_ref: (1, Nout)  f32  bias (added pre-activation)
    o_ref: (tm, Nout) f32  resident across the K grid axis (accumulator)
    act_start: None (no activation) or first lane index getting 2*sigmoid.
    """
    k = pl.program_id(1)

    @pl.when(k == 0)
    def _():
        o_ref[...] = jnp.zeros_like(o_ref)

    o_ref[...] += jnp.dot(p_ref[...], w_ref[...],
                          preferred_element_type=jnp.float32)

    @pl.when(k == pl.num_programs(1) - 1)
    def _():
        out = o_ref[...] + b_ref[...]
        if act_start is not None:
            lane = jax.lax.broadcasted_iota(jnp.int32, (1, out.shape[-1]), 1)
            sig = 2.0 * pl.reciprocal(1.0 + jnp.exp(-out), approx=True)
            out = jnp.where(lane >= act_start, sig, out)
        o_ref[...] = out


def matmul_bias_act(patches, w_mat, b_vec, act_start=None):
    """patches (M, K) bf16 @ w_mat (K, Nout) bf16 + bias -> (M, Nout) f32.

    K and Nout must be 128-multiples (lane-dense blocks)."""
    M, K = patches.shape
    Kw, Nout = w_mat.shape
    assert K == Kw and K % 128 == 0 and Nout % 128 == 0
    tm, tk = _pick_matmul_tiles(M, K, Nout, _vmem_budget_bytes())
    M_pad = _round_up(M, tm)
    if M_pad != M:
        patches = jnp.pad(patches, ((0, M_pad - M), (0, 0)))
    grid = (M_pad // tm, K // tk)
    # NOTE: pl.Buffered(3) on the patches spec (extra headroom on v5e/v6e) was skipped
    # for portability; the default double-buffered pipeline is used on all generations.
    out = pl.pallas_call(
        functools.partial(_matmul_bias_act_kernel, act_start=act_start),
        out_shape=jax.ShapeDtypeStruct((M_pad, Nout), jnp.float32),
        grid_spec=pltpu.PrefetchScalarGridSpec(
            num_scalar_prefetch=0,
            grid=grid,
            in_specs=[
                pl.BlockSpec((tm, tk), lambda i, k: (i, k)),
                pl.BlockSpec((tk, Nout), lambda i, k: (k, 0)),
                pl.BlockSpec((1, Nout), lambda i, k: (0, 0)),
            ],
            out_specs=pl.BlockSpec((tm, Nout), lambda i, k: (i, 0)),
        ),
        compiler_params=pltpu.CompilerParams(
            dimension_semantics=("parallel", "arbitrary"),
            vmem_limit_bytes=_vmem_limit_bytes(),
        ),
    )(patches, w_mat, b_vec)
    return out[:M]


# ----------------------------------------------------------------------------
# JAX glue: im2col, bilinear corner gather + pre-combine into deformable im2col
# ----------------------------------------------------------------------------
def im2col(x, ksize, stride, pad, dil):
    """x (N,C,H,W) -> patches (M, KK*C); column order is (tap k outer, channel c inner)."""
    N, C, H, W = x.shape
    KH, KW = ksize
    sh, sw = stride
    Ho = (H + 2 * pad - dil * (KH - 1) - 1) // sh + 1
    Wo = (W + 2 * pad - dil * (KW - 1) - 1) // sw + 1
    xp = jnp.pad(x, ((0, 0), (0, 0), (pad, pad), (pad, pad)))
    taps = []
    for kh in range(KH):
        for kw in range(KW):
            taps.append(xp[:, :,
                           kh * dil: kh * dil + (Ho - 1) * sh + 1: sh,
                           kw * dil: kw * dil + (Wo - 1) * sw + 1: sw])
    p = jnp.stack(taps, axis=1)                 # (N, KK, C, Ho, Wo)
    p = jnp.transpose(p, (0, 3, 4, 1, 2))       # (N, Ho, Wo, KK, C)
    return p.reshape(N * Ho * Wo, KH * KW * C), Ho, Wo


def build_deform_cols(x, offset, mask, ksize, stride, pad, dil, Ho, Wo):
    """Gather the 4 bilinear corners and pre-combine them with (bilinear_w * mask).

    x:      (N, C, H, W)
    offset: (N, Ho, Wo, 2*KK)  channel 2k = dy, 2k+1 = dx (torchvision convention)
    mask:   (N, Ho, Wo, KK)
    Returns:
      cols: (M, KK*C) bf16 deformable im2col (tap outer, channel inner), ready for
            a plain matmul against the (KK*C, Cout) regular-conv weight.
    """
    N, C, H, W = x.shape
    KH, KW = ksize
    sh, sw = stride
    KK = KH * KW
    M = N * Ho * Wo

    x_nhwc = jnp.transpose(x, (0, 2, 3, 1)).reshape(N, H * W, C).astype(jnp.bfloat16)

    kh_off = (jnp.arange(KK) // KW).astype(jnp.float32) * dil
    kw_off = (jnp.arange(KK) % KW).astype(jnp.float32) * dil
    base_y = jnp.arange(Ho, dtype=jnp.float32) * sh - pad
    base_x = jnp.arange(Wo, dtype=jnp.float32) * sw - pad

    dy = offset[..., 0::2]                                    # (N, Ho, Wo, KK)
    dx = offset[..., 1::2]
    py = base_y[None, :, None, None] + kh_off[None, None, None, :] + dy
    px = base_x[None, None, :, None] + kw_off[None, None, None, :] + dx

    y0 = jnp.floor(py)
    x0 = jnp.floor(px)
    ly, lx = py - y0, px - x0
    hy, hx = 1.0 - ly, 1.0 - lx
    corners = ((y0, x0, hy * hx), (y0, x0 + 1.0, hy * lx),
               (y0 + 1.0, x0, ly * hx), (y0 + 1.0, x0 + 1.0, ly * lx))

    cols = None
    for yy, xx, wgt in corners:
        yi = yy.astype(jnp.int32)
        xi = xx.astype(jnp.int32)
        valid = (yi >= 0) & (yi < H) & (xi >= 0) & (xi < W)
        idx = (jnp.clip(yi, 0, H - 1) * W
               + jnp.clip(xi, 0, W - 1)).reshape(N, Ho * Wo * KK, 1)
        vals = jnp.take_along_axis(
            x_nhwc, jnp.broadcast_to(idx, (N, Ho * Wo * KK, C)), axis=1)
        w_eff = jnp.where(valid, wgt, 0.0).reshape(N, Ho * Wo * KK, 1)
        term = vals.astype(jnp.float32) * w_eff
        cols = term if cols is None else cols + term

    cols = cols * mask.reshape(N, Ho * Wo * KK, 1)            # modulation mask
    return cols.reshape(M, KK * C).astype(jnp.bfloat16)


# ----------------------------------------------------------------------------
# Module
# ----------------------------------------------------------------------------
class DeformableConv2dPallas:
    """Mirrors focoos DeformableConv2d.__init__/forward (NCHW in, NCHW out)."""

    def __init__(self, in_channels, out_channels, kernel_size=3, stride=1,
                 padding=1, dilation=1, bias=False, key=None):
        kernel_size = kernel_size if isinstance(kernel_size, tuple) else (kernel_size, kernel_size)
        self.ksize = kernel_size
        self.stride = stride if isinstance(stride, tuple) else (stride, stride)
        self.padding = padding
        self.dilation = dilation
        self.use_bias = bias
        self.in_channels = in_channels
        self.out_channels = out_channels
        KH, KW = kernel_size
        KK = KH * KW
        self.KK = KK
        C = in_channels
        CKK = KK * C

        # offset / modulator convs: zero-initialized exactly like the PyTorch module
        self.offset_w = jnp.zeros((2 * KK, in_channels, KH, KW), jnp.float32)
        self.mod_w = jnp.zeros((KK, in_channels, KH, KW), jnp.float32)
        self.offset_b = jnp.zeros((2 * KK,), jnp.float32) if bias else None
        self.mod_b = jnp.zeros((KK,), jnp.float32) if bias else None

        # regular conv: deterministic kaiming-uniform-like init
        if key is None:
            key = jax.random.PRNGKey(0)
        fan_in = in_channels * KK
        bound = 1.0 / jnp.sqrt(jnp.float32(fan_in))
        kw_, kb_ = jax.random.split(key)
        self.reg_w = jax.random.uniform(
            kw_, (out_channels, in_channels, KH, KW), jnp.float32, -bound, bound)
        self.reg_b = (jax.random.uniform(kb_, (out_channels,), jnp.float32, -bound, bound)
                      if bias else None)

        # ---- matmul-ready (pre-transposed / lane-padded / bf16) parameters ------
        self.k_pad = _round_up(CKK, 128)                 # lane-dense K for both matmuls

        # fused offset+modulator weight: columns [0,2KK) = offsets, [2KK,3KK) = modulator
        w_cat = jnp.concatenate([self.offset_w, self.mod_w], axis=0)      # (3KK, C, KH, KW)
        w_cat = jnp.transpose(w_cat.reshape(3 * KK, C, KK), (2, 1, 0))    # (KK, C, 3KK)
        self.wfused_pad = _round_up(3 * KK, 128)
        self.w_fused = jnp.pad(
            w_cat.reshape(CKK, 3 * KK),
            ((0, self.k_pad - CKK), (0, self.wfused_pad - 3 * KK))).astype(jnp.bfloat16)
        b_vec = jnp.zeros((1, self.wfused_pad), jnp.float32)
        if bias:
            b_vec = b_vec.at[0, :2 * KK].set(self.offset_b)
            b_vec = b_vec.at[0, 2 * KK:3 * KK].set(self.mod_b)
        self.b_fused = b_vec

        # deformable conv weight flattened over (tap, channel): (KK*C pad, Cout pad) bf16
        self.coutp = _round_up(out_channels, 128)
        w_def = jnp.transpose(self.reg_w.reshape(out_channels, C, KK), (2, 1, 0))  # (KK,C,Cout)
        self.w_def = jnp.pad(
            w_def.reshape(CKK, out_channels),
            ((0, self.k_pad - CKK), (0, self.coutp - out_channels))).astype(jnp.bfloat16)
        b_def = jnp.zeros((1, self.coutp), jnp.float32)
        if bias:
            b_def = b_def.at[0, :out_channels].set(self.reg_b)
        self.b_def = b_def

        self._forward = jax.jit(self._forward_impl)

    def _forward_impl(self, x):
        N, C, H, W = x.shape
        KK = self.KK
        CKK = KK * C

        # --- fused offset + modulator conv (single Pallas matmul, 2*sigmoid fused) ----
        patches, Ho, Wo = im2col(x, self.ksize, self.stride, self.padding, self.dilation)
        patches = jnp.pad(patches.astype(jnp.bfloat16),
                          ((0, 0), (0, self.k_pad - CKK)))               # lane-dense K
        fused = matmul_bias_act(patches, self.w_fused, self.b_fused,
                                act_start=2 * KK)                        # (M, Wpad) f32
        offset = fused[:, :2 * KK].reshape(N, Ho, Wo, 2 * KK)
        modulator = fused[:, 2 * KK:3 * KK].reshape(N, Ho, Wo, KK)

        # --- modulated deformable conv as a plain K-tiled Pallas matmul ----------------
        cols = build_deform_cols(x, offset, modulator, self.ksize, self.stride,
                                 self.padding, self.dilation, Ho, Wo)    # (M, KK*C) bf16
        cols = jnp.pad(cols, ((0, 0), (0, self.k_pad - CKK)))            # lane-dense K
        out = matmul_bias_act(cols, self.w_def, self.b_def,
                              act_start=None)[:, :self.out_channels]     # (M, Cout) f32
        out = out.reshape(N, Ho, Wo, self.out_channels)
        return jnp.transpose(out, (0, 3, 1, 2))                          # back to NCHW

    def __call__(self, x):
        return self._forward(x)


if __name__ == "__main__":
    key = jax.random.PRNGKey(0)
    k_in, k_mod = jax.random.split(key)

    N, Cin, H, W = 2, 4, 16, 16
    Cout = 8
    x = jax.random.normal(k_in, (N, Cin, H, W), jnp.float32)

    module = DeformableConv2dPallas(Cin, Cout, kernel_size=3, stride=1,
                                    padding=1, dilation=1, bias=False, key=k_mod)
    y = jax.block_until_ready(module(x))
    assert y.shape == (N, Cout, H, W)

    # Sanity: zero-initialized offset/modulator convs => zero offsets and mask == 1.0,
    # so the result must equal a standard 3x3 convolution on bf16-rounded inputs
    # (the kernel feeds bf16 operands to the MXU with f32 accumulation; the modulator
    # uses the EUP approximate reciprocal, hence the slightly relaxed tolerance).
    x_bf = x.astype(jnp.bfloat16).astype(jnp.float32)
    w_bf = module.reg_w.astype(jnp.bfloat16).astype(jnp.float32)
    ref = jax.lax.conv_general_dilated(
        x_bf, w_bf, window_strides=(1, 1), padding=[(1, 1), (1, 1)],
        rhs_dilation=(1, 1), dimension_numbers=("NCHW", "OIHW", "NCHW"),
        precision=jax.lax.Precision.HIGHEST)
    assert jnp.allclose(y, ref, atol=5e-3, rtol=5e-3)

    print("KERNEL_OK")
</pallas_src>

<mosaic_0001>
module attributes {stable_mosaic.version = 11 : i64} {
  func.func @_matmul_bias_act_kernel(%arg0: i32, %arg1: i32, %arg2: memref<128x128xbf16, #tpu.memory_space<vmem>>, %arg3: memref<128x128xbf16, #tpu.memory_space<vmem>>, %arg4: memref<1x128xf32, #tpu.memory_space<vmem>>, %arg5: memref<128x128xf32, #tpu.memory_space<vmem>>) attributes {dimension_semantics = [#tpu.dimension_semantics<parallel>, #tpu.dimension_semantics<arbitrary>], iteration_bounds = array<i64: 4, 1>, scalar_prefetch = 0 : i64, scratch_operands = 0 : i64, tpu.core_type = #tpu.core_type<tc>, window_params = [{transform_indices = @transform_0, window_bounds = array<i64: 128, 128>}, {transform_indices = @transform_1, window_bounds = array<i64: 128, 128>}, {pipeline_mode = #tpu.pipeline_mode<synchronous>, transform_indices = @transform_2, window_bounds = array<i64: 1, 128>}, {transform_indices = @transform_3, window_bounds = array<i64: 128, 128>}]} {
    %c0_i32 = arith.constant 0 : i32
    %0 = arith.cmpi eq, %arg1, %c0_i32 : i32
    %1 = arith.extui %0 : i1 to i32
    %c0_i32_0 = arith.constant 0 : i32
    %2 = arith.cmpi ne, %1, %c0_i32_0 : i32
    scf.if %2 {
      %cst_10 = arith.constant 0.000000e+00 : f32
      %12 = vector.broadcast %cst_10 : f32 to vector<128x128xf32>
      %c0_11 = arith.constant 0 : index
      %c0_12 = arith.constant 0 : index
      %13 = vector.load %arg5[%c0_11, %c0_12] : memref<128x128xf32, #tpu.memory_space<vmem>>, vector<128x128xf32>
      tpu.vector_store %arg5[%c0_11, %c0_12], %12 {strides = array<i32>} : memref<128x128xf32, #tpu.memory_space<vmem>>, vector<128x128xf32>,
    } else {
    }
    %c0 = arith.constant 0 : index
    %c0_1 = arith.constant 0 : index
    %3 = vector.load %arg5[%c0, %c0_1] : memref<128x128xf32, #tpu.memory_space<vmem>>, vector<128x128xf32>
    %c0_2 = arith.constant 0 : index
    %c0_3 = arith.constant 0 : index
    %4 = vector.load %arg2[%c0_2, %c0_3] : memref<128x128xbf16, #tpu.memory_space<vmem>>, vector<128x128xbf16>
    %c0_4 = arith.constant 0 : index
    %c0_5 = arith.constant 0 : index
    %5 = vector.load %arg3[%c0_4, %c0_5] : memref<128x128xbf16, #tpu.memory_space<vmem>>, vector<128x128xbf16>
    %cst = arith.constant dense<0.000000e+00> : vector<128x128xf32>
    %6 = tpu.matmul %4, %5, %cst {dimension_numbers = #tpu.dot_dimension_numbers<[1], [0], [0], [1], [0, 0, 1, 1], [], []>} : vector<128x128xbf16>, vector<128x128xbf16>, vector<128x128xf32> -> vector<128x128xf32>
    %7 = arith.addf %3, %6 : vector<128x128xf32>
    %c0_6 = arith.constant 0 : index
    %c0_7 = arith.constant 0 : index
    %8 = vector.load %arg5[%c0_6, %c0_7] : memref<128x128xf32, #tpu.memory_space<vmem>>, vector<128x128xf32>
    tpu.vector_store %arg5[%c0_6, %c0_7], %7 {strides = array<i32>} : memref<128x128xf32, #tpu.memory_space<vmem>>, vector<128x128xf32>,
    %c0_i32_8 = arith.constant 0 : i32
    %9 = arith.cmpi eq, %arg1, %c0_i32_8 : i32
    %10 = arith.extui %9 : i1 to i32
    %c0_i32_9 = arith.constant 0 : i32
    %11 = arith.cmpi ne, %10, %c0_i32_9 : i32
    scf.if %11 {
      %c0_10 = arith.constant 0 : index
      %c0_11 = arith.constant 0 : index
      %12 = vector.load %arg5[%c0_10, %c0_11] : memref<128x128xf32, #tpu.memory_space<vmem>>, vector<128x128xf32>
      %c0_12 = arith.constant 0 : index
      %c0_13 = arith.constant 0 : index
      %13 = vector.load %arg4[%c0_12, %c0_13] : memref<1x128xf32, #tpu.memory_space<vmem>>, vector<1x128xf32>
      %14 = vector.broadcast %13 : vector<1x128xf32> to vector<128x128xf32>
      %15 = arith.addf %12, %14 : vector<128x128xf32>
      %16 = tpu.iota {dimensions = array<i32: 1>} : vector<1x128xi32>
      %cst_14 = arith.constant 0.000000e+00 : f32
      %17 = vector.broadcast %cst_14 : f32 to vector<128x128xf32>
      %18 = arith.subf %17, %15 : vector<128x128xf32>
      %19 = math.exp %18 : vector<128x128xf32>
      %cst_15 = arith.constant 1.000000e+00 : f32
      %20 = vector.broadcast %cst_15 : f32 to vector<128x128xf32>
      %21 = arith.addf %20, %19 : vector<128x128xf32>
      %22 = tpu.reciprocal %21 {approx = true} : vector<128x128xf32> -> vector<128x128xf32>
      %cst_16 = arith.constant 2.000000e+00 : f32
      %23 = vector.broadcast %cst_16 : f32 to vector<128x128xf32>
      %24 = arith.mulf %23, %22 : vector<128x128xf32>
      %c18_i32 = arith.constant 18 : i32
      %25 = vector.broadcast %c18_i32 : i32 to vector<1x128xi32>
      %26 = arith.cmpi sge, %16, %25 : vector<1x128xi32>
      %27 = vector.shape_cast %26 : vector<1x128xi1> to vector<1x128xi1>
      %28 = vector.broadcast %27 : vector<1x128xi1> to vector<128x128xi1>
      %29 = arith.select %28, %24, %15 : vector<128x128xi1>, vector<128x128xf32>
      %c0_17 = arith.constant 0 : index
      %c0_18 = arith.constant 0 : index
      %30 = vector.load %arg5[%c0_17, %c0_18] : memref<128x128xf32, #tpu.memory_space<vmem>>, vector<128x128xf32>
      tpu.vector_store %arg5[%c0_17, %c0_18], %29 {strides = array<i32>} : memref<128x128xf32, #tpu.memory_space<vmem>>, vector<128x128xf32>,
    } else {
    }
    return
  }
  func.func @transform_0(%arg0: i32, %arg1: i32) -> (i32, i32) {
    %c0_i32 = arith.constant 0 : i32
    return %arg0, %arg1 : i32, i32
  }
  func.func @transform_1(%arg0: i32, %arg1: i32) -> (i32, i32) {
    %c0_i32 = arith.constant 0 : i32
    %c0_i32_0 = arith.constant 0 : i32
    return %arg1, %c0_i32 : i32, i32
  }
  func.func @transform_2(%arg0: i32, %arg1: i32) -> (i32, i32) {
    %c0_i32 = arith.constant 0 : i32
    %c0_i32_0 = arith.constant 0 : i32
    %c0_i32_1 = arith.constant 0 : i32
    return %c0_i32, %c0_i32_0 : i32, i32
  }
  func.func @transform_3(%arg0: i32, %arg1: i32) -> (i32, i32) {
    %c0_i32 = arith.constant 0 : i32
    %c0_i32_0 = arith.constant 0 : i32
    return %arg0, %c0_i32 : i32, i32
  }
}

module attributes {stable_mosaic.version = 11 : i64} {
  func.func @_matmul_bias_act_kernel(%arg0: i32, %arg1: i32, %arg2: memref<128x128xbf16, #tpu.memory_space<vmem>>, %arg3: memref<128x128xbf16, #tpu.memory_space<vmem>>, %arg4: memref<1x128xf32, #tpu.memory_space<vmem>>, %arg5: memref<128x128xf32, #tpu.memory_space<vmem>>) attributes {dimension_semantics = [#tpu.dimension_semantics<parallel>, #tpu.dimension_semantics<arbitrary>], iteration_bounds = array<i64: 4, 1>, scalar_prefetch = 0 : i64, scratch_operands = 0 : i64, tpu.core_type = #tpu.core_type<tc>, window_params = [{transform_indices = @transform_0, window_bounds = array<i64: 128, 128>}, {transform_indices = @transform_1, window_bounds = array<i64: 128, 128>}, {pipeline_mode = #tpu.pipeline_mode<synchronous>, transform_indices = @transform_2, window_bounds = array<i64: 1, 128>}, {transform_indices = @transform_3, window_bounds = array<i64: 128, 128>}]} {
    %c0_i32 = arith.constant 0 : i32
    %0 = arith.cmpi eq, %arg1, %c0_i32 : i32
    %1 = arith.extui %0 : i1 to i32
    %c0_i32_0 = arith.constant 0 : i32
    %2 = arith.cmpi ne, %1, %c0_i32_0 : i32
    scf.if %2 {
      %cst_10 = arith.constant 0.000000e+00 : f32
      %12 = vector.broadcast %cst_10 : f32 to vector<128x128xf32>
      %c0_11 = arith.constant 0 : index
      %c0_12 = arith.constant 0 : index
      %13 = vector.load %arg5[%c0_11, %c0_12] : memref<128x128xf32, #tpu.memory_space<vmem>>, vector<128x128xf32>
      tpu.vector_store %arg5[%c0_11, %c0_12], %12 {strides = array<i32>} : memref<128x128xf32, #tpu.memory_space<vmem>>, vector<128x128xf32>,
    } else {
    }
    %c0 = arith.constant 0 : index
    %c0_1 = arith.constant 0 : index
    %3 = vector.load %arg5[%c0, %c0_1] : memref<128x128xf32, #tpu.memory_space<vmem>>, vector<128x128xf32>
    %c0_2 = arith.constant 0 : index
    %c0_3 = arith.constant 0 : index
    %4 = vector.load %arg2[%c0_2, %c0_3] : memref<128x128xbf16, #tpu.memory_space<vmem>>, vector<128x128xbf16>
    %c0_4 = arith.constant 0 : index
    %c0_5 = arith.constant 0 : index
    %5 = vector.load %arg3[%c0_4, %c0_5] : memref<128x128xbf16, #tpu.memory_space<vmem>>, vector<128x128xbf16>
    %cst = arith.constant dense<0.000000e+00> : vector<128x128xf32>
    %6 = tpu.matmul %4, %5, %cst {dimension_numbers = #tpu.dot_dimension_numbers<[1], [0], [0], [1], [0, 0, 1, 1], [], []>} : vector<128x128xbf16>, vector<128x128xbf16>, vector<128x128xf32> -> vector<128x128xf32>
    %7 = arith.addf %3, %6 : vector<128x128xf32>
    %c0_6 = arith.constant 0 : index
    %c0_7 = arith.constant 0 : index
    %8 = vector.load %arg5[%c0_6, %c0_7] : memref<128x128xf32, #tpu.memory_space<vmem>>, vector<128x128xf32>
    tpu.vector_store %arg5[%c0_6, %c0_7], %7 {strides = array<i32>} : memref<128x128xf32, #tpu.memory_space<vmem>>, vector<128x128xf32>,
    %c0_i32_8 = arith.constant 0 : i32
    %9 = arith.cmpi eq, %arg1, %c0_i32_8 : i32
    %10 = arith.extui %9 : i1 to i32
    %c0_i32_9 = arith.constant 0 : i32
    %11 = arith.cmpi ne, %10, %c0_i32_9 : i32
    scf.if %11 {
      %c0_10 = arith.constant 0 : index
      %c0_11 = arith.constant 0 : index
      %12 = vector.load %arg5[%c0_10, %c0_11] : memref<128x128xf32, #tpu.memory_space<vmem>>, vector<128x128xf32>
      %c0_12 = arith.constant 0 : index
      %c0_13 = arith.constant 0 : index
      %13 = vector.load %arg4[%c0_12, %c0_13] : memref<1x128xf32, #tpu.memory_space<vmem>>, vector<1x128xf32>
      %14 = vector.broadcast %13 : vector<1x128xf32> to vector<128x128xf32>
      %15 = arith.addf %12, %14 : vector<128x128xf32>
      %c0_14 = arith.constant 0 : index
      %c0_15 = arith.constant 0 : index
      %16 = vector.load %arg5[%c0_14, %c0_15] : memref<128x128xf32, #tpu.memory_space<vmem>>, vector<128x128xf32>
      tpu.vector_store %arg5[%c0_14, %c0_15], %15 {strides = array<i32>} : memref<128x128xf32, #tpu.memory_space<vmem>>, vector<128x128xf32>,
    } else {
    }
    return
  }
  func.func @transform_0(%arg0: i32, %arg1: i32) -> (i32, i32) {
    %c0_i32 = arith.constant 0 : i32
    return %arg0, %arg1 : i32, i32
  }
  func.func @transform_1(%arg0: i32, %arg1: i32) -> (i32, i32) {
    %c0_i32 = arith.constant 0 : i32
    %c0_i32_0 = arith.constant 0 : i32
    return %arg1, %c0_i32 : i32, i32
  }
  func.func @transform_2(%arg0: i32, %arg1: i32) -> (i32, i32) {
    %c0_i32 = arith.constant 0 : i32
    %c0_i32_0 = arith.constant 0 : i32
    %c0_i32_1 = arith.constant 0 : i32
    return %c0_i32, %c0_i32_0 : i32, i32
  }
  func.func @transform_3(%arg0: i32, %arg1: i32) -> (i32, i32) {
    %c0_i32 = arith.constant 0 : i32
    %c0_i32_0 = arith.constant 0 : i32
    return %arg0, %c0_i32 : i32, i32
  }
}

</mosaic_0001>

<bundles_post_ra>
// kernel: mul.53
= control target key start
LH: loop header
LB: loop body
LE: loop exit
PB: predicated region body
PF: predicated region fallthrough
CT: control target
= control target key end

     0   :  { %vm6_vm0 = vcmask 1041409   ;;  %vm10_vm1 = vcmask 1042434   ;;  %vm14_vm2 = vcmask 1043459   ;;  %vm48_vm3 = vcmask 7168   ;;  %s3669_s11 = smov 127   ;;  %s3670_s28 = smov 125   ;;  %s6015_s0 = inlined_call_operand.vmem [shape: f32[512,9], index: 0, kind: input, shape index: {}]   ;;  %s6016_s1 = inlined_call_operand.hbm [shape: f32[2,2304], index: 1, kind: output, shape index: {}]  }
   0x1   :  { %v2977_v0 = vld [vmem:[%s6015_s0 + $0x47] sm:$0x1]   ;;  %v2993_v11 = vld [vmem:[%s6015_s0 + $0x55] sm:$0x1]   ;;  %vm131_vm4 = vcmask 23552   ;;  %vm90_vm5 = vcmask 15360  }
   0x2   :  { %v2978_v1 = vld [vmem:[%s6015_s0 + $0x146] sm:$0x2]   ;;  %v2994_v14 = vld [vmem:[%s6015_s0 + $0x154] sm:$0x2]   ;;  %v2985_v26 = vld [vmem:[%s6015_s0 + $0xe] sm:$0x1]  }
   0x3   :  { %v2979_v2 = vld [vmem:[%s6015_s0 + $0xc5] sm:$0x4]   ;;  %v25_v4 = vsel %vm6_vm0, %v2978_v1, %v2977_v0  ;;  %v2995_v15 = vld [vmem:[%s6015_s0 + $0xd3] sm:$0x4]   ;;  %v108_v18 = vsel %vm6_vm0, %v2994_v14, %v2993_v11  ;;  %v2986_v29 = vld [vmem:[%s6015_s0 + $0x10d] sm:$0x2]  }
   0x4   :  { %v2980_v3 = vld [vmem:[%s6015_s0 + $0x1c4] sm:$0x8]   ;;  %v29_v8 = vsel %vm10_vm1, %v2979_v2, %v25_v4  ;;  %v2996_v16 = vld [vmem:[%s6015_s0 + $0x1d2] sm:$0x8]   ;;  %v112_v23 = vsel %vm10_vm1, %v2995_v15, %v108_v18  ;;  %v2987_v30 = vld [vmem:[%s6015_s0 + $0x8c] sm:$0x4]   ;;  %v67_v33 = vsel %vm6_vm0, %v2986_v29, %v2985_v26 }
   0x5   :  { %v2981_v5 = vld [vmem:[%s6015_s0 + $0x47] sm:$0x1]   ;;  %v33_v12 = vsel %vm14_vm2, %v2980_v3, %v29_v8  ;;  %v2997_v19 = vld [vmem:[%s6015_s0 + $0x55] sm:$0x1]   ;;  %v116_v27 = vsel %vm14_vm2, %v2996_v16, %v112_v23  ;;  %v2988_v31 = vld [vmem:[%s6015_s0 + $0x18b] sm:$0x8]   ;;  %v71_v38 = vsel %vm10_vm1, %v2987_v30, %v67_v33 }
   0x6   :  { %v2982_v6 = vld [vmem:[%s6015_s0 + $0x146] sm:$0x2]   ;;  %v2998_v20 = vld [vmem:[%s6015_s0 + $0x154] sm:$0x2]   ;;  %v2989_v34 = vld [vmem:[%s6015_s0 + $0xe] sm:$0x1]   ;;  %v75_v42 = vsel %vm14_vm2, %v2988_v31, %v71_v38 }
   0x7   :  { %v2983_v7 = vld [vmem:[%s6015_s0 + $0xc5] sm:$0x4]   ;;  %v39_v9 = vsel %vm6_vm0, %v2982_v6, %v2981_v5  ;;  %v2999_v21 = vld [vmem:[%s6015_s0 + $0xd3] sm:$0x4]   ;;  %v122_v24 = vsel %vm6_vm0, %v2998_v20, %v2997_v19  ;;  %v2990_v35 = vld [vmem:[%s6015_s0 + $0x10d] sm:$0x2]  }
   0x8   :  { %v2984_v10 = vld [vmem:[%s6015_s0 + $0x1c4] sm:$0x8]   ;;  %v43_v13 = vsel %vm10_vm1, %v2983_v7, %v39_v9  ;;  %v3000_v25 = vld [vmem:[%s6015_s0 + $0x1d2] sm:$0x8]   ;;  %v126_v28 = vsel %vm10_vm1, %v2999_v21, %v122_v24  ;;  %v2991_v36 = vld [vmem:[%s6015_s0 + $0x8c] sm:$0x4]   ;;  %v81_v39 = vsel %vm6_vm0, %v2990_v35, %v2989_v34 }
   0x9   :  { %v47_v17 = vsel %vm14_vm2, %v2984_v10, %v43_v13  ;;  %v130_v32 = vsel %vm14_vm2, %v3000_v25, %v126_v28  ;;  %v2992_v40 = vld [vmem:[%s6015_s0 + $0x18b] sm:$0x8]   ;;  %v3001_v41 = vld [vmem:[%s6015_s0 + $0x1c] sm:$0x1]   ;;  %v85_v43 = vsel %vm10_vm1, %v2991_v36, %v81_v39  ;;  %vm173_vm6 = vcmask 31744   ;;  %s3671_s16 = smov 126  }
   0xa   :  { %v49_v22 = vsel %vm48_vm3, %v47_v17, %v33_v12  ;;  %v132_v37 = vsel %vm131_vm4, %v130_v32, %v116_v27  ;;  %v3002_v44 = vld [vmem:[%s6015_s0 + $0x11b] sm:$0x2]   ;;  %v89_v47 = vsel %vm14_vm2, %v2992_v40, %v85_v43  ;;  %v3009_v56 = vld [vmem:[%s6015_s0 + $0xe3] sm:$0x1]   ;;  %vm177_vm7 = vcmask 39936   ;;  %s3672_s2 = smov 124  }
   0xb   :  { %50 = vrot.lane.b32.xlu0 %v49_v22, %s3669_s11  ;;  %133 = vrot.lane.b32.xlu1 %v132_v37, %s3670_s28  ;;  %v3003_v45 = vld [vmem:[%s6015_s0 + $0x9a] sm:$0x4]   ;;  %v150_v48 = vsel %vm6_vm0, %v3002_v44, %v3001_v41  ;;  %v91_v52 = vsel %vm90_vm5, %v89_v47, %v75_v42  ;;  %v3010_v59 = vld [vmem:[%s6015_s0 + $0x1e2] sm:$0x2]   ;;  %vm135_vm8 = vcmask 48128   ;;  %vm94_vm9 = vcmask 56320  }
   0xc   :  { %v3004_v46 = vld [vmem:[%s6015_s0 + $0x199] sm:$0x8]   ;;  %v154_v53 = vsel %vm10_vm1, %v3003_v45, %v150_v48  ;;  %v3011_v60 = vld [vmem:[%s6015_s0 + $0x61] sm:$0x4]   ;;  %v192_v62 = vsel %vm6_vm0, %v3010_v59, %v3009_v56  ;;  %v3017_v9 = vld [vmem:[%s6015_s0 + $0xaa] sm:$0x1]  }
   0xd   :  { %v3005_v49 = vld [vmem:[%s6015_s0 + $0x1c] sm:$0x1]   ;;  %v158_v57 = vsel %vm14_vm2, %v3004_v46, %v154_v53  ;;  %v3012_v63 = vld [vmem:[%s6015_s0 + $0x160] sm:$0x8]   ;;  %v196_v3 = vsel %vm10_vm1, %v3011_v60, %v192_v62  ;;  %v3018_v10 = vld [vmem:[%s6015_s0 + $0x1a9] sm:$0x2]  }
   0xe   :  { %v3006_v50 = vld [vmem:[%s6015_s0 + $0x11b] sm:$0x2]   ;;  %v3013_v0 = vld [vmem:[%s6015_s0 + $0x63] sm:$0x1]   ;;  %v200_v7 = vsel %vm14_vm2, %v3012_v63, %v196_v3  ;;  %v3019_v11 = vld [vmem:[%s6015_s0 + $0x28] sm:$0x4]   ;;  %v234_v13 = vsel %vm6_vm0, %v3018_v10, %v3017_v9 }
   0xf   :  { %v3007_v51 = vld [vmem:[%s6015_s0 + $0x9a] sm:$0x4]   ;;  %v164_v54 = vsel %vm6_vm0, %v3006_v50, %v3005_v49  ;;  %92 = vrot.lane.b32.xlu0 %v91_v52, %s3671_s16  ;;  %v3014_v1 = vld [vmem:[%s6015_s0 + $0x162] sm:$0x2]   ;;  %v3020_v14 = vld [vmem:[%s6015_s0 + $0x127] sm:$0x8]   ;;  %v238_v18 = vsel %vm10_vm1, %v3019_v11, %v234_v13 }
  0x10   :  { %v3008_v55 = vld [vmem:[%s6015_s0 + $0x199] sm:$0x8]   ;;  %v168_v58 = vsel %vm10_vm1, %v3007_v51, %v164_v54  ;;  %v206_v4 = vsel %vm6_vm0, %v3014_v1, %v3013_v0  ;;  %v3015_v5 = vld [vmem:[%s6015_s0 + $0xe1] sm:$0x4]   ;;  %v3021_v15 = vld [vmem:[%s6015_s0 + $0x2a] sm:$0x1]   ;;  %v242_v22 = vsel %vm14_vm2, %v3020_v14, %v238_v18 }
  0x11   :  { %v172_v61 = vsel %vm14_vm2, %v3008_v55, %v168_v58  ;;  %v3016_v6 = vld [vmem:[%s6015_s0 + $0x1e0] sm:$0x8]   ;;  %v210_v8 = vsel %vm10_vm1, %v3015_v5, %v206_v4  ;;  %v3022_v16 = vld [vmem:[%s6015_s0 + $0x129] sm:$0x2]   ;;  %s3673_s19 = smov 123   ;;  %vm52_vm10 = vcmask 64512  }
  0x12   :  { %v174_v2 = vsel %vm173_vm6, %v172_v61, %v158_v57  ;;  %v214_v12 = vsel %vm14_vm2, %v3016_v6, %v210_v8  ;;  %v248_v19 = vsel %vm6_vm0, %v3022_v16, %v3021_v15  ;;  %v3023_v20 = vld [vmem:[%s6015_s0 + $0xa8] sm:$0x4]   ;;  %v3025_v24 = vld [vmem:[%s6015_s0 + $0x71] sm:$0x1]   ;;  %s3674_s7 = smov 122   ;;  %s3675_s26 = smov 121  }
  0x13   :  { %175 = vrot.lane.b32.xlu1 %v174_v2, %s3672_s2  ;;  %v216_v17 = vsel %vm177_vm7, %v214_v12, %v200_v7  ;;  %v3024_v21 = vld [vmem:[%s6015_s0 + $0x1a7] sm:$0x8]   ;;  %v252_v23 = vsel %vm10_vm1, %v3023_v20, %v248_v19  ;;  %v3026_v25 = vld [vmem:[%s6015_s0 + $0x170] sm:$0x2]   ;;  %v3033_v39 = vld [vmem:[%s6015_s0 + $0x38] sm:$0x1]  }
  0x14   :  { %217 = vrot.lane.b32.xlu0 %v216_v17, %s3673_s19  ;;  %v3027_v26 = vld [vmem:[%s6015_s0 + $0xef] sm:$0x4]   ;;  %v256_v27 = vsel %vm14_vm2, %v3024_v21, %v252_v23  ;;  %v276_v28 = vsel %vm6_vm0, %v3026_v25, %v3025_v24  ;;  %v3034_v40 = vld [vmem:[%s6015_s0 + $0x137] sm:$0x2]   ;;  %v3041_v52 = vld [vmem:[%s6015_s0 + $0x7f] sm:$0x1]  }
  0x15   :  { %v3028_v29 = vld [vmem:[%s6015_s0 + $0x1ee] sm:$0x8]   ;;  %v258_v32 = vsel %vm135_vm8, %v256_v27, %v242_v22  ;;  %v280_v33 = vsel %vm10_vm1, %v3027_v26, %v276_v28  ;;  %v3035_v41 = vld [vmem:[%s6015_s0 + $0xb6] sm:$0x4]   ;;  %v318_v43 = vsel %vm6_vm0, %v3034_v40, %v3033_v39  ;;  %v3042_v55 = vld [vmem:[%s6015_s0 + $0x17e] sm:$0x2]  }
  0x16   :  { %v3029_v30 = vld [vmem:[%s6015_s0 + $0xf1] sm:$0x1]   ;;  %v284_v37 = vsel %vm14_vm2, %v3028_v29, %v280_v33  ;;  %v3036_v44 = vld [vmem:[%s6015_s0 + $0x1b5] sm:$0x8]   ;;  %v322_v48 = vsel %vm10_vm1, %v3035_v41, %v318_v43  ;;  %v3043_v56 = vld [vmem:[%s6015_s0 + $0xfd] sm:$0x4]   ;;  %v360_v59 = vsel %vm6_vm0, %v3042_v55, %v3041_v52 }
  0x17   :  { %v3030_v31 = vld [vmem:[%s6015_s0 + $0x1f0] sm:$0x2]   ;;  %259 = vrot.lane.b32.xlu1 %v258_v32, %s3674_s7  ;;  %v3037_v45 = vld [vmem:[%s6015_s0 + $0xb8] sm:$0x1]   ;;  %v326_v53 = vsel %vm14_vm2, %v3036_v44, %v322_v48  ;;  %v3044_v57 = vld [vmem:[%s6015_s0 + $0x1fc] sm:$0x8]   ;;  %v364_v63 = vsel %vm10_vm1, %v3043_v56, %v360_v59 }
  0x18   :  { %v290_v34 = vsel %vm6_vm0, %v3030_v31, %v3029_v30  ;;  %v3031_v35 = vld [vmem:[%s6015_s0 + $0x6f] sm:$0x4]   ;;  %v3038_v46 = vld [vmem:[%s6015_s0 + $0x1b7] sm:$0x2]   ;;  %v3045_v60 = vld [vmem:[%s6015_s0 + $0x46] sm:$0x1]   ;;  %v368_v4 = vsel %vm14_vm2, %v3044_v57, %v364_v63 }
  0x19   :  { %v3032_v36 = vld [vmem:[%s6015_s0 + $0x16e] sm:$0x8]   ;;  %v294_v38 = vsel %vm10_vm1, %v3031_v35, %v290_v34  ;;  %v332_v49 = vsel %vm6_vm0, %v3038_v46, %v3037_v45  ;;  %v3039_v50 = vld [vmem:[%s6015_s0 + $0x36] sm:$0x4]   ;;  %v3046_v61 = vld [vmem:[%s6015_s0 + $0x145] sm:$0x2]  }
  0x1a   :  { %v298_v42 = vsel %vm14_vm2, %v3032_v36, %v294_v38  ;;  %v3040_v51 = vld [vmem:[%s6015_s0 + $0x135] sm:$0x8]   ;;  %v336_v54 = vsel %vm10_vm1, %v3039_v50, %v332_v49  ;;  %v381_v0 = vsel %vm6_vm0, %v3046_v61, %v3045_v60  ;;  %v3047_v1 = vld [vmem:[%s6015_s0 + $0xc4] sm:$0x4]   ;;  %v3049_v3 = vld [vmem:[%s6015_s0 + $0xd] sm:$0x1]  }
  0x1b   :  { %v300_v47 = vsel %vm94_vm9, %v298_v42, %v284_v37  ;;  %v340_v58 = vsel %vm14_vm2, %v3040_v51, %v336_v54  ;;  %v3048_v2 = vld [vmem:[%s6015_s0 + $0x1c3] sm:$0x8]   ;;  %s3676_s14 = smov 120   ;;  %v385_v5 = vsel %vm10_vm1, %v3047_v1, %v381_v0  ;;  %v3050_v6 = vld [vmem:[%s6015_s0 + $0x10c] sm:$0x2]   ;;  %s3677_s21 = smov 119  }
  0x1c   :  { %301 = vrot.lane.b32.xlu0 %v300_v47, %s3675_s26  ;;  %v342_v62 = vsel %vm52_vm10, %v340_v58, %v326_v53  ;;  %v3051_v7 = vld [vmem:[%s6015_s0 + $0x8b] sm:$0x4]   ;;  %v389_v9 = vsel %vm14_vm2, %v3048_v2, %v385_v5  ;;  %v402_v10 = vsel %vm6_vm0, %v3050_v6, %v3049_v3  ;;  %v3053_v11 = vld [vmem:[%s6015_s0 + $0x54] sm:$0x1]   ;;  %v3057_v17 = vld [vmem:[%s6015_s0 + $0x1b] sm:$0x1]  }
  0x1d   :  { %343 = vrot.lane.b32.xlu1 %v342_v62, %s3676_s14  ;;  %v3052_v8 = vld [vmem:[%s6015_s0 + $0x18a] sm:$0x8]   ;;  %v3054_v12 = vld [vmem:[%s6015_s0 + $0x153] sm:$0x2]   ;;  %v406_v13 = vsel %vm10_vm1, %v3051_v7, %v402_v10  ;;  %v3058_v20 = vld [vmem:[%s6015_s0 + $0x11a] sm:$0x2]  }
  0x1e   :  { %v422_v14 = vsel %vm6_vm0, %v3054_v12, %v3053_v11  ;;  %v3055_v15 = vld [vmem:[%s6015_s0 + $0xd2] sm:$0x4]   ;;  %v410_v18 = vsel %vm14_vm2, %v3052_v8, %v406_v13  ;;  %v3059_v21 = vld [vmem:[%s6015_s0 + $0x99] sm:$0x4]   ;;  %s3678_s9 = smov 118   ;;  %v443_v23 = vsel %vm6_vm0, %v3058_v20, %v3057_v17  ;;  %s3679_s14 = smov 117  }
  0x1f   :  { %v3056_v16 = vld [vmem:[%s6015_s0 + $0x1d1] sm:$0x8]   ;;  %v426_v19 = vsel %vm10_vm1, %v3055_v15, %v422_v14  ;;  %v3060_v22 = vld [vmem:[%s6015_s0 + $0x198] sm:$0x8]   ;;  %v3061_v24 = vld [vmem:[%s6015_s0 + $0x62] sm:$0x1]   ;;  %v447_v27 = vsel %vm10_vm1, %v3059_v21, %v443_v23 }
  0x20   :  { %369 = vrot.lane.b32.xlu0 %v368_v4, %s3677_s21  ;;  %v3062_v25 = vld [vmem:[%s6015_s0 + $0x161] sm:$0x2]   ;;  %v430_v26 = vsel %vm14_vm2, %v3056_v16, %v426_v19  ;;  %v3065_v30 = vld [vmem:[%s6015_s0 + $0x29] sm:$0x1]   ;;  %v451_v31 = vsel %vm14_vm2, %v3060_v22, %v447_v27  ;;  %v3069_v38 = vld [vmem:[%s6015_s0 + $0xf0] sm:$0x1]  }
  0x21   :  { %390 = vrot.lane.b32.xlu1 %v389_v9, %s3678_s9  ;;  %v464_v28 = vsel %vm6_vm0, %v3062_v25, %v3061_v24  ;;  %v3063_v29 = vld [vmem:[%s6015_s0 + $0xe0] sm:$0x4]   ;;  %v3066_v34 = vld [vmem:[%s6015_s0 + $0x128] sm:$0x2]   ;;  %v3070_v39 = vld [vmem:[%s6015_s0 + $0x1ef] sm:$0x2]  }
  0x22   :  { %v468_v32 = vsel %vm10_vm1, %v3063_v29, %v464_v28  ;;  %v3064_v33 = vld [vmem:[%s6015_s0 + $0x1df] sm:$0x8]   ;;  %v3067_v35 = vld [vmem:[%s6015_s0 + $0xa7] sm:$0x4]   ;;  %v485_v36 = vsel %vm6_vm0, %v3066_v34, %v3065_v30  ;;  %s3680_s2 = smov 116   ;;  %v506_v41 = vsel %vm6_vm0, %v3070_v39, %v3069_v38  ;;  %s3681_s7 = smov 115  }
  0x23   :  { %v3068_v37 = vld [vmem:[%s6015_s0 + $0x1a6] sm:$0x8]   ;;  %v489_v40 = vsel %vm10_vm1, %v3067_v35, %v485_v36  ;;  %v3071_v42 = vld [vmem:[%s6015_s0 + $0x6e] sm:$0x4]   ;;  %v3073_v43 = vld [vmem:[%s6015_s0 + $0xb7] sm:$0x1]   ;;  %v472_v44 = vsel %vm14_vm2, %v3064_v33, %v468_v32 }
  0x24   :  { %411 = vrot.lane.b32.xlu0 %v410_v18, %s3679_s14  ;;  %v3074_v45 = vld [vmem:[%s6015_s0 + $0x1b6] sm:$0x2]   ;;  %v493_v47 = vsel %vm14_vm2, %v3068_v37, %v489_v40  ;;  %v510_v48 = vsel %vm10_vm1, %v3071_v42, %v506_v41  ;;  %v3072_v49 = vld [vmem:[%s6015_s0 + $0x16d] sm:$0x8]   ;;  %v3077_v51 = vld [vmem:[%s6015_s0 + $0x7e] sm:$0x1]  }
  0x25   :  { %431 = vrot.lane.b32.xlu1 %v430_v26, %s3680_s2  ;;  %v3075_v46 = vld [vmem:[%s6015_s0 + $0x35] sm:$0x4]   ;;  %v527_v50 = vsel %vm6_vm0, %v3074_v45, %v3073_v43  ;;  %v3078_v52 = vld [vmem:[%s6015_s0 + $0x17d] sm:$0x2]   ;;  %v3081_v57 = vld [vmem:[%s6015_s0 + $0x45] sm:$0x1]   ;;  %v514_v60 = vsel %vm14_vm2, %v3072_v49, %v510_v48 }
  0x26   :  { %v531_v53 = vsel %vm10_vm1, %v3075_v46, %v527_v50  ;;  %v3076_v54 = vld [vmem:[%s6015_s0 + $0x134] sm:$0x8]   ;;  %v548_v55 = vsel %vm6_vm0, %v3078_v52, %v3077_v51  ;;  %v3079_v56 = vld [vmem:[%s6015_s0 + $0xfc] sm:$0x4]   ;;  %s3682_s24 = smov 114   ;;  %s3683_s29 = smov 113  }
  0x27   :  { %v3082_v58 = vld [vmem:[%s6015_s0 + $0x144] sm:$0x2]   ;;  %v3085_v62 = vld [vmem:[%s6015_s0 + $0xc] sm:$0x1]   ;;  %v535_v0 = vsel %vm14_vm2, %v3076_v54, %v531_v53  ;;  %v552_v1 = vsel %vm10_vm1, %v3079_v56, %v548_v55  ;;  %v3080_v2 = vld [vmem:[%s6015_s0 + $0x1fb] sm:$0x8]  }
  0x28   :  { %452 = vrot.lane.b32.xlu0 %v451_v31, %s3681_s7  ;;  %v3083_v59 = vld [vmem:[%s6015_s0 + $0xc3] sm:$0x4]   ;;  %v569_v61 = vsel %vm6_vm0, %v3082_v58, %v3081_v57  ;;  %v3086_v63 = vld [vmem:[%s6015_s0 + $0x10b] sm:$0x2]   ;;  %v3089_v3 = vld [vmem:[%s6015_s0 + $0x53] sm:$0x1]   ;;  %v556_v13 = vsel %vm14_vm2, %v3080_v2, %v552_v1 }
  0x29   :  { %473 = vrot.lane.b32.xlu1 %v472_v44, %s3682_s24  ;;  %v573_v4 = vsel %vm10_vm1, %v3083_v59, %v569_v61  ;;  %v3084_v5 = vld [vmem:[%s6015_s0 + $0x1c2] sm:$0x8]   ;;  %v590_v6 = vsel %vm6_vm0, %v3086_v63, %v3085_v62  ;;  %v3087_v7 = vld [vmem:[%s6015_s0 + $0x8a] sm:$0x4]   ;;  %v3090_v8 = vld [vmem:[%s6015_s0 + $0x152] sm:$0x2]  }
  0x2a   :  { %s3684_s15 = smov 112   ;;  %v610_v9 = vsel %vm6_vm0, %v3090_v8, %v3089_v3  ;;  %v3091_v10 = vld [vmem:[%s6015_s0 + $0xd1] sm:$0x4]   ;;  %v3093_v11 = vld [vmem:[%s6015_s0 + $0x1a] sm:$0x1]   ;;  %s3685_s22 = smov 111   ;;  %v577_v15 = vsel %vm14_vm2, %v3084_v5, %v573_v4  ;;  %v594_v16 = vsel %vm10_vm1, %v3087_v7, %v590_v6 }
  0x2b   :  { %v3094_v12 = vld [vmem:[%s6015_s0 + $0x119] sm:$0x2]   ;;  %v3097_v14 = vld [vmem:[%s6015_s0 + $0x61] sm:$0x1]   ;;  %v3088_v17 = vld [vmem:[%s6015_s0 + $0x189] sm:$0x8]   ;;  %v614_v19 = vsel %vm10_vm1, %v3091_v10, %v610_v9 }
  0x2c   :  { %494 = vrot.lane.b32.xlu0 %v493_v47, %s3683_s29  ;;  %v3098_v18 = vld [vmem:[%s6015_s0 + $0x160] sm:$0x2]   ;;  %v3092_v20 = vld [vmem:[%s6015_s0 + $0x1d0] sm:$0x8]   ;;  %v631_v21 = vsel %vm6_vm0, %v3094_v12, %v3093_v11  ;;  %v3095_v22 = vld [vmem:[%s6015_s0 + $0x98] sm:$0x4]   ;;  %v598_v27 = vsel %vm14_vm2, %v3088_v17, %v594_v16 }
  0x2d   :  { %515 = vrot.lane.b32.xlu1 %v514_v60, %s3684_s15  ;;  %s3686_s4 = smov 110   ;;  %v652_v23 = vsel %vm6_vm0, %v3098_v18, %v3097_v14  ;;  %v3099_v24 = vld [vmem:[%s6015_s0 + $0xdf] sm:$0x4]   ;;  %v3101_v25 = vld [vmem:[%s6015_s0 + $0x28] sm:$0x1]   ;;  %s3687_s11 = smov 109   ;;  %v618_v30 = vsel %vm14_vm2, %v3092_v20, %v614_v19  ;;  %v635_v31 = vsel %vm10_vm1, %v3095_v22, %v631_v21 }
  0x2e   :  { %v3102_v26 = vld [vmem:[%s6015_s0 + $0x127] sm:$0x2]   ;;  %v3105_v28 = vld [vmem:[%s6015_s0 + $0xef] sm:$0x1]   ;;  %v3096_v32 = vld [vmem:[%s6015_s0 + $0x197] sm:$0x8]   ;;  %v656_v33 = vsel %vm10_vm1, %v3099_v24, %v652_v23 }
  0x2f   :  { %v3106_v29 = vld [vmem:[%s6015_s0 + $0x1ee] sm:$0x2]   ;;  %v3100_v34 = vld [vmem:[%s6015_s0 + $0x1de] sm:$0x8]   ;;  %v673_v35 = vsel %vm6_vm0, %v3102_v26, %v3101_v25  ;;  %v3103_v36 = vld [vmem:[%s6015_s0 + $0xa6] sm:$0x4]   ;;  %v639_v41 = vsel %vm14_vm2, %v3096_v32, %v635_v31 }
  0x30   :  { %536 = vrot.lane.b32.xlu0 %v535_v0, %s3685_s22  ;;  %s3688_s22 = smov 108   ;;  %v694_v37 = vsel %vm6_vm0, %v3106_v29, %v3105_v28  ;;  %v3107_v38 = vld [vmem:[%s6015_s0 + $0x6d] sm:$0x4]   ;;  %v3109_v39 = vld [vmem:[%s6015_s0 + $0xb6] sm:$0x1]   ;;  %s3689_s29 = smov 107   ;;  %v660_v44 = vsel %vm14_vm2, %v3100_v34, %v656_v33  ;;  %v677_v45 = vsel %vm10_vm1, %v3103_v36, %v673_v35 }
  0x31   :  { %557 = vrot.lane.b32.xlu1 %v556_v13, %s3686_s4  ;;  %v3110_v40 = vld [vmem:[%s6015_s0 + $0x1b5] sm:$0x2]   ;;  %v3113_v42 = vld [vmem:[%s6015_s0 + $0x7d] sm:$0x1]   ;;  %v3104_v46 = vld [vmem:[%s6015_s0 + $0x1a5] sm:$0x8]   ;;  %v698_v47 = vsel %vm10_vm1, %v3107_v38, %v694_v37 }
  0x32   :  { %v3114_v43 = vld [vmem:[%s6015_s0 + $0x17c] sm:$0x2]   ;;  %v3108_v48 = vld [vmem:[%s6015_s0 + $0x16c] sm:$0x8]   ;;  %v715_v49 = vsel %vm6_vm0, %v3110_v40, %v3109_v39  ;;  %v3111_v50 = vld [vmem:[%s6015_s0 + $0x34] sm:$0x4]   ;;  %v681_v55 = vsel %vm14_vm2, %v3104_v46, %v677_v45 }
  0x33   :  { %v736_v51 = vsel %vm6_vm0, %v3114_v43, %v3113_v42  ;;  %v3115_v52 = vld [vmem:[%s6015_s0 + $0xfb] sm:$0x4]   ;;  %v3117_v53 = vld [vmem:[%s6015_s0 + $0x44] sm:$0x1]   ;;  %s3691_s18 = smov 105   ;;  %v702_v58 = vsel %vm14_vm2, %v3108_v48, %v698_v47  ;;  %v719_v59 = vsel %vm10_vm1, %v3111_v50, %v715_v49  ;;  %s3693_s7 = smov 103  }
  0x34   :  { %578 = vrot.lane.b32.xlu0 %v577_v15, %s3687_s11  ;;  %s3690_s11 = smov 106   ;;  %v3118_v54 = vld [vmem:[%s6015_s0 + $0x143] sm:$0x2]   ;;  %v3121_v56 = vld [vmem:[%s6015_s0 + $0xb] sm:$0x1]   ;;  %v740_v61 = vsel %vm10_vm1, %v3115_v52, %v736_v51  ;;  %s3695_s25 = smov 101  }
  0x35   :  { %599 = vrot.lane.b32.xlu1 %v598_v27, %s3688_s22  ;;  %v3122_v57 = vld [vmem:[%s6015_s0 + $0x10a] sm:$0x2]   ;;  %v3112_v60 = vld [vmem:[%s6015_s0 + $0x133] sm:$0x8]   ;;  %v3116_v62 = vld [vmem:[%s6015_s0 + $0x1fa] sm:$0x8]   ;;  %v757_v63 = vsel %vm6_vm0, %v3118_v54, %v3117_v53 }
  0x36   :  { %v3119_v0 = vld [vmem:[%s6015_s0 + $0xc2] sm:$0x4]   ;;  %v778_v1 = vsel %vm6_vm0, %v3122_v57, %v3121_v56  ;;  %v3123_v2 = vld [vmem:[%s6015_s0 + $0x89] sm:$0x4]   ;;  %v3125_v3 = vld [vmem:[%s6015_s0 + $0x52] sm:$0x1]   ;;  %v723_v5 = vsel %vm14_vm2, %v3112_v60, %v719_v59  ;;  %v744_v8 = vsel %vm14_vm2, %v3116_v62, %v740_v61 }
  0x37   :  { %v3126_v4 = vld [vmem:[%s6015_s0 + $0x151] sm:$0x2]   ;;  %v3129_v6 = vld [vmem:[%s6015_s0 + $0x19] sm:$0x1]   ;;  %v761_v9 = vsel %vm10_vm1, %v3119_v0, %v757_v63  ;;  %v3120_v10 = vld [vmem:[%s6015_s0 + $0x1c1] sm:$0x8]   ;;  %v782_v11 = vsel %vm10_vm1, %v3123_v2, %v778_v1 }
  0x38   :  { %619 = vrot.lane.b32.xlu0 %v618_v30, %s3689_s29  ;;  %s3692_s29 = smov 104   ;;  %v3130_v7 = vld [vmem:[%s6015_s0 + $0x118] sm:$0x2]   ;;  %v3124_v12 = vld [vmem:[%s6015_s0 + $0x188] sm:$0x8]   ;;  %v798_v13 = vsel %vm6_vm0, %v3126_v4, %v3125_v3  ;;  %v765_v19 = vsel %vm14_vm2, %v3120_v10, %v761_v9  ;;  %s3697_s14 = smov 99  }
  0x39   :  { %640 = vrot.lane.b32.xlu1 %v639_v41, %s3690_s11  ;;  %v3127_v14 = vld [vmem:[%s6015_s0 + $0xd0] sm:$0x4]   ;;  %v819_v15 = vsel %vm6_vm0, %v3130_v7, %v3129_v6  ;;  %v3131_v16 = vld [vmem:[%s6015_s0 + $0x97] sm:$0x4]   ;;  %v3133_v17 = vld [vmem:[%s6015_s0 + $0x60] sm:$0x1]   ;;  %v786_v22 = vsel %vm14_vm2, %v3124_v12, %v782_v11 }
  0x3a   :  { %v3134_v18 = vld [vmem:[%s6015_s0 + $0x15f] sm:$0x2]   ;;  %v3137_v20 = vld [vmem:[%s6015_s0 + $0x27] sm:$0x1]   ;;  %v802_v23 = vsel %vm10_vm1, %v3127_v14, %v798_v13  ;;  %v3128_v24 = vld [vmem:[%s6015_s0 + $0x1cf] sm:$0x8]   ;;  %v823_v25 = vsel %vm10_vm1, %v3131_v16, %v819_v15 }
  0x3b   :  { %v3138_v21 = vld [vmem:[%s6015_s0 + $0x126] sm:$0x2]   ;;  %v3132_v26 = vld [vmem:[%s6015_s0 + $0x196] sm:$0x8]   ;;  %v840_v27 = vsel %vm6_vm0, %v3134_v18, %v3133_v17  ;;  %v3135_v28 = vld [vmem:[%s6015_s0 + $0xde] sm:$0x4]   ;;  %v806_v33 = vsel %vm14_vm2, %v3128_v24, %v802_v23 }
  0x3c   :  { %661 = vrot.lane.b32.xlu0 %v660_v44, %s3691_s18  ;;  %s3694_s18 = smov 102   ;;  %v861_v29 = vsel %vm6_vm0, %v3138_v21, %v3137_v20  ;;  %v3139_v30 = vld [vmem:[%s6015_s0 + $0xa5] sm:$0x4]   ;;  %v3141_v31 = vld [vmem:[%s6015_s0 + $0xee] sm:$0x1]   ;;  %v827_v36 = vsel %vm14_vm2, %v3132_v26, %v823_v25  ;;  %v844_v37 = vsel %vm10_vm1, %v3135_v28, %v840_v27  ;;  %s3699_s3 = smov 97  }
  0x3d   :  { %682 = vrot.lane.b32.xlu1 %v681_v55, %s3692_s29  ;;  %v3142_v32 = vld [vmem:[%s6015_s0 + $0x1ed] sm:$0x2]   ;;  %v3145_v34 = vld [vmem:[%s6015_s0 + $0xb5] sm:$0x1]   ;;  %v3136_v38 = vld [vmem:[%s6015_s0 + $0x1dd] sm:$0x8]   ;;  %v865_v39 = vsel %vm10_vm1, %v3139_v30, %v861_v29 }
  0x3e   :  { %v3146_v35 = vld [vmem:[%s6015_s0 + $0x1b4] sm:$0x2]   ;;  %v3140_v40 = vld [vmem:[%s6015_s0 + $0x1a4] sm:$0x8]   ;;  %v882_v41 = vsel %vm6_vm0, %v3142_v32, %v3141_v31  ;;  %v3143_v42 = vld [vmem:[%s6015_s0 + $0x6c] sm:$0x4]   ;;  %v848_v47 = vsel %vm14_vm2, %v3136_v38, %v844_v37 }
  0x3f   :  { %v903_v43 = vsel %vm6_vm0, %v3146_v35, %v3145_v34  ;;  %v3147_v44 = vld [vmem:[%s6015_s0 + $0x33] sm:$0x4]   ;;  %v3149_v45 = vld [vmem:[%s6015_s0 + $0x7c] sm:$0x1]   ;;  %v3153_v48 = vld [vmem:[%s6015_s0 + $0x43] sm:$0x1]   ;;  %v869_v50 = vsel %vm14_vm2, %v3140_v40, %v865_v39  ;;  %v886_v51 = vsel %vm10_vm1, %v3143_v42, %v882_v41 }
  0x40   :  { %703 = vrot.lane.b32.xlu0 %v702_v58, %s3693_s7  ;;  %s3696_s7 = smov 100   ;;  %v3150_v46 = vld [vmem:[%s6015_s0 + $0x17b] sm:$0x2]   ;;  %v3154_v49 = vld [vmem:[%s6015_s0 + $0x142] sm:$0x2]   ;;  %v907_v53 = vsel %vm10_vm1, %v3147_v44, %v903_v43  ;;  %s3701_s21 = smov 95  }
  0x41   :  { %724 = vrot.lane.b32.xlu1 %v723_v5, %s3694_s18  ;;  %v3144_v52 = vld [vmem:[%s6015_s0 + $0x16b] sm:$0x8]   ;;  %v3148_v54 = vld [vmem:[%s6015_s0 + $0x132] sm:$0x8]   ;;  %v924_v55 = vsel %vm6_vm0, %v3150_v46, %v3149_v45  ;;  %v3151_v56 = vld [vmem:[%s6015_s0 + $0xfa] sm:$0x4]   ;;  %v945_v57 = vsel %vm6_vm0, %v3154_v49, %v3153_v48 }
  0x42   :  { %v3155_v58 = vld [vmem:[%s6015_s0 + $0xc1] sm:$0x4]   ;;  %v3157_v59 = vld [vmem:[%s6015_s0 + $0xa] sm:$0x1]   ;;  %v890_v61 = vsel %vm14_vm2, %v3144_v52, %v886_v51  ;;  %v3161_v62 = vld [vmem:[%s6015_s0 + $0x51] sm:$0x1]   ;;  %v911_v0 = vsel %vm14_vm2, %v3148_v54, %v907_v53  ;;  %v928_v1 = vsel %vm10_vm1, %v3151_v56, %v924_v55 }
  0x43   :  { %v3158_v60 = vld [vmem:[%s6015_s0 + $0x109] sm:$0x2]   ;;  %v3162_v63 = vld [vmem:[%s6015_s0 + $0x150] sm:$0x2]   ;;  %v3152_v2 = vld [vmem:[%s6015_s0 + $0x1f9] sm:$0x8]   ;;  %v949_v3 = vsel %vm10_vm1, %v3155_v58, %v945_v57 }
  0x44   :  { %745 = vrot.lane.b32.xlu0 %v744_v8, %s3695_s25  ;;  %s3698_s25 = smov 98   ;;  %v3156_v4 = vld [vmem:[%s6015_s0 + $0x1c0] sm:$0x8]   ;;  %v966_v5 = vsel %vm6_vm0, %v3158_v60, %v3157_v59  ;;  %v3159_v6 = vld [vmem:[%s6015_s0 + $0x88] sm:$0x4]   ;;  %v986_v7 = vsel %vm6_vm0, %v3162_v63, %v3161_v62  ;;  %s3703_s10 = smov 93   ;;  %v932_v11 = vsel %vm14_vm2, %v3152_v2, %v928_v1 }
  0x45   :  { %766 = vrot.lane.b32.xlu1 %v765_v19, %s3696_s7  ;;  %v3163_v8 = vld [vmem:[%s6015_s0 + $0xcf] sm:$0x4]   ;;  %v3165_v9 = vld [vmem:[%s6015_s0 + $0x18] sm:$0x1]   ;;  %v3169_v12 = vld [vmem:[%s6015_s0 + $0x5f] sm:$0x1]   ;;  %v953_v14 = vsel %vm14_vm2, %v3156_v4, %v949_v3  ;;  %v970_v15 = vsel %vm10_vm1, %v3159_v6, %v966_v5 }
  0x46   :  { %v3166_v10 = vld [vmem:[%s6015_s0 + $0x117] sm:$0x2]   ;;  %v3170_v13 = vld [vmem:[%s6015_s0 + $0x15e] sm:$0x2]   ;;  %v3160_v16 = vld [vmem:[%s6015_s0 + $0x187] sm:$0x8]   ;;  %v990_v17 = vsel %vm10_vm1, %v3163_v8, %v986_v7 }
  0x47   :  { %v3164_v18 = vld [vmem:[%s6015_s0 + $0x1ce] sm:$0x8]   ;;  %v1007_v19 = vsel %vm6_vm0, %v3166_v10, %v3165_v9  ;;  %v3167_v20 = vld [vmem:[%s6015_s0 + $0x96] sm:$0x4]   ;;  %v1028_v21 = vsel %vm6_vm0, %v3170_v13, %v3169_v12  ;;  %v3173_v23 = vld [vmem:[%s6015_s0 + $0x26] sm:$0x1]   ;;  %v974_v25 = vsel %vm14_vm2, %v3160_v16, %v970_v15 }
  0x48   :  { %787 = vrot.lane.b32.xlu0 %v786_v22, %s3697_s14  ;;  %s3700_s14 = smov 96   ;;  %v3171_v22 = vld [vmem:[%s6015_s0 + $0xdd] sm:$0x4]   ;;  %v3174_v24 = vld [vmem:[%s6015_s0 + $0x125] sm:$0x2]   ;;  %s3705_s28 = smov 91   ;;  %v994_v28 = vsel %vm14_vm2, %v3164_v18, %v990_v17  ;;  %v1011_v29 = vsel %vm10_vm1, %v3167_v20, %v1007_v19 }
  0x49   :  { %807 = vrot.lane.b32.xlu1 %v806_v33, %s3698_s25  ;;  %v3177_v26 = vld [vmem:[%s6015_s0 + $0xed] sm:$0x1]   ;;  %v3168_v30 = vld [vmem:[%s6015_s0 + $0x195] sm:$0x8]   ;;  %v1032_v31 = vsel %vm10_vm1, %v3171_v22, %v1028_v21  ;;  %v3172_v32 = vld [vmem:[%s6015_s0 + $0x1dc] sm:$0x8]   ;;  %v1049_v33 = vsel %vm6_vm0, %v3174_v24, %v3173_v23 }
  0x4a   :  { %v3178_v27 = vld [vmem:[%s6015_s0 + $0x1ec] sm:$0x2]   ;;  %v3175_v34 = vld [vmem:[%s6015_s0 + $0xa4] sm:$0x4]   ;;  %v3181_v37 = vld [vmem:[%s6015_s0 + $0xb4] sm:$0x1]   ;;  %v1015_v39 = vsel %vm14_vm2, %v3168_v30, %v1011_v29  ;;  %v1036_v42 = vsel %vm14_vm2, %v3172_v32, %v1032_v31 }
  0x4b   :  { %v1070_v35 = vsel %vm6_vm0, %v3178_v27, %v3177_v26  ;;  %v3182_v38 = vld [vmem:[%s6015_s0 + $0x1b3] sm:$0x2]   ;;  %s3707_s17 = smov 89   ;;  %v3185_v40 = vld [vmem:[%s6015_s0 + $0x7b] sm:$0x1]   ;;  %v1053_v43 = vsel %vm10_vm1, %v3175_v34, %v1049_v33  ;;  %s3709_s6 = smov 87  }
  0x4c   :  { %828 = vrot.lane.b32.xlu0 %v827_v36, %s3699_s3  ;;  %s3702_s3 = smov 94   ;;  %v3179_v36 = vld [vmem:[%s6015_s0 + $0x6b] sm:$0x4]   ;;  %v3186_v41 = vld [vmem:[%s6015_s0 + $0x17a] sm:$0x2]   ;;  %s3711_s24 = smov 85  }
  0x4d   :  { %849 = vrot.lane.b32.xlu1 %v848_v47, %s3700_s14  ;;  %v3176_v44 = vld [vmem:[%s6015_s0 + $0x1a3] sm:$0x8]   ;;  %v1074_v45 = vsel %vm10_vm1, %v3179_v36, %v1070_v35  ;;  %v3180_v46 = vld [vmem:[%s6015_s0 + $0x16a] sm:$0x8]   ;;  %v1091_v47 = vsel %vm6_vm0, %v3182_v38, %v3181_v37  ;;  %v3183_v48 = vld [vmem:[%s6015_s0 + $0x32] sm:$0x4]   ;;  %v1112_v49 = vsel %vm6_vm0, %v3186_v41, %v3185_v40 }
  0x4e   :  { %v3189_v51 = vld [vmem:[%s6015_s0 + $0x42] sm:$0x1]   ;;  %v1057_v53 = vsel %vm14_vm2, %v3176_v44, %v1053_v43  ;;  %v3193_v54 = vld [vmem:[%s6015_s0 + $0x9] sm:$0x1]   ;;  %v1078_v56 = vsel %vm14_vm2, %v3180_v46, %v1074_v45  ;;  %v1095_v57 = vsel %vm10_vm1, %v3183_v48, %v1091_v47  ;;  %v3184_v58 = vld [vmem:[%s6015_s0 + $0x131] sm:$0x8]  }
  0x4f   :  { %v3190_v52 = vld [vmem:[%s6015_s0 + $0x141] sm:$0x2]   ;;  %v3194_v55 = vld [vmem:[%s6015_s0 + $0x108] sm:$0x2]   ;;  %v3188_v60 = vld [vmem:[%s6015_s0 + $0x1f8] sm:$0x8]   ;;  %v1099_v3 = vsel %vm14_vm2, %v3184_v58, %v1095_v57 }
  0x50   :  { %870 = vrot.lane.b32.xlu0 %v869_v50, %s3701_s21  ;;  %s3704_s21 = smov 92   ;;  %v3187_v50 = vld [vmem:[%s6015_s0 + $0xf9] sm:$0x4]   ;;  %v3191_v62 = vld [vmem:[%s6015_s0 + $0xc0] sm:$0x4]   ;;  %v1154_v63 = vsel %vm6_vm0, %v3194_v55, %v3193_v54  ;;  %s3713_s13 = smov 83  }
  0x51   :  { %891 = vrot.lane.b32.xlu1 %v890_v61, %s3702_s3  ;;  %v1116_v59 = vsel %vm10_vm1, %v3187_v50, %v1112_v49  ;;  %v1133_v61 = vsel %vm6_vm0, %v3190_v52, %v3189_v51  ;;  %v3197_v1 = vld [vmem:[%s6015_s0 + $0x50] sm:$0x1]   ;;  %v3201_v4 = vld [vmem:[%s6015_s0 + $0x17] sm:$0x1]   ;;  %v3192_v8 = vld [vmem:[%s6015_s0 + $0x1bf] sm:$0x8]  }
  0x52   :  { %v3198_v2 = vld [vmem:[%s6015_s0 + $0x14f] sm:$0x2]   ;;  %v3202_v5 = vld [vmem:[%s6015_s0 + $0x116] sm:$0x2]   ;;  %v1120_v6 = vsel %vm14_vm2, %v3188_v60, %v1116_v59  ;;  %v1137_v7 = vsel %vm10_vm1, %v3191_v62, %v1133_v61  ;;  %v3196_v10 = vld [vmem:[%s6015_s0 + $0x186] sm:$0x8]  }
  0x53   :  { %v3199_v12 = vld [vmem:[%s6015_s0 + $0xce] sm:$0x4]   ;;  %v1195_v13 = vsel %vm6_vm0, %v3202_v5, %v3201_v4  ;;  %v3205_v15 = vld [vmem:[%s6015_s0 + $0x5e] sm:$0x1]   ;;  %v1141_v17 = vsel %vm14_vm2, %v3192_v8, %v1137_v7  ;;  %v3209_v18 = vld [vmem:[%s6015_s0 + $0x25] sm:$0x1]  }
  0x54   :  { %912 = vrot.lane.b32.xlu0 %v911_v0, %s3703_s10  ;;  %s3706_s10 = smov 90   ;;  %v3195_v0 = vld [vmem:[%s6015_s0 + $0x87] sm:$0x4]   ;;  %v3206_v16 = vld [vmem:[%s6015_s0 + $0x15d] sm:$0x2]   ;;  %s3715_s2 = smov 81  }
  0x55   :  { %933 = vrot.lane.b32.xlu1 %v932_v11, %s3704_s21  ;;  %v1158_v9 = vsel %vm10_vm1, %v3195_v0, %v1154_v63  ;;  %v1174_v11 = vsel %vm6_vm0, %v3198_v2, %v3197_v1  ;;  %v3210_v19 = vld [vmem:[%s6015_s0 + $0x124] sm:$0x2]   ;;  %v3200_v22 = vld [vmem:[%s6015_s0 + $0x1cd] sm:$0x8]   ;;  %v3204_v24 = vld [vmem:[%s6015_s0 + $0x194] sm:$0x8]  }
  0x56   :  { %v1162_v20 = vsel %vm14_vm2, %v3196_v10, %v1158_v9  ;;  %v1178_v21 = vsel %vm10_vm1, %v3199_v12, %v1174_v11  ;;  %v3207_v26 = vld [vmem:[%s6015_s0 + $0xdc] sm:$0x4]   ;;  %v1237_v27 = vsel %vm6_vm0, %v3210_v19, %v3209_v18  ;;  %v3213_v29 = vld [vmem:[%s6015_s0 + $0xec] sm:$0x1]   ;;  %v3217_v32 = vld [vmem:[%s6015_s0 + $0xb3] sm:$0x1]  }
  0x57   :  { %v3214_v30 = vld [vmem:[%s6015_s0 + $0x1eb] sm:$0x2]   ;;  %v1182_v31 = vsel %vm14_vm2, %v3200_v22, %v1178_v21  ;;  %v3218_v33 = vld [vmem:[%s6015_s0 + $0x1b2] sm:$0x2]   ;;  %v3208_v36 = vld [vmem:[%s6015_s0 + $0x1db] sm:$0x8]  }
  0x58   :  { %954 = vrot.lane.b32.xlu0 %v953_v14, %s3705_s28  ;;  %s3708_s28 = smov 88   ;;  %v3203_v14 = vld [vmem:[%s6015_s0 + $0x95] sm:$0x4]   ;;  %v3212_v38 = vld [vmem:[%s6015_s0 + $0x1a2] sm:$0x8]   ;;  %v1279_v41 = vsel %vm6_vm0, %v3218_v33, %v3217_v32  ;;  %s3717_s20 = smov 79  }
  0x59   :  { %975 = vrot.lane.b32.xlu1 %v974_v25, %s3706_s10  ;;  %v1199_v23 = vsel %vm10_vm1, %v3203_v14, %v1195_v13  ;;  %v1216_v25 = vsel %vm6_vm0, %v3206_v16, %v3205_v15  ;;  %v3215_v40 = vld [vmem:[%s6015_s0 + $0x6a] sm:$0x4]   ;;  %v3221_v43 = vld [vmem:[%s6015_s0 + $0x7a] sm:$0x1]   ;;  %v3225_v46 = vld [vmem:[%s6015_s0 + $0x41] sm:$0x1]  }
  0x5a   :  { %v1203_v34 = vsel %vm14_vm2, %v3204_v24, %v1199_v23  ;;  %v1220_v35 = vsel %vm10_vm1, %v3207_v26, %v1216_v25  ;;  %v3222_v44 = vld [vmem:[%s6015_s0 + $0x179] sm:$0x2]   ;;  %v3226_v47 = vld [vmem:[%s6015_s0 + $0x140] sm:$0x2]   ;;  %v3216_v50 = vld [vmem:[%s6015_s0 + $0x169] sm:$0x8]  }
  0x5b   :  { %v1224_v45 = vsel %vm14_vm2, %v3208_v36, %v1220_v35  ;;  %v3220_v52 = vld [vmem:[%s6015_s0 + $0x130] sm:$0x8]   ;;  %v3223_v54 = vld [vmem:[%s6015_s0 + $0xf8] sm:$0x4]   ;;  %v3227_v57 = vld [vmem:[%s6015_s0 + $0xbf] sm:$0x4]  }
  0x5c   :  { %995 = vrot.lane.b32.xlu0 %v994_v28, %s3707_s17  ;;  %s3710_s17 = smov 86   ;;  %v3211_v28 = vld [vmem:[%s6015_s0 + $0xa3] sm:$0x4]   ;;  %v3224_v55 = vld [vmem:[%s6015_s0 + $0x1f7] sm:$0x8]   ;;  %s3719_s11 = smov 77  }
  0x5d   :  { %1016 = vrot.lane.b32.xlu1 %v1015_v39, %s3708_s28  ;;  %v1241_v37 = vsel %vm10_vm1, %v3211_v28, %v1237_v27  ;;  %v1258_v39 = vsel %vm6_vm0, %v3214_v30, %v3213_v29  ;;  %v3229_v58 = vld [vmem:[%s6015_s0 + $0x8] sm:$0x1]   ;;  %v3228_v61 = vld [vmem:[%s6015_s0 + $0x1be] sm:$0x8]   ;;  %v3233_v62 = vld [vmem:[%s6015_s0 + $0x4f] sm:$0x1]  }
  0x5e   :  { %v1245_v48 = vsel %vm14_vm2, %v3212_v38, %v1241_v37  ;;  %v1262_v49 = vsel %vm10_vm1, %v3215_v40, %v1258_v39  ;;  %v3230_v59 = vld [vmem:[%s6015_s0 + $0x107] sm:$0x2]   ;;  %v3234_v63 = vld [vmem:[%s6015_s0 + $0x14e] sm:$0x2]   ;;  %v3_v4 = vld [vmem:[%s6015_s0] sm:$0x1]  }
  0x5f   :  { %v1266_v60 = vsel %vm14_vm2, %v3216_v50, %v1262_v49  ;;  %v3231_v2 = vld [vmem:[%s6015_s0 + $0x86] sm:$0x4]   ;;  %v3235_v7 = vld [vmem:[%s6015_s0 + $0xcd] sm:$0x4]   ;;  %v2976_v8 = vld [vmem:[%s6015_s0 + $0x17d] sm:$0x8]   ;;  %v1362_v10 = vsel %vm6_vm0, %v3234_v63, %v3233_v62 }
  0x60   :  { %1037 = vrot.lane.b32.xlu0 %v1036_v42, %s3709_s6  ;;  %s3712_s6 = smov 84   ;;  %v3219_v42 = vld [vmem:[%s6015_s0 + $0x31] sm:$0x4]   ;;  %v2974_v9 = vld [vmem:[%s6015_s0 + $0x7f] sm:$0x2]   ;;  %s3720_s30 = smov 76   ;;  %v1366_v22 = vsel %vm10_vm1, %v3235_v7, %v1362_v10 }
  0x61   :  { %1058 = vrot.lane.b32.xlu1 %v1057_v53, %s3710_s17  ;;  %v1283_v51 = vsel %vm10_vm1, %v3219_v42, %v1279_v41  ;;  %v1300_v53 = vsel %vm6_vm0, %v3222_v44, %v3221_v43  ;;  %v3237_v11 = vld [vmem:[%s6015_s0 + $0x16] sm:$0x1]   ;;  %vm16_vm11 = vcmask 72704   ;;  %v7_v13 = vsel %vm6_vm0, %v2974_v9, %v3_v4  ;;  %v3241_v15 = vld [vmem:[%s6015_s0 + $0x5d] sm:$0x1]   ;;  %s3722_s17 = smov 74  }
  0x62   :  { %v1287_v0 = vsel %vm14_vm2, %v3220_v52, %v1283_v51  ;;  %v1304_v1 = vsel %vm10_vm1, %v3223_v54, %v1300_v53  ;;  %v3238_v12 = vld [vmem:[%s6015_s0 + $0x115] sm:$0x2]   ;;  %v3242_v16 = vld [vmem:[%s6015_s0 + $0x15c] sm:$0x2]   ;;  %vm57_vm12 = vcmask 1048568   ;;  %vm140_vm13 = vcmask 1048552  }
  0x63   :  { %v1308_v14 = vsel %vm14_vm2, %v3224_v55, %v1304_v1  ;;  %v3236_v23 = vld [vmem:[%s6015_s0 + $0x1cc] sm:$0x8]   ;;  %v1383_v24 = vsel %vm6_vm0, %v3238_v12, %v3237_v11  ;;  %v3239_v25 = vld [vmem:[%s6015_s0 + $0x94] sm:$0x4]   ;;  %v1404_v26 = vsel %vm6_vm0, %v3242_v16, %v3241_v15  ;;  %v3243_v27 = vld [vmem:[%s6015_s0 + $0xdb] sm:$0x4]  }
  0x64   :  { %1079 = vrot.lane.b32.xlu0 %v1078_v56, %s3711_s24  ;;  %s3714_s24 = smov 82   ;;  %v1321_v56 = vsel %vm6_vm0, %v3226_v47, %v3225_v46  ;;  %v3245_v28 = vld [vmem:[%s6015_s0 + $0x24] sm:$0x1]   ;;  %v3249_v32 = vld [vmem:[%s6015_s0 + $0xeb] sm:$0x1]   ;;  %v1387_v35 = vsel %vm10_vm1, %v3239_v25, %v1383_v24  ;;  %v1408_v37 = vsel %vm10_vm1, %v3243_v27, %v1404_v26  ;;  %vm99_vm14 = vcmask 1048560  }
  0x65   :  { %1100 = vrot.lane.b32.xlu1 %v1099_v3, %s3712_s6  ;;  %v2975_v3 = vld [vmem:[%s6015_s0 + $0xfe] sm:$0x4]   ;;  %v1325_v5 = vsel %vm10_vm1, %v3227_v57, %v1321_v56  ;;  %s3721_s6 = smov 75   ;;  %v3246_v29 = vld [vmem:[%s6015_s0 + $0x123] sm:$0x2]   ;;  %s3726_s26 = smov 70  }
  0x66   :  { %v1329_v18 = vsel %vm14_vm2, %v3228_v61, %v1325_v5  ;;  %v3250_v33 = vld [vmem:[%s6015_s0 + $0x1ea] sm:$0x2]   ;;  %v3240_v36 = vld [vmem:[%s6015_s0 + $0x193] sm:$0x8]   ;;  %v3244_v38 = vld [vmem:[%s6015_s0 + $0x1da] sm:$0x8]   ;;  %v1425_v39 = vsel %vm6_vm0, %v3246_v29, %v3245_v28 }
  0x67   :  { %v3247_v40 = vld [vmem:[%s6015_s0 + $0xa2] sm:$0x4]   ;;  %v1446_v42 = vsel %vm6_vm0, %v3250_v33, %v3249_v32  ;;  %v3251_v43 = vld [vmem:[%s6015_s0 + $0x69] sm:$0x4]   ;;  %v3253_v44 = vld [vmem:[%s6015_s0 + $0xb2] sm:$0x1]   ;;  %v1391_v46 = vsel %vm14_vm2, %v3240_v36, %v1387_v35  ;;  %v1412_v49 = vsel %vm14_vm2, %v3244_v38, %v1408_v37 }
  0x68   :  { %1121 = vrot.lane.b32.xlu0 %v1120_v6, %s3713_s13  ;;  %s3716_s13 = smov 80   ;;  %v1342_v6 = vsel %vm6_vm0, %v3230_v59, %v3229_v58  ;;  %v3257_v47 = vld [vmem:[%s6015_s0 + $0x79] sm:$0x1]   ;;  %v1429_v50 = vsel %vm10_vm1, %v3247_v40, %v1425_v39  ;;  %v3248_v51 = vld [vmem:[%s6015_s0 + $0x1a1] sm:$0x8]   ;;  %v1450_v53 = vsel %vm10_vm1, %v3251_v43, %v1446_v42  ;;  %vm182_vm15 = vcmask 1048544  }
  0x69   :  { %1142 = vrot.lane.b32.xlu1 %v1141_v17, %s3714_s24  ;;  %v11_v17 = vsel %vm10_vm1, %v2975_v3, %v7_v13  ;;  %v1346_v19 = vsel %vm10_vm1, %v3231_v2, %v1342_v6  ;;  %s3723_s24 = smov 73   ;;  %v3252_v54 = vld [vmem:[%s6015_s0 + $0x168] sm:$0x8]   ;;  %v3255_v56 = vld [vmem:[%s6015_s0 + $0x30] sm:$0x4]   ;;  %v1433_v61 = vsel %vm14_vm2, %v3248_v51, %v1429_v50  ;;  %s3731_s9 = smov 65  }
  0x6a   :  { %v15_v21 = vsel %vm14_vm2, %v2976_v8, %v11_v17  ;;  %v3259_v57 = vld [vmem:[%s6015_s0 + $0xf7] sm:$0x4]   ;;  %v3261_v59 = vld [vmem:[%s6015_s0 + $0x40] sm:$0x1]   ;;  %v3265_v62 = vld [vmem:[%s6015_s0 + $0x7] sm:$0x1]  }
  0x6b   :  { %17 = vst.msk [vmem:[#allocation2] ss:$72 sm:$0x3] %vm16_vm11, %v15_v21   ;;  %19 = vst.msk [vmem:[#allocation2 - $0x8f] ss:$72 sm:$0xc] %vm16_vm11, %v15_v21  }
  0x6c   :  { %1163 = vrot.lane.b32.xlu0 %v1162_v20, %s3715_s2  ;;  %s3718_s2 = smov 78   ;;  %v3232_v20 = vld [vmem:[%s6015_s0 + $0x185] sm:$0x8]   ;;  %v3266_v63 = vld [vmem:[%s6015_s0 + $0x106] sm:$0x2]   ;;  %s3732_s22 = smov 64  }
  0x6d   :  { %1183 = vrot.lane.b32.xlu1 %v1182_v31, %s3716_s13  ;;  %v1350_v30 = vsel %vm14_vm2, %v3232_v20, %v1346_v19  ;;  %s3725_s13 = smov 71   ;;  %v3256_v3 = vld [vmem:[%s6015_s0 + $0x12f] sm:$0x8]   ;;  %v3260_v5 = vld [vmem:[%s6015_s0 + $0x1f6] sm:$0x8]   ;;  %v1530_v8 = vsel %vm6_vm0, %v3266_v63, %v3265_v62  ;;  %s3733_s27 = smov 63  }
  0x6e   :  { %v3263_v7 = vld [vmem:[%s6015_s0 + $0xbe] sm:$0x4]   ;;  %v3267_v9 = vld [vmem:[%s6015_s0 + $0x85] sm:$0x4]   ;;  %v3269_v10 = vld [vmem:[%s6015_s0 + $0x4e] sm:$0x1]  }
  0x6f   :  { %v3270_v11 = vld [vmem:[%s6015_s0 + $0x14d] sm:$0x2]   ;;  %v3274_v15 = vld [vmem:[%s6015_s0 + $0x114] sm:$0x2]   ;;  %v1534_v19 = vsel %vm10_vm1, %v3267_v9, %v1530_v8  ;;  %v3268_v20 = vld [vmem:[%s6015_s0 + $0x184] sm:$0x8]  }
  0x70   :  { %1204 = vrot.lane.b32.xlu0 %v1203_v34, %s3717_s20  ;;  %v1370_v34 = vsel %vm14_vm2, %v3236_v23, %v1366_v22  ;;  %s3729_s20 = smov 67   ;;  %v1550_v21 = vsel %vm6_vm0, %v3270_v11, %v3269_v10  ;;  %v3271_v22 = vld [vmem:[%s6015_s0 + $0xcc] sm:$0x4]   ;;  %v3275_v25 = vld [vmem:[%s6015_s0 + $0x93] sm:$0x4]   ;;  %s3735_s16 = smov 61  }
  0x71   :  { %1225 = vrot.lane.b32.xlu1 %v1224_v45, %s3718_s2  ;;  %v3254_v45 = vld [vmem:[%s6015_s0 + $0x1b1] sm:$0x2]   ;;  %s3727_s2 = smov 69   ;;  %v3277_v26 = vld [vmem:[%s6015_s0 + $0x5c] sm:$0x1]   ;;  %v1554_v32 = vsel %vm10_vm1, %v3271_v22, %v1550_v21  ;;  %s3737_s5 = smov 59  }
  0x72   :  { %v1467_v55 = vsel %vm6_vm0, %v3254_v45, %v3253_v44  ;;  %v3278_v27 = vld [vmem:[%s6015_s0 + $0x15b] sm:$0x2]   ;;  %v3281_v29 = vld [vmem:[%s6015_s0 + $0x23] sm:$0x1]   ;;  %v3272_v33 = vld [vmem:[%s6015_s0 + $0x1cb] sm:$0x8]  }
  0x73   :  { %v1471_v2 = vsel %vm10_vm1, %v3255_v56, %v1467_v55  ;;  %v3276_v36 = vld [vmem:[%s6015_s0 + $0x192] sm:$0x8]   ;;  %v1592_v37 = vsel %vm6_vm0, %v3278_v27, %v3277_v26  ;;  %v3279_v38 = vld [vmem:[%s6015_s0 + $0xda] sm:$0x4]   ;;  %v3283_v39 = vld [vmem:[%s6015_s0 + $0xa1] sm:$0x4]   ;;  %v1558_v43 = vsel %vm14_vm2, %v3272_v33, %v1554_v32 }
  0x74   :  { %1246 = vrot.lane.b32.xlu0 %v1245_v48, %s3719_s11  ;;  %v3258_v48 = vld [vmem:[%s6015_s0 + $0x178] sm:$0x2]   ;;  %v1475_v13 = vsel %vm14_vm2, %v3256_v3, %v1471_v2  ;;  %v3286_v42 = vld [vmem:[%s6015_s0 + $0x1e9] sm:$0x2]   ;;  %v3289_v44 = vld [vmem:[%s6015_s0 + $0xb1] sm:$0x1]  }
  0x75   :  { %1267 = vrot.lane.b32.xlu1 %v1266_v60, %s3720_s30  ;;  %v1488_v58 = vsel %vm6_vm0, %v3258_v48, %v3257_v47  ;;  %v3262_v60 = vld [vmem:[%s6015_s0 + $0x13f] sm:$0x2]   ;;  %v3290_v45 = vld [vmem:[%s6015_s0 + $0x1b0] sm:$0x2]   ;;  %v1596_v48 = vsel %vm10_vm1, %v3279_v38, %v1592_v37  ;;  %v3299_v8 = vld [vmem:[%s6015_s0 + $0xbd] sm:$0x4]  }
  0x76   :  { %v1492_v4 = vsel %vm10_vm1, %v3259_v57, %v1488_v58  ;;  %v1509_v6 = vsel %vm6_vm0, %v3262_v60, %v3261_v59  ;;  %v1655_v55 = vsel %vm6_vm0, %v3290_v45, %v3289_v44  ;;  %v3291_v56 = vld [vmem:[%s6015_s0 + $0x2f] sm:$0x4]   ;;  %v3293_v57 = vld [vmem:[%s6015_s0 + $0x78] sm:$0x1]   ;;  %v3297_v60 = vld [vmem:[%s6015_s0 + $0x3f] sm:$0x1]  }
  0x77   :  { %v1496_v16 = vsel %vm14_vm2, %v3260_v5, %v1492_v4  ;;  %v1513_v17 = vsel %vm10_vm1, %v3263_v7, %v1509_v6  ;;  %v3294_v58 = vld [vmem:[%s6015_s0 + $0x177] sm:$0x2]   ;;  %v1659_v3 = vsel %vm10_vm1, %v3291_v56, %v1655_v55  ;;  %v3292_v4 = vld [vmem:[%s6015_s0 + $0x12e] sm:$0x8]   ;;  %v3301_v9 = vld [vmem:[%s6015_s0 + $0x6] sm:$0x1]  }
  0x78   :  { %1288 = vrot.lane.b32.xlu0 %v1287_v0, %s3721_s6  ;;  %s3724_s6 = smov 72   ;;  %v1454_v0 = vsel %vm14_vm2, %v3252_v54, %v1450_v53  ;;  %v3287_v54 = vld [vmem:[%s6015_s0 + $0x68] sm:$0x4]   ;;  %v1676_v5 = vsel %vm6_vm0, %v3294_v58, %v3293_v57  ;;  %v3295_v6 = vld [vmem:[%s6015_s0 + $0xf6] sm:$0x4]   ;;  %vm454_vm11 = vcmask 1015704  }
  0x79   :  { %1309 = vrot.lane.b32.xlu1 %v1308_v14, %s3722_s17  ;;  %v3273_v14 = vld [vmem:[%s6015_s0 + $0x15] sm:$0x1]   ;;  %v3302_v10 = vld [vmem:[%s6015_s0 + $0x105] sm:$0x2]   ;;  %v3310_v26 = vld [vmem:[%s6015_s0 + $0x113] sm:$0x2]  }
  0x7a   :  { %v1571_v24 = vsel %vm6_vm0, %v3274_v15, %v3273_v14  ;;  %v1663_v15 = vsel %vm14_vm2, %v3292_v4, %v1659_v3  ;;  %v1718_v21 = vsel %vm6_vm0, %v3302_v10, %v3301_v9  ;;  %v3303_v22 = vld [vmem:[%s6015_s0 + $0x84] sm:$0x4]   ;;  %s3739_s23 = smov 57   ;;  %v3311_v38 = vld [vmem:[%s6015_s0 + $0x92] sm:$0x4]   ;;  %s3741_s12 = smov 55  }
  0x7b   :  { %v1575_v35 = vsel %vm10_vm1, %v3275_v25, %v1571_v24  ;;  %v3307_v24 = vld [vmem:[%s6015_s0 + $0xcb] sm:$0x4]   ;;  %v3309_v25 = vld [vmem:[%s6015_s0 + $0x14] sm:$0x1]   ;;  %v1722_v32 = vsel %vm10_vm1, %v3303_v22, %v1718_v21  ;;  %v3304_v33 = vld [vmem:[%s6015_s0 + $0x183] sm:$0x8]  }
  0x7c   :  { %1330 = vrot.lane.b32.xlu0 %v1329_v18, %s3723_s24  ;;  %v3264_v18 = vld [vmem:[%s6015_s0 + $0x1bd] sm:$0x8]   ;;  %v1579_v47 = vsel %vm14_vm2, %v3276_v36, %v1575_v35  ;;  %v3308_v36 = vld [vmem:[%s6015_s0 + $0x1ca] sm:$0x8]   ;;  %v1759_v37 = vsel %vm6_vm0, %v3310_v26, %v3309_v25  ;;  %v3321_v44 = vld [vmem:[%s6015_s0 + $0xe9] sm:$0x1]  }
  0x7d   :  { %v51_v31 = vpop.permute.xlu0 %50   ;;  %1351 = vrot.lane.b32.xlu1 %v1350_v30, %s3724_s6  ;;  %v134_v41 = vpop.permute.xlu1 %133   ;;  %v1517_v28 = vsel %vm14_vm2, %v3264_v18, %v1513_v17  ;;  %v3282_v30 = vld [vmem:[%s6015_s0 + $0x122] sm:$0x2]   ;;  %v3296_v17 = vld [vmem:[%s6015_s0 + $0x1f5] sm:$0x8]   ;;  %v3322_v45 = vld [vmem:[%s6015_s0 + $0x1e8] sm:$0x2]  }
  0x7e   :  { %54 = vst.msk [vmem:[#allocation2 + $0x28] sm:$0x3] %vm52_vm10, %v51_v31   ;;  %56 = vst.msk [vmem:[#allocation2 + $0x6e] sm:$0xc] %vm52_vm10, %v51_v31   ;;  %v1613_v40 = vsel %vm6_vm0, %v3282_v30, %v3281_v29  ;;  %vm433_vm10 = vcmask 1023904   ;;  %v1822_v55 = vsel %vm6_vm0, %v3322_v45, %v3321_v44  ;;  %s3743_s30 = smov 53  }
  0x7f   :  { %59 = vst.msk [vmem:[#allocation2 + $0x20] sm:$0x3] %vm57_vm12, %v51_v31   ;;  %61 = vst.msk [vmem:[#allocation2 + $0x66] sm:$0xc] %vm57_vm12, %v51_v31   ;;  %v1538_v31 = vsel %vm14_vm2, %v3268_v20, %v1534_v19  ;;  %v1617_v51 = vsel %vm10_vm1, %v3283_v39, %v1613_v40  ;;  %vm475_vm12 = vcmask 1007504   ;;  %s3745_s19 = smov 51  }
  0x80   :  { %1371 = vrot.lane.b32.xlu0 %v1370_v34, %s3725_s13  ;;  %137 = vst.msk [vmem:[#allocation2 + $0x30] sm:$0x3] %vm135_vm8, %v134_v41   ;;  %139 = vst.msk [vmem:[#allocation2 + $0x76] sm:$0xc] %vm135_vm8, %v134_v41   ;;  %s3728_s13 = smov 68   ;;  %vm371_vm8 = vcmask 1048504  }
  0x81   :  { %142 = vst.msk [vmem:[#allocation2 + $0x28] sm:$0x3] %vm140_vm13, %v134_v41   ;;  %144 = vst.msk [vmem:[#allocation2 + $0x6e] sm:$0xc] %vm140_vm13, %v134_v41   ;;  %v93_v52 = vpop.permute.xlu0 %92   ;;  %1392 = vrot.lane.b32.xlu1 %v1391_v46, %s3726_s26  ;;  %v3285_v41 = vld [vmem:[%s6015_s0 + $0xea] sm:$0x1]  }
  0x82   :  { %96 = vst.msk [vmem:[#allocation2 + $0x8] sm:$0x3] %vm94_vm9, %v93_v52   ;;  %98 = vst.msk [vmem:[#allocation2 + $0x4e] sm:$0xc] %vm94_vm9, %v93_v52   ;;  %v1634_v53 = vsel %vm6_vm0, %v3286_v42, %v3285_v41  ;;  %vm413_vm9 = vcmask 1032104   ;;  %vm496_vm13 = vcmask 999304  }
  0x83   :  { %100 = vst.msk [vmem:[#allocation2] sm:$0x3] %vm99_vm14, %v93_v52   ;;  %102 = vst.msk [vmem:[#allocation2 + $0x46] sm:$0xc] %vm99_vm14, %v93_v52   ;;  %v3284_v52 = vld [vmem:[%s6015_s0 + $0x1a0] sm:$0x8]  }
  0x84   :  { %1413 = vrot.lane.b32.xlu0 %v1412_v49, %s3727_s2  ;;  %s3730_s2 = smov 66   ;;  %v3280_v49 = vld [vmem:[%s6015_s0 + $0x1d9] sm:$0x8]   ;;  %v1621_v63 = vsel %vm14_vm2, %v3284_v52, %v1617_v51  ;;  %v3300_v20 = vld [vmem:[%s6015_s0 + $0x1bc] sm:$0x8]   ;;  %vm517_vm14 = vcmask 991104  }
  0x85   :  { %v176_v1 = vpop.permute.xlu1 %175   ;;  %1434 = vrot.lane.b32.xlu1 %v1433_v61, %s3728_s13  ;;  %v1600_v59 = vsel %vm14_vm2, %v3280_v49, %v1596_v48  ;;  %v3298_v61 = vld [vmem:[%s6015_s0 + $0x13e] sm:$0x2]   ;;  %v3314_v29 = vld [vmem:[%s6015_s0 + $0x15a] sm:$0x2]   ;;  %v3317_v41 = vld [vmem:[%s6015_s0 + $0x22] sm:$0x1]   ;;  %v1763_v48 = vsel %vm10_vm1, %v3311_v38, %v1759_v37 }
  0x86   :  { %179 = vst.msk [vmem:[#allocation2 + $0x10] sm:$0x3] %vm177_vm7, %v176_v1   ;;  %181 = vst.msk [vmem:[#allocation2 + $0x56] sm:$0xc] %vm177_vm7, %v176_v1   ;;  %vm224_vm7 = vcmask 1048536   ;;  %v218_v12 = vpop.permute.xlu0 %217   ;;  %v1697_v7 = vsel %vm6_vm0, %v3298_v61, %v3297_v60  ;;  %s3747_s8 = smov 49  }
  0x87   :  { %184 = vst.msk [vmem:[#allocation2 + $0x8] sm:$0x3] %vm182_vm15, %v176_v1   ;;  %186 = vst.msk [vmem:[#allocation2 + $0x4e] sm:$0xc] %vm182_vm15, %v176_v1   ;;  %v3288_v1 = vld [vmem:[%s6015_s0 + $0x167] sm:$0x8]   ;;  %v1701_v19 = vsel %vm10_vm1, %v3299_v8, %v1697_v7 }
  0x88   :  { %1455 = vrot.lane.b32.xlu0 %v1454_v0, %s3729_s20  ;;  %221 = vst.msk [vmem:[#allocation2 + $0x80] sm:$0x3] %vm173_vm6, %v218_v12   ;;  %223 = vst.msk [vmem:[#allocation2 + $0x36] sm:$0xc] %vm173_vm6, %v218_v12   ;;  %vm266_vm6 = vcmask 1048528   ;;  %v1638_v0 = vsel %vm10_vm1, %v3287_v54, %v1634_v53  ;;  %vm538_vm15 = vcmask 982904  }
  0x89   :  { %226 = vst.msk [vmem:[#allocation2 + $0x30] sm:$0x3] %vm224_vm7, %v218_v12   ;;  %228 = vst.msk [vmem:[#allocation2 + $0x76] sm:$0xc] %vm224_vm7, %v218_v12   ;;  %1476 = vrot.lane.b32.xlu1 %v1475_v13, %s3730_s2  ;;  %v260_v23 = vpop.permute.xlu1 %259   ;;  %v1642_v11 = vsel %vm14_vm2, %v3288_v1, %v1638_v0  ;;  %v3305_v12 = vld [vmem:[%s6015_s0 + $0x4d] sm:$0x1]  }
  0x8a   :  { %263 = vst.msk [vmem:[#allocation2 + $0x60] sm:$0x3] %vm131_vm4, %v260_v23   ;;  %265 = vst.msk [vmem:[#allocation2 + $0x16] sm:$0xc] %vm131_vm4, %v260_v23   ;;  %vm308_vm4 = vcmask 1048520   ;;  %vm559_vm7 = vcmask 974704  }
  0x8b   :  { %268 = vst.msk [vmem:[#allocation2 + $0x10] sm:$0x3] %vm266_vm6, %v260_v23   ;;  %270 = vst.msk [vmem:[#allocation2 + $0x56] sm:$0xc] %vm266_vm6, %v260_v23   ;;  %v3306_v13 = vld [vmem:[%s6015_s0 + $0x14c] sm:$0x2]  }
  0x8c   :  { %1497 = vrot.lane.b32.xlu0 %v1496_v16, %s3731_s9  ;;  %s3734_s9 = smov 62   ;;  %v1680_v16 = vsel %vm10_vm1, %v3295_v6, %v1676_v5  ;;  %v1738_v23 = vsel %vm6_vm0, %v3306_v13, %v3305_v12  ;;  %v3315_v40 = vld [vmem:[%s6015_s0 + $0xd9] sm:$0x4]   ;;  %v3318_v42 = vld [vmem:[%s6015_s0 + $0x121] sm:$0x2]   ;;  %vm580_vm6 = vcmask 966504  }
  0x8d   :  { %1518 = vrot.lane.b32.xlu1 %v1517_v28, %s3732_s22  ;;  %v1684_v27 = vsel %vm14_vm2, %v3296_v17, %v1680_v16  ;;  %v3313_v28 = vld [vmem:[%s6015_s0 + $0x5b] sm:$0x1]   ;;  %v1742_v35 = vsel %vm10_vm1, %v3307_v24, %v1738_v23  ;;  %v3312_v49 = vld [vmem:[%s6015_s0 + $0x191] sm:$0x8]   ;;  %v1801_v53 = vsel %vm6_vm0, %v3318_v42, %v3317_v41  ;;  %v3319_v54 = vld [vmem:[%s6015_s0 + $0xa0] sm:$0x4]  }
  0x8e   :  { %v302_v34 = vpop.permute.xlu0 %301   ;;  %v1780_v39 = vsel %vm6_vm0, %v3314_v29, %v3313_v28  ;;  %v3316_v52 = vld [vmem:[%s6015_s0 + $0x1d8] sm:$0x8]   ;;  %v3323_v56 = vld [vmem:[%s6015_s0 + $0x67] sm:$0x4]   ;;  %v3325_v57 = vld [vmem:[%s6015_s0 + $0xb0] sm:$0x1]   ;;  %v1805_v0 = vsel %vm10_vm1, %v3319_v54, %v1801_v53 }
  0x8f   :  { %305 = vst.msk [vmem:[#allocation2 + $0x40] sm:$0x3] %vm90_vm5, %v302_v34   ;;  %307 = vst.msk [vmem:[#allocation2 + $0x86] sm:$0xc] %vm90_vm5, %v302_v34   ;;  %vm350_vm5 = vcmask 1048512   ;;  %v344_v46 = vpop.permute.xlu1 %343   ;;  %v1784_v51 = vsel %vm10_vm1, %v3315_v40, %v1780_v39  ;;  %v1826_v3 = vsel %vm10_vm1, %v3323_v56, %v1822_v55  ;;  %s3749_s26 = smov 47  }
  0x90   :  { %310 = vst.msk [vmem:[#allocation2 + $0x80] sm:$0x3] %vm308_vm4, %v302_v34   ;;  %312 = vst.msk [vmem:[#allocation2 + $0x36] sm:$0xc] %vm308_vm4, %v302_v34   ;;  %1539 = vrot.lane.b32.xlu0 %v1538_v31, %s3733_s27  ;;  %s3736_s27 = smov 60   ;;  %v1705_v31 = vsel %vm14_vm2, %v3300_v20, %v1701_v19  ;;  %vm601_vm4 = vcmask 958304  }
  0x91   :  { %347 = vst.msk [vmem:[#allocation2 + $0x20] sm:$0x3] %vm48_vm3, %v344_v46   ;;  %349 = vst.msk [vmem:[#allocation2 + $0x66] sm:$0xc] %vm48_vm3, %v344_v46   ;;  %vm392_vm3 = vcmask 1040304   ;;  %1559 = vrot.lane.b32.xlu1 %v1558_v43, %s3734_s9  ;;  %v1726_v43 = vsel %vm14_vm2, %v3304_v33, %v1722_v32  ;;  %s3751_s15 = smov 45  }
  0x92   :  { %v370_v50 = vpop.permute.xlu0 %369   ;;  %352 = vst.msk [vmem:[#allocation2 + $0x60] sm:$0x3] %vm350_vm5, %v344_v46   ;;  %354 = vst.msk [vmem:[#allocation2 + $0x16] sm:$0xc] %vm350_vm5, %v344_v46   ;;  %v3326_v58 = vld [vmem:[%s6015_s0 + $0x1af] sm:$0x2]  }
  0x93   :  { %373 = vst.msk [vmem:[#allocation2 + $0x40] sm:$0x3] %vm371_vm8, %v370_v50   ;;  %375 = vst.msk [vmem:[#allocation2 + $0x86] sm:$0xc] %vm371_vm8, %v370_v50   ;;  %v391_v62 = vpop.permute.xlu1 %390   ;;  %v3329_v60 = vld [vmem:[%s6015_s0 + $0x77] sm:$0x1]   ;;  %v1843_v5 = vsel %vm6_vm0, %v3326_v58, %v3325_v57 }
  0x94   :  { %1580 = vrot.lane.b32.xlu0 %v1579_v47, %s3735_s16  ;;  %394 = vst.msk [vmem:[#allocation2 + $0x20] sm:$0x3] %vm392_vm3, %v391_v62   ;;  %396 = vst.msk [vmem:[#allocation2 + $0x66] sm:$0xc] %vm392_vm3, %v391_v62   ;;  %s3738_s16 = smov 58   ;;  %v1746_v47 = vsel %vm14_vm2, %v3308_v36, %v1742_v35  ;;  %vm621_vm5 = vcmask 950104  }
  0x95   :  { %1601 = vrot.lane.b32.xlu1 %v1600_v59, %s3736_s27  ;;  %v1767_v59 = vsel %vm14_vm2, %v3312_v49, %v1763_v48  ;;  %v3330_v61 = vld [vmem:[%s6015_s0 + $0x176] sm:$0x2]   ;;  %v3320_v1 = vld [vmem:[%s6015_s0 + $0x19f] sm:$0x8]   ;;  %v3324_v4 = vld [vmem:[%s6015_s0 + $0x166] sm:$0x8]  }
  0x96   :  { %v412_v2 = vpop.permute.xlu0 %411   ;;  %v3327_v6 = vld [vmem:[%s6015_s0 + $0x2e] sm:$0x4]   ;;  %v1864_v7 = vsel %vm6_vm0, %v3330_v61, %v3329_v60  ;;  %v3331_v8 = vld [vmem:[%s6015_s0 + $0xf5] sm:$0x4]   ;;  %v3333_v9 = vld [vmem:[%s6015_s0 + $0x3e] sm:$0x1]  }
  0x97   :  { %414 = vst.msk [vmem:[#allocation2] sm:$0x3] %vm413_vm9, %v412_v2   ;;  %416 = vst.msk [vmem:[#allocation2 + $0x46] sm:$0xc] %vm413_vm9, %v412_v2   ;;  %v432_v14 = vpop.permute.xlu1 %431   ;;  %v3334_v10 = vld [vmem:[%s6015_s0 + $0x13d] sm:$0x2]   ;;  %v1847_v16 = vsel %vm10_vm1, %v3327_v6, %v1843_v5  ;;  %v1868_v19 = vsel %vm10_vm1, %v3331_v8, %v1864_v7 }
  0x98   :  { %1622 = vrot.lane.b32.xlu0 %v1621_v63, %s3737_s5  ;;  %435 = vst.msk [vmem:[#allocation2 + $0x28] sm:$0x3] %vm433_vm10, %v432_v14   ;;  %437 = vst.msk [vmem:[#allocation2 + $0x6e] sm:$0xc] %vm433_vm10, %v432_v14   ;;  %s3740_s5 = smov 56   ;;  %v1788_v63 = vsel %vm14_vm2, %v3316_v52, %v1784_v51  ;;  %vm642_vm8 = vcmask 941904   ;;  %v1885_v21 = vsel %vm6_vm0, %v3334_v10, %v3333_v9 }
  0x99   :  { %1643 = vrot.lane.b32.xlu1 %v1642_v11, %s3738_s16  ;;  %v1809_v11 = vsel %vm14_vm2, %v3320_v1, %v1805_v0  ;;  %v3337_v12 = vld [vmem:[%s6015_s0 + $0x5] sm:$0x1]   ;;  %v3328_v17 = vld [vmem:[%s6015_s0 + $0x12d] sm:$0x8]   ;;  %v3332_v20 = vld [vmem:[%s6015_s0 + $0x1f4] sm:$0x8]  }
  0x9a   :  { %v453_v18 = vpop.permute.xlu0 %452   ;;  %v3338_v13 = vld [vmem:[%s6015_s0 + $0x104] sm:$0x2]   ;;  %v3335_v22 = vld [vmem:[%s6015_s0 + $0xbc] sm:$0x4]   ;;  %v3341_v25 = vld [vmem:[%s6015_s0 + $0x4c] sm:$0x1]  }
  0x9b   :  { %456 = vst.msk [vmem:[#allocation2 + $0x8] sm:$0x3] %vm454_vm11, %v453_v18   ;;  %458 = vst.msk [vmem:[#allocation2 + $0x4e] sm:$0xc] %vm454_vm11, %v453_v18   ;;  %v474_v30 = vpop.permute.xlu1 %473   ;;  %v1906_v23 = vsel %vm6_vm0, %v3338_v13, %v3337_v12  ;;  %v3339_v24 = vld [vmem:[%s6015_s0 + $0x83] sm:$0x4]   ;;  %v1889_v32 = vsel %vm10_vm1, %v3335_v22, %v1885_v21 }
  0x9c   :  { %1664 = vrot.lane.b32.xlu0 %v1663_v15, %s3739_s23  ;;  %477 = vst.msk [vmem:[#allocation2 + $0x30] sm:$0x3] %vm475_vm12, %v474_v30   ;;  %479 = vst.msk [vmem:[#allocation2 + $0x76] sm:$0xc] %vm475_vm12, %v474_v30   ;;  %s3742_s23 = smov 54   ;;  %v1830_v15 = vsel %vm14_vm2, %v3324_v4, %v1826_v3  ;;  %vm663_vm3 = vcmask 933704   ;;  %v1910_v35 = vsel %vm10_vm1, %v3339_v24, %v1906_v23 }
  0x9d   :  { %1685 = vrot.lane.b32.xlu1 %v1684_v27, %s3740_s5  ;;  %v3342_v26 = vld [vmem:[%s6015_s0 + $0x14b] sm:$0x2]   ;;  %v1851_v27 = vsel %vm14_vm2, %v3328_v17, %v1847_v16  ;;  %v3345_v28 = vld [vmem:[%s6015_s0 + $0x13] sm:$0x1]   ;;  %v3336_v33 = vld [vmem:[%s6015_s0 + $0x1bb] sm:$0x8]  }
  0x9e   :  { %v495_v34 = vpop.permute.xlu0 %494   ;;  %v3346_v29 = vld [vmem:[%s6015_s0 + $0x112] sm:$0x2]   ;;  %vm684_vm9 = vcmask 925504   ;;  %v3340_v36 = vld [vmem:[%s6015_s0 + $0x182] sm:$0x8]   ;;  %v1926_v37 = vsel %vm6_vm0, %v3342_v26, %v3341_v25  ;;  %vm705_vm10 = vcmask 917304  }
  0x9f   :  { %498 = vst.msk [vmem:[#allocation2 + $0x10] sm:$0x3] %vm496_vm13, %v495_v34   ;;  %500 = vst.msk [vmem:[#allocation2 + $0x56] sm:$0xc] %vm496_vm13, %v495_v34   ;;  %v516_v46 = vpop.permute.xlu1 %515   ;;  %v3343_v38 = vld [vmem:[%s6015_s0 + $0xca] sm:$0x4]   ;;  %v1947_v39 = vsel %vm6_vm0, %v3346_v29, %v3345_v28 }
  0xa0   :  { %1706 = vrot.lane.b32.xlu0 %v1705_v31, %s3741_s12  ;;  %519 = vst.msk [vmem:[#allocation2 + $0x80] sm:$0x3] %vm517_vm14, %v516_v46   ;;  %521 = vst.msk [vmem:[#allocation2 + $0x36] sm:$0xc] %vm517_vm14, %v516_v46   ;;  %s3744_s12 = smov 52   ;;  %v1872_v31 = vsel %vm14_vm2, %v3332_v20, %v1868_v19  ;;  %v1930_v48 = vsel %vm10_vm1, %v3343_v38, %v1926_v37  ;;  %vm726_vm11 = vcmask 909104  }
  0xa1   :  { %1727 = vrot.lane.b32.xlu1 %v1726_v43, %s3742_s23  ;;  %v3347_v40 = vld [vmem:[%s6015_s0 + $0x91] sm:$0x4]   ;;  %v3349_v41 = vld [vmem:[%s6015_s0 + $0x5a] sm:$0x1]   ;;  %v1893_v43 = vsel %vm14_vm2, %v3336_v33, %v1889_v32  ;;  %v3353_v44 = vld [vmem:[%s6015_s0 + $0x21] sm:$0x1]  }
  0xa2   :  { %v537_v50 = vpop.permute.xlu0 %536   ;;  %v3350_v42 = vld [vmem:[%s6015_s0 + $0x159] sm:$0x2]   ;;  %v3354_v45 = vld [vmem:[%s6015_s0 + $0x120] sm:$0x2]   ;;  %v3344_v49 = vld [vmem:[%s6015_s0 + $0x1c9] sm:$0x8]   ;;  %v1951_v51 = vsel %vm10_vm1, %v3347_v40, %v1947_v39 }
  0xa3   :  { %540 = vst.msk [vmem:[#allocation2 + $0x60] sm:$0x3] %vm538_vm15, %v537_v50   ;;  %542 = vst.msk [vmem:[#allocation2 + $0x16] sm:$0xc] %vm538_vm15, %v537_v50   ;;  %v558_v62 = vpop.permute.xlu1 %557   ;;  %v3348_v52 = vld [vmem:[%s6015_s0 + $0x190] sm:$0x8]   ;;  %v1968_v53 = vsel %vm6_vm0, %v3350_v42, %v3349_v41  ;;  %v1989_v55 = vsel %vm6_vm0, %v3354_v45, %v3353_v44 }
  0xa4   :  { %1747 = vrot.lane.b32.xlu0 %v1746_v47, %s3743_s30  ;;  %561 = vst.msk [vmem:[#allocation2 + $0x40] sm:$0x3] %vm559_vm7, %v558_v62   ;;  %563 = vst.msk [vmem:[#allocation2 + $0x86] sm:$0xc] %vm559_vm7, %v558_v62   ;;  %s3746_s30 = smov 50   ;;  %v1914_v47 = vsel %vm14_vm2, %v3340_v36, %v1910_v35  ;;  %vm747_vm12 = vcmask 900904  }
  0xa5   :  { %1768 = vrot.lane.b32.xlu1 %v1767_v59, %s3744_s12  ;;  %v3351_v54 = vld [vmem:[%s6015_s0 + $0xd8] sm:$0x4]   ;;  %v3355_v56 = vld [vmem:[%s6015_s0 + $0x9f] sm:$0x4]   ;;  %v3357_v57 = vld [vmem:[%s6015_s0 + $0xe8] sm:$0x1]   ;;  %v1934_v59 = vsel %vm14_vm2, %v3344_v49, %v1930_v48 }
  0xa6   :  { %v579_v2 = vpop.permute.xlu0 %578   ;;  %v3358_v58 = vld [vmem:[%s6015_s0 + $0x1e7] sm:$0x2]   ;;  %v3361_v60 = vld [vmem:[%s6015_s0 + $0xaf] sm:$0x1]   ;;  %v1972_v0 = vsel %vm10_vm1, %v3351_v54, %v1968_v53  ;;  %v3352_v1 = vld [vmem:[%s6015_s0 + $0x1d7] sm:$0x8]   ;;  %v1993_v3 = vsel %vm10_vm1, %v3355_v56, %v1989_v55 }
  0xa7   :  { %582 = vst.msk [vmem:[#allocation2 + $0x20] sm:$0x3] %vm580_vm6, %v579_v2   ;;  %584 = vst.msk [vmem:[#allocation2 + $0x66] sm:$0xc] %vm580_vm6, %v579_v2   ;;  %v600_v14 = vpop.permute.xlu1 %599   ;;  %v3362_v61 = vld [vmem:[%s6015_s0 + $0x1ae] sm:$0x2]   ;;  %v2010_v5 = vsel %vm6_vm0, %v3358_v58, %v3357_v57 }
  0xa8   :  { %1789 = vrot.lane.b32.xlu0 %v1788_v63, %s3745_s19  ;;  %602 = vst.msk [vmem:[#allocation2] sm:$0x3] %vm601_vm4, %v600_v14   ;;  %604 = vst.msk [vmem:[#allocation2 + $0x46] sm:$0xc] %vm601_vm4, %v600_v14   ;;  %s3748_s19 = smov 48   ;;  %v1955_v63 = vsel %vm14_vm2, %v3348_v52, %v1951_v51  ;;  %vm768_vm13 = vcmask 892704   ;;  %v2031_v7 = vsel %vm6_vm0, %v3362_v61, %v3361_v60 }
  0xa9   :  { %1810 = vrot.lane.b32.xlu1 %v1809_v11, %s3746_s30  ;;  %v3356_v4 = vld [vmem:[%s6015_s0 + $0x19e] sm:$0x8]   ;;  %v3359_v6 = vld [vmem:[%s6015_s0 + $0x66] sm:$0x4]   ;;  %v3363_v8 = vld [vmem:[%s6015_s0 + $0x2d] sm:$0x4]   ;;  %v1976_v11 = vsel %vm14_vm2, %v3352_v1, %v1972_v0 }
  0xaa   :  { %v620_v18 = vpop.permute.xlu0 %619   ;;  %v3365_v9 = vld [vmem:[%s6015_s0 + $0x76] sm:$0x1]   ;;  %s3753_s4 = smov 43   ;;  %vm789_vm14 = vcmask 884504   ;;  %v3369_v12 = vld [vmem:[%s6015_s0 + $0x3d] sm:$0x1]   ;;  %v2014_v16 = vsel %vm10_vm1, %v3359_v6, %v2010_v5  ;;  %v2035_v19 = vsel %vm10_vm1, %v3363_v8, %v2031_v7 }
  0xab   :  { %623 = vst.msk [vmem:[#allocation2 + $0x28] sm:$0x3] %vm621_vm5, %v620_v18   ;;  %625 = vst.msk [vmem:[#allocation2 + $0x6e] sm:$0xc] %vm621_vm5, %v620_v18   ;;  %v641_v30 = vpop.permute.xlu1 %640   ;;  %v3366_v10 = vld [vmem:[%s6015_s0 + $0x175] sm:$0x2]  }
  0xac   :  { %1831 = vrot.lane.b32.xlu0 %v1830_v15, %s3747_s8  ;;  %644 = vst.msk [vmem:[#allocation2 + $0x8] sm:$0x3] %vm642_vm8, %v641_v30   ;;  %646 = vst.msk [vmem:[#allocation2 + $0x4e] sm:$0xc] %vm642_vm8, %v641_v30   ;;  %s3750_s8 = smov 46   ;;  %v1997_v15 = vsel %vm14_vm2, %v3356_v4, %v1993_v3  ;;  %vm809_vm15 = vcmask 876304   ;;  %v2052_v21 = vsel %vm6_vm0, %v3366_v10, %v3365_v9 }
  0xad   :  { %1852 = vrot.lane.b32.xlu1 %v1851_v27, %s3748_s19  ;;  %v3370_v13 = vld [vmem:[%s6015_s0 + $0x13c] sm:$0x2]   ;;  %v3360_v17 = vld [vmem:[%s6015_s0 + $0x165] sm:$0x8]   ;;  %v3364_v20 = vld [vmem:[%s6015_s0 + $0x12c] sm:$0x8]  }
  0xae   :  { %v662_v34 = vpop.permute.xlu0 %661   ;;  %v3367_v22 = vld [vmem:[%s6015_s0 + $0xf4] sm:$0x4]   ;;  %v2073_v23 = vsel %vm6_vm0, %v3370_v13, %v3369_v12  ;;  %v3371_v24 = vld [vmem:[%s6015_s0 + $0xbb] sm:$0x4]   ;;  %v3373_v25 = vld [vmem:[%s6015_s0 + $0x4] sm:$0x1]   ;;  %v2018_v27 = vsel %vm14_vm2, %v3360_v17, %v2014_v16 }
  0xaf   :  { %665 = vst.msk [vmem:[#allocation2 + $0x30] sm:$0x3] %vm663_vm3, %v662_v34   ;;  %667 = vst.msk [vmem:[#allocation2 + $0x76] sm:$0xc] %vm663_vm3, %v662_v34   ;;  %v683_v46 = vpop.permute.xlu1 %682   ;;  %v3374_v26 = vld [vmem:[%s6015_s0 + $0x103] sm:$0x2]   ;;  %v2056_v32 = vsel %vm10_vm1, %v3367_v22, %v2052_v21  ;;  %v2077_v35 = vsel %vm10_vm1, %v3371_v24, %v2073_v23 }
  0xb0   :  { %1873 = vrot.lane.b32.xlu0 %v1872_v31, %s3749_s26  ;;  %686 = vst.msk [vmem:[#allocation2 + $0x10] sm:$0x3] %vm684_vm9, %v683_v46   ;;  %688 = vst.msk [vmem:[#allocation2 + $0x56] sm:$0xc] %vm684_vm9, %v683_v46   ;;  %s3752_s26 = smov 44   ;;  %s3755_s22 = smov 41   ;;  %v2039_v31 = vsel %vm14_vm2, %v3364_v20, %v2035_v19  ;;  %v2094_v37 = vsel %vm6_vm0, %v3374_v26, %v3373_v25 }
  0xb1   :  { %1894 = vrot.lane.b32.xlu1 %v1893_v43, %s3750_s8  ;;  %vm830_vm7 = vcmask 868104   ;;  %v3377_v28 = vld [vmem:[%s6015_s0 + $0x4b] sm:$0x1]   ;;  %v3368_v33 = vld [vmem:[%s6015_s0 + $0x1f3] sm:$0x8]   ;;  %vm851_vm6 = vcmask 859904  }
  0xb2   :  { %v704_v50 = vpop.permute.xlu0 %703   ;;  %v3378_v29 = vld [vmem:[%s6015_s0 + $0x14a] sm:$0x2]   ;;  %v3372_v36 = vld [vmem:[%s6015_s0 + $0x1ba] sm:$0x8]   ;;  %v3375_v38 = vld [vmem:[%s6015_s0 + $0x82] sm:$0x4]   ;;  %v2060_v43 = vsel %vm14_vm2, %v3368_v33, %v2056_v32 }
  0xb3   :  { %707 = vst.msk [vmem:[#allocation2 + $0x80] sm:$0x3] %vm705_vm10, %v704_v50   ;;  %709 = vst.msk [vmem:[#allocation2 + $0x36] sm:$0xc] %vm705_vm10, %v704_v50   ;;  %v725_v62 = vpop.permute.xlu1 %724   ;;  %v2114_v39 = vsel %vm6_vm0, %v3378_v29, %v3377_v28  ;;  %v3379_v40 = vld [vmem:[%s6015_s0 + $0xc9] sm:$0x4]   ;;  %v2098_v48 = vsel %vm10_vm1, %v3375_v38, %v2094_v37 }
  0xb4   :  { %1915 = vrot.lane.b32.xlu0 %v1914_v47, %s3751_s15  ;;  %728 = vst.msk [vmem:[#allocation2 + $0x60] sm:$0x3] %vm726_vm11, %v725_v62   ;;  %730 = vst.msk [vmem:[#allocation2 + $0x16] sm:$0xc] %vm726_vm11, %v725_v62   ;;  %s3754_s15 = smov 42   ;;  %s3757_s11 = smov 39   ;;  %v2081_v47 = vsel %vm14_vm2, %v3372_v36, %v2077_v35  ;;  %v2118_v51 = vsel %vm10_vm1, %v3379_v40, %v2114_v39 }
  0xb5   :  { %1935 = vrot.lane.b32.xlu1 %v1934_v59, %s3752_s26  ;;  %v3381_v41 = vld [vmem:[%s6015_s0 + $0x12] sm:$0x1]   ;;  %vm872_vm4 = vcmask 851704   ;;  %v3385_v44 = vld [vmem:[%s6015_s0 + $0x59] sm:$0x1]   ;;  %vm893_vm5 = vcmask 843504  }
  0xb6   :  { %v746_v2 = vpop.permute.xlu0 %745   ;;  %v3382_v42 = vld [vmem:[%s6015_s0 + $0x111] sm:$0x2]   ;;  %v3386_v45 = vld [vmem:[%s6015_s0 + $0x158] sm:$0x2]   ;;  %v3376_v49 = vld [vmem:[%s6015_s0 + $0x181] sm:$0x8]  }
  0xb7   :  { %749 = vst.msk [vmem:[#allocation2 + $0x40] sm:$0x3] %vm747_vm12, %v746_v2   ;;  %751 = vst.msk [vmem:[#allocation2 + $0x86] sm:$0xc] %vm747_vm12, %v746_v2   ;;  %v767_v14 = vpop.permute.xlu1 %766   ;;  %v3380_v52 = vld [vmem:[%s6015_s0 + $0x1c8] sm:$0x8]   ;;  %v2135_v53 = vsel %vm6_vm0, %v3382_v42, %v3381_v41  ;;  %v2156_v55 = vsel %vm6_vm0, %v3386_v45, %v3385_v44  ;;  %v2102_v59 = vsel %vm14_vm2, %v3376_v49, %v2098_v48 }
  0xb8   :  { %1956 = vrot.lane.b32.xlu0 %v1955_v63, %s3753_s4  ;;  %770 = vst.msk [vmem:[#allocation2 + $0x20] sm:$0x3] %vm768_vm13, %v767_v14   ;;  %772 = vst.msk [vmem:[#allocation2 + $0x66] sm:$0xc] %vm768_vm13, %v767_v14   ;;  %s3756_s4 = smov 40   ;;  %s3759_s29 = smov 37   ;;  %v2122_v63 = vsel %vm14_vm2, %v3380_v52, %v2118_v51 }
  0xb9   :  { %1977 = vrot.lane.b32.xlu1 %v1976_v11, %s3754_s15  ;;  %v3383_v54 = vld [vmem:[%s6015_s0 + $0x90] sm:$0x4]   ;;  %v3387_v56 = vld [vmem:[%s6015_s0 + $0xd7] sm:$0x4]   ;;  %v3389_v57 = vld [vmem:[%s6015_s0 + $0x20] sm:$0x1]  }
  0xba   :  { %v788_v18 = vpop.permute.xlu0 %787   ;;  %v3390_v58 = vld [vmem:[%s6015_s0 + $0x11f] sm:$0x2]   ;;  %vm914_vm8 = vcmask 835304   ;;  %v3393_v60 = vld [vmem:[%s6015_s0 + $0xe7] sm:$0x1]   ;;  %v2139_v0 = vsel %vm10_vm1, %v3383_v54, %v2135_v53  ;;  %vm935_vm3 = vcmask 827104   ;;  %v2160_v3 = vsel %vm10_vm1, %v3387_v56, %v2156_v55 }
  0xbb   :  { %790 = vst.msk [vmem:[#allocation2] sm:$0x3] %vm789_vm14, %v788_v18   ;;  %792 = vst.msk [vmem:[#allocation2 + $0x46] sm:$0xc] %vm789_vm14, %v788_v18   ;;  %v808_v30 = vpop.permute.xlu1 %807   ;;  %v3394_v61 = vld [vmem:[%s6015_s0 + $0x1e6] sm:$0x2]   ;;  %v2177_v5 = vsel %vm6_vm0, %v3390_v58, %v3389_v57 }
  0xbc   :  { %1998 = vrot.lane.b32.xlu0 %v1997_v15, %s3755_s22  ;;  %811 = vst.msk [vmem:[#allocation2 + $0x28] sm:$0x3] %vm809_vm15, %v808_v30   ;;  %813 = vst.msk [vmem:[#allocation2 + $0x6e] sm:$0xc] %vm809_vm15, %v808_v30   ;;  %s3758_s22 = smov 38   ;;  %v2198_v7 = vsel %vm6_vm0, %v3394_v61, %v3393_v60  ;;  %s3761_s18 = smov 35  }
  0xbd   :  { %2019 = vrot.lane.b32.xlu1 %v2018_v27, %s3756_s4  ;;  %v3384_v1 = vld [vmem:[%s6015_s0 + $0x18f] sm:$0x8]   ;;  %v3388_v4 = vld [vmem:[%s6015_s0 + $0x1d6] sm:$0x8]   ;;  %v3391_v6 = vld [vmem:[%s6015_s0 + $0x9e] sm:$0x4]  }
  0xbe   :  { %v829_v34 = vpop.permute.xlu0 %828   ;;  %v3395_v8 = vld [vmem:[%s6015_s0 + $0x65] sm:$0x4]   ;;  %v3397_v9 = vld [vmem:[%s6015_s0 + $0xae] sm:$0x1]   ;;  %vm956_vm9 = vcmask 818904   ;;  %v2143_v11 = vsel %vm14_vm2, %v3384_v1, %v2139_v0  ;;  %v2164_v15 = vsel %vm14_vm2, %v3388_v4, %v2160_v3  ;;  %v2181_v16 = vsel %vm10_vm1, %v3391_v6, %v2177_v5  ;;  %s3763_s7 = smov 33  }
  0xbf   :  { %832 = vst.msk [vmem:[#allocation2 + $0x8] sm:$0x3] %vm830_vm7, %v829_v34   ;;  %834 = vst.msk [vmem:[#allocation2 + $0x4e] sm:$0xc] %vm830_vm7, %v829_v34   ;;  %v850_v46 = vpop.permute.xlu1 %849   ;;  %v3398_v10 = vld [vmem:[%s6015_s0 + $0x1ad] sm:$0x2]   ;;  %v2202_v19 = vsel %vm10_vm1, %v3395_v8, %v2198_v7 }
  0xc0   :  { %2040 = vrot.lane.b32.xlu0 %v2039_v31, %s3757_s11  ;;  %853 = vst.msk [vmem:[#allocation2 + $0x30] sm:$0x3] %vm851_vm6, %v850_v46   ;;  %855 = vst.msk [vmem:[#allocation2 + $0x76] sm:$0xc] %vm851_vm6, %v850_v46   ;;  %s3760_s11 = smov 36   ;;  %vm977_vm10 = vcmask 810704   ;;  %v2219_v21 = vsel %vm6_vm0, %v3398_v10, %v3397_v9 }
  0xc1   :  { %2061 = vrot.lane.b32.xlu1 %v2060_v43, %s3758_s22  ;;  %v3401_v12 = vld [vmem:[%s6015_s0 + $0x75] sm:$0x1]   ;;  %v3392_v17 = vld [vmem:[%s6015_s0 + $0x19d] sm:$0x8]   ;;  %v3396_v20 = vld [vmem:[%s6015_s0 + $0x164] sm:$0x8]  }
  0xc2   :  { %v871_v50 = vpop.permute.xlu0 %870   ;;  %v3402_v13 = vld [vmem:[%s6015_s0 + $0x174] sm:$0x2]   ;;  %v3399_v22 = vld [vmem:[%s6015_s0 + $0x2c] sm:$0x4]   ;;  %v3405_v25 = vld [vmem:[%s6015_s0 + $0x3c] sm:$0x1]   ;;  %v2185_v27 = vsel %vm14_vm2, %v3392_v17, %v2181_v16  ;;  %v2206_v31 = vsel %vm14_vm2, %v3396_v20, %v2202_v19 }
  0xc3   :  { %874 = vst.msk [vmem:[#allocation2 + $0x10] sm:$0x3] %vm872_vm4, %v871_v50   ;;  %876 = vst.msk [vmem:[#allocation2 + $0x56] sm:$0xc] %vm872_vm4, %v871_v50   ;;  %v892_v62 = vpop.permute.xlu1 %891   ;;  %v2240_v23 = vsel %vm6_vm0, %v3402_v13, %v3401_v12  ;;  %v3403_v24 = vld [vmem:[%s6015_s0 + $0xf3] sm:$0x4]   ;;  %v2223_v32 = vsel %vm10_vm1, %v3399_v22, %v2219_v21 }
  0xc4   :  { %2082 = vrot.lane.b32.xlu0 %v2081_v47, %s3759_s29  ;;  %895 = vst.msk [vmem:[#allocation2 + $0x80] sm:$0x3] %vm893_vm5, %v892_v62   ;;  %897 = vst.msk [vmem:[#allocation2 + $0x36] sm:$0xc] %vm893_vm5, %v892_v62   ;;  %s3762_s29 = smov 34   ;;  %vm997_vm11 = vcmask 802504   ;;  %v2244_v35 = vsel %vm10_vm1, %v3403_v24, %v2240_v23 }
  0xc5   :  { %2103 = vrot.lane.b32.xlu1 %v2102_v59, %s3760_s11  ;;  %v3406_v26 = vld [vmem:[%s6015_s0 + $0x13b] sm:$0x2]   ;;  %v3409_v28 = vld [vmem:[%s6015_s0 + $0x3] sm:$0x1]   ;;  %v3400_v33 = vld [vmem:[%s6015_s0 + $0x12b] sm:$0x8]  }
  0xc6   :  { %v913_v2 = vpop.permute.xlu0 %912   ;;  %v3410_v29 = vld [vmem:[%s6015_s0 + $0x102] sm:$0x2]   ;;  %vm1018_vm12 = vcmask 794304   ;;  %v3404_v36 = vld [vmem:[%s6015_s0 + $0x1f2] sm:$0x8]   ;;  %v2261_v37 = vsel %vm6_vm0, %v3406_v26, %v3405_v25  ;;  %s3765_s25 = smov 31   ;;  %v2227_v43 = vsel %vm14_vm2, %v3400_v33, %v2223_v32 }
  0xc7   :  { %916 = vst.msk [vmem:[#allocation2 + $0x60] sm:$0x3] %vm914_vm8, %v913_v2   ;;  %918 = vst.msk [vmem:[#allocation2 + $0x16] sm:$0xc] %vm914_vm8, %v913_v2   ;;  %v934_v14 = vpop.permute.xlu1 %933   ;;  %v3407_v38 = vld [vmem:[%s6015_s0 + $0xba] sm:$0x4]   ;;  %v2282_v39 = vsel %vm6_vm0, %v3410_v29, %v3409_v28  ;;  %v2248_v47 = vsel %vm14_vm2, %v3404_v36, %v2244_v35 }
  0xc8   :  { %2123 = vrot.lane.b32.xlu0 %v2122_v63, %s3761_s18  ;;  %937 = vst.msk [vmem:[#allocation2 + $0x40] sm:$0x3] %vm935_vm3, %v934_v14   ;;  %939 = vst.msk [vmem:[#allocation2 + $0x86] sm:$0xc] %vm935_vm3, %v934_v14   ;;  %s3764_s18 = smov 32   ;;  %vm1039_vm13 = vcmask 786104   ;;  %v2265_v48 = vsel %vm10_vm1, %v3407_v38, %v2261_v37 }
  0xc9   :  { %2144 = vrot.lane.b32.xlu1 %v2143_v11, %s3762_s29  ;;  %v3411_v40 = vld [vmem:[%s6015_s0 + $0x81] sm:$0x4]   ;;  %v3413_v41 = vld [vmem:[%s6015_s0 + $0x4a] sm:$0x1]   ;;  %v3417_v44 = vld [vmem:[%s6015_s0 + $0x11] sm:$0x1]  }
  0xca   :  { %v955_v18 = vpop.permute.xlu0 %954   ;;  %v3414_v42 = vld [vmem:[%s6015_s0 + $0x149] sm:$0x2]   ;;  %v3418_v45 = vld [vmem:[%s6015_s0 + $0x110] sm:$0x2]   ;;  %v3408_v49 = vld [vmem:[%s6015_s0 + $0x1b9] sm:$0x8]   ;;  %v2286_v51 = vsel %vm10_vm1, %v3411_v40, %v2282_v39 }
  0xcb   :  { %958 = vst.msk [vmem:[#allocation2 + $0x20] sm:$0x3] %vm956_vm9, %v955_v18   ;;  %960 = vst.msk [vmem:[#allocation2 + $0x66] sm:$0xc] %vm956_vm9, %v955_v18   ;;  %v976_v30 = vpop.permute.xlu1 %975   ;;  %vm1060_vm14 = vcmask 777904   ;;  %v2302_v53 = vsel %vm6_vm0, %v3414_v42, %v3413_v41  ;;  %v2323_v55 = vsel %vm6_vm0, %v3418_v45, %v3417_v44  ;;  %s3767_s14 = smov 29   ;;  %v2269_v59 = vsel %vm14_vm2, %v3408_v49, %v2265_v48 }
  0xcc   :  { %2165 = vrot.lane.b32.xlu0 %v2164_v15, %s3763_s7  ;;  %978 = vst.msk [vmem:[#allocation2] sm:$0x3] %vm977_vm10, %v976_v30   ;;  %980 = vst.msk [vmem:[#allocation2 + $0x46] sm:$0xc] %vm977_vm10, %v976_v30   ;;  %v3412_v52 = vld [vmem:[%s6015_s0 + $0x180] sm:$0x8]  }
  0xcd   :  { %2186 = vrot.lane.b32.xlu1 %v2185_v27, %s3764_s18  ;;  %v3415_v54 = vld [vmem:[%s6015_s0 + $0xc8] sm:$0x4]   ;;  %s3766_s7 = smov 30   ;;  %v3419_v56 = vld [vmem:[%s6015_s0 + $0x8f] sm:$0x4]   ;;  %vm1081_vm15 = vcmask 769704   ;;  %v2290_v63 = vsel %vm14_vm2, %v3412_v52, %v2286_v51 }
  0xce   :  { %v996_v34 = vpop.permute.xlu0 %995   ;;  %v3421_v57 = vld [vmem:[%s6015_s0 + $0x58] sm:$0x1]   ;;  %v3425_v60 = vld [vmem:[%s6015_s0 + $0x1f] sm:$0x1]   ;;  %v2306_v0 = vsel %vm10_vm1, %v3415_v54, %v2302_v53  ;;  %v3416_v1 = vld [vmem:[%s6015_s0 + $0x1c7] sm:$0x8]   ;;  %v2327_v3 = vsel %vm10_vm1, %v3419_v56, %v2323_v55 }
  0xcf   :  { %999 = vst.msk [vmem:[#allocation2 + $0x28] sm:$0x3] %vm997_vm11, %v996_v34   ;;  %1001 = vst.msk [vmem:[#allocation2 + $0x6e] sm:$0xc] %vm997_vm11, %v996_v34   ;;  %v1017_v46 = vpop.permute.xlu1 %1016   ;;  %v3422_v58 = vld [vmem:[%s6015_s0 + $0x157] sm:$0x2]   ;;  %v2310_v11 = vsel %vm14_vm2, %v3416_v1, %v2306_v0 }
  0xd0   :  { %2207 = vrot.lane.b32.xlu0 %v2206_v31, %s3765_s25  ;;  %1020 = vst.msk [vmem:[#allocation2 + $0x8] sm:$0x3] %vm1018_vm12, %v1017_v46   ;;  %1022 = vst.msk [vmem:[#allocation2 + $0x4e] sm:$0xc] %vm1018_vm12, %v1017_v46   ;;  %v3426_v61 = vld [vmem:[%s6015_s0 + $0x11e] sm:$0x2]   ;;  %v2344_v5 = vsel %vm6_vm0, %v3422_v58, %v3421_v57 }
  0xd1   :  { %2228 = vrot.lane.b32.xlu1 %v2227_v43, %s3766_s7  ;;  %vm1102_vm7 = vcmask 761504   ;;  %v3420_v4 = vld [vmem:[%s6015_s0 + $0x18e] sm:$0x8]   ;;  %v3423_v6 = vld [vmem:[%s6015_s0 + $0xd6] sm:$0x4]   ;;  %s3768_s25 = smov 28   ;;  %v2365_v7 = vsel %vm6_vm0, %v3426_v61, %v3425_v60 }
  0xd2   :  { %v1038_v50 = vpop.permute.xlu0 %1037   ;;  %v3427_v8 = vld [vmem:[%s6015_s0 + $0x9d] sm:$0x4]   ;;  %v3429_v9 = vld [vmem:[%s6015_s0 + $0xe6] sm:$0x1]   ;;  %s3769_s3 = smov 27   ;;  %vm1123_vm6 = vcmask 753304   ;;  %v2331_v15 = vsel %vm14_vm2, %v3420_v4, %v2327_v3  ;;  %v2348_v16 = vsel %vm10_vm1, %v3423_v6, %v2344_v5 }
  0xd3   :  { %1041 = vst.msk [vmem:[#allocation2 + $0x30] sm:$0x3] %vm1039_vm13, %v1038_v50   ;;  %1043 = vst.msk [vmem:[#allocation2 + $0x76] sm:$0xc] %vm1039_vm13, %v1038_v50   ;;  %v1059_v62 = vpop.permute.xlu1 %1058   ;;  %v3430_v10 = vld [vmem:[%s6015_s0 + $0x1e5] sm:$0x2]   ;;  %v2369_v19 = vsel %vm10_vm1, %v3427_v8, %v2365_v7 }
  0xd4   :  { %2249 = vrot.lane.b32.xlu0 %v2248_v47, %s3767_s14  ;;  %1062 = vst.msk [vmem:[#allocation2 + $0x10] sm:$0x3] %vm1060_vm14, %v1059_v62   ;;  %1064 = vst.msk [vmem:[#allocation2 + $0x56] sm:$0xc] %vm1060_vm14, %v1059_v62   ;;  %v3433_v12 = vld [vmem:[%s6015_s0 + $0xad] sm:$0x1]   ;;  %v2386_v21 = vsel %vm6_vm0, %v3430_v10, %v3429_v9 }
  0xd5   :  { %2270 = vrot.lane.b32.xlu1 %v2269_v59, %s3768_s25  ;;  %v3434_v13 = vld [vmem:[%s6015_s0 + $0x1ac] sm:$0x2]   ;;  %vm1144_vm4 = vcmask 745104   ;;  %v3424_v17 = vld [vmem:[%s6015_s0 + $0x1d5] sm:$0x8]   ;;  %s3770_s16 = smov 26  }
  0xd6   :  { %v1080_v2 = vpop.permute.xlu0 %1079   ;;  %v3428_v20 = vld [vmem:[%s6015_s0 + $0x19c] sm:$0x8]   ;;  %v3431_v22 = vld [vmem:[%s6015_s0 + $0x64] sm:$0x4]   ;;  %v3435_v23 = vld [vmem:[%s6015_s0 + $0x2b] sm:$0x4]   ;;  %v2407_v24 = vsel %vm6_vm0, %v3434_v13, %v3433_v12 }
  0xd7   :  { %1083 = vst.msk [vmem:[#allocation2 + $0x80] sm:$0x3] %vm1081_vm15, %v1080_v2   ;;  %1085 = vst.msk [vmem:[#allocation2 + $0x36] sm:$0xc] %vm1081_vm15, %v1080_v2   ;;  %v1101_v14 = vpop.permute.xlu1 %1100   ;;  %v3437_v25 = vld [vmem:[%s6015_s0 + $0x74] sm:$0x1]  }
  0xd8   :  { %2291 = vrot.lane.b32.xlu0 %v2290_v63, %s3769_s3  ;;  %1104 = vst.msk [vmem:[#allocation2 + $0x60] sm:$0x3] %vm1102_vm7, %v1101_v14   ;;  %1106 = vst.msk [vmem:[#allocation2 + $0x16] sm:$0xc] %vm1102_vm7, %v1101_v14   ;;  %v3438_v26 = vld [vmem:[%s6015_s0 + $0x173] sm:$0x2]  }
  0xd9   :  { %2311 = vrot.lane.b32.xlu1 %v2310_v11, %s3770_s16 }
  0xda   :  { %v1122_v18 = vpop.permute.xlu0 %1121  }
  0xdb   :  { %1125 = vst.msk [vmem:[#allocation2 + $0x40] sm:$0x3] %vm1123_vm6, %v1122_v18   ;;  %1127 = vst.msk [vmem:[#allocation2 + $0x86] sm:$0xc] %vm1123_vm6, %v1122_v18  }
  0xdc   :  { %2 = vsyncpa [#allocation1], 0  ;;  %s3771_s21 = smov 25   ;;  %vm1165_vm5 = vcmask 736904   ;;  %v2352_v27 = vsel %vm14_vm2, %v3424_v17, %v2348_v16  ;;  %v3441_v28 = vld [vmem:[%s6015_s0 + $0x3b] sm:$0x1]   ;;  %v1143_v30 = vpop.permute.xlu1 %1142   ;;  %v2373_v31 = vsel %vm14_vm2, %v3428_v20, %v2369_v19  ;;  %v2390_v32 = vsel %vm10_vm1, %v3431_v22, %v2386_v21 }
  0xdd   :  { %2332 = vrot.lane.b32.xlu0 %v2331_v15, %s3771_s21  ;;  %v3442_v29 = vld [vmem:[%s6015_s0 + $0x13a] sm:$0x2]   ;;  %v3432_v33 = vld [vmem:[%s6015_s0 + $0x163] sm:$0x8]   ;;  %1146 = vst.msk [vmem:[#allocation2 + $0x20] sm:$0x3] %vm1144_vm4, %v1143_v30   ;;  %v2411_v35 = vsel %vm10_vm1, %v3435_v23, %v2407_v24  ;;  %v2428_v37 = vsel %vm6_vm0, %v3438_v26, %v3437_v25 }
  0xde   :  { %1148 = vst.msk [vmem:[#allocation2 + $0x66] sm:$0xc] %vm1144_vm4, %v1143_v30   ;;  %v1164_v34 = vpop.permute.xlu0 %1163   ;;  %vm1185_vm8 = vcmask 728704   ;;  %v3436_v36 = vld [vmem:[%s6015_s0 + $0x12a] sm:$0x8]   ;;  %s3772_s3 = smov 24   ;;  %v2449_v39 = vsel %vm6_vm0, %v3442_v29, %v3441_v28  ;;  %v2394_v43 = vsel %vm14_vm2, %v3432_v33, %v2390_v32 }
  0xdf   :  { %v3439_v38 = vld [vmem:[%s6015_s0 + $0xf2] sm:$0x4]   ;;  %1166 = vst.msk [vmem:[#allocation2] sm:$0x3] %vm1165_vm5, %v1164_v34   ;;  %1168 = vst.msk [vmem:[#allocation2 + $0x46] sm:$0xc] %vm1165_vm5, %v1164_v34   ;;  %2353 = vrot.lane.b32.xlu1 %v2352_v27, %s3772_s3  ;;  %v2415_v47 = vsel %vm14_vm2, %v3436_v36, %v2411_v35 }
  0xe0   :  { %v3443_v40 = vld [vmem:[%s6015_s0 + $0xb9] sm:$0x4]   ;;  %v3445_v41 = vld [vmem:[%s6015_s0 + $0x2] sm:$0x1]   ;;  %s3773_s10 = smov 23   ;;  %vm1206_vm3 = vcmask 720504   ;;  %v1184_v46 = vpop.permute.xlu1 %1183   ;;  %v2432_v48 = vsel %vm10_vm1, %v3439_v38, %v2428_v37 }
  0xe1   :  { %v3446_v42 = vld [vmem:[%s6015_s0 + $0x101] sm:$0x2]   ;;  %2374 = vrot.lane.b32.xlu0 %v2373_v31, %s3773_s10  ;;  %v3449_v44 = vld [vmem:[%s6015_s0 + $0x49] sm:$0x1]   ;;  %v3440_v49 = vld [vmem:[%s6015_s0 + $0x1f1] sm:$0x8]   ;;  %v2453_v51 = vsel %vm10_vm1, %v3443_v40, %v2449_v39 }
  0xe2   :  { %v3450_v45 = vld [vmem:[%s6015_s0 + $0x148] sm:$0x2]   ;;  %1187 = vst.msk [vmem:[#allocation2 + $0x28] sm:$0x3] %vm1185_vm8, %v1184_v46   ;;  %1189 = vst.msk [vmem:[#allocation2 + $0x6e] sm:$0xc] %vm1185_vm8, %v1184_v46   ;;  %v1205_v50 = vpop.permute.xlu0 %1204   ;;  %v2470_v53 = vsel %vm6_vm0, %v3446_v42, %v3445_v41  ;;  %v2436_v59 = vsel %vm14_vm2, %v3440_v49, %v2432_v48 }
  0xe3   :  { %vm1227_vm9 = vcmask 712304   ;;  %v3444_v52 = vld [vmem:[%s6015_s0 + $0x1b8] sm:$0x8]   ;;  %v3447_v54 = vld [vmem:[%s6015_s0 + $0x80] sm:$0x4]   ;;  %s3774_s21 = smov 22   ;;  %v2490_v55 = vsel %vm6_vm0, %v3450_v45, %v3449_v44 }
  0xe4   :  { %1208 = vst.msk [vmem:[#allocation2 + $0x8] sm:$0x3] %vm1206_vm3, %v1205_v50   ;;  %1210 = vst.msk [vmem:[#allocation2 + $0x4e] sm:$0xc] %vm1206_vm3, %v1205_v50   ;;  %2395 = vrot.lane.b32.xlu1 %v2394_v43, %s3774_s21  ;;  %v3451_v56 = vld [vmem:[%s6015_s0 + $0xc7] sm:$0x4]   ;;  %v1226_v62 = vpop.permute.xlu1 %1225   ;;  %v2457_v63 = vsel %vm14_vm2, %v3444_v52, %v2453_v51  ;;  %v2474_v0 = vsel %vm10_vm1, %v3447_v54, %v2470_v53 }
  0xe5   :  { %v3453_v57 = vld [vmem:[%s6015_s0 + $0x10] sm:$0x1]   ;;  %s3775_s28 = smov 21   ;;  %vm1248_vm10 = vcmask 704104   ;;  %v3457_v60 = vld [vmem:[%s6015_s0 + $0x57] sm:$0x1]   ;;  %v2494_v3 = vsel %vm10_vm1, %v3451_v56, %v2490_v55 }
  0xe6   :  { %v3454_v58 = vld [vmem:[%s6015_s0 + $0x10f] sm:$0x2]   ;;  %2416 = vrot.lane.b32.xlu0 %v2415_v47, %s3775_s28  ;;  %v3458_v61 = vld [vmem:[%s6015_s0 + $0x156] sm:$0x2]   ;;  %v3448_v1 = vld [vmem:[%s6015_s0 + $0x17f] sm:$0x8]   ;;  %v1247_v2 = vpop.permute.xlu0 %1246  }
  0xe7   :  { %1229 = vst.msk [vmem:[#allocation2 + $0x30] sm:$0x3] %vm1227_vm9, %v1226_v62   ;;  %1231 = vst.msk [vmem:[#allocation2 + $0x76] sm:$0xc] %vm1227_vm9, %v1226_v62   ;;  %vm1269_vm11 = vcmask 695904   ;;  %v2511_v5 = vsel %vm6_vm0, %v3454_v58, %v3453_v57  ;;  %s3776_s10 = smov 20   ;;  %v2532_v7 = vsel %vm6_vm0, %v3458_v61, %v3457_v60  ;;  %v2478_v11 = vsel %vm14_vm2, %v3448_v1, %v2474_v0 }
  0xe8   :  { %v3452_v4 = vld [vmem:[%s6015_s0 + $0x1c6] sm:$0x8]   ;;  %v3455_v6 = vld [vmem:[%s6015_s0 + $0x8e] sm:$0x4]   ;;  %1250 = vst.msk [vmem:[#allocation2 + $0x10] sm:$0x3] %vm1248_vm10, %v1247_v2   ;;  %2437 = vrot.lane.b32.xlu1 %v2436_v59, %s3776_s10  ;;  %v1268_v14 = vpop.permute.xlu1 %1267  }
  0xe9   :  { %1252 = vst.msk [vmem:[#allocation2 + $0x56] sm:$0xc] %vm1248_vm10, %v1247_v2   ;;  %v3459_v8 = vld [vmem:[%s6015_s0 + $0xd5] sm:$0x4]   ;;  %v3461_v9 = vld [vmem:[%s6015_s0 + $0x1e] sm:$0x1]   ;;  %v2498_v15 = vsel %vm14_vm2, %v3452_v4, %v2494_v3  ;;  %v2515_v16 = vsel %vm10_vm1, %v3455_v6, %v2511_v5 }
  0xea   :  { %v3462_v10 = vld [vmem:[%s6015_s0 + $0x11d] sm:$0x2]   ;;  %s3777_s17 = smov 19   ;;  %vm1290_vm12 = vcmask 687704   ;;  %v3465_v12 = vld [vmem:[%s6015_s0 + $0xe5] sm:$0x1]   ;;  %v1289_v18 = vpop.permute.xlu0 %1288   ;;  %v2536_v19 = vsel %vm10_vm1, %v3459_v8, %v2532_v7 }
  0xeb   :  { %2458 = vrot.lane.b32.xlu0 %v2457_v63, %s3777_s17  ;;  %v3466_v13 = vld [vmem:[%s6015_s0 + $0x1e4] sm:$0x2]   ;;  %v3456_v17 = vld [vmem:[%s6015_s0 + $0x18d] sm:$0x8]   ;;  %1271 = vst.msk [vmem:[#allocation2 + $0x80] sm:$0x3] %vm1269_vm11, %v1268_v14   ;;  %v2553_v21 = vsel %vm6_vm0, %v3462_v10, %v3461_v9 }
  0xec   :  { %1273 = vst.msk [vmem:[#allocation2 + $0x36] sm:$0xc] %vm1269_vm11, %v1268_v14   ;;  %vm1311_vm13 = vcmask 679504   ;;  %v3460_v20 = vld [vmem:[%s6015_s0 + $0x1d4] sm:$0x8]   ;;  %s3778_s28 = smov 18   ;;  %v2574_v23 = vsel %vm6_vm0, %v3466_v13, %v3465_v12  ;;  %v2519_v27 = vsel %vm14_vm2, %v3456_v17, %v2515_v16  ;;  %v1310_v30 = vpop.permute.xlu1 %1309  }
  0xed   :  { %v3463_v22 = vld [vmem:[%s6015_s0 + $0x9c] sm:$0x4]   ;;  %1292 = vst.msk [vmem:[#allocation2 + $0x60] sm:$0x3] %vm1290_vm12, %v1289_v18   ;;  %1294 = vst.msk [vmem:[#allocation2 + $0x16] sm:$0xc] %vm1290_vm12, %v1289_v18   ;;  %2479 = vrot.lane.b32.xlu1 %v2478_v11, %s3778_s28  ;;  %v2540_v31 = vsel %vm14_vm2, %v3460_v20, %v2536_v19 }
  0xee   :  { %v3467_v24 = vld [vmem:[%s6015_s0 + $0x63] sm:$0x4]   ;;  %v3469_v25 = vld [vmem:[%s6015_s0 + $0xac] sm:$0x1]   ;;  %s3779_s6 = smov 17   ;;  %vm1332_vm14 = vcmask 671304   ;;  %v2557_v32 = vsel %vm10_vm1, %v3463_v22, %v2553_v21  ;;  %v1331_v34 = vpop.permute.xlu0 %1330  }
  0xef   :  { %v3470_v26 = vld [vmem:[%s6015_s0 + $0x1ab] sm:$0x2]   ;;  %2499 = vrot.lane.b32.xlu0 %v2498_v15, %s3779_s6  ;;  %v3473_v28 = vld [vmem:[%s6015_s0 + $0x73] sm:$0x1]   ;;  %v3464_v33 = vld [vmem:[%s6015_s0 + $0x19b] sm:$0x8]   ;;  %v2578_v35 = vsel %vm10_vm1, %v3467_v24, %v2574_v23 }
  0xf0   :  { %v3474_v29 = vld [vmem:[%s6015_s0 + $0x172] sm:$0x2]   ;;  %1313 = vst.msk [vmem:[#allocation2 + $0x40] sm:$0x3] %vm1311_vm13, %v1310_v30   ;;  %1315 = vst.msk [vmem:[#allocation2 + $0x86] sm:$0xc] %vm1311_vm13, %v1310_v30   ;;  %v2595_v37 = vsel %vm6_vm0, %v3470_v26, %v3469_v25  ;;  %v2561_v43 = vsel %vm14_vm2, %v3464_v33, %v2557_v32  ;;  %v1352_v46 = vpop.permute.xlu1 %1351  }
  0xf1   :  { %vm1353_vm15 = vcmask 663104   ;;  %v3468_v36 = vld [vmem:[%s6015_s0 + $0x162] sm:$0x8]   ;;  %v3471_v38 = vld [vmem:[%s6015_s0 + $0x2a] sm:$0x4]   ;;  %s3780_s17 = smov 16   ;;  %v2616_v39 = vsel %vm6_vm0, %v3474_v29, %v3473_v28 }
  0xf2   :  { %1334 = vst.msk [vmem:[#allocation2 + $0x20] sm:$0x3] %vm1332_vm14, %v1331_v34   ;;  %1336 = vst.msk [vmem:[#allocation2 + $0x66] sm:$0xc] %vm1332_vm14, %v1331_v34   ;;  %2520 = vrot.lane.b32.xlu1 %v2519_v27, %s3780_s17  ;;  %v3475_v40 = vld [vmem:[%s6015_s0 + $0xf1] sm:$0x4]   ;;  %v2582_v47 = vsel %vm14_vm2, %v3468_v36, %v2578_v35  ;;  %v2599_v48 = vsel %vm10_vm1, %v3471_v38, %v2595_v37  ;;  %v1372_v50 = vpop.permute.xlu0 %1371  }
  0xf3   :  { %v3477_v41 = vld [vmem:[%s6015_s0 + $0x3a] sm:$0x1]   ;;  %s3781_s24 = smov 15   ;;  %vm1373_vm7 = vcmask 654904   ;;  %v3481_v44 = vld [vmem:[%s6015_s0 + $0x1] sm:$0x1]   ;;  %v2620_v51 = vsel %vm10_vm1, %v3475_v40, %v2616_v39 }
  0xf4   :  { %v3478_v42 = vld [vmem:[%s6015_s0 + $0x139] sm:$0x2]   ;;  %2541 = vrot.lane.b32.xlu0 %v2540_v31, %s3781_s24  ;;  %v3482_v45 = vld [vmem:[%s6015_s0 + $0x100] sm:$0x2]   ;;  %v3472_v49 = vld [vmem:[%s6015_s0 + $0x129] sm:$0x8]   ;;  %v1393_v62 = vpop.permute.xlu1 %1392  }
  0xf5   :  { %1354 = vst.msk [vmem:[#allocation2] sm:$0x3] %vm1353_vm15, %v1352_v46   ;;  %1356 = vst.msk [vmem:[#allocation2 + $0x46] sm:$0xc] %vm1353_vm15, %v1352_v46   ;;  %vm1394_vm6 = vcmask 646704   ;;  %v2637_v53 = vsel %vm6_vm0, %v3478_v42, %v3477_v41  ;;  %s3782_s6 = smov 14   ;;  %v2658_v55 = vsel %vm6_vm0, %v3482_v45, %v3481_v44  ;;  %v2603_v59 = vsel %vm14_vm2, %v3472_v49, %v2599_v48 }
  0xf6   :  { %v3476_v52 = vld [vmem:[%s6015_s0 + $0x1f0] sm:$0x8]   ;;  %v3479_v54 = vld [vmem:[%s6015_s0 + $0xb8] sm:$0x4]   ;;  %1375 = vst.msk [vmem:[#allocation2 + $0x28] sm:$0x3] %vm1373_vm7, %v1372_v50   ;;  %2562 = vrot.lane.b32.xlu1 %v2561_v43, %s3782_s6  ;;  %v1414_v2 = vpop.permute.xlu0 %1413  }
  0xf7   :  { %1377 = vst.msk [vmem:[#allocation2 + $0x6e] sm:$0xc] %vm1373_vm7, %v1372_v50   ;;  %v3483_v56 = vld [vmem:[%s6015_s0 + $0x7f] sm:$0x4]   ;;  %v3485_v57 = vld [vmem:[%s6015_s0 + $0x48] sm:$0x1]   ;;  %v2624_v63 = vsel %vm14_vm2, %v3476_v52, %v2620_v51  ;;  %v2641_v0 = vsel %vm10_vm1, %v3479_v54, %v2637_v53 }
  0xf8   :  { %v3486_v58 = vld [vmem:[%s6015_s0 + $0x147] sm:$0x2]   ;;  %s3783_s13 = smov 13   ;;  %vm1415_vm4 = vcmask 638504   ;;  %v3489_v60 = vld [vmem:[%s6015_s0 + $0xf] sm:$0x1]   ;;  %v2662_v3 = vsel %vm10_vm1, %v3483_v56, %v2658_v55  ;;  %v1435_v14 = vpop.permute.xlu1 %1434  }
  0xf9   :  { %2583 = vrot.lane.b32.xlu0 %v2582_v47, %s3783_s13  ;;  %v3490_v61 = vld [vmem:[%s6015_s0 + $0x10e] sm:$0x2]   ;;  %v3480_v1 = vld [vmem:[%s6015_s0 + $0x1b7] sm:$0x8]   ;;  %1396 = vst.msk [vmem:[#allocation2 + $0x8] sm:$0x3] %vm1394_vm6, %v1393_v62   ;;  %v2678_v5 = vsel %vm6_vm0, %v3486_v58, %v3485_v57 }
  0xfa   :  { %1398 = vst.msk [vmem:[#allocation2 + $0x4e] sm:$0xc] %vm1394_vm6, %v1393_v62   ;;  %vm1436_vm5 = vcmask 630304   ;;  %v3484_v4 = vld [vmem:[%s6015_s0 + $0x17e] sm:$0x8]   ;;  %s3784_s24 = smov 12   ;;  %v2699_v7 = vsel %vm6_vm0, %v3490_v61, %v3489_v60  ;;  %v2645_v11 = vsel %vm14_vm2, %v3480_v1, %v2641_v0  ;;  %v1456_v18 = vpop.permute.xlu0 %1455  }
  0xfb   :  { %v3487_v6 = vld [vmem:[%s6015_s0 + $0xc6] sm:$0x4]   ;;  %1417 = vst.msk [vmem:[#allocation2 + $0x30] sm:$0x3] %vm1415_vm4, %v1414_v2   ;;  %1419 = vst.msk [vmem:[#allocation2 + $0x76] sm:$0xc] %vm1415_vm4, %v1414_v2   ;;  %2604 = vrot.lane.b32.xlu1 %v2603_v59, %s3784_s24  ;;  %v2666_v15 = vsel %vm14_vm2, %v3484_v4, %v2662_v3 }
  0xfc   :  { %v3491_v8 = vld [vmem:[%s6015_s0 + $0x8d] sm:$0x4]   ;;  %v3493_v9 = vld [vmem:[%s6015_s0 + $0x56] sm:$0x1]   ;;  %s3785_s2 = smov 11   ;;  %vm1457_vm8 = vcmask 622104   ;;  %v2682_v16 = vsel %vm10_vm1, %v3487_v6, %v2678_v5  ;;  %v1477_v30 = vpop.permute.xlu1 %1476  }
  0xfd   :  { %v3494_v10 = vld [vmem:[%s6015_s0 + $0x155] sm:$0x2]   ;;  %2625 = vrot.lane.b32.xlu0 %v2624_v63, %s3785_s2  ;;  %v3497_v12 = vld [vmem:[%s6015_s0 + $0x1d] sm:$0x1]   ;;  %v3488_v17 = vld [vmem:[%s6015_s0 + $0x1c5] sm:$0x8]   ;;  %v2703_v19 = vsel %vm10_vm1, %v3491_v8, %v2699_v7 }
  0xfe   :  { %v3498_v13 = vld [vmem:[%s6015_s0 + $0x11c] sm:$0x2]   ;;  %1438 = vst.msk [vmem:[#allocation2 + $0x10] sm:$0x3] %vm1436_vm5, %v1435_v14   ;;  %1440 = vst.msk [vmem:[#allocation2 + $0x56] sm:$0xc] %vm1436_vm5, %v1435_v14   ;;  %v2720_v21 = vsel %vm6_vm0, %v3494_v10, %v3493_v9  ;;  %v2686_v27 = vsel %vm14_vm2, %v3488_v17, %v2682_v16  ;;  %v1498_v34 = vpop.permute.xlu0 %1497  }
  0xff   :  { %vm1478_vm3 = vcmask 613904   ;;  %v3492_v20 = vld [vmem:[%s6015_s0 + $0x18c] sm:$0x8]   ;;  %v3495_v22 = vld [vmem:[%s6015_s0 + $0xd4] sm:$0x4]   ;;  %s3786_s13 = smov 10   ;;  %v2741_v23 = vsel %vm6_vm0, %v3498_v13, %v3497_v12 }
 0x100   :  { %1459 = vst.msk [vmem:[#allocation2 + $0x80] sm:$0x3] %vm1457_vm8, %v1456_v18   ;;  %1461 = vst.msk [vmem:[#allocation2 + $0x36] sm:$0xc] %vm1457_vm8, %v1456_v18   ;;  %2646 = vrot.lane.b32.xlu1 %v2645_v11, %s3786_s13  ;;  %v3499_v24 = vld [vmem:[%s6015_s0 + $0x9b] sm:$0x4]   ;;  %v2707_v31 = vsel %vm14_vm2, %v3492_v20, %v2703_v19  ;;  %v2724_v32 = vsel %vm10_vm1, %v3495_v22, %v2720_v21  ;;  %v1519_v46 = vpop.permute.xlu1 %1518  }
 0x101   :  { %v3501_v25 = vld [vmem:[%s6015_s0 + $0xe4] sm:$0x1]   ;;  %s3787_s20 = smov 9   ;;  %vm1499_vm9 = vcmask 605704   ;;  %v3505_v28 = vld [vmem:[%s6015_s0 + $0xab] sm:$0x1]   ;;  %v2745_v35 = vsel %vm10_vm1, %v3499_v24, %v2741_v23 }
 0x102   :  { %v3502_v26 = vld [vmem:[%s6015_s0 + $0x1e3] sm:$0x2]   ;;  %2667 = vrot.lane.b32.xlu0 %v2666_v15, %s3787_s20  ;;  %v3506_v29 = vld [vmem:[%s6015_s0 + $0x1aa] sm:$0x2]   ;;  %v3496_v33 = vld [vmem:[%s6015_s0 + $0x1d3] sm:$0x8]   ;;  %v1540_v50 = vpop.permute.xlu0 %1539  }
 0x103   :  { %1480 = vst.msk [vmem:[#allocation2 + $0x60] sm:$0x3] %vm1478_vm3, %v1477_v30   ;;  %1482 = vst.msk [vmem:[#allocation2 + $0x16] sm:$0xc] %vm1478_vm3, %v1477_v30   ;;  %vm1520_vm10 = vcmask 597504   ;;  %v2762_v37 = vsel %vm6_vm0, %v3502_v26, %v3501_v25  ;;  %s3788_s2 = smov 8   ;;  %v2783_v39 = vsel %vm6_vm0, %v3506_v29, %v3505_v28  ;;  %v2728_v43 = vsel %vm14_vm2, %v3496_v33, %v2724_v32 }
 0x104   :  { %v3500_v36 = vld [vmem:[%s6015_s0 + $0x19a] sm:$0x8]   ;;  %v3503_v38 = vld [vmem:[%s6015_s0 + $0x62] sm:$0x4]   ;;  %1501 = vst.msk [vmem:[#allocation2 + $0x40] sm:$0x3] %vm1499_vm9, %v1498_v34   ;;  %2687 = vrot.lane.b32.xlu1 %v2686_v27, %s3788_s2  ;;  %v1560_v58 = vpop.permute.xlu1 %1559  }
 0x105   :  { %1503 = vst.msk [vmem:[#allocation2 + $0x86] sm:$0xc] %vm1499_vm9, %v1498_v34   ;;  %v3507_v40 = vld [vmem:[%s6015_s0 + $0x29] sm:$0x4]   ;;  %v3509_v41 = vld [vmem:[%s6015_s0 + $0x72] sm:$0x1]   ;;  %v2749_v47 = vsel %vm14_vm2, %v3500_v36, %v2745_v35  ;;  %v2766_v48 = vsel %vm10_vm1, %v3503_v38, %v2762_v37 }
 0x106   :  { %v3510_v42 = vld [vmem:[%s6015_s0 + $0x171] sm:$0x2]   ;;  %s3789_s9 = smov 7   ;;  %vm1541_vm11 = vcmask 589304   ;;  %v3513_v44 = vld [vmem:[%s6015_s0 + $0x39] sm:$0x1]   ;;  %v2787_v51 = vsel %vm10_vm1, %v3507_v40, %v2783_v39  ;;  %v1581_v62 = vpop.permute.xlu0 %1580  }
 0x107   :  { %2708 = vrot.lane.b32.xlu0 %v2707_v31, %s3789_s9  ;;  %v3514_v45 = vld [vmem:[%s6015_s0 + $0x138] sm:$0x2]   ;;  %v3504_v49 = vld [vmem:[%s6015_s0 + $0x161] sm:$0x8]   ;;  %1522 = vst.msk [vmem:[#allocation2 + $0x20] sm:$0x3] %vm1520_vm10, %v1519_v46   ;;  %v2804_v53 = vsel %vm6_vm0, %v3510_v42, %v3509_v41 }
 0x108   :  { %1524 = vst.msk [vmem:[#allocation2 + $0x66] sm:$0xc] %vm1520_vm10, %v1519_v46   ;;  %v3508_v52 = vld [vmem:[%s6015_s0 + $0x128] sm:$0x8]   ;;  %v3511_v54 = vld [vmem:[%s6015_s0 + $0xf0] sm:$0x4]   ;;  %v2825_v55 = vsel %vm6_vm0, %v3514_v45, %v3513_v44  ;;  %v2770_v57 = vsel %vm14_vm2, %v3504_v49, %v2766_v48  ;;  %v1602_v2 = vpop.permute.xlu1 %1601  }
 0x109   :  { %1542 = vst.msk [vmem:[#allocation2] sm:$0x3] %vm1541_vm11, %v1540_v50   ;;  %1544 = vst.msk [vmem:[#allocation2 + $0x46] sm:$0xc] %vm1541_vm11, %v1540_v50   ;;  %s3790_s20 = smov 6   ;;  %vm1561_vm12 = vcmask 581104   ;;  %v2791_v59 = vsel %vm14_vm2, %v3508_v52, %v2787_v51  ;;  %v2808_v60 = vsel %vm10_vm1, %v3511_v54, %v2804_v53 }
 0x10a   :  { %2729 = vrot.lane.b32.xlu1 %v2728_v43, %s3790_s20  ;;  %v3515_v56 = vld [vmem:[%s6015_s0 + $0xb7] sm:$0x4]   ;;  %s3791_s23 = smov 5   ;;  %vm1582_vm0 = vcmask 572904   ;;  %v3512_v61 = vld [vmem:[%s6015_s0 + $0x1ef] sm:$0x8]   ;;  %v1623_v4 = vpop.permute.xlu0 %1622  }
 0x10b   :  { %2750 = vrot.lane.b32.xlu0 %v2749_v47, %s3791_s23  ;;  %1563 = vst.msk [vmem:[#allocation2 + $0x28] sm:$0x3] %vm1561_vm12, %v1560_v58   ;;  %1565 = vst.msk [vmem:[#allocation2 + $0x6e] sm:$0xc] %vm1561_vm12, %v1560_v58   ;;  %v2829_v63 = vsel %vm10_vm1, %v3515_v56, %v2825_v55  ;;  %v3516_v0 = vld [vmem:[%s6015_s0 + $0x1b6] sm:$0x8]   ;;  %v2812_v1 = vsel %vm14_vm2, %v3512_v61, %v2808_v60 }
 0x10c   :  { %1584 = vst.msk [vmem:[#allocation2 + $0x8] sm:$0x3] %vm1582_vm0, %v1581_v62   ;;  %1586 = vst.msk [vmem:[#allocation2 + $0x4e] sm:$0xc] %vm1582_vm0, %v1581_v62   ;;  %s3792_s0 = smov 4   ;;  %vm1603_vm1 = vcmask 564704   ;;  %v2833_v3 = vsel %vm14_vm2, %v3516_v0, %v2829_v63  ;;  %v1644_v5 = vpop.permute.xlu1 %1643  }
 0x10d   :  { %s3793_s28 = smov 3   ;;  %vm1624_vm13 = vcmask 556504   ;;  %1605 = vst.msk [vmem:[#allocation2 + $0x30] sm:$0x3] %vm1603_vm1, %v1602_v2   ;;  %1607 = vst.msk [vmem:[#allocation2 + $0x76] sm:$0xc] %vm1603_vm1, %v1602_v2  }
 0x10e   :  { %2771 = vrot.lane.b32.xlu1 %v2770_v57, %s3792_s0  ;;  %1626 = vst.msk [vmem:[#allocation2 + $0x10] sm:$0x3] %vm1624_vm13, %v1623_v4   ;;  %1628 = vst.msk [vmem:[#allocation2 + $0x56] sm:$0xc] %vm1624_vm13, %v1623_v4   ;;  %s3794_s29 = smov 2   ;;  %vm1645_vm2 = vcmask 548304   ;;  %v1665_v6 = vpop.permute.xlu0 %1664  }
 0x10f   :  { %2792 = vrot.lane.b32.xlu0 %v2791_v59, %s3793_s28  ;;  %s3795_s30 = smov 1   ;;  %vm1666_vm14 = vcmask 540104   ;;  %1647 = vst.msk [vmem:[#allocation2 + $0x80] sm:$0x3] %vm1645_vm2, %v1644_v5   ;;  %1649 = vst.msk [vmem:[#allocation2 + $0x36] sm:$0xc] %vm1645_vm2, %v1644_v5  }
 0x110   :  { %1668 = vst.msk [vmem:[#allocation2 + $0x60] sm:$0x3] %vm1666_vm14, %v1665_v6   ;;  %1670 = vst.msk [vmem:[#allocation2 + $0x16] sm:$0xc] %vm1666_vm14, %v1665_v6   ;;  %vm1687_vm15 = vcmask 531904   ;;  %vm1708_vm7 = vcmask 523704   ;;  %v1686_v7 = vpop.permute.xlu1 %1685  }
 0x111   :  { %1689 = vst.msk [vmem:[#allocation2 + $0x40] sm:$0x3] %vm1687_vm15, %v1686_v7   ;;  %1691 = vst.msk [vmem:[#allocation2 + $0x86] sm:$0xc] %vm1687_vm15, %v1686_v7   ;;  %vm1729_vm6 = vcmask 515504   ;;  %vm1749_vm4 = vcmask 507304  }
 0x112   :  { %2813 = vrot.lane.b32.xlu1 %v2812_v1, %s3794_s29  ;;  %v1707_v8 = vpop.permute.xlu0 %1706   ;;  %vm1770_vm5 = vcmask 499104   ;;  %vm1791_vm8 = vcmask 490904   ;;  %vm1812_vm3 = vcmask 482704   ;;  %vm1833_vm9 = vcmask 474504   ;;  %s3796_s2 = smov [#allocation0]  }
 0x113   :  { %2834 = vrot.lane.b32.xlu0 %v2833_v3, %s3795_s30  ;;  %1710 = vst.msk [vmem:[#allocation2 + $0x20] sm:$0x3] %vm1708_vm7, %v1707_v8   ;;  %1712 = vst.msk [vmem:[#allocation2 + $0x66] sm:$0xc] %vm1708_vm7, %v1707_v8   ;;  %vm1854_vm10 = vcmask 466304   ;;  %vm1875_vm11 = vcmask 458104  }
 0x114   :  { %v1728_v9 = vpop.permute.xlu1 %1727   ;;  %vm1896_vm12 = vcmask 449904   ;;  %vm1917_vm0 = vcmask 441704   ;;  %vm1937_vm1 = vcmask 433504   ;;  %vm1958_vm13 = vcmask 425304   ;;  %s2952_s3 = sshll.u32 %s3796_s2, 4  ;;  %s2953_s3 = int_to_ptr.vmem [resolvable:$true] %s2952_s3 }
 0x115   :  { %1730 = vst.msk [vmem:[#allocation2] sm:$0x3] %vm1729_vm6, %v1728_v9   ;;  %1732 = vst.msk [vmem:[#allocation2 + $0x46] sm:$0xc] %vm1729_vm6, %v1728_v9   ;;  %vm1979_vm2 = vcmask 417104   ;;  %vm2000_vm14 = vcmask 408904   ;;  %p3650_p1 = scmp.lt.s32.totalorder %s2953_s3, %s2953_s3 }
 0x116   :  { %v1748_v10 = vpop.permute.xlu0 %1747   ;;  %vm2021_vm15 = vcmask 400704   ;;  %vm2042_vm7 = vcmask 392504   ;;  %vm2063_vm6 = vcmask 384304   ;;  %s3645_s4 = scalar_lea.vmem %s2953_s3, 576 }
 0x117   :  { %1751 = vst.msk [vmem:[#allocation2 + $0x28] sm:$0x3] %vm1749_vm4, %v1748_v10   ;;  %1753 = vst.msk [vmem:[#allocation2 + $0x6e] sm:$0xc] %vm1749_vm4, %v1748_v10   ;;  %vm2084_vm4 = vcmask 376104   ;;  %p3646_p0 = scmp.ne.s32.totalorder %s2953_s3, %s3645_s4  ;;  %p3651_p2 = scmp.lt.s32.totalorder %s3645_s4, %s3645_s4 }
 0x118   :  { %v1769_v11 = vpop.permute.xlu1 %1768  }
 0x119   :  { %1772 = vst.msk [vmem:[#allocation2 + $0x8] sm:$0x3] %vm1770_vm5, %v1769_v11   ;;  %1774 = vst.msk [vmem:[#allocation2 + $0x4e] sm:$0xc] %vm1770_vm5, %v1769_v11   ;;  %vm2105_vm5 = vcmask 367904   ;;  %p3652_p3 = por %p3651_p2, %p3650_p1 }
 0x11a   :  { %v1790_v12 = vpop.permute.xlu0 %1789  }
 0x11b   :  { %1793 = vst.msk [vmem:[#allocation2 + $0x30] sm:$0x3] %vm1791_vm8, %v1790_v12   ;;  %1795 = vst.msk [vmem:[#allocation2 + $0x76] sm:$0xc] %vm1791_vm8, %v1790_v12   ;;  %vm2125_vm8 = vcmask 359704   ;;  %p3653_p4 = pnand %p3652_p3, %p3646_p0 }
 0x11c   :  { %v1811_v13 = vpop.permute.xlu1 %1810  }
 0x11d   :  { %1814 = vst.msk [vmem:[#allocation2 + $0x10] sm:$0x3] %vm1812_vm3, %v1811_v13   ;;  %1816 = vst.msk [vmem:[#allocation2 + $0x56] sm:$0xc] %vm1812_vm3, %v1811_v13   ;;  %vm2146_vm3 = vcmask 351504  }
 0x11e   :  { %v1832_v14 = vpop.permute.xlu0 %1831  }
 0x11f   :  { %1835 = vst.msk [vmem:[#allocation2 + $0x80] sm:$0x3] %vm1833_vm9, %v1832_v14   ;;  %1837 = vst.msk [vmem:[#allocation2 + $0x36] sm:$0xc] %vm1833_vm9, %v1832_v14   ;;  %vm2167_vm9 = vcmask 343304  }
 0x120   :  { %v1853_v15 = vpop.permute.xlu1 %1852  }
 0x121   :  { %1856 = vst.msk [vmem:[#allocation2 + $0x60] sm:$0x3] %vm1854_vm10, %v1853_v15   ;;  %1858 = vst.msk [vmem:[#allocation2 + $0x16] sm:$0xc] %vm1854_vm10, %v1853_v15   ;;  %vm2188_vm10 = vcmask 335104  }
 0x122   :  { %v1874_v16 = vpop.permute.xlu0 %1873  }
 0x123   :  { %1877 = vst.msk [vmem:[#allocation2 + $0x40] sm:$0x3] %vm1875_vm11, %v1874_v16   ;;  %1879 = vst.msk [vmem:[#allocation2 + $0x86] sm:$0xc] %vm1875_vm11, %v1874_v16   ;;  %vm2209_vm11 = vcmask 326904  }
 0x124   :  { %v1895_v17 = vpop.permute.xlu1 %1894  }
 0x125   :  { %1898 = vst.msk [vmem:[#allocation2 + $0x20] sm:$0x3] %vm1896_vm12, %v1895_v17   ;;  %1900 = vst.msk [vmem:[#allocation2 + $0x66] sm:$0xc] %vm1896_vm12, %v1895_v17   ;;  %vm2230_vm12 = vcmask 318704  }
 0x126   :  { %v1916_v18 = vpop.permute.xlu0 %1915  }
 0x127   :  { %1918 = vst.msk [vmem:[#allocation2] sm:$0x3] %vm1917_vm0, %v1916_v18   ;;  %1920 = vst.msk [vmem:[#allocation2 + $0x46] sm:$0xc] %vm1917_vm0, %v1916_v18   ;;  %vm2251_vm0 = vcmask 310504  }
 0x128   :  { %v1936_v19 = vpop.permute.xlu1 %1935  }
 0x129   :  { %1939 = vst.msk [vmem:[#allocation2 + $0x28] sm:$0x3] %vm1937_vm1, %v1936_v19   ;;  %1941 = vst.msk [vmem:[#allocation2 + $0x6e] sm:$0xc] %vm1937_vm1, %v1936_v19   ;;  %vm2272_vm1 = vcmask 302304  }
 0x12a   :  { %v1957_v20 = vpop.permute.xlu0 %1956  }
 0x12b   :  { %1960 = vst.msk [vmem:[#allocation2 + $0x8] sm:$0x3] %vm1958_vm13, %v1957_v20   ;;  %1962 = vst.msk [vmem:[#allocation2 + $0x4e] sm:$0xc] %vm1958_vm13, %v1957_v20   ;;  %vm2293_vm13 = vcmask 294104  }
 0x12c   :  { %v1978_v21 = vpop.permute.xlu1 %1977  }
 0x12d   :  { %1981 = vst.msk [vmem:[#allocation2 + $0x30] sm:$0x3] %vm1979_vm2, %v1978_v21   ;;  %1983 = vst.msk [vmem:[#allocation2 + $0x76] sm:$0xc] %vm1979_vm2, %v1978_v21   ;;  %vm2313_vm2 = vcmask 285904  }
 0x12e   :  { %v1999_v22 = vpop.permute.xlu0 %1998  }
 0x12f   :  { %2002 = vst.msk [vmem:[#allocation2 + $0x10] sm:$0x3] %vm2000_vm14, %v1999_v22   ;;  %2004 = vst.msk [vmem:[#allocation2 + $0x56] sm:$0xc] %vm2000_vm14, %v1999_v22   ;;  %vm2334_vm14 = vcmask 277704  }
 0x130   :  { %v2020_v23 = vpop.permute.xlu1 %2019  }
 0x131   :  { %2023 = vst.msk [vmem:[#allocation2 + $0x80] sm:$0x3] %vm2021_vm15, %v2020_v23   ;;  %2025 = vst.msk [vmem:[#allocation2 + $0x36] sm:$0xc] %vm2021_vm15, %v2020_v23   ;;  %vm2355_vm15 = vcmask 269504  }
 0x132   :  { %v2041_v24 = vpop.permute.xlu0 %2040  }
 0x133   :  { %2044 = vst.msk [vmem:[#allocation2 + $0x60] sm:$0x3] %vm2042_vm7, %v2041_v24   ;;  %2046 = vst.msk [vmem:[#allocation2 + $0x16] sm:$0xc] %vm2042_vm7, %v2041_v24   ;;  %vm2376_vm7 = vcmask 261304  }
 0x134   :  { %v2062_v25 = vpop.permute.xlu1 %2061  }
 0x135   :  { %2065 = vst.msk [vmem:[#allocation2 + $0x40] sm:$0x3] %vm2063_vm6, %v2062_v25   ;;  %2067 = vst.msk [vmem:[#allocation2 + $0x86] sm:$0xc] %vm2063_vm6, %v2062_v25   ;;  %vm2397_vm6 = vcmask 253104  }
 0x136   :  { %v2083_v26 = vpop.permute.xlu0 %2082  }
 0x137   :  { %2086 = vst.msk [vmem:[#allocation2 + $0x20] sm:$0x3] %vm2084_vm4, %v2083_v26   ;;  %2088 = vst.msk [vmem:[#allocation2 + $0x66] sm:$0xc] %vm2084_vm4, %v2083_v26   ;;  %vm2418_vm4 = vcmask 244904  }
 0x138   :  { %v2104_v27 = vpop.permute.xlu1 %2103  }
 0x139   :  { %2106 = vst.msk [vmem:[#allocation2] sm:$0x3] %vm2105_vm5, %v2104_v27   ;;  %2108 = vst.msk [vmem:[#allocation2 + $0x46] sm:$0xc] %vm2105_vm5, %v2104_v27   ;;  %vm2439_vm5 = vcmask 236704  }
 0x13a   :  { %v2124_v28 = vpop.permute.xlu0 %2123  }
 0x13b   :  { %2127 = vst.msk [vmem:[#allocation2 + $0x28] sm:$0x3] %vm2125_vm8, %v2124_v28   ;;  %2129 = vst.msk [vmem:[#allocation2 + $0x6e] sm:$0xc] %vm2125_vm8, %v2124_v28   ;;  %vm2460_vm8 = vcmask 228504  }
 0x13c   :  { %v2145_v29 = vpop.permute.xlu1 %2144  }
 0x13d   :  { %2148 = vst.msk [vmem:[#allocation2 + $0x8] sm:$0x3] %vm2146_vm3, %v2145_v29   ;;  %2150 = vst.msk [vmem:[#allocation2 + $0x4e] sm:$0xc] %vm2146_vm3, %v2145_v29   ;;  %vm2481_vm3 = vcmask 220304  }
 0x13e   :  { %v2166_v30 = vpop.permute.xlu0 %2165  }
 0x13f   :  { %2169 = vst.msk [vmem:[#allocation2 + $0x30] sm:$0x3] %vm2167_vm9, %v2166_v30   ;;  %2171 = vst.msk [vmem:[#allocation2 + $0x76] sm:$0xc] %vm2167_vm9, %v2166_v30   ;;  %vm2501_vm9 = vcmask 212104  }
 0x140   :  { %v2187_v31 = vpop.permute.xlu1 %2186  }
 0x141   :  { %2190 = vst.msk [vmem:[#allocation2 + $0x10] sm:$0x3] %vm2188_vm10, %v2187_v31   ;;  %2192 = vst.msk [vmem:[#allocation2 + $0x56] sm:$0xc] %vm2188_vm10, %v2187_v31   ;;  %vm2522_vm10 = vcmask 203904  }
 0x142   :  { %v2208_v32 = vpop.permute.xlu0 %2207  }
 0x143   :  { %2211 = vst.msk [vmem:[#allocation2 + $0x80] sm:$0x3] %vm2209_vm11, %v2208_v32   ;;  %2213 = vst.msk [vmem:[#allocation2 + $0x36] sm:$0xc] %vm2209_vm11, %v2208_v32   ;;  %vm2543_vm11 = vcmask 195704  }
 0x144   :  { %v2229_v33 = vpop.permute.xlu1 %2228  }
 0x145   :  { %2232 = vst.msk [vmem:[#allocation2 + $0x60] sm:$0x3] %vm2230_vm12, %v2229_v33   ;;  %2234 = vst.msk [vmem:[#allocation2 + $0x16] sm:$0xc] %vm2230_vm12, %v2229_v33   ;;  %vm2564_vm12 = vcmask 187504  }
 0x146   :  { %v2250_v34 = vpop.permute.xlu0 %2249  }
 0x147   :  { %2253 = vst.msk [vmem:[#allocation2 + $0x40] sm:$0x3] %vm2251_vm0, %v2250_v34   ;;  %2255 = vst.msk [vmem:[#allocation2 + $0x86] sm:$0xc] %vm2251_vm0, %v2250_v34   ;;  %vm2585_vm0 = vcmask 179304  }
 0x148   :  { %v2271_v35 = vpop.permute.xlu1 %2270  }
 0x149   :  { %2274 = vst.msk [vmem:[#allocation2 + $0x20] sm:$0x3] %vm2272_vm1, %v2271_v35   ;;  %2276 = vst.msk [vmem:[#allocation2 + $0x66] sm:$0xc] %vm2272_vm1, %v2271_v35   ;;  %vm2606_vm1 = vcmask 171104  }
 0x14a   :  { %v2292_v36 = vpop.permute.xlu0 %2291  }
 0x14b   :  { %2294 = vst.msk [vmem:[#allocation2] sm:$0x3] %vm2293_vm13, %v2292_v36   ;;  %2296 = vst.msk [vmem:[#allocation2 + $0x46] sm:$0xc] %vm2293_vm13, %v2292_v36   ;;  %vm2627_vm13 = vcmask 162904  }
 0x14c   :  { %v2312_v37 = vpop.permute.xlu1 %2311  }
 0x14d   :  { %2315 = vst.msk [vmem:[#allocation2 + $0x28] sm:$0x3] %vm2313_vm2, %v2312_v37   ;;  %2317 = vst.msk [vmem:[#allocation2 + $0x6e] sm:$0xc] %vm2313_vm2, %v2312_v37   ;;  %vm2648_vm2 = vcmask 154704  }
 0x14f   :  { %v2333_v38 = vpop.permute.xlu0 %2332  }
 0x150   :  { %2336 = vst.msk [vmem:[#allocation2 + $0x8] sm:$0x3] %vm2334_vm14, %v2333_v38   ;;  %2338 = vst.msk [vmem:[#allocation2 + $0x4e] sm:$0xc] %vm2334_vm14, %v2333_v38   ;;  %vm2669_vm14 = vcmask 146504  }
 0x151   :  { %v2354_v39 = vpop.permute.xlu1 %2353  }
 0x152   :  { %2357 = vst.msk [vmem:[#allocation2 + $0x30] sm:$0x3] %vm2355_vm15, %v2354_v39   ;;  %2359 = vst.msk [vmem:[#allocation2 + $0x76] sm:$0xc] %vm2355_vm15, %v2354_v39   ;;  %vm2689_vm15 = vcmask 138304  }
 0x153   :  { %v2375_v40 = vpop.permute.xlu0 %2374  }
 0x154   :  { %2378 = vst.msk [vmem:[#allocation2 + $0x10] sm:$0x3] %vm2376_vm7, %v2375_v40   ;;  %2380 = vst.msk [vmem:[#allocation2 + $0x56] sm:$0xc] %vm2376_vm7, %v2375_v40   ;;  %vm2710_vm7 = vcmask 130104  }
 0x156   :  { %v2396_v41 = vpop.permute.xlu1 %2395  }
 0x157   :  { %2399 = vst.msk [vmem:[#allocation2 + $0x80] sm:$0x3] %vm2397_vm6, %v2396_v41   ;;  %2401 = vst.msk [vmem:[#allocation2 + $0x36] sm:$0xc] %vm2397_vm6, %v2396_v41   ;;  %vm2731_vm6 = vcmask 121904  }
 0x158   :  { %v2417_v42 = vpop.permute.xlu0 %2416  }
 0x159   :  { %2420 = vst.msk [vmem:[#allocation2 + $0x60] sm:$0x3] %vm2418_vm4, %v2417_v42   ;;  %2422 = vst.msk [vmem:[#allocation2 + $0x16] sm:$0xc] %vm2418_vm4, %v2417_v42   ;;  %vm2752_vm4 = vcmask 113704  }
 0x15a   :  { %v2438_v43 = vpop.permute.xlu1 %2437  }
 0x15b   :  { %2441 = vst.msk [vmem:[#allocation2 + $0x40] sm:$0x3] %vm2439_vm5, %v2438_v43   ;;  %2443 = vst.msk [vmem:[#allocation2 + $0x86] sm:$0xc] %vm2439_vm5, %v2438_v43   ;;  %vm2773_vm5 = vcmask 105504  }
 0x15d   :  { %v2459_v44 = vpop.permute.xlu0 %2458  }
 0x15e   :  { %2462 = vst.msk [vmem:[#allocation2 + $0x20] sm:$0x3] %vm2460_vm8, %v2459_v44   ;;  %2464 = vst.msk [vmem:[#allocation2 + $0x66] sm:$0xc] %vm2460_vm8, %v2459_v44   ;;  %vm2794_vm8 = vcmask 97304  }
 0x15f   :  { %v2480_v45 = vpop.permute.xlu1 %2479  }
 0x160   :  { %2482 = vst.msk [vmem:[#allocation2] sm:$0x3] %vm2481_vm3, %v2480_v45   ;;  %2484 = vst.msk [vmem:[#allocation2 + $0x46] sm:$0xc] %vm2481_vm3, %v2480_v45   ;;  %vm2815_vm3 = vcmask 89104  }
 0x161   :  { %v2500_v46 = vpop.permute.xlu0 %2499  }
 0x162   :  { %2503 = vst.msk [vmem:[#allocation2 + $0x28] sm:$0x3] %vm2501_vm9, %v2500_v46   ;;  %2505 = vst.msk [vmem:[#allocation2 + $0x6e] sm:$0xc] %vm2501_vm9, %v2500_v46   ;;  %vm2836_vm9 = vcmask 80904  }
 0x164   :  { %v2521_v47 = vpop.permute.xlu1 %2520  }
 0x165   :  { %2524 = vst.msk [vmem:[#allocation2 + $0x8] sm:$0x3] %vm2522_vm10, %v2521_v47   ;;  %2526 = vst.msk [vmem:[#allocation2 + $0x4e] sm:$0xc] %vm2522_vm10, %v2521_v47  }
 0x166   :  { %v2542_v48 = vpop.permute.xlu0 %2541  }
 0x167   :  { %2545 = vst.msk [vmem:[#allocation2 + $0x30] sm:$0x3] %vm2543_vm11, %v2542_v48   ;;  %2547 = vst.msk [vmem:[#allocation2 + $0x76] sm:$0xc] %vm2543_vm11, %v2542_v48  }
 0x168   :  { %v2563_v49 = vpop.permute.xlu1 %2562  }
 0x169   :  { %2566 = vst.msk [vmem:[#allocation2 + $0x10] sm:$0x3] %vm2564_vm12, %v2563_v49   ;;  %2568 = vst.msk [vmem:[#allocation2 + $0x56] sm:$0xc] %vm2564_vm12, %v2563_v49  }
 0x16b   :  { %v2584_v50 = vpop.permute.xlu0 %2583  }
 0x16c   :  { %2587 = vst.msk [vmem:[#allocation2 + $0x80] sm:$0x3] %vm2585_vm0, %v2584_v50   ;;  %2589 = vst.msk [vmem:[#allocation2 + $0x36] sm:$0xc] %vm2585_vm0, %v2584_v50  }
 0x16d   :  { %v2605_v51 = vpop.permute.xlu1 %2604  }
 0x16e   :  { %2608 = vst.msk [vmem:[#allocation2 + $0x60] sm:$0x3] %vm2606_vm1, %v2605_v51   ;;  %2610 = vst.msk [vmem:[#allocation2 + $0x16] sm:$0xc] %vm2606_vm1, %v2605_v51  }
 0x16f   :  { %v2626_v52 = vpop.permute.xlu0 %2625  }
 0x170   :  { %2629 = vst.msk [vmem:[#allocation2 + $0x40] sm:$0x3] %vm2627_vm13, %v2626_v52   ;;  %2631 = vst.msk [vmem:[#allocation2 + $0x86] sm:$0xc] %vm2627_vm13, %v2626_v52  }
 0x172   :  { %v2647_v53 = vpop.permute.xlu1 %2646  }
 0x173   :  { %2650 = vst.msk [vmem:[#allocation2 + $0x20] sm:$0x3] %vm2648_vm2, %v2647_v53   ;;  %2652 = vst.msk [vmem:[#allocation2 + $0x66] sm:$0xc] %vm2648_vm2, %v2647_v53  }
 0x174   :  { %v2668_v54 = vpop.permute.xlu0 %2667  }
 0x175   :  { %2670 = vst.msk [vmem:[#allocation2] sm:$0x3] %vm2669_vm14, %v2668_v54   ;;  %2672 = vst.msk [vmem:[#allocation2 + $0x46] sm:$0xc] %vm2669_vm14, %v2668_v54  }
 0x176   :  { %v2688_v55 = vpop.permute.xlu1 %2687  }
 0x177   :  { %2691 = vst.msk [vmem:[#allocation2 + $0x28] sm:$0x3] %vm2689_vm15, %v2688_v55   ;;  %2693 = vst.msk [vmem:[#allocation2 + $0x6e] sm:$0xc] %vm2689_vm15, %v2688_v55  }
 0x179   :  { %v2709_v56 = vpop.permute.xlu0 %2708  }
 0x17a   :  { %2712 = vst.msk [vmem:[#allocation2 + $0x8] sm:$0x3] %vm2710_vm7, %v2709_v56   ;;  %2714 = vst.msk [vmem:[#allocation2 + $0x4e] sm:$0xc] %vm2710_vm7, %v2709_v56  }
 0x17c   :  { %v2730_v57 = vpop.permute.xlu1 %2729   ;;  %v2844_v58 = vld [vmem:[#allocation2] sm:$0x3]  ;;  %v2895_v59 = vld [vmem:[#allocation2 + $0x48] sm:$0x3] }
 0x17d   :  { %2733 = vst.msk [vmem:[#allocation2 + $0x30] sm:$0x3] %vm2731_vm6, %v2730_v57   ;;  %2735 = vst.msk [vmem:[#allocation2 + $0x76] sm:$0xc] %vm2731_vm6, %v2730_v57   ;;  %v2751_v60 = vpop.permute.xlu0 %2750  }
 0x17e   :  { %2846 = vst [vmem:[#allocation0] sm:$0x3] %v2844_v58  ;;  %2899 = vst [vmem:[#allocation0 + $0x12] sm:$0x3] %v2895_v59  ;;  %v2871_v61 = vld [vmem:[#allocation2 + $0x28] sm:$0x3] }
 0x17f   :  { %2754 = vst.msk [vmem:[#allocation2 + $0x10] sm:$0x3] %vm2752_vm4, %v2751_v60   ;;  %2756 = vst.msk [vmem:[#allocation2 + $0x56] sm:$0xc] %vm2752_vm4, %v2751_v60   ;;  %v2925_v62 = vld [vmem:[#allocation2 + $0x70] sm:$0x3] }
 0x180   :  { %v2772_v63 = vpop.permute.xlu1 %2771   ;;  %2875 = vst [vmem:[#allocation0 + $0xa] sm:$0x3] %v2871_v61  ;;  %2929 = vst [vmem:[#allocation0 + $0x1c] sm:$0x3] %v2925_v62 }
 0x181   :  { %v2848_v0 = vld [vmem:[#allocation2 + $0x8] sm:$0x3]  ;;  %v2901_v1 = vld [vmem:[#allocation2 + $0x50] sm:$0x3]  ;;  %2775 = vst.msk [vmem:[#allocation2 + $0x80] sm:$0x3] %vm2773_vm5, %v2772_v63   ;;  %v2793_v2 = vpop.permute.xlu0 %2792  }
 0x182   :  { %2777 = vst.msk [vmem:[#allocation2 + $0x36] sm:$0xc] %vm2773_vm5, %v2772_v63   ;;  %2851 = vst [vmem:[#allocation0 + $0x2] sm:$0x3] %v2848_v0 }
 0x183   :  { %2905 = vst [vmem:[#allocation0 + $0x14] sm:$0x3] %v2901_v1  ;;  %2796 = vst.msk [vmem:[#allocation2 + $0x60] sm:$0x3] %vm2794_vm8, %v2793_v2  }
 0x184   :  { %2798 = vst.msk [vmem:[#allocation2 + $0x16] sm:$0xc] %vm2794_vm8, %v2793_v2   ;;  %v2877_v3 = vld [vmem:[#allocation2 + $0x30] sm:$0x3]  ;;  %v2931_v4 = vld [vmem:[#allocation2 + $0x78] sm:$0x3]  ;;  %v2814_v5 = vpop.permute.xlu1 %2813  }
 0x185   :  { %2881 = vst [vmem:[#allocation0 + $0xc] sm:$0x3] %v2877_v3  ;;  %2935 = vst [vmem:[#allocation0 + $0x1e] sm:$0x3] %v2931_v4  ;;  %v2835_v8 = vpop.permute.xlu0 %2834  }
 0x186   :  { %v2853_v6 = vld [vmem:[#allocation2 + $0x10] sm:$0x3]  ;;  %v2907_v7 = vld [vmem:[#allocation2 + $0x58] sm:$0x3]  ;;  %2817 = vst.msk [vmem:[#allocation2 + $0x40] sm:$0x3] %vm2815_vm3, %v2814_v5  }
 0x187   :  { %2819 = vst.msk [vmem:[#allocation2 + $0x86] sm:$0xc] %vm2815_vm3, %v2814_v5   ;;  %2857 = vst [vmem:[#allocation0 + $0x4] sm:$0x3] %v2853_v6 }
 0x188   :  { %2911 = vst [vmem:[#allocation0 + $0x16] sm:$0x3] %v2907_v7  ;;  %2838 = vst.msk [vmem:[#allocation2 + $0x20] sm:$0x3] %vm2836_vm9, %v2835_v8   ;;  %v2937_v10 = vld [vmem:[#allocation2 + $0x80] sm:$0x3] }
 0x189   :  { %2840 = vst.msk [vmem:[#allocation2 + $0x66] sm:$0xc] %vm2836_vm9, %v2835_v8   ;;  %v2883_v9 = vld [vmem:[#allocation2 + $0x38] sm:$0x3]  ;;  %2941 = vst [vmem:[#allocation0 + $0x20] sm:$0x3] %v2937_v10 }
 0x18a   :  { %2887 = vst [vmem:[#allocation0 + $0xe] sm:$0x3] %v2883_v9  ;;  %v2913_v12 = vld [vmem:[#allocation2 + $0x60] sm:$0x3] }
 0x18b   :  { %v2859_v11 = vld [vmem:[#allocation2 + $0x18] sm:$0x3]  ;;  %2917 = vst [vmem:[#allocation0 + $0x18] sm:$0x3] %v2913_v12 }
 0x18c   :  { %2863 = vst [vmem:[#allocation0 + $0x6] sm:$0x3] %v2859_v11 }
 0x18d   :  { %v2889_v13 = vld [vmem:[#allocation2 + $0x40] sm:$0x3] }
 0x18e   :  { %v2943_v14 = vld [vmem:[#allocation2 + $0x88] sm:$0x3]  ;;  %2893 = vst [vmem:[#allocation0 + $0x10] sm:$0x3] %v2889_v13 }
 0x18f   :  { %2947 = vst [vmem:[#allocation0 + $0x22] sm:$0x3] %v2943_v14  ;;  %v2865_v15 = vld [vmem:[#allocation2 + $0x20] sm:$0x3] }
 0x190   :  { %v2919_v16 = vld [vmem:[#allocation2 + $0x68] sm:$0x3]  ;;  %2869 = vst [vmem:[#allocation0 + $0x8] sm:$0x3] %v2865_v15 }
 0x191   :  { %2923 = vst [vmem:[#allocation0 + $0x1a] sm:$0x3] %v2919_v16 }
 0x192   :  { %3656 = shalt.err (!%p3653_p4)
}
 0x193   :  { %s3657_s7 = scalar_lea.hbm %s6016_s1, 576 }
 0x194   :  { %p3658_p5 = scmp.ne.s32.totalorder %s6016_s1, %s3657_s7  ;;  %p3661_p6 = scmp.lt.u32.totalorder %s3657_s7, %s6016_s1 }
 0x196   :  { %p3663_p7 = pnand %p3661_p6, %p3658_p5 }
 0x198   :  { %3666 = shalt.err (!%p3663_p7)
}
 0x199   :  { %2955 = dma.vmem_to_hbm [thread:$0]  %s2953_s3, 576, %s6016_s1, [#allocation1]  }
 0x19a   :  { %3667 = dma.done.wait [#allocation1], 576  }
 0x19b   :  { %3668 = vsyncadd [#allocation1], 4294966720 }
 0x19c   :  { %2957 = vsyncpa [#allocation1], 1 }

// kernel: _forward_impl.2
= control target key start
LH: loop header
LB: loop body
LE: loop exit
PB: predicated region body
PF: predicated region fallthrough
CT: control target
= control target key end

     0   :  { %s1013_s12 = smov 0   ;;  %s1015_s13 = smov 0   ;;  %s1222_s0 = inlined_call_operand.vmem [shape: bf16[512,128], index: 0, kind: input, shape index: {}]   ;;  %s1223_s1 = inlined_call_operand.vmem [shape: bf16[128,128], index: 1, kind: input, shape index: {}]   ;;  %s1224_s2 = inlined_call_operand.vmem [shape: f32[1,128], index: 2, kind: input, shape index: {}]   ;;  %s1225_s3 = inlined_call_operand.vmem [shape: f32[512,128], index: 3, kind: output, shape index: {}]  }
   0x1   :  { %s1017_s14 = smov 0  }
   0x2 LB: > { %s25_s15 = sadd.s32 1, %s987_s13  ;;  %p776_p0 = scmp.ge.s32.totalorder %s991_s14, 1  ;;  %s991_s14 = sphi %s1017_s14, %s13_s14   ;;  %s987_s13 = sphi %s1015_s13, %s1227_s13   ;;  %s983_s12 = sphi %s1013_s12, %s1226_s12  }
   0x3   : > { %p27_p1 = scmp.ge.s32.totalorder %s25_s15, 4  ;;  %p166_p2 = scmp.lt.s32.totalorder %s991_s14, 5 }
   0x5   : > { %s1229_s15 = smov (%p27_p1, %s25_s15), 0  ;;  %p167_p3 = pnand %p776_p0, %p166_p2 }
   0x6   : > { %v889_v0 = vld [vmem:[%s1223_s1] sm:$0xff] (!%p167_p3)   ;;  %s777_s18 = sshll.u32 (!%p167_p3), %s983_s12, 4  ;;  %v890_v1 = vld [vmem:[%s1223_s1 + $0x8] sm:$0xff] (!%p167_p3)   ;;  %v891_v2 = vld [vmem:[%s1223_s1 + $0x10] sm:$0xff] (!%p167_p3)  }
   0x7   : > { %170 = sbr.rel (%p167_p3) target bundleno = 313 (0x139), region = 32  ;;  %p199_p4 = scmp.lt.s32.totalorder (!%p167_p3), %s777_s18, 63  ;;  %816 = vmatprep.subr.bf16.mxu0 (!%p167_p3), %v889_v0  ;;  %848 = vmatprep.subr.bf16.mxu1 (!%p167_p3), %v889_v0  ;;  %v892_v3 = vld [vmem:[%s1223_s1 + $0x18] sm:$0xff] (!%p167_p3)   ;;  %v893_v6 = vld [vmem:[%s1223_s1 + $0x20] sm:$0xff] (!%p167_p3)   ;;  %v894_v7 = vld [vmem:[%s1223_s1 + $0x28] sm:$0xff] (!%p167_p3)  }
   0x8   : > { %817 = vmatpush3.bf16.msra.mxu0 (!%p167_p3), %v889_v0  ;;  %856 = vmatpush3.bf16.msra.mxu1 (!%p167_p3), %v889_v0  ;;  %v895_v8 = vld [vmem:[%s1223_s1 + $0x30] sm:$0xff] (!%p167_p3)   ;;  %v896_v9 = vld [vmem:[%s1223_s1 + $0x38] sm:$0xff] (!%p167_p3)   ;;  %v1074_v17 = vld [vmem:[%s1224_s2] ss:$0 sm:$0xff] (!%p167_p3) }
   0x9   : > { %818 = vmatprep.subr.bf16.mxu0 (!%p167_p3), %v890_v1  ;;  %849 = vmatprep.subr.bf16.mxu1 (!%p167_p3), %v890_v1 }
   0xc   : > { %819 = vmatpush3.bf16.msra.mxu0 (!%p167_p3), %v890_v1  ;;  %857 = vmatpush3.bf16.msra.mxu1 (!%p167_p3), %v890_v1 }
   0xd   : > { %820 = vmatprep.subr.bf16.mxu0 (!%p167_p3), %v891_v2  ;;  %850 = vmatprep.subr.bf16.mxu1 (!%p167_p3), %v891_v2 }
   0xe   : > { %s1231_s18 = smov (!%p199_p4, %s777_s18), 63 }
   0xf   : > { %s778_s23 = sshll.u32 %s1231_s18, 2  ;;  %s780_s12 = sshll.u32 %s1231_s18, 3 }
  0x10   : > { %s1046_s26 = scalar_lea.vmem %s1222_s0, %s778_s23  ;;  %821 = vmatpush3.bf16.msra.mxu0 %v891_v2  ;;  %858 = vmatpush3.bf16.msra.mxu1 %v891_v2  ;;  %s1147_s19 = scalar_lea.vmem %s1225_s3, %s780_s12 }
  0x11   : > { %v897_v4 = vld [vmem:[%s1046_s26] sm:$0xff]   ;;  %822 = vmatprep.subr.bf16.mxu0 %v892_v3  ;;  %851 = vmatprep.subr.bf16.mxu1 %v892_v3  ;;  %v899_v10 = vld [vmem:[%s1046_s26 + $0x8] sm:$0xff]   ;;  %v901_v12 = vld [vmem:[%s1046_s26 + $0x10] sm:$0xff]  }
  0x12   : > { %v898_v5 = vld [vmem:[%s1046_s26 + $0x20] sm:$0xff]   ;;  %832 = vmatprep.mubr.bf16.mxu0 %v897_v4  ;;  %v900_v11 = vld [vmem:[%s1046_s26 + $0x28] sm:$0xff]   ;;  %v902_v13 = vld [vmem:[%s1046_s26 + $0x30] sm:$0xff]  }
  0x13   : > { %840 = vmatprep.mubr.bf16.mxu1 %v898_v5  ;;  %v903_v14 = vld [vmem:[%s1046_s26 + $0x18] sm:$0xff]  }
  0x14   : > { %823 = vmatpush3.bf16.msra.mxu0 %v892_v3  ;;  %859 = vmatpush3.bf16.msra.mxu1 %v892_v3  ;;  %v904_v15 = vld [vmem:[%s1046_s26 + $0x38] sm:$0xff]  }
  0x15   : > { %824 = vmatprep.subr.bf16.mxu0 %v893_v6  ;;  %852 = vmatprep.subr.bf16.mxu1 %v893_v6 }
  0x18   : > { %825 = vmatpush3.bf16.msra.mxu0 %v893_v6  ;;  %860 = vmatpush3.bf16.msra.mxu1 %v893_v6 }
  0x19   : > { %826 = vmatprep.subr.bf16.mxu0 %v894_v7  ;;  %853 = vmatprep.subr.bf16.mxu1 %v894_v7 }
  0x1c   : > { %827 = vmatpush3.bf16.msra.mxu0 %v894_v7  ;;  %861 = vmatpush3.bf16.msra.mxu1 %v894_v7 }
  0x1d   : > { %828 = vmatprep.subr.bf16.mxu0 %v895_v8  ;;  %854 = vmatprep.subr.bf16.mxu1 %v895_v8 }
  0x20   : > { %829 = vmatpush3.bf16.msra.mxu0 %v895_v8  ;;  %862 = vmatpush3.bf16.msra.mxu1 %v895_v8 }
  0x21   : > { %830 = vmatprep.subr.bf16.mxu0 %v896_v9  ;;  %855 = vmatprep.subr.bf16.mxu1 %v896_v9 }
  0x24   : > { %831 = vmatpush3.bf16.msra.mxu0 %v896_v9  ;;  %863 = vmatpush3.bf16.msra.mxu1 %v896_v9 }
  0x27   : > { %833 = vmatmul.mubr.bf16.vlgmr.msra.gmra.mrb[0].mxu0 %v899_v10  ;;  %841 = vmatmul.mubr.bf16.vlgmr.msra.gmra.mrb[0].mxu1 %v900_v11 }
  0x28   : > { %836 = vmatprep.mubr.bf16.mxu0 %v901_v12  ;;  %844 = vmatprep.mubr.bf16.mxu1 %v902_v13 }
  0x2f   : > { %837 = vmatmul.mubr.bf16.gmra.mrb[4].mxu0 %v903_v14  ;;  %845 = vmatmul.mubr.bf16.gmra.mrb[4].mxu1 %v904_v15 }
  0xfa   : > { %v834_v16 = vpop.f32.mrb[0].mxu0  ;;  %v842_v18 = vpop.f32.mrb[0].mxu1 }
  0xfb   : > { %v418_v19 = vpop.f32.mrb[1].mxu0  ;;  %v450_v20 = vpop.f32.mrb[1].mxu1  ;;  %v1077_v23 = vadd.f32 %v834_v16, %v1074_v17  ;;  %v1080_v24 = vadd.f32 %v842_v18, %v1074_v17 }
  0xfc   : > { %v835_v21 = vpop.f32.mrb[2].mxu0  ;;  %v843_v22 = vpop.f32.mrb[2].mxu1  ;;  %v1083_v27 = vadd.f32 %v1074_v17, %v418_v19  ;;  %v1086_v28 = vadd.f32 %v1074_v17, %v450_v20  ;;  %v555_v19 = vlaneseq }
  0xfd   : > { %v421_v25 = vpop.f32.mrb[3].mxu0  ;;  %v453_v26 = vpop.f32.mrb[3].mxu1  ;;  %v559_v29 = vsub.f32 0.0, %v1077_v23  ;;  %v567_v30 = vsub.f32 0.0, %v1080_v24  ;;  %v1091_v31 = vadd.f32 %v835_v21, %v1074_v17  ;;  %v1094_v32 = vadd.f32 %v843_v22, %v1074_v17 }
  0xfe   : > { %v557_v33 = vsub.f32 0.0, %v1083_v27  ;;  %v565_v34 = vsub.f32 0.0, %v1086_v28  ;;  %v1099_v35 = vadd.f32 %v1074_v17, %v421_v25  ;;  %v1102_v36 = vadd.f32 %v1074_v17, %v453_v26 }
  0xff   : > { %v577_v37 = vmul.f32 1.442695, %v559_v29  ;;  %v593_v38 = vmul.f32 1.442695, %v567_v30  ;;  %v560_v39 = vsub.f32 0.0, %v1091_v31  ;;  %v568_v40 = vsub.f32 0.0, %v1094_v32 }
 0x100   : > { %v573_v41 = vmul.f32 1.442695, %v557_v33  ;;  %v589_v42 = vmul.f32 1.442695, %v565_v34  ;;  %v558_v43 = vsub.f32 0.0, %v1099_v35  ;;  %v566_v44 = vsub.f32 0.0, %v1102_v36 }
 0x101   : > { %905 = vpow2.f32 %v577_v37  ;;  %v579_v45 = vmul.f32 1.442695, %v560_v39  ;;  %v595_v48 = vmul.f32 1.442695, %v568_v40  ;;  %v1138_v39 = vand.u32 127, %v555_v19 }
 0x102   : > { %v838_v46 = vpop.f32.mrb[4].mxu0  ;;  %v846_v47 = vpop.f32.mrb[4].mxu1  ;;  %907 = vpow2.f32 %v593_v38  ;;  %v575_v49 = vmul.f32 1.442695, %v558_v43  ;;  %v591_v54 = vmul.f32 1.442695, %v566_v44 }
 0x103   : > { %v434_v50 = vpop.f32.mrb[5].mxu0  ;;  %v466_v51 = vpop.f32.mrb[5].mxu1  ;;  %909 = vpow2.f32 %v573_v41  ;;  %v1109_v55 = vadd.f32 %v838_v46, %v1074_v17  ;;  %v1112_v58 = vadd.f32 %v846_v47, %v1074_v17  ;;  %vm653_vm0 = vcmp.ge.s32.totalorder %v1138_v39, 18 }
 0x104   : > { %v839_v52 = vpop.f32.mrb[6].mxu0  ;;  %v847_v53 = vpop.f32.mrb[6].mxu1  ;;  %911 = vpow2.f32 %v589_v42  ;;  %v1115_v59 = vadd.f32 %v1074_v17, %v434_v50  ;;  %v1118_v60 = vadd.f32 %v1074_v17, %v466_v51 }
 0x105   : > { %v437_v56 = vpop.f32.mrb[7].mxu0  ;;  %v469_v57 = vpop.f32.mrb[7].mxu1  ;;  %913 = vpow2.f32 %v579_v45  ;;  %v563_v61 = vsub.f32 0.0, %v1109_v55  ;;  %v571_v62 = vsub.f32 0.0, %v1112_v58  ;;  %v1125_v5 = vadd.f32 %v839_v52, %v1074_v17 }
 0x106   : > { %915 = vpow2.f32 %v595_v48  ;;  %v561_v63 = vsub.f32 0.0, %v1115_v59  ;;  %v569_v0 = vsub.f32 0.0, %v1118_v60  ;;  %v1129_v16 = vadd.f32 %v847_v53, %v1074_v17 }
 0x107   : > { %917 = vpow2.f32 %v575_v49  ;;  %v585_v1 = vmul.f32 1.442695, %v563_v61  ;;  %v601_v2 = vmul.f32 1.442695, %v571_v62  ;;  %v564_v13 = vsub.f32 0.0, %v1125_v5 }
 0x108   : > { %919 = vpow2.f32 %v591_v54  ;;  %v581_v3 = vmul.f32 1.442695, %v561_v63  ;;  %v597_v4 = vmul.f32 1.442695, %v569_v0  ;;  %v1132_v21 = vadd.f32 %v1074_v17, %v437_v56 }
 0x109   : > { %921 = vpow2.f32 %v585_v1  ;;  %v1135_v26 = vadd.f32 %v1074_v17, %v469_v57  ;;  %v587_v33 = vmul.f32 1.442695, %v564_v13  ;;  %v572_v37 = vsub.f32 0.0, %v1129_v16 }
 0x10a   : > { %923 = vpow2.f32 %v601_v2  ;;  %v562_v40 = vsub.f32 0.0, %v1132_v21 }
 0x10b   : > { %v906_v6 = vpop.eup %905  ;;  %925 = vpow2.f32 %v581_v3  ;;  %v570_v17 = vsub.f32 0.0, %v1135_v26  ;;  %v603_v47 = vmul.f32 1.442695, %v572_v37 }
 0x10c   : > { %v908_v7 = vpop.eup %907  ;;  %v607_v8 = vadd.f32 1.0, %v906_v6  ;;  %927 = vpow2.f32 %v597_v4  ;;  %v583_v50 = vmul.f32 1.442695, %v562_v40 }
 0x10d   : > { %v910_v9 = vpop.eup %909  ;;  %v615_v10 = vadd.f32 1.0, %v908_v7  ;;  %v599_v53 = vmul.f32 1.442695, %v570_v17 }
 0x10e   : > { %v912_v11 = vpop.eup %911  ;;  %929 = vrcp.f32 %v607_v8  ;;  %v605_v12 = vadd.f32 1.0, %v910_v9 }
 0x10f   : > { %v914_v14 = vpop.eup %913  ;;  %931 = vrcp.f32 %v615_v10  ;;  %v613_v15 = vadd.f32 1.0, %v912_v11 }
 0x110   : > { %v916_v18 = vpop.eup %915  ;;  %933 = vrcp.f32 %v605_v12  ;;  %v608_v20 = vadd.f32 1.0, %v914_v14 }
 0x111   : > { %v918_v22 = vpop.eup %917  ;;  %935 = vrcp.f32 %v613_v15  ;;  %v616_v25 = vadd.f32 1.0, %v916_v18 }
 0x112   : > { %v920_v29 = vpop.eup %919  ;;  %937 = vrcp.f32 %v608_v20  ;;  %v606_v30 = vadd.f32 1.0, %v918_v22 }
 0x113   : > { %939 = vrcp.f32 %v616_v25  ;;  %v614_v34 = vadd.f32 1.0, %v920_v29  ;;  %v922_v38 = vpop.eup %921 }
 0x114   : > { %941 = vrcp.f32 %v606_v30  ;;  %v924_v41 = vpop.eup %923  ;;  %v611_v42 = vadd.f32 1.0, %v922_v38 }
 0x115   : > { %943 = vrcp.f32 %v614_v34  ;;  %v926_v43 = vpop.eup %925  ;;  %v619_v44 = vadd.f32 1.0, %v924_v41 }
 0x116   : > { %945 = vpow2.f32 %v587_v33  ;;  %v928_v45 = vpop.eup %927  ;;  %v609_v46 = vadd.f32 1.0, %v926_v43 }
 0x117   : > { %947 = vrcp.f32 %v611_v42  ;;  %v617_v49 = vadd.f32 1.0, %v928_v45 }
 0x118   : > { %v930_v48 = vpop.eup %929  ;;  %949 = vrcp.f32 %v619_v44 }
 0x119   : > { %v932_v51 = vpop.eup %931  ;;  %v639_v52 = vmul.f32 2.0, %v930_v48  ;;  %951 = vrcp.f32 %v609_v46 }
 0x11a   : > { %v934_v54 = vpop.eup %933  ;;  %v647_v56 = vmul.f32 2.0, %v932_v51  ;;  %953 = vrcp.f32 %v617_v49 }
 0x11b   : > { %v936_v57 = vpop.eup %935  ;;  %v658_v61 = vsel %vm653_vm0, %v639_v52, %v1077_v23  ;;  %v637_v62 = vmul.f32 2.0, %v934_v54  ;;  %955 = vpow2.f32 %v603_v47 }
 0x11c   : > { %v938_v63 = vpop.eup %937  ;;  %674 = vst [vmem:[%s1147_s19 + $0x10] sm:$0xff] %v658_v61  ;;  %v666_v0 = vsel %vm653_vm0, %v647_v56, %v1080_v24  ;;  %v645_v1 = vmul.f32 2.0, %v936_v57  ;;  %957 = vpow2.f32 %v583_v50 }
 0x11d   : > { %v940_v2 = vpop.eup %939  ;;  %682 = vst [vmem:[%s1147_s19 + $0x50] sm:$0xff] %v666_v0  ;;  %v656_v3 = vsel %vm653_vm0, %v637_v62, %v1083_v27  ;;  %v640_v23 = vmul.f32 2.0, %v938_v63  ;;  %959 = vpow2.f32 %v599_v53 }
 0x11e   : > { %v942_v4 = vpop.eup %941  ;;  %672 = vst [vmem:[%s1147_s19] sm:$0xff] %v656_v3  ;;  %v664_v6 = vsel %vm653_vm0, %v645_v1, %v1086_v28  ;;  %v648_v24 = vmul.f32 2.0, %v940_v2 }
 0x11f   : > { %v944_v7 = vpop.eup %943  ;;  %680 = vst [vmem:[%s1147_s19 + $0x40] sm:$0xff] %v664_v6  ;;  %v659_v8 = vsel %vm653_vm0, %v640_v23, %v1091_v31  ;;  %v638_v9 = vmul.f32 2.0, %v942_v4 }
 0x120   : > { %v946_v27 = vpop.eup %945  ;;  %675 = vst [vmem:[%s1147_s19 + $0x18] sm:$0xff] %v659_v8  ;;  %v667_v10 = vsel %vm653_vm0, %v648_v24, %v1094_v32  ;;  %v646_v11 = vmul.f32 2.0, %v944_v7 }
 0x121   : > { %v948_v12 = vpop.eup %947  ;;  %683 = vst [vmem:[%s1147_s19 + $0x58] sm:$0xff] %v667_v10  ;;  %v657_v28 = vsel %vm653_vm0, %v638_v9, %v1099_v35  ;;  %v612_v13 = vadd.f32 1.0, %v946_v27 }
 0x122   : > { %v950_v14 = vpop.eup %949  ;;  %673 = vst [vmem:[%s1147_s19 + $0x8] sm:$0xff] %v657_v28  ;;  %v665_v31 = vsel %vm653_vm0, %v646_v11, %v1102_v36  ;;  %v643_v15 = vmul.f32 2.0, %v948_v12 }
 0x123   : > { %v952_v18 = vpop.eup %951  ;;  %681 = vst [vmem:[%s1147_s19 + $0x48] sm:$0xff] %v665_v31  ;;  %v651_v32 = vmul.f32 2.0, %v950_v14  ;;  %961 = vrcp.f32 %v612_v13 }
 0x124   : > { %v954_v19 = vpop.eup %953  ;;  %v662_v35 = vsel %vm653_vm0, %v643_v15, %v1109_v55  ;;  %v641_v20 = vmul.f32 2.0, %v952_v18 }
 0x125   : > { %v956_v22 = vpop.eup %955  ;;  %678 = vst [vmem:[%s1147_s19 + $0x30] sm:$0xff] %v662_v35  ;;  %v670_v25 = vsel %vm653_vm0, %v651_v32, %v1112_v58  ;;  %v649_v36 = vmul.f32 2.0, %v954_v19 }
 0x126   : > { %v958_v29 = vpop.eup %957  ;;  %686 = vst [vmem:[%s1147_s19 + $0x70] sm:$0xff] %v670_v25  ;;  %v660_v30 = vsel %vm653_vm0, %v641_v20, %v1115_v59  ;;  %v620_v33 = vadd.f32 1.0, %v956_v22 }
 0x127   : > { %v960_v34 = vpop.eup %959  ;;  %676 = vst [vmem:[%s1147_s19 + $0x20] sm:$0xff] %v660_v30  ;;  %v668_v55 = vsel %vm653_vm0, %v649_v36, %v1118_v60  ;;  %v610_v37 = vadd.f32 1.0, %v958_v29 }
 0x128   : > { %684 = vst [vmem:[%s1147_s19 + $0x60] sm:$0xff] %v668_v55  ;;  %963 = vrcp.f32 %v620_v33  ;;  %v618_v58 = vadd.f32 1.0, %v960_v34 }
 0x129   : > { %965 = vrcp.f32 %v610_v37 }
 0x12a   : > { %967 = vrcp.f32 %v618_v58 }
 0x12d   : > { %v962_v38 = vpop.eup %961 }
 0x12e   : > { %v644_v40 = vmul.f32 2.0, %v962_v38 }
 0x130   : > { %v663_v59 = vsel %vm653_vm0, %v644_v40, %v1125_v5 }
 0x131   : > { %679 = vst [vmem:[%s1147_s19 + $0x38] sm:$0xff] %v663_v59 }
 0x132   : > { %v964_v41 = vpop.eup %963 }
 0x133   : > { %v966_v42 = vpop.eup %965  ;;  %v652_v17 = vmul.f32 2.0, %v964_v41 }
 0x134   : > { %v968_v60 = vpop.eup %967  ;;  %v642_v43 = vmul.f32 2.0, %v966_v42 }
 0x135   : > { %v671_v44 = vsel %vm653_vm0, %v652_v17, %v1129_v16  ;;  %v650_v45 = vmul.f32 2.0, %v968_v60 }
 0x136   : > { %687 = vst [vmem:[%s1147_s19 + $0x78] sm:$0xff] %v671_v44  ;;  %v661_v46 = vsel %vm653_vm0, %v642_v43, %v1132_v21 }
 0x137   : > { %677 = vst [vmem:[%s1147_s19 + $0x28] sm:$0xff] %v661_v46  ;;  %v669_v5 = vsel %vm653_vm0, %v650_v45, %v1135_v26 }
 0x138   : > { %685 = vst [vmem:[%s1147_s19 + $0x68] sm:$0xff] %v669_v5 }
 0x139 PF: > { %s13_s14 = sadd.s32 1, %s991_s14   ;;  %s1226_s12 = smov %s987_s13 }
 0x13a   : > { %p10_p5 = scmp.ge.s32.totalorder %s13_s14, 6   ;;  %s1227_s13 = smov %s1229_s15 }
 0x13c   :  { %12 = sbr.rel (!%p10_p5) target bundleno = 2 (0x2), region = 73 }

// kernel: mul.34
= control target key start
LH: loop header
LB: loop body
LE: loop exit
PB: predicated region body
PF: predicated region fallthrough
CT: control target
= control target key end

     0   :  { %vm6_vm0 = vcmask 1041409   ;;  %vm10_vm1 = vcmask 1042434   ;;  %vm14_vm2 = vcmask 1043459   ;;  %vm48_vm3 = vcmask 7168   ;;  %s3669_s11 = smov 127   ;;  %s3670_s28 = smov 125   ;;  %s6015_s0 = inlined_call_operand.vmem [shape: f32[2,16,16,9], index: 0, kind: input, shape index: {}]   ;;  %s6016_s1 = inlined_call_operand.hbm [shape: f32[2,2304], index: 1, kind: output, shape index: {}]  }
   0x1   :  { %v2977_v0 = vld [vmem:[%s6015_s0 + $0x47] sm:$0x1]   ;;  %v2993_v11 = vld [vmem:[%s6015_s0 + $0x55] sm:$0x1]   ;;  %vm131_vm4 = vcmask 23552   ;;  %vm90_vm5 = vcmask 15360  }
   0x2   :  { %v2978_v1 = vld [vmem:[%s6015_s0 + $0x146] sm:$0x2]   ;;  %v2994_v14 = vld [vmem:[%s6015_s0 + $0x154] sm:$0x2]   ;;  %v2985_v26 = vld [vmem:[%s6015_s0 + $0xe] sm:$0x1]  }
   0x3   :  { %v2979_v2 = vld [vmem:[%s6015_s0 + $0xc5] sm:$0x4]   ;;  %v25_v4 = vsel %vm6_vm0, %v2978_v1, %v2977_v0  ;;  %v2995_v15 = vld [vmem:[%s6015_s0 + $0xd3] sm:$0x4]   ;;  %v108_v18 = vsel %vm6_vm0, %v2994_v14, %v2993_v11  ;;  %v2986_v29 = vld [vmem:[%s6015_s0 + $0x10d] sm:$0x2]  }
   0x4   :  { %v2980_v3 = vld [vmem:[%s6015_s0 + $0x1c4] sm:$0x8]   ;;  %v29_v8 = vsel %vm10_vm1, %v2979_v2, %v25_v4  ;;  %v2996_v16 = vld [vmem:[%s6015_s0 + $0x1d2] sm:$0x8]   ;;  %v112_v23 = vsel %vm10_vm1, %v2995_v15, %v108_v18  ;;  %v2987_v30 = vld [vmem:[%s6015_s0 + $0x8c] sm:$0x4]   ;;  %v67_v33 = vsel %vm6_vm0, %v2986_v29, %v2985_v26 }
   0x5   :  { %v2981_v5 = vld [vmem:[%s6015_s0 + $0x47] sm:$0x1]   ;;  %v33_v12 = vsel %vm14_vm2, %v2980_v3, %v29_v8  ;;  %v2997_v19 = vld [vmem:[%s6015_s0 + $0x55] sm:$0x1]   ;;  %v116_v27 = vsel %vm14_vm2, %v2996_v16, %v112_v23  ;;  %v2988_v31 = vld [vmem:[%s6015_s0 + $0x18b] sm:$0x8]   ;;  %v71_v38 = vsel %vm10_vm1, %v2987_v30, %v67_v33 }
   0x6   :  { %v2982_v6 = vld [vmem:[%s6015_s0 + $0x146] sm:$0x2]   ;;  %v2998_v20 = vld [vmem:[%s6015_s0 + $0x154] sm:$0x2]   ;;  %v2989_v34 = vld [vmem:[%s6015_s0 + $0xe] sm:$0x1]   ;;  %v75_v42 = vsel %vm14_vm2, %v2988_v31, %v71_v38 }
   0x7   :  { %v2983_v7 = vld [vmem:[%s6015_s0 + $0xc5] sm:$0x4]   ;;  %v39_v9 = vsel %vm6_vm0, %v2982_v6, %v2981_v5  ;;  %v2999_v21 = vld [vmem:[%s6015_s0 + $0xd3] sm:$0x4]   ;;  %v122_v24 = vsel %vm6_vm0, %v2998_v20, %v2997_v19  ;;  %v2990_v35 = vld [vmem:[%s6015_s0 + $0x10d] sm:$0x2]  }
   0x8   :  { %v2984_v10 = vld [vmem:[%s6015_s0 + $0x1c4] sm:$0x8]   ;;  %v43_v13 = vsel %vm10_vm1, %v2983_v7, %v39_v9  ;;  %v3000_v25 = vld [vmem:[%s6015_s0 + $0x1d2] sm:$0x8]   ;;  %v126_v28 = vsel %vm10_vm1, %v2999_v21, %v122_v24  ;;  %v2991_v36 = vld [vmem:[%s6015_s0 + $0x8c] sm:$0x4]   ;;  %v81_v39 = vsel %vm6_vm0, %v2990_v35, %v2989_v34 }
   0x9   :  { %v47_v17 = vsel %vm14_vm2, %v2984_v10, %v43_v13  ;;  %v130_v32 = vsel %vm14_vm2, %v3000_v25, %v126_v28  ;;  %v2992_v40 = vld [vmem:[%s6015_s0 + $0x18b] sm:$0x8]   ;;  %v3001_v41 = vld [vmem:[%s6015_s0 + $0x1c] sm:$0x1]   ;;  %v85_v43 = vsel %vm10_vm1, %v2991_v36, %v81_v39  ;;  %vm173_vm6 = vcmask 31744   ;;  %s3671_s16 = smov 126  }
   0xa   :  { %v49_v22 = vsel %vm48_vm3, %v47_v17, %v33_v12  ;;  %v132_v37 = vsel %vm131_vm4, %v130_v32, %v116_v27  ;;  %v3002_v44 = vld [vmem:[%s6015_s0 + $0x11b] sm:$0x2]   ;;  %v89_v47 = vsel %vm14_vm2, %v2992_v40, %v85_v43  ;;  %v3009_v56 = vld [vmem:[%s6015_s0 + $0xe3] sm:$0x1]   ;;  %vm177_vm7 = vcmask 39936   ;;  %s3672_s2 = smov 124  }
   0xb   :  { %50 = vrot.lane.b32.xlu0 %v49_v22, %s3669_s11  ;;  %133 = vrot.lane.b32.xlu1 %v132_v37, %s3670_s28  ;;  %v3003_v45 = vld [vmem:[%s6015_s0 + $0x9a] sm:$0x4]   ;;  %v150_v48 = vsel %vm6_vm0, %v3002_v44, %v3001_v41  ;;  %v91_v52 = vsel %vm90_vm5, %v89_v47, %v75_v42  ;;  %v3010_v59 = vld [vmem:[%s6015_s0 + $0x1e2] sm:$0x2]   ;;  %vm135_vm8 = vcmask 48128   ;;  %vm94_vm9 = vcmask 56320  }
   0xc   :  { %v3004_v46 = vld [vmem:[%s6015_s0 + $0x199] sm:$0x8]   ;;  %v154_v53 = vsel %vm10_vm1, %v3003_v45, %v150_v48  ;;  %v3011_v60 = vld [vmem:[%s6015_s0 + $0x61] sm:$0x4]   ;;  %v192_v62 = vsel %vm6_vm0, %v3010_v59, %v3009_v56  ;;  %v3017_v9 = vld [vmem:[%s6015_s0 + $0xaa] sm:$0x1]  }
   0xd   :  { %v3005_v49 = vld [vmem:[%s6015_s0 + $0x1c] sm:$0x1]   ;;  %v158_v57 = vsel %vm14_vm2, %v3004_v46, %v154_v53  ;;  %v3012_v63 = vld [vmem:[%s6015_s0 + $0x160] sm:$0x8]   ;;  %v196_v3 = vsel %vm10_vm1, %v3011_v60, %v192_v62  ;;  %v3018_v10 = vld [vmem:[%s6015_s0 + $0x1a9] sm:$0x2]  }
   0xe   :  { %v3006_v50 = vld [vmem:[%s6015_s0 + $0x11b] sm:$0x2]   ;;  %v3013_v0 = vld [vmem:[%s6015_s0 + $0x63] sm:$0x1]   ;;  %v200_v7 = vsel %vm14_vm2, %v3012_v63, %v196_v3  ;;  %v3019_v11 = vld [vmem:[%s6015_s0 + $0x28] sm:$0x4]   ;;  %v234_v13 = vsel %vm6_vm0, %v3018_v10, %v3017_v9 }
   0xf   :  { %v3007_v51 = vld [vmem:[%s6015_s0 + $0x9a] sm:$0x4]   ;;  %v164_v54 = vsel %vm6_vm0, %v3006_v50, %v3005_v49  ;;  %92 = vrot.lane.b32.xlu0 %v91_v52, %s3671_s16  ;;  %v3014_v1 = vld [vmem:[%s6015_s0 + $0x162] sm:$0x2]   ;;  %v3020_v14 = vld [vmem:[%s6015_s0 + $0x127] sm:$0x8]   ;;  %v238_v18 = vsel %vm10_vm1, %v3019_v11, %v234_v13 }
  0x10   :  { %v3008_v55 = vld [vmem:[%s6015_s0 + $0x199] sm:$0x8]   ;;  %v168_v58 = vsel %vm10_vm1, %v3007_v51, %v164_v54  ;;  %v206_v4 = vsel %vm6_vm0, %v3014_v1, %v3013_v0  ;;  %v3015_v5 = vld [vmem:[%s6015_s0 + $0xe1] sm:$0x4]   ;;  %v3021_v15 = vld [vmem:[%s6015_s0 + $0x2a] sm:$0x1]   ;;  %v242_v22 = vsel %vm14_vm2, %v3020_v14, %v238_v18 }
  0x11   :  { %v172_v61 = vsel %vm14_vm2, %v3008_v55, %v168_v58  ;;  %v3016_v6 = vld [vmem:[%s6015_s0 + $0x1e0] sm:$0x8]   ;;  %v210_v8 = vsel %vm10_vm1, %v3015_v5, %v206_v4  ;;  %v3022_v16 = vld [vmem:[%s6015_s0 + $0x129] sm:$0x2]   ;;  %s3673_s19 = smov 123   ;;  %vm52_vm10 = vcmask 64512  }
  0x12   :  { %v174_v2 = vsel %vm173_vm6, %v172_v61, %v158_v57  ;;  %v214_v12 = vsel %vm14_vm2, %v3016_v6, %v210_v8  ;;  %v248_v19 = vsel %vm6_vm0, %v3022_v16, %v3021_v15  ;;  %v3023_v20 = vld [vmem:[%s6015_s0 + $0xa8] sm:$0x4]   ;;  %v3025_v24 = vld [vmem:[%s6015_s0 + $0x71] sm:$0x1]   ;;  %s3674_s7 = smov 122   ;;  %s3675_s26 = smov 121  }
  0x13   :  { %175 = vrot.lane.b32.xlu1 %v174_v2, %s3672_s2  ;;  %v216_v17 = vsel %vm177_vm7, %v214_v12, %v200_v7  ;;  %v3024_v21 = vld [vmem:[%s6015_s0 + $0x1a7] sm:$0x8]   ;;  %v252_v23 = vsel %vm10_vm1, %v3023_v20, %v248_v19  ;;  %v3026_v25 = vld [vmem:[%s6015_s0 + $0x170] sm:$0x2]   ;;  %v3033_v39 = vld [vmem:[%s6015_s0 + $0x38] sm:$0x1]  }
  0x14   :  { %217 = vrot.lane.b32.xlu0 %v216_v17, %s3673_s19  ;;  %v3027_v26 = vld [vmem:[%s6015_s0 + $0xef] sm:$0x4]   ;;  %v256_v27 = vsel %vm14_vm2, %v3024_v21, %v252_v23  ;;  %v276_v28 = vsel %vm6_vm0, %v3026_v25, %v3025_v24  ;;  %v3034_v40 = vld [vmem:[%s6015_s0 + $0x137] sm:$0x2]   ;;  %v3041_v52 = vld [vmem:[%s6015_s0 + $0x7f] sm:$0x1]  }
  0x15   :  { %v3028_v29 = vld [vmem:[%s6015_s0 + $0x1ee] sm:$0x8]   ;;  %v258_v32 = vsel %vm135_vm8, %v256_v27, %v242_v22  ;;  %v280_v33 = vsel %vm10_vm1, %v3027_v26, %v276_v28  ;;  %v3035_v41 = vld [vmem:[%s6015_s0 + $0xb6] sm:$0x4]   ;;  %v318_v43 = vsel %vm6_vm0, %v3034_v40, %v3033_v39  ;;  %v3042_v55 = vld [vmem:[%s6015_s0 + $0x17e] sm:$0x2]  }
  0x16   :  { %v3029_v30 = vld [vmem:[%s6015_s0 + $0xf1] sm:$0x1]   ;;  %v284_v37 = vsel %vm14_vm2, %v3028_v29, %v280_v33  ;;  %v3036_v44 = vld [vmem:[%s6015_s0 + $0x1b5] sm:$0x8]   ;;  %v322_v48 = vsel %vm10_vm1, %v3035_v41, %v318_v43  ;;  %v3043_v56 = vld [vmem:[%s6015_s0 + $0xfd] sm:$0x4]   ;;  %v360_v59 = vsel %vm6_vm0, %v3042_v55, %v3041_v52 }
  0x17   :  { %v3030_v31 = vld [vmem:[%s6015_s0 + $0x1f0] sm:$0x2]   ;;  %259 = vrot.lane.b32.xlu1 %v258_v32, %s3674_s7  ;;  %v3037_v45 = vld [vmem:[%s6015_s0 + $0xb8] sm:$0x1]   ;;  %v326_v53 = vsel %vm14_vm2, %v3036_v44, %v322_v48  ;;  %v3044_v57 = vld [vmem:[%s6015_s0 + $0x1fc] sm:$0x8]   ;;  %v364_v63 = vsel %vm10_vm1, %v3043_v56, %v360_v59 }
  0x18   :  { %v290_v34 = vsel %vm6_vm0, %v3030_v31, %v3029_v30  ;;  %v3031_v35 = vld [vmem:[%s6015_s0 + $0x6f] sm:$0x4]   ;;  %v3038_v46 = vld [vmem:[%s6015_s0 + $0x1b7] sm:$0x2]   ;;  %v3045_v60 = vld [vmem:[%s6015_s0 + $0x46] sm:$0x1]   ;;  %v368_v4 = vsel %vm14_vm2, %v3044_v57, %v364_v63 }
  0x19   :  { %v3032_v36 = vld [vmem:[%s6015_s0 + $0x16e] sm:$0x8]   ;;  %v294_v38 = vsel %vm10_vm1, %v3031_v35, %v290_v34  ;;  %v332_v49 = vsel %vm6_vm0, %v3038_v46, %v3037_v45  ;;  %v3039_v50 = vld [vmem:[%s6015_s0 + $0x36] sm:$0x4]   ;;  %v3046_v61 = vld [vmem:[%s6015_s0 + $0x145] sm:$0x2]  }
  0x1a   :  { %v298_v42 = vsel %vm14_vm2, %v3032_v36, %v294_v38  ;;  %v3040_v51 = vld [vmem:[%s6015_s0 + $0x135] sm:$0x8]   ;;  %v336_v54 = vsel %vm10_vm1, %v3039_v50, %v332_v49  ;;  %v381_v0 = vsel %vm6_vm0, %v3046_v61, %v3045_v60  ;;  %v3047_v1 = vld [vmem:[%s6015_s0 + $0xc4] sm:$0x4]   ;;  %v3049_v3 = vld [vmem:[%s6015_s0 + $0xd] sm:$0x1]  }
  0x1b   :  { %v300_v47 = vsel %vm94_vm9, %v298_v42, %v284_v37  ;;  %v340_v58 = vsel %vm14_vm2, %v3040_v51, %v336_v54  ;;  %v3048_v2 = vld [vmem:[%s6015_s0 + $0x1c3] sm:$0x8]   ;;  %s3676_s14 = smov 120   ;;  %v385_v5 = vsel %vm10_vm1, %v3047_v1, %v381_v0  ;;  %v3050_v6 = vld [vmem:[%s6015_s0 + $0x10c] sm:$0x2]   ;;  %s3677_s21 = smov 119  }
  0x1c   :  { %301 = vrot.lane.b32.xlu0 %v300_v47, %s3675_s26  ;;  %v342_v62 = vsel %vm52_vm10, %v340_v58, %v326_v53  ;;  %v3051_v7 = vld [vmem:[%s6015_s0 + $0x8b] sm:$0x4]   ;;  %v389_v9 = vsel %vm14_vm2, %v3048_v2, %v385_v5  ;;  %v402_v10 = vsel %vm6_vm0, %v3050_v6, %v3049_v3  ;;  %v3053_v11 = vld [vmem:[%s6015_s0 + $0x54] sm:$0x1]   ;;  %v3057_v17 = vld [vmem:[%s6015_s0 + $0x1b] sm:$0x1]  }
  0x1d   :  { %343 = vrot.lane.b32.xlu1 %v342_v62, %s3676_s14  ;;  %v3052_v8 = vld [vmem:[%s6015_s0 + $0x18a] sm:$0x8]   ;;  %v3054_v12 = vld [vmem:[%s6015_s0 + $0x153] sm:$0x2]   ;;  %v406_v13 = vsel %vm10_vm1, %v3051_v7, %v402_v10  ;;  %v3058_v20 = vld [vmem:[%s6015_s0 + $0x11a] sm:$0x2]  }
  0x1e   :  { %v422_v14 = vsel %vm6_vm0, %v3054_v12, %v3053_v11  ;;  %v3055_v15 = vld [vmem:[%s6015_s0 + $0xd2] sm:$0x4]   ;;  %v410_v18 = vsel %vm14_vm2, %v3052_v8, %v406_v13  ;;  %v3059_v21 = vld [vmem:[%s6015_s0 + $0x99] sm:$0x4]   ;;  %s3678_s9 = smov 118   ;;  %v443_v23 = vsel %vm6_vm0, %v3058_v20, %v3057_v17  ;;  %s3679_s14 = smov 117  }
  0x1f   :  { %v3056_v16 = vld [vmem:[%s6015_s0 + $0x1d1] sm:$0x8]   ;;  %v426_v19 = vsel %vm10_vm1, %v3055_v15, %v422_v14  ;;  %v3060_v22 = vld [vmem:[%s6015_s0 + $0x198] sm:$0x8]   ;;  %v3061_v24 = vld [vmem:[%s6015_s0 + $0x62] sm:$0x1]   ;;  %v447_v27 = vsel %vm10_vm1, %v3059_v21, %v443_v23 }
  0x20   :  { %369 = vrot.lane.b32.xlu0 %v368_v4, %s3677_s21  ;;  %v3062_v25 = vld [vmem:[%s6015_s0 + $0x161] sm:$0x2]   ;;  %v430_v26 = vsel %vm14_vm2, %v3056_v16, %v426_v19  ;;  %v3065_v30 = vld [vmem:[%s6015_s0 + $0x29] sm:$0x1]   ;;  %v451_v31 = vsel %vm14_vm2, %v3060_v22, %v447_v27  ;;  %v3069_v38 = vld [vmem:[%s6015_s0 + $0xf0] sm:$0x1]  }
  0x21   :  { %390 = vrot.lane.b32.xlu1 %v389_v9, %s3678_s9  ;;  %v464_v28 = vsel %vm6_vm0, %v3062_v25, %v3061_v24  ;;  %v3063_v29 = vld [vmem:[%s6015_s0 + $0xe0] sm:$0x4]   ;;  %v3066_v34 = vld [vmem:[%s6015_s0 + $0x128] sm:$0x2]   ;;  %v3070_v39 = vld [vmem:[%s6015_s0 + $0x1ef] sm:$0x2]  }
  0x22   :  { %v468_v32 = vsel %vm10_vm1, %v3063_v29, %v464_v28  ;;  %v3064_v33 = vld [vmem:[%s6015_s0 + $0x1df] sm:$0x8]   ;;  %v3067_v35 = vld [vmem:[%s6015_s0 + $0xa7] sm:$0x4]   ;;  %v485_v36 = vsel %vm6_vm0, %v3066_v34, %v3065_v30  ;;  %s3680_s2 = smov 116   ;;  %v506_v41 = vsel %vm6_vm0, %v3070_v39, %v3069_v38  ;;  %s3681_s7 = smov 115  }
  0x23   :  { %v3068_v37 = vld [vmem:[%s6015_s0 + $0x1a6] sm:$0x8]   ;;  %v489_v40 = vsel %vm10_vm1, %v3067_v35, %v485_v36  ;;  %v3071_v42 = vld [vmem:[%s6015_s0 + $0x6e] sm:$0x4]   ;;  %v3073_v43 = vld [vmem:[%s6015_s0 + $0xb7] sm:$0x1]   ;;  %v472_v44 = vsel %vm14_vm2, %v3064_v33, %v468_v32 }
  0x24   :  { %411 = vrot.lane.b32.xlu0 %v410_v18, %s3679_s14  ;;  %v3074_v45 = vld [vmem:[%s6015_s0 + $0x1b6] sm:$0x2]   ;;  %v493_v47 = vsel %vm14_vm2, %v3068_v37, %v489_v40  ;;  %v510_v48 = vsel %vm10_vm1, %v3071_v42, %v506_v41  ;;  %v3072_v49 = vld [vmem:[%s6015_s0 + $0x16d] sm:$0x8]   ;;  %v3077_v51 = vld [vmem:[%s6015_s0 + $0x7e] sm:$0x1]  }
  0x25   :  { %431 = vrot.lane.b32.xlu1 %v430_v26, %s3680_s2  ;;  %v3075_v46 = vld [vmem:[%s6015_s0 + $0x35] sm:$0x4]   ;;  %v527_v50 = vsel %vm6_vm0, %v3074_v45, %v3073_v43  ;;  %v3078_v52 = vld [vmem:[%s6015_s0 + $0x17d] sm:$0x2]   ;;  %v3081_v57 = vld [vmem:[%s6015_s0 + $0x45] sm:$0x1]   ;;  %v514_v60 = vsel %vm14_vm2, %v3072_v49, %v510_v48 }
  0x26   :  { %v531_v53 = vsel %vm10_vm1, %v3075_v46, %v527_v50  ;;  %v3076_v54 = vld [vmem:[%s6015_s0 + $0x134] sm:$0x8]   ;;  %v548_v55 = vsel %vm6_vm0, %v3078_v52, %v3077_v51  ;;  %v3079_v56 = vld [vmem:[%s6015_s0 + $0xfc] sm:$0x4]   ;;  %s3682_s24 = smov 114   ;;  %s3683_s29 = smov 113  }
  0x27   :  { %v3082_v58 = vld [vmem:[%s6015_s0 + $0x144] sm:$0x2]   ;;  %v3085_v62 = vld [vmem:[%s6015_s0 + $0xc] sm:$0x1]   ;;  %v535_v0 = vsel %vm14_vm2, %v3076_v54, %v531_v53  ;;  %v552_v1 = vsel %vm10_vm1, %v3079_v56, %v548_v55  ;;  %v3080_v2 = vld [vmem:[%s6015_s0 + $0x1fb] sm:$0x8]  }
  0x28   :  { %452 = vrot.lane.b32.xlu0 %v451_v31, %s3681_s7  ;;  %v3083_v59 = vld [vmem:[%s6015_s0 + $0xc3] sm:$0x4]   ;;  %v569_v61 = vsel %vm6_vm0, %v3082_v58, %v3081_v57  ;;  %v3086_v63 = vld [vmem:[%s6015_s0 + $0x10b] sm:$0x2]   ;;  %v3089_v3 = vld [vmem:[%s6015_s0 + $0x53] sm:$0x1]   ;;  %v556_v13 = vsel %vm14_vm2, %v3080_v2, %v552_v1 }
  0x29   :  { %473 = vrot.lane.b32.xlu1 %v472_v44, %s3682_s24  ;;  %v573_v4 = vsel %vm10_vm1, %v3083_v59, %v569_v61  ;;  %v3084_v5 = vld [vmem:[%s6015_s0 + $0x1c2] sm:$0x8]   ;;  %v590_v6 = vsel %vm6_vm0, %v3086_v63, %v3085_v62  ;;  %v3087_v7 = vld [vmem:[%s6015_s0 + $0x8a] sm:$0x4]   ;;  %v3090_v8 = vld [vmem:[%s6015_s0 + $0x152] sm:$0x2]  }
  0x2a   :  { %s3684_s15 = smov 112   ;;  %v610_v9 = vsel %vm6_vm0, %v3090_v8, %v3089_v3  ;;  %v3091_v10 = vld [vmem:[%s6015_s0 + $0xd1] sm:$0x4]   ;;  %v3093_v11 = vld [vmem:[%s6015_s0 + $0x1a] sm:$0x1]   ;;  %s3685_s22 = smov 111   ;;  %v577_v15 = vsel %vm14_vm2, %v3084_v5, %v573_v4  ;;  %v594_v16 = vsel %vm10_vm1, %v3087_v7, %v590_v6 }
  0x2b   :  { %v3094_v12 = vld [vmem:[%s6015_s0 + $0x119] sm:$0x2]   ;;  %v3097_v14 = vld [vmem:[%s6015_s0 + $0x61] sm:$0x1]   ;;  %v3088_v17 = vld [vmem:[%s6015_s0 + $0x189] sm:$0x8]   ;;  %v614_v19 = vsel %vm10_vm1, %v3091_v10, %v610_v9 }
  0x2c   :  { %494 = vrot.lane.b32.xlu0 %v493_v47, %s3683_s29  ;;  %v3098_v18 = vld [vmem:[%s6015_s0 + $0x160] sm:$0x2]   ;;  %v3092_v20 = vld [vmem:[%s6015_s0 + $0x1d0] sm:$0x8]   ;;  %v631_v21 = vsel %vm6_vm0, %v3094_v12, %v3093_v11  ;;  %v3095_v22 = vld [vmem:[%s6015_s0 + $0x98] sm:$0x4]   ;;  %v598_v27 = vsel %vm14_vm2, %v3088_v17, %v594_v16 }
  0x2d   :  { %515 = vrot.lane.b32.xlu1 %v514_v60, %s3684_s15  ;;  %s3686_s4 = smov 110   ;;  %v652_v23 = vsel %vm6_vm0, %v3098_v18, %v3097_v14  ;;  %v3099_v24 = vld [vmem:[%s6015_s0 + $0xdf] sm:$0x4]   ;;  %v3101_v25 = vld [vmem:[%s6015_s0 + $0x28] sm:$0x1]   ;;  %s3687_s11 = smov 109   ;;  %v618_v30 = vsel %vm14_vm2, %v3092_v20, %v614_v19  ;;  %v635_v31 = vsel %vm10_vm1, %v3095_v22, %v631_v21 }
  0x2e   :  { %v3102_v26 = vld [vmem:[%s6015_s0 + $0x127] sm:$0x2]   ;;  %v3105_v28 = vld [vmem:[%s6015_s0 + $0xef] sm:$0x1]   ;;  %v3096_v32 = vld [vmem:[%s6015_s0 + $0x197] sm:$0x8]   ;;  %v656_v33 = vsel %vm10_vm1, %v3099_v24, %v652_v23 }
  0x2f   :  { %v3106_v29 = vld [vmem:[%s6015_s0 + $0x1ee] sm:$0x2]   ;;  %v3100_v34 = vld [vmem:[%s6015_s0 + $0x1de] sm:$0x8]   ;;  %v673_v35 = vsel %vm6_vm0, %v3102_v26, %v3101_v25  ;;  %v3103_v36 = vld [vmem:[%s6015_s0 + $0xa6] sm:$0x4]   ;;  %v639_v41 = vsel %vm14_vm2, %v3096_v32, %v635_v31 }
  0x30   :  { %536 = vrot.lane.b32.xlu0 %v535_v0, %s3685_s22  ;;  %s3688_s22 = smov 108   ;;  %v694_v37 = vsel %vm6_vm0, %v3106_v29, %v3105_v28  ;;  %v3107_v38 = vld [vmem:[%s6015_s0 + $0x6d] sm:$0x4]   ;;  %v3109_v39 = vld [vmem:[%s6015_s0 + $0xb6] sm:$0x1]   ;;  %s3689_s29 = smov 107   ;;  %v660_v44 = vsel %vm14_vm2, %v3100_v34, %v656_v33  ;;  %v677_v45 = vsel %vm10_vm1, %v3103_v36, %v673_v35 }
  0x31   :  { %557 = vrot.lane.b32.xlu1 %v556_v13, %s3686_s4  ;;  %v3110_v40 = vld [vmem:[%s6015_s0 + $0x1b5] sm:$0x2]   ;;  %v3113_v42 = vld [vmem:[%s6015_s0 + $0x7d] sm:$0x1]   ;;  %v3104_v46 = vld [vmem:[%s6015_s0 + $0x1a5] sm:$0x8]   ;;  %v698_v47 = vsel %vm10_vm1, %v3107_v38, %v694_v37 }
  0x32   :  { %v3114_v43 = vld [vmem:[%s6015_s0 + $0x17c] sm:$0x2]   ;;  %v3108_v48 = vld [vmem:[%s6015_s0 + $0x16c] sm:$0x8]   ;;  %v715_v49 = vsel %vm6_vm0, %v3110_v40, %v3109_v39  ;;  %v3111_v50 = vld [vmem:[%s6015_s0 + $0x34] sm:$0x4]   ;;  %v681_v55 = vsel %vm14_vm2, %v3104_v46, %v677_v45 }
  0x33   :  { %v736_v51 = vsel %vm6_vm0, %v3114_v43, %v3113_v42  ;;  %v3115_v52 = vld [vmem:[%s6015_s0 + $0xfb] sm:$0x4]   ;;  %v3117_v53 = vld [vmem:[%s6015_s0 + $0x44] sm:$0x1]   ;;  %s3691_s18 = smov 105   ;;  %v702_v58 = vsel %vm14_vm2, %v3108_v48, %v698_v47  ;;  %v719_v59 = vsel %vm10_vm1, %v3111_v50, %v715_v49  ;;  %s3693_s7 = smov 103  }
  0x34   :  { %578 = vrot.lane.b32.xlu0 %v577_v15, %s3687_s11  ;;  %s3690_s11 = smov 106   ;;  %v3118_v54 = vld [vmem:[%s6015_s0 + $0x143] sm:$0x2]   ;;  %v3121_v56 = vld [vmem:[%s6015_s0 + $0xb] sm:$0x1]   ;;  %v740_v61 = vsel %vm10_vm1, %v3115_v52, %v736_v51  ;;  %s3695_s25 = smov 101  }
  0x35   :  { %599 = vrot.lane.b32.xlu1 %v598_v27, %s3688_s22  ;;  %v3122_v57 = vld [vmem:[%s6015_s0 + $0x10a] sm:$0x2]   ;;  %v3112_v60 = vld [vmem:[%s6015_s0 + $0x133] sm:$0x8]   ;;  %v3116_v62 = vld [vmem:[%s6015_s0 + $0x1fa] sm:$0x8]   ;;  %v757_v63 = vsel %vm6_vm0, %v3118_v54, %v3117_v53 }
  0x36   :  { %v3119_v0 = vld [vmem:[%s6015_s0 + $0xc2] sm:$0x4]   ;;  %v778_v1 = vsel %vm6_vm0, %v3122_v57, %v3121_v56  ;;  %v3123_v2 = vld [vmem:[%s6015_s0 + $0x89] sm:$0x4]   ;;  %v3125_v3 = vld [vmem:[%s6015_s0 + $0x52] sm:$0x1]   ;;  %v723_v5 = vsel %vm14_vm2, %v3112_v60, %v719_v59  ;;  %v744_v8 = vsel %vm14_vm2, %v3116_v62, %v740_v61 }
  0x37   :  { %v3126_v4 = vld [vmem:[%s6015_s0 + $0x151] sm:$0x2]   ;;  %v3129_v6 = vld [vmem:[%s6015_s0 + $0x19] sm:$0x1]   ;;  %v761_v9 = vsel %vm10_vm1, %v3119_v0, %v757_v63  ;;  %v3120_v10 = vld [vmem:[%s6015_s0 + $0x1c1] sm:$0x8]   ;;  %v782_v11 = vsel %vm10_vm1, %v3123_v2, %v778_v1 }
  0x38   :  { %619 = vrot.lane.b32.xlu0 %v618_v30, %s3689_s29  ;;  %s3692_s29 = smov 104   ;;  %v3130_v7 = vld [vmem:[%s6015_s0 + $0x118] sm:$0x2]   ;;  %v3124_v12 = vld [vmem:[%s6015_s0 + $0x188] sm:$0x8]   ;;  %v798_v13 = vsel %vm6_vm0, %v3126_v4, %v3125_v3  ;;  %v765_v19 = vsel %vm14_vm2, %v3120_v10, %v761_v9  ;;  %s3697_s14 = smov 99  }
  0x39   :  { %640 = vrot.lane.b32.xlu1 %v639_v41, %s3690_s11  ;;  %v3127_v14 = vld [vmem:[%s6015_s0 + $0xd0] sm:$0x4]   ;;  %v819_v15 = vsel %vm6_vm0, %v3130_v7, %v3129_v6  ;;  %v3131_v16 = vld [vmem:[%s6015_s0 + $0x97] sm:$0x4]   ;;  %v3133_v17 = vld [vmem:[%s6015_s0 + $0x60] sm:$0x1]   ;;  %v786_v22 = vsel %vm14_vm2, %v3124_v12, %v782_v11 }
  0x3a   :  { %v3134_v18 = vld [vmem:[%s6015_s0 + $0x15f] sm:$0x2]   ;;  %v3137_v20 = vld [vmem:[%s6015_s0 + $0x27] sm:$0x1]   ;;  %v802_v23 = vsel %vm10_vm1, %v3127_v14, %v798_v13  ;;  %v3128_v24 = vld [vmem:[%s6015_s0 + $0x1cf] sm:$0x8]   ;;  %v823_v25 = vsel %vm10_vm1, %v3131_v16, %v819_v15 }
  0x3b   :  { %v3138_v21 = vld [vmem:[%s6015_s0 + $0x126] sm:$0x2]   ;;  %v3132_v26 = vld [vmem:[%s6015_s0 + $0x196] sm:$0x8]   ;;  %v840_v27 = vsel %vm6_vm0, %v3134_v18, %v3133_v17  ;;  %v3135_v28 = vld [vmem:[%s6015_s0 + $0xde] sm:$0x4]   ;;  %v806_v33 = vsel %vm14_vm2, %v3128_v24, %v802_v23 }
  0x3c   :  { %661 = vrot.lane.b32.xlu0 %v660_v44, %s3691_s18  ;;  %s3694_s18 = smov 102   ;;  %v861_v29 = vsel %vm6_vm0, %v3138_v21, %v3137_v20  ;;  %v3139_v30 = vld [vmem:[%s6015_s0 + $0xa5] sm:$0x4]   ;;  %v3141_v31 = vld [vmem:[%s6015_s0 + $0xee] sm:$0x1]   ;;  %v827_v36 = vsel %vm14_vm2, %v3132_v26, %v823_v25  ;;  %v844_v37 = vsel %vm10_vm1, %v3135_v28, %v840_v27  ;;  %s3699_s3 = smov 97  }
  0x3d   :  { %682 = vrot.lane.b32.xlu1 %v681_v55, %s3692_s29  ;;  %v3142_v32 = vld [vmem:[%s6015_s0 + $0x1ed] sm:$0x2]   ;;  %v3145_v34 = vld [vmem:[%s6015_s0 + $0xb5] sm:$0x1]   ;;  %v3136_v38 = vld [vmem:[%s6015_s0 + $0x1dd] sm:$0x8]   ;;  %v865_v39 = vsel %vm10_vm1, %v3139_v30, %v861_v29 }
  0x3e   :  { %v3146_v35 = vld [vmem:[%s6015_s0 + $0x1b4] sm:$0x2]   ;;  %v3140_v40 = vld [vmem:[%s6015_s0 + $0x1a4] sm:$0x8]   ;;  %v882_v41 = vsel %vm6_vm0, %v3142_v32, %v3141_v31  ;;  %v3143_v42 = vld [vmem:[%s6015_s0 + $0x6c] sm:$0x4]   ;;  %v848_v47 = vsel %vm14_vm2, %v3136_v38, %v844_v37 }
  0x3f   :  { %v903_v43 = vsel %vm6_vm0, %v3146_v35, %v3145_v34  ;;  %v3147_v44 = vld [vmem:[%s6015_s0 + $0x33] sm:$0x4]   ;;  %v3149_v45 = vld [vmem:[%s6015_s0 + $0x7c] sm:$0x1]   ;;  %v3153_v48 = vld [vmem:[%s6015_s0 + $0x43] sm:$0x1]   ;;  %v869_v50 = vsel %vm14_vm2, %v3140_v40, %v865_v39  ;;  %v886_v51 = vsel %vm10_vm1, %v3143_v42, %v882_v41 }
  0x40   :  { %703 = vrot.lane.b32.xlu0 %v702_v58, %s3693_s7  ;;  %s3696_s7 = smov 100   ;;  %v3150_v46 = vld [vmem:[%s6015_s0 + $0x17b] sm:$0x2]   ;;  %v3154_v49 = vld [vmem:[%s6015_s0 + $0x142] sm:$0x2]   ;;  %v907_v53 = vsel %vm10_vm1, %v3147_v44, %v903_v43  ;;  %s3701_s21 = smov 95  }
  0x41   :  { %724 = vrot.lane.b32.xlu1 %v723_v5, %s3694_s18  ;;  %v3144_v52 = vld [vmem:[%s6015_s0 + $0x16b] sm:$0x8]   ;;  %v3148_v54 = vld [vmem:[%s6015_s0 + $0x132] sm:$0x8]   ;;  %v924_v55 = vsel %vm6_vm0, %v3150_v46, %v3149_v45  ;;  %v3151_v56 = vld [vmem:[%s6015_s0 + $0xfa] sm:$0x4]   ;;  %v945_v57 = vsel %vm6_vm0, %v3154_v49, %v3153_v48 }
  0x42   :  { %v3155_v58 = vld [vmem:[%s6015_s0 + $0xc1] sm:$0x4]   ;;  %v3157_v59 = vld [vmem:[%s6015_s0 + $0xa] sm:$0x1]   ;;  %v890_v61 = vsel %vm14_vm2, %v3144_v52, %v886_v51  ;;  %v3161_v62 = vld [vmem:[%s6015_s0 + $0x51] sm:$0x1]   ;;  %v911_v0 = vsel %vm14_vm2, %v3148_v54, %v907_v53  ;;  %v928_v1 = vsel %vm10_vm1, %v3151_v56, %v924_v55 }
  0x43   :  { %v3158_v60 = vld [vmem:[%s6015_s0 + $0x109] sm:$0x2]   ;;  %v3162_v63 = vld [vmem:[%s6015_s0 + $0x150] sm:$0x2]   ;;  %v3152_v2 = vld [vmem:[%s6015_s0 + $0x1f9] sm:$0x8]   ;;  %v949_v3 = vsel %vm10_vm1, %v3155_v58, %v945_v57 }
  0x44   :  { %745 = vrot.lane.b32.xlu0 %v744_v8, %s3695_s25  ;;  %s3698_s25 = smov 98   ;;  %v3156_v4 = vld [vmem:[%s6015_s0 + $0x1c0] sm:$0x8]   ;;  %v966_v5 = vsel %vm6_vm0, %v3158_v60, %v3157_v59  ;;  %v3159_v6 = vld [vmem:[%s6015_s0 + $0x88] sm:$0x4]   ;;  %v986_v7 = vsel %vm6_vm0, %v3162_v63, %v3161_v62  ;;  %s3703_s10 = smov 93   ;;  %v932_v11 = vsel %vm14_vm2, %v3152_v2, %v928_v1 }
  0x45   :  { %766 = vrot.lane.b32.xlu1 %v765_v19, %s3696_s7  ;;  %v3163_v8 = vld [vmem:[%s6015_s0 + $0xcf] sm:$0x4]   ;;  %v3165_v9 = vld [vmem:[%s6015_s0 + $0x18] sm:$0x1]   ;;  %v3169_v12 = vld [vmem:[%s6015_s0 + $0x5f] sm:$0x1]   ;;  %v953_v14 = vsel %vm14_vm2, %v3156_v4, %v949_v3  ;;  %v970_v15 = vsel %vm10_vm1, %v3159_v6, %v966_v5 }
  0x46   :  { %v3166_v10 = vld [vmem:[%s6015_s0 + $0x117] sm:$0x2]   ;;  %v3170_v13 = vld [vmem:[%s6015_s0 + $0x15e] sm:$0x2]   ;;  %v3160_v16 = vld [vmem:[%s6015_s0 + $0x187] sm:$0x8]   ;;  %v990_v17 = vsel %vm10_vm1, %v3163_v8, %v986_v7 }
  0x47   :  { %v3164_v18 = vld [vmem:[%s6015_s0 + $0x1ce] sm:$0x8]   ;;  %v1007_v19 = vsel %vm6_vm0, %v3166_v10, %v3165_v9  ;;  %v3167_v20 = vld [vmem:[%s6015_s0 + $0x96] sm:$0x4]   ;;  %v1028_v21 = vsel %vm6_vm0, %v3170_v13, %v3169_v12  ;;  %v3173_v23 = vld [vmem:[%s6015_s0 + $0x26] sm:$0x1]   ;;  %v974_v25 = vsel %vm14_vm2, %v3160_v16, %v970_v15 }
  0x48   :  { %787 = vrot.lane.b32.xlu0 %v786_v22, %s3697_s14  ;;  %s3700_s14 = smov 96   ;;  %v3171_v22 = vld [vmem:[%s6015_s0 + $0xdd] sm:$0x4]   ;;  %v3174_v24 = vld [vmem:[%s6015_s0 + $0x125] sm:$0x2]   ;;  %s3705_s28 = smov 91   ;;  %v994_v28 = vsel %vm14_vm2, %v3164_v18, %v990_v17  ;;  %v1011_v29 = vsel %vm10_vm1, %v3167_v20, %v1007_v19 }
  0x49   :  { %807 = vrot.lane.b32.xlu1 %v806_v33, %s3698_s25  ;;  %v3177_v26 = vld [vmem:[%s6015_s0 + $0xed] sm:$0x1]   ;;  %v3168_v30 = vld [vmem:[%s6015_s0 + $0x195] sm:$0x8]   ;;  %v1032_v31 = vsel %vm10_vm1, %v3171_v22, %v1028_v21  ;;  %v3172_v32 = vld [vmem:[%s6015_s0 + $0x1dc] sm:$0x8]   ;;  %v1049_v33 = vsel %vm6_vm0, %v3174_v24, %v3173_v23 }
  0x4a   :  { %v3178_v27 = vld [vmem:[%s6015_s0 + $0x1ec] sm:$0x2]   ;;  %v3175_v34 = vld [vmem:[%s6015_s0 + $0xa4] sm:$0x4]   ;;  %v3181_v37 = vld [vmem:[%s6015_s0 + $0xb4] sm:$0x1]   ;;  %v1015_v39 = vsel %vm14_vm2, %v3168_v30, %v1011_v29  ;;  %v1036_v42 = vsel %vm14_vm2, %v3172_v32, %v1032_v31 }
  0x4b   :  { %v1070_v35 = vsel %vm6_vm0, %v3178_v27, %v3177_v26  ;;  %v3182_v38 = vld [vmem:[%s6015_s0 + $0x1b3] sm:$0x2]   ;;  %s3707_s17 = smov 89   ;;  %v3185_v40 = vld [vmem:[%s6015_s0 + $0x7b] sm:$0x1]   ;;  %v1053_v43 = vsel %vm10_vm1, %v3175_v34, %v1049_v33  ;;  %s3709_s6 = smov 87  }
  0x4c   :  { %828 = vrot.lane.b32.xlu0 %v827_v36, %s3699_s3  ;;  %s3702_s3 = smov 94   ;;  %v3179_v36 = vld [vmem:[%s6015_s0 + $0x6b] sm:$0x4]   ;;  %v3186_v41 = vld [vmem:[%s6015_s0 + $0x17a] sm:$0x2]   ;;  %s3711_s24 = smov 85  }
  0x4d   :  { %849 = vrot.lane.b32.xlu1 %v848_v47, %s3700_s14  ;;  %v3176_v44 = vld [vmem:[%s6015_s0 + $0x1a3] sm:$0x8]   ;;  %v1074_v45 = vsel %vm10_vm1, %v3179_v36, %v1070_v35  ;;  %v3180_v46 = vld [vmem:[%s6015_s0 + $0x16a] sm:$0x8]   ;;  %v1091_v47 = vsel %vm6_vm0, %v3182_v38, %v3181_v37  ;;  %v3183_v48 = vld [vmem:[%s6015_s0 + $0x32] sm:$0x4]   ;;  %v1112_v49 = vsel %vm6_vm0, %v3186_v41, %v3185_v40 }
  0x4e   :  { %v3189_v51 = vld [vmem:[%s6015_s0 + $0x42] sm:$0x1]   ;;  %v1057_v53 = vsel %vm14_vm2, %v3176_v44, %v1053_v43  ;;  %v3193_v54 = vld [vmem:[%s6015_s0 + $0x9] sm:$0x1]   ;;  %v1078_v56 = vsel %vm14_vm2, %v3180_v46, %v1074_v45  ;;  %v1095_v57 = vsel %vm10_vm1, %v3183_v48, %v1091_v47  ;;  %v3184_v58 = vld [vmem:[%s6015_s0 + $0x131] sm:$0x8]  }
  0x4f   :  { %v3190_v52 = vld [vmem:[%s6015_s0 + $0x141] sm:$0x2]   ;;  %v3194_v55 = vld [vmem:[%s6015_s0 + $0x108] sm:$0x2]   ;;  %v3188_v60 = vld [vmem:[%s6015_s0 + $0x1f8] sm:$0x8]   ;;  %v1099_v3 = vsel %vm14_vm2, %v3184_v58, %v1095_v57 }
  0x50   :  { %870 = vrot.lane.b32.xlu0 %v869_v50, %s3701_s21  ;;  %s3704_s21 = smov 92   ;;  %v3187_v50 = vld [vmem:[%s6015_s0 + $0xf9] sm:$0x4]   ;;  %v3191_v62 = vld [vmem:[%s6015_s0 + $0xc0] sm:$0x4]   ;;  %v1154_v63 = vsel %vm6_vm0, %v3194_v55, %v3193_v54  ;;  %s3713_s13 = smov 83  }
  0x51   :  { %891 = vrot.lane.b32.xlu1 %v890_v61, %s3702_s3  ;;  %v1116_v59 = vsel %vm10_vm1, %v3187_v50, %v1112_v49  ;;  %v1133_v61 = vsel %vm6_vm0, %v3190_v52, %v3189_v51  ;;  %v3197_v1 = vld [vmem:[%s6015_s0 + $0x50] sm:$0x1]   ;;  %v3201_v4 = vld [vmem:[%s6015_s0 + $0x17] sm:$0x1]   ;;  %v3192_v8 = vld [vmem:[%s6015_s0 + $0x1bf] sm:$0x8]  }
  0x52   :  { %v3198_v2 = vld [vmem:[%s6015_s0 + $0x14f] sm:$0x2]   ;;  %v3202_v5 = vld [vmem:[%s6015_s0 + $0x116] sm:$0x2]   ;;  %v1120_v6 = vsel %vm14_vm2, %v3188_v60, %v1116_v59  ;;  %v1137_v7 = vsel %vm10_vm1, %v3191_v62, %v1133_v61  ;;  %v3196_v10 = vld [vmem:[%s6015_s0 + $0x186] sm:$0x8]  }
  0x53   :  { %v3199_v12 = vld [vmem:[%s6015_s0 + $0xce] sm:$0x4]   ;;  %v1195_v13 = vsel %vm6_vm0, %v3202_v5, %v3201_v4  ;;  %v3205_v15 = vld [vmem:[%s6015_s0 + $0x5e] sm:$0x1]   ;;  %v1141_v17 = vsel %vm14_vm2, %v3192_v8, %v1137_v7  ;;  %v3209_v18 = vld [vmem:[%s6015_s0 + $0x25] sm:$0x1]  }
  0x54   :  { %912 = vrot.lane.b32.xlu0 %v911_v0, %s3703_s10  ;;  %s3706_s10 = smov 90   ;;  %v3195_v0 = vld [vmem:[%s6015_s0 + $0x87] sm:$0x4]   ;;  %v3206_v16 = vld [vmem:[%s6015_s0 + $0x15d] sm:$0x2]   ;;  %s3715_s2 = smov 81  }
  0x55   :  { %933 = vrot.lane.b32.xlu1 %v932_v11, %s3704_s21  ;;  %v1158_v9 = vsel %vm10_vm1, %v3195_v0, %v1154_v63  ;;  %v1174_v11 = vsel %vm6_vm0, %v3198_v2, %v3197_v1  ;;  %v3210_v19 = vld [vmem:[%s6015_s0 + $0x124] sm:$0x2]   ;;  %v3200_v22 = vld [vmem:[%s6015_s0 + $0x1cd] sm:$0x8]   ;;  %v3204_v24 = vld [vmem:[%s6015_s0 + $0x194] sm:$0x8]  }
  0x56   :  { %v1162_v20 = vsel %vm14_vm2, %v3196_v10, %v1158_v9  ;;  %v1178_v21 = vsel %vm10_vm1, %v3199_v12, %v1174_v11  ;;  %v3207_v26 = vld [vmem:[%s6015_s0 + $0xdc] sm:$0x4]   ;;  %v1237_v27 = vsel %vm6_vm0, %v3210_v19, %v3209_v18  ;;  %v3213_v29 = vld [vmem:[%s6015_s0 + $0xec] sm:$0x1]   ;;  %v3217_v32 = vld [vmem:[%s6015_s0 + $0xb3] sm:$0x1]  }
  0x57   :  { %v3214_v30 = vld [vmem:[%s6015_s0 + $0x1eb] sm:$0x2]   ;;  %v1182_v31 = vsel %vm14_vm2, %v3200_v22, %v1178_v21  ;;  %v3218_v33 = vld [vmem:[%s6015_s0 + $0x1b2] sm:$0x2]   ;;  %v3208_v36 = vld [vmem:[%s6015_s0 + $0x1db] sm:$0x8]  }
  0x58   :  { %954 = vrot.lane.b32.xlu0 %v953_v14, %s3705_s28  ;;  %s3708_s28 = smov 88   ;;  %v3203_v14 = vld [vmem:[%s6015_s0 + $0x95] sm:$0x4]   ;;  %v3212_v38 = vld [vmem:[%s6015_s0 + $0x1a2] sm:$0x8]   ;;  %v1279_v41 = vsel %vm6_vm0, %v3218_v33, %v3217_v32  ;;  %s3717_s20 = smov 79  }
  0x59   :  { %975 = vrot.lane.b32.xlu1 %v974_v25, %s3706_s10  ;;  %v1199_v23 = vsel %vm10_vm1, %v3203_v14, %v1195_v13  ;;  %v1216_v25 = vsel %vm6_vm0, %v3206_v16, %v3205_v15  ;;  %v3215_v40 = vld [vmem:[%s6015_s0 + $0x6a] sm:$0x4]   ;;  %v3221_v43 = vld [vmem:[%s6015_s0 + $0x7a] sm:$0x1]   ;;  %v3225_v46 = vld [vmem:[%s6015_s0 + $0x41] sm:$0x1]  }
  0x5a   :  { %v1203_v34 = vsel %vm14_vm2, %v3204_v24, %v1199_v23  ;;  %v1220_v35 = vsel %vm10_vm1, %v3207_v26, %v1216_v25  ;;  %v3222_v44 = vld [vmem:[%s6015_s0 + $0x179] sm:$0x2]   ;;  %v3226_v47 = vld [vmem:[%s6015_s0 + $0x140] sm:$0x2]   ;;  %v3216_v50 = vld [vmem:[%s6015_s0 + $0x169] sm:$0x8]  }
  0x5b   :  { %v1224_v45 = vsel %vm14_vm2, %v3208_v36, %v1220_v35  ;;  %v3220_v52 = vld [vmem:[%s6015_s0 + $0x130] sm:$0x8]   ;;  %v3223_v54 = vld [vmem:[%s6015_s0 + $0xf8] sm:$0x4]   ;;  %v3227_v57 = vld [vmem:[%s6015_s0 + $0xbf] sm:$0x4]  }
  0x5c   :  { %995 = vrot.lane.b32.xlu0 %v994_v28, %s3707_s17  ;;  %s3710_s17 = smov 86   ;;  %v3211_v28 = vld [vmem:[%s6015_s0 + $0xa3] sm:$0x4]   ;;  %v3224_v55 = vld [vmem:[%s6015_s0 + $0x1f7] sm:$0x8]   ;;  %s3719_s11 = smov 77  }
  0x5d   :  { %1016 = vrot.lane.b32.xlu1 %v1015_v39, %s3708_s28  ;;  %v1241_v37 = vsel %vm10_vm1, %v3211_v28, %v1237_v27  ;;  %v1258_v39 = vsel %vm6_vm0, %v3214_v30, %v3213_v29  ;;  %v3229_v58 = vld [vmem:[%s6015_s0 + $0x8] sm:$0x1]   ;;  %v3228_v61 = vld [vmem:[%s6015_s0 + $0x1be] sm:$0x8]   ;;  %v3233_v62 = vld [vmem:[%s6015_s0 + $0x4f] sm:$0x1]  }
  0x5e   :  { %v1245_v48 = vsel %vm14_vm2, %v3212_v38, %v1241_v37  ;;  %v1262_v49 = vsel %vm10_vm1, %v3215_v40, %v1258_v39  ;;  %v3230_v59 = vld [vmem:[%s6015_s0 + $0x107] sm:$0x2]   ;;  %v3234_v63 = vld [vmem:[%s6015_s0 + $0x14e] sm:$0x2]   ;;  %v3_v4 = vld [vmem:[%s6015_s0] sm:$0x1]  }
  0x5f   :  { %v1266_v60 = vsel %vm14_vm2, %v3216_v50, %v1262_v49  ;;  %v3231_v2 = vld [vmem:[%s6015_s0 + $0x86] sm:$0x4]   ;;  %v3235_v7 = vld [vmem:[%s6015_s0 + $0xcd] sm:$0x4]   ;;  %v2976_v8 = vld [vmem:[%s6015_s0 + $0x17d] sm:$0x8]   ;;  %v1362_v10 = vsel %vm6_vm0, %v3234_v63, %v3233_v62 }
  0x60   :  { %1037 = vrot.lane.b32.xlu0 %v1036_v42, %s3709_s6  ;;  %s3712_s6 = smov 84   ;;  %v3219_v42 = vld [vmem:[%s6015_s0 + $0x31] sm:$0x4]   ;;  %v2974_v9 = vld [vmem:[%s6015_s0 + $0x7f] sm:$0x2]   ;;  %s3720_s30 = smov 76   ;;  %v1366_v22 = vsel %vm10_vm1, %v3235_v7, %v1362_v10 }
  0x61   :  { %1058 = vrot.lane.b32.xlu1 %v1057_v53, %s3710_s17  ;;  %v1283_v51 = vsel %vm10_vm1, %v3219_v42, %v1279_v41  ;;  %v1300_v53 = vsel %vm6_vm0, %v3222_v44, %v3221_v43  ;;  %v3237_v11 = vld [vmem:[%s6015_s0 + $0x16] sm:$0x1]   ;;  %vm16_vm11 = vcmask 72704   ;;  %v7_v13 = vsel %vm6_vm0, %v2974_v9, %v3_v4  ;;  %v3241_v15 = vld [vmem:[%s6015_s0 + $0x5d] sm:$0x1]   ;;  %s3722_s17 = smov 74  }
  0x62   :  { %v1287_v0 = vsel %vm14_vm2, %v3220_v52, %v1283_v51  ;;  %v1304_v1 = vsel %vm10_vm1, %v3223_v54, %v1300_v53  ;;  %v3238_v12 = vld [vmem:[%s6015_s0 + $0x115] sm:$0x2]   ;;  %v3242_v16 = vld [vmem:[%s6015_s0 + $0x15c] sm:$0x2]   ;;  %vm57_vm12 = vcmask 1048568   ;;  %vm140_vm13 = vcmask 1048552  }
  0x63   :  { %v1308_v14 = vsel %vm14_vm2, %v3224_v55, %v1304_v1  ;;  %v3236_v23 = vld [vmem:[%s6015_s0 + $0x1cc] sm:$0x8]   ;;  %v1383_v24 = vsel %vm6_vm0, %v3238_v12, %v3237_v11  ;;  %v3239_v25 = vld [vmem:[%s6015_s0 + $0x94] sm:$0x4]   ;;  %v1404_v26 = vsel %vm6_vm0, %v3242_v16, %v3241_v15  ;;  %v3243_v27 = vld [vmem:[%s6015_s0 + $0xdb] sm:$0x4]  }
  0x64   :  { %1079 = vrot.lane.b32.xlu0 %v1078_v56, %s3711_s24  ;;  %s3714_s24 = smov 82   ;;  %v1321_v56 = vsel %vm6_vm0, %v3226_v47, %v3225_v46  ;;  %v3245_v28 = vld [vmem:[%s6015_s0 + $0x24] sm:$0x1]   ;;  %v3249_v32 = vld [vmem:[%s6015_s0 + $0xeb] sm:$0x1]   ;;  %v1387_v35 = vsel %vm10_vm1, %v3239_v25, %v1383_v24  ;;  %v1408_v37 = vsel %vm10_vm1, %v3243_v27, %v1404_v26  ;;  %vm99_vm14 = vcmask 1048560  }
  0x65   :  { %1100 = vrot.lane.b32.xlu1 %v1099_v3, %s3712_s6  ;;  %v2975_v3 = vld [vmem:[%s6015_s0 + $0xfe] sm:$0x4]   ;;  %v1325_v5 = vsel %vm10_vm1, %v3227_v57, %v1321_v56  ;;  %s3721_s6 = smov 75   ;;  %v3246_v29 = vld [vmem:[%s6015_s0 + $0x123] sm:$0x2]   ;;  %s3726_s26 = smov 70  }
  0x66   :  { %v1329_v18 = vsel %vm14_vm2, %v3228_v61, %v1325_v5  ;;  %v3250_v33 = vld [vmem:[%s6015_s0 + $0x1ea] sm:$0x2]   ;;  %v3240_v36 = vld [vmem:[%s6015_s0 + $0x193] sm:$0x8]   ;;  %v3244_v38 = vld [vmem:[%s6015_s0 + $0x1da] sm:$0x8]   ;;  %v1425_v39 = vsel %vm6_vm0, %v3246_v29, %v3245_v28 }
  0x67   :  { %v3247_v40 = vld [vmem:[%s6015_s0 + $0xa2] sm:$0x4]   ;;  %v1446_v42 = vsel %vm6_vm0, %v3250_v33, %v3249_v32  ;;  %v3251_v43 = vld [vmem:[%s6015_s0 + $0x69] sm:$0x4]   ;;  %v3253_v44 = vld [vmem:[%s6015_s0 + $0xb2] sm:$0x1]   ;;  %v1391_v46 = vsel %vm14_vm2, %v3240_v36, %v1387_v35  ;;  %v1412_v49 = vsel %vm14_vm2, %v3244_v38, %v1408_v37 }
  0x68   :  { %1121 = vrot.lane.b32.xlu0 %v1120_v6, %s3713_s13  ;;  %s3716_s13 = smov 80   ;;  %v1342_v6 = vsel %vm6_vm0, %v3230_v59, %v3229_v58  ;;  %v3257_v47 = vld [vmem:[%s6015_s0 + $0x79] sm:$0x1]   ;;  %v1429_v50 = vsel %vm10_vm1, %v3247_v40, %v1425_v39  ;;  %v3248_v51 = vld [vmem:[%s6015_s0 + $0x1a1] sm:$0x8]   ;;  %v1450_v53 = vsel %vm10_vm1, %v3251_v43, %v1446_v42  ;;  %vm182_vm15 = vcmask 1048544  }
  0x69   :  { %1142 = vrot.lane.b32.xlu1 %v1141_v17, %s3714_s24  ;;  %v11_v17 = vsel %vm10_vm1, %v2975_v3, %v7_v13  ;;  %v1346_v19 = vsel %vm10_vm1, %v3231_v2, %v1342_v6  ;;  %s3723_s24 = smov 73   ;;  %v3252_v54 = vld [vmem:[%s6015_s0 + $0x168] sm:$0x8]   ;;  %v3255_v56 = vld [vmem:[%s6015_s0 + $0x30] sm:$0x4]   ;;  %v1433_v61 = vsel %vm14_vm2, %v3248_v51, %v1429_v50  ;;  %s3731_s9 = smov 65  }
  0x6a   :  { %v15_v21 = vsel %vm14_vm2, %v2976_v8, %v11_v17  ;;  %v3259_v57 = vld [vmem:[%s6015_s0 + $0xf7] sm:$0x4]   ;;  %v3261_v59 = vld [vmem:[%s6015_s0 + $0x40] sm:$0x1]   ;;  %v3265_v62 = vld [vmem:[%s6015_s0 + $0x7] sm:$0x1]  }
  0x6b   :  { %17 = vst.msk [vmem:[#allocation2] ss:$72 sm:$0x3] %vm16_vm11, %v15_v21   ;;  %19 = vst.msk [vmem:[#allocation2 - $0x8f] ss:$72 sm:$0xc] %vm16_vm11, %v15_v21  }
  0x6c   :  { %1163 = vrot.lane.b32.xlu0 %v1162_v20, %s3715_s2  ;;  %s3718_s2 = smov 78   ;;  %v3232_v20 = vld [vmem:[%s6015_s0 + $0x185] sm:$0x8]   ;;  %v3266_v63 = vld [vmem:[%s6015_s0 + $0x106] sm:$0x2]   ;;  %s3732_s22 = smov 64  }
  0x6d   :  { %1183 = vrot.lane.b32.xlu1 %v1182_v31, %s3716_s13  ;;  %v1350_v30 = vsel %vm14_vm2, %v3232_v20, %v1346_v19  ;;  %s3725_s13 = smov 71   ;;  %v3256_v3 = vld [vmem:[%s6015_s0 + $0x12f] sm:$0x8]   ;;  %v3260_v5 = vld [vmem:[%s6015_s0 + $0x1f6] sm:$0x8]   ;;  %v1530_v8 = vsel %vm6_vm0, %v3266_v63, %v3265_v62  ;;  %s3733_s27 = smov 63  }
  0x6e   :  { %v3263_v7 = vld [vmem:[%s6015_s0 + $0xbe] sm:$0x4]   ;;  %v3267_v9 = vld [vmem:[%s6015_s0 + $0x85] sm:$0x4]   ;;  %v3269_v10 = vld [vmem:[%s6015_s0 + $0x4e] sm:$0x1]  }
  0x6f   :  { %v3270_v11 = vld [vmem:[%s6015_s0 + $0x14d] sm:$0x2]   ;;  %v3274_v15 = vld [vmem:[%s6015_s0 + $0x114] sm:$0x2]   ;;  %v1534_v19 = vsel %vm10_vm1, %v3267_v9, %v1530_v8  ;;  %v3268_v20 = vld [vmem:[%s6015_s0 + $0x184] sm:$0x8]  }
  0x70   :  { %1204 = vrot.lane.b32.xlu0 %v1203_v34, %s3717_s20  ;;  %v1370_v34 = vsel %vm14_vm2, %v3236_v23, %v1366_v22  ;;  %s3729_s20 = smov 67   ;;  %v1550_v21 = vsel %vm6_vm0, %v3270_v11, %v3269_v10  ;;  %v3271_v22 = vld [vmem:[%s6015_s0 + $0xcc] sm:$0x4]   ;;  %v3275_v25 = vld [vmem:[%s6015_s0 + $0x93] sm:$0x4]   ;;  %s3735_s16 = smov 61  }
  0x71   :  { %1225 = vrot.lane.b32.xlu1 %v1224_v45, %s3718_s2  ;;  %v3254_v45 = vld [vmem:[%s6015_s0 + $0x1b1] sm:$0x2]   ;;  %s3727_s2 = smov 69   ;;  %v3277_v26 = vld [vmem:[%s6015_s0 + $0x5c] sm:$0x1]   ;;  %v1554_v32 = vsel %vm10_vm1, %v3271_v22, %v1550_v21  ;;  %s3737_s5 = smov 59  }
  0x72   :  { %v1467_v55 = vsel %vm6_vm0, %v3254_v45, %v3253_v44  ;;  %v3278_v27 = vld [vmem:[%s6015_s0 + $0x15b] sm:$0x2]   ;;  %v3281_v29 = vld [vmem:[%s6015_s0 + $0x23] sm:$0x1]   ;;  %v3272_v33 = vld [vmem:[%s6015_s0 + $0x1cb] sm:$0x8]  }
  0x73   :  { %v1471_v2 = vsel %vm10_vm1, %v3255_v56, %v1467_v55  ;;  %v3276_v36 = vld [vmem:[%s6015_s0 + $0x192] sm:$0x8]   ;;  %v1592_v37 = vsel %vm6_vm0, %v3278_v27, %v3277_v26  ;;  %v3279_v38 = vld [vmem:[%s6015_s0 + $0xda] sm:$0x4]   ;;  %v3283_v39 = vld [vmem:[%s6015_s0 + $0xa1] sm:$0x4]   ;;  %v1558_v43 = vsel %vm14_vm2, %v3272_v33, %v1554_v32 }
  0x74   :  { %1246 = vrot.lane.b32.xlu0 %v1245_v48, %s3719_s11  ;;  %v3258_v48 = vld [vmem:[%s6015_s0 + $0x178] sm:$0x2]   ;;  %v1475_v13 = vsel %vm14_vm2, %v3256_v3, %v1471_v2  ;;  %v3286_v42 = vld [vmem:[%s6015_s0 + $0x1e9] sm:$0x2]   ;;  %v3289_v44 = vld [vmem:[%s6015_s0 + $0xb1] sm:$0x1]  }
  0x75   :  { %1267 = vrot.lane.b32.xlu1 %v1266_v60, %s3720_s30  ;;  %v1488_v58 = vsel %vm6_vm0, %v3258_v48, %v3257_v47  ;;  %v3262_v60 = vld [vmem:[%s6015_s0 + $0x13f] sm:$0x2]   ;;  %v3290_v45 = vld [vmem:[%s6015_s0 + $0x1b0] sm:$0x2]   ;;  %v1596_v48 = vsel %vm10_vm1, %v3279_v38, %v1592_v37  ;;  %v3299_v8 = vld [vmem:[%s6015_s0 + $0xbd] sm:$0x4]  }
  0x76   :  { %v1492_v4 = vsel %vm10_vm1, %v3259_v57, %v1488_v58  ;;  %v1509_v6 = vsel %vm6_vm0, %v3262_v60, %v3261_v59  ;;  %v1655_v55 = vsel %vm6_vm0, %v3290_v45, %v3289_v44  ;;  %v3291_v56 = vld [vmem:[%s6015_s0 + $0x2f] sm:$0x4]   ;;  %v3293_v57 = vld [vmem:[%s6015_s0 + $0x78] sm:$0x1]   ;;  %v3297_v60 = vld [vmem:[%s6015_s0 + $0x3f] sm:$0x1]  }
  0x77   :  { %v1496_v16 = vsel %vm14_vm2, %v3260_v5, %v1492_v4  ;;  %v1513_v17 = vsel %vm10_vm1, %v3263_v7, %v1509_v6  ;;  %v3294_v58 = vld [vmem:[%s6015_s0 + $0x177] sm:$0x2]   ;;  %v1659_v3 = vsel %vm10_vm1, %v3291_v56, %v1655_v55  ;;  %v3292_v4 = vld [vmem:[%s6015_s0 + $0x12e] sm:$0x8]   ;;  %v3301_v9 = vld [vmem:[%s6015_s0 + $0x6] sm:$0x1]  }
  0x78   :  { %1288 = vrot.lane.b32.xlu0 %v1287_v0, %s3721_s6  ;;  %s3724_s6 = smov 72   ;;  %v1454_v0 = vsel %vm14_vm2, %v3252_v54, %v1450_v53  ;;  %v3287_v54 = vld [vmem:[%s6015_s0 + $0x68] sm:$0x4]   ;;  %v1676_v5 = vsel %vm6_vm0, %v3294_v58, %v3293_v57  ;;  %v3295_v6 = vld [vmem:[%s6015_s0 + $0xf6] sm:$0x4]   ;;  %vm454_vm11 = vcmask 1015704  }
  0x79   :  { %1309 = vrot.lane.b32.xlu1 %v1308_v14, %s3722_s17  ;;  %v3273_v14 = vld [vmem:[%s6015_s0 + $0x15] sm:$0x1]   ;;  %v3302_v10 = vld [vmem:[%s6015_s0 + $0x105] sm:$0x2]   ;;  %v3310_v26 = vld [vmem:[%s6015_s0 + $0x113] sm:$0x2]  }
  0x7a   :  { %v1571_v24 = vsel %vm6_vm0, %v3274_v15, %v3273_v14  ;;  %v1663_v15 = vsel %vm14_vm2, %v3292_v4, %v1659_v3  ;;  %v1718_v21 = vsel %vm6_vm0, %v3302_v10, %v3301_v9  ;;  %v3303_v22 = vld [vmem:[%s6015_s0 + $0x84] sm:$0x4]   ;;  %s3739_s23 = smov 57   ;;  %v3311_v38 = vld [vmem:[%s6015_s0 + $0x92] sm:$0x4]   ;;  %s3741_s12 = smov 55  }
  0x7b   :  { %v1575_v35 = vsel %vm10_vm1, %v3275_v25, %v1571_v24  ;;  %v3307_v24 = vld [vmem:[%s6015_s0 + $0xcb] sm:$0x4]   ;;  %v3309_v25 = vld [vmem:[%s6015_s0 + $0x14] sm:$0x1]   ;;  %v1722_v32 = vsel %vm10_vm1, %v3303_v22, %v1718_v21  ;;  %v3304_v33 = vld [vmem:[%s6015_s0 + $0x183] sm:$0x8]  }
  0x7c   :  { %1330 = vrot.lane.b32.xlu0 %v1329_v18, %s3723_s24  ;;  %v3264_v18 = vld [vmem:[%s6015_s0 + $0x1bd] sm:$0x8]   ;;  %v1579_v47 = vsel %vm14_vm2, %v3276_v36, %v1575_v35  ;;  %v3308_v36 = vld [vmem:[%s6015_s0 + $0x1ca] sm:$0x8]   ;;  %v1759_v37 = vsel %vm6_vm0, %v3310_v26, %v3309_v25  ;;  %v3321_v44 = vld [vmem:[%s6015_s0 + $0xe9] sm:$0x1]  }
  0x7d   :  { %v51_v31 = vpop.permute.xlu0 %50   ;;  %1351 = vrot.lane.b32.xlu1 %v1350_v30, %s3724_s6  ;;  %v134_v41 = vpop.permute.xlu1 %133   ;;  %v1517_v28 = vsel %vm14_vm2, %v3264_v18, %v1513_v17  ;;  %v3282_v30 = vld [vmem:[%s6015_s0 + $0x122] sm:$0x2]   ;;  %v3296_v17 = vld [vmem:[%s6015_s0 + $0x1f5] sm:$0x8]   ;;  %v3322_v45 = vld [vmem:[%s6015_s0 + $0x1e8] sm:$0x2]  }
  0x7e   :  { %54 = vst.msk [vmem:[#allocation2 + $0x28] sm:$0x3] %vm52_vm10, %v51_v31   ;;  %56 = vst.msk [vmem:[#allocation2 + $0x6e] sm:$0xc] %vm52_vm10, %v51_v31   ;;  %v1613_v40 = vsel %vm6_vm0, %v3282_v30, %v3281_v29  ;;  %vm433_vm10 = vcmask 1023904   ;;  %v1822_v55 = vsel %vm6_vm0, %v3322_v45, %v3321_v44  ;;  %s3743_s30 = smov 53  }
  0x7f   :  { %59 = vst.msk [vmem:[#allocation2 + $0x20] sm:$0x3] %vm57_vm12, %v51_v31   ;;  %61 = vst.msk [vmem:[#allocation2 + $0x66] sm:$0xc] %vm57_vm12, %v51_v31   ;;  %v1538_v31 = vsel %vm14_vm2, %v3268_v20, %v1534_v19  ;;  %v1617_v51 = vsel %vm10_vm1, %v3283_v39, %v1613_v40  ;;  %vm475_vm12 = vcmask 1007504   ;;  %s3745_s19 = smov 51  }
  0x80   :  { %1371 = vrot.lane.b32.xlu0 %v1370_v34, %s3725_s13  ;;  %137 = vst.msk [vmem:[#allocation2 + $0x30] sm:$0x3] %vm135_vm8, %v134_v41   ;;  %139 = vst.msk [vmem:[#allocation2 + $0x76] sm:$0xc] %vm135_vm8, %v134_v41   ;;  %s3728_s13 = smov 68   ;;  %vm371_vm8 = vcmask 1048504  }
  0x81   :  { %142 = vst.msk [vmem:[#allocation2 + $0x28] sm:$0x3] %vm140_vm13, %v134_v41   ;;  %144 = vst.msk [vmem:[#allocation2 + $0x6e] sm:$0xc] %vm140_vm13, %v134_v41   ;;  %v93_v52 = vpop.permute.xlu0 %92   ;;  %1392 = vrot.lane.b32.xlu1 %v1391_v46, %s3726_s26  ;;  %v3285_v41 = vld [vmem:[%s6015_s0 + $0xea] sm:$0x1]  }
  0x82   :  { %96 = vst.msk [vmem:[#allocation2 + $0x8] sm:$0x3] %vm94_vm9, %v93_v52   ;;  %98 = vst.msk [vmem:[#allocation2 + $0x4e] sm:$0xc] %vm94_vm9, %v93_v52   ;;  %v1634_v53 = vsel %vm6_vm0, %v3286_v42, %v3285_v41  ;;  %vm413_vm9 = vcmask 1032104   ;;  %vm496_vm13 = vcmask 999304  }
  0x83   :  { %100 = vst.msk [vmem:[#allocation2] sm:$0x3] %vm99_vm14, %v93_v52   ;;  %102 = vst.msk [vmem:[#allocation2 + $0x46] sm:$0xc] %vm99_vm14, %v93_v52   ;;  %v3284_v52 = vld [vmem:[%s6015_s0 + $0x1a0] sm:$0x8]  }
  0x84   :  { %1413 = vrot.lane.b32.xlu0 %v1412_v49, %s3727_s2  ;;  %s3730_s2 = smov 66   ;;  %v3280_v49 = vld [vmem:[%s6015_s0 + $0x1d9] sm:$0x8]   ;;  %v1621_v63 = vsel %vm14_vm2, %v3284_v52, %v1617_v51  ;;  %v3300_v20 = vld [vmem:[%s6015_s0 + $0x1bc] sm:$0x8]   ;;  %vm517_vm14 = vcmask 991104  }
  0x85   :  { %v176_v1 = vpop.permute.xlu1 %175   ;;  %1434 = vrot.lane.b32.xlu1 %v1433_v61, %s3728_s13  ;;  %v1600_v59 = vsel %vm14_vm2, %v3280_v49, %v1596_v48  ;;  %v3298_v61 = vld [vmem:[%s6015_s0 + $0x13e] sm:$0x2]   ;;  %v3314_v29 = vld [vmem:[%s6015_s0 + $0x15a] sm:$0x2]   ;;  %v3317_v41 = vld [vmem:[%s6015_s0 + $0x22] sm:$0x1]   ;;  %v1763_v48 = vsel %vm10_vm1, %v3311_v38, %v1759_v37 }
  0x86   :  { %179 = vst.msk [vmem:[#allocation2 + $0x10] sm:$0x3] %vm177_vm7, %v176_v1   ;;  %181 = vst.msk [vmem:[#allocation2 + $0x56] sm:$0xc] %vm177_vm7, %v176_v1   ;;  %vm224_vm7 = vcmask 1048536   ;;  %v218_v12 = vpop.permute.xlu0 %217   ;;  %v1697_v7 = vsel %vm6_vm0, %v3298_v61, %v3297_v60  ;;  %s3747_s8 = smov 49  }
  0x87   :  { %184 = vst.msk [vmem:[#allocation2 + $0x8] sm:$0x3] %vm182_vm15, %v176_v1   ;;  %186 = vst.msk [vmem:[#allocation2 + $0x4e] sm:$0xc] %vm182_vm15, %v176_v1   ;;  %v3288_v1 = vld [vmem:[%s6015_s0 + $0x167] sm:$0x8]   ;;  %v1701_v19 = vsel %vm10_vm1, %v3299_v8, %v1697_v7 }
  0x88   :  { %1455 = vrot.lane.b32.xlu0 %v1454_v0, %s3729_s20  ;;  %221 = vst.msk [vmem:[#allocation2 + $0x80] sm:$0x3] %vm173_vm6, %v218_v12   ;;  %223 = vst.msk [vmem:[#allocation2 + $0x36] sm:$0xc] %vm173_vm6, %v218_v12   ;;  %vm266_vm6 = vcmask 1048528   ;;  %v1638_v0 = vsel %vm10_vm1, %v3287_v54, %v1634_v53  ;;  %vm538_vm15 = vcmask 982904  }
  0x89   :  { %226 = vst.msk [vmem:[#allocation2 + $0x30] sm:$0x3] %vm224_vm7, %v218_v12   ;;  %228 = vst.msk [vmem:[#allocation2 + $0x76] sm:$0xc] %vm224_vm7, %v218_v12   ;;  %1476 = vrot.lane.b32.xlu1 %v1475_v13, %s3730_s2  ;;  %v260_v23 = vpop.permute.xlu1 %259   ;;  %v1642_v11 = vsel %vm14_vm2, %v3288_v1, %v1638_v0  ;;  %v3305_v12 = vld [vmem:[%s6015_s0 + $0x4d] sm:$0x1]  }
  0x8a   :  { %263 = vst.msk [vmem:[#allocation2 + $0x60] sm:$0x3] %vm131_vm4, %v260_v23   ;;  %265 = vst.msk [vmem:[#allocation2 + $0x16] sm:$0xc] %vm131_vm4, %v260_v23   ;;  %vm308_vm4 = vcmask 1048520   ;;  %vm559_vm7 = vcmask 974704  }
  0x8b   :  { %268 = vst.msk [vmem:[#allocation2 + $0x10] sm:$0x3] %vm266_vm6, %v260_v23   ;;  %270 = vst.msk [vmem:[#allocation2 + $0x56] sm:$0xc] %vm266_vm6, %v260_v23   ;;  %v3306_v13 = vld [vmem:[%s6015_s0 + $0x14c] sm:$0x2]  }
  0x8c   :  { %1497 = vrot.lane.b32.xlu0 %v1496_v16, %s3731_s9  ;;  %s3734_s9 = smov 62   ;;  %v1680_v16 = vsel %vm10_vm1, %v3295_v6, %v1676_v5  ;;  %v1738_v23 = vsel %vm6_vm0, %v3306_v13, %v3305_v12  ;;  %v3315_v40 = vld [vmem:[%s6015_s0 + $0xd9] sm:$0x4]   ;;  %v3318_v42 = vld [vmem:[%s6015_s0 + $0x121] sm:$0x2]   ;;  %vm580_vm6 = vcmask 966504  }
  0x8d   :  { %1518 = vrot.lane.b32.xlu1 %v1517_v28, %s3732_s22  ;;  %v1684_v27 = vsel %vm14_vm2, %v3296_v17, %v1680_v16  ;;  %v3313_v28 = vld [vmem:[%s6015_s0 + $0x5b] sm:$0x1]   ;;  %v1742_v35 = vsel %vm10_vm1, %v3307_v24, %v1738_v23  ;;  %v3312_v49 = vld [vmem:[%s6015_s0 + $0x191] sm:$0x8]   ;;  %v1801_v53 = vsel %vm6_vm0, %v3318_v42, %v3317_v41  ;;  %v3319_v54 = vld [vmem:[%s6015_s0 + $0xa0] sm:$0x4]  }
  0x8e   :  { %v302_v34 = vpop.permute.xlu0 %301   ;;  %v1780_v39 = vsel %vm6_vm0, %v3314_v29, %v3313_v28  ;;  %v3316_v52 = vld [vmem:[%s6015_s0 + $0x1d8] sm:$0x8]   ;;  %v3323_v56 = vld [vmem:[%s6015_s0 + $0x67] sm:$0x4]   ;;  %v3325_v57 = vld [vmem:[%s6015_s0 + $0xb0] sm:$0x1]   ;;  %v1805_v0 = vsel %vm10_vm1, %v3319_v54, %v1801_v53 }
  0x8f   :  { %305 = vst.msk [vmem:[#allocation2 + $0x40] sm:$0x3] %vm90_vm5, %v302_v34   ;;  %307 = vst.msk [vmem:[#allocation2 + $0x86] sm:$0xc] %vm90_vm5, %v302_v34   ;;  %vm350_vm5 = vcmask 1048512   ;;  %v344_v46 = vpop.permute.xlu1 %343   ;;  %v1784_v51 = vsel %vm10_vm1, %v3315_v40, %v1780_v39  ;;  %v1826_v3 = vsel %vm10_vm1, %v3323_v56, %v1822_v55  ;;  %s3749_s26 = smov 47  }
  0x90   :  { %310 = vst.msk [vmem:[#allocation2 + $0x80] sm:$0x3] %vm308_vm4, %v302_v34   ;;  %312 = vst.msk [vmem:[#allocation2 + $0x36] sm:$0xc] %vm308_vm4, %v302_v34   ;;  %1539 = vrot.lane.b32.xlu0 %v1538_v31, %s3733_s27  ;;  %s3736_s27 = smov 60   ;;  %v1705_v31 = vsel %vm14_vm2, %v3300_v20, %v1701_v19  ;;  %vm601_vm4 = vcmask 958304  }
  0x91   :  { %347 = vst.msk [vmem:[#allocation2 + $0x20] sm:$0x3] %vm48_vm3, %v344_v46   ;;  %349 = vst.msk [vmem:[#allocation2 + $0x66] sm:$0xc] %vm48_vm3, %v344_v46   ;;  %vm392_vm3 = vcmask 1040304   ;;  %1559 = vrot.lane.b32.xlu1 %v1558_v43, %s3734_s9  ;;  %v1726_v43 = vsel %vm14_vm2, %v3304_v33, %v1722_v32  ;;  %s3751_s15 = smov 45  }
  0x92   :  { %v370_v50 = vpop.permute.xlu0 %369   ;;  %352 = vst.msk [vmem:[#allocation2 + $0x60] sm:$0x3] %vm350_vm5, %v344_v46   ;;  %354 = vst.msk [vmem:[#allocation2 + $0x16] sm:$0xc] %vm350_vm5, %v344_v46   ;;  %v3326_v58 = vld [vmem:[%s6015_s0 + $0x1af] sm:$0x2]  }
  0x93   :  { %373 = vst.msk [vmem:[#allocation2 + $0x40] sm:$0x3] %vm371_vm8, %v370_v50   ;;  %375 = vst.msk [vmem:[#allocation2 + $0x86] sm:$0xc] %vm371_vm8, %v370_v50   ;;  %v391_v62 = vpop.permute.xlu1 %390   ;;  %v3329_v60 = vld [vmem:[%s6015_s0 + $0x77] sm:$0x1]   ;;  %v1843_v5 = vsel %vm6_vm0, %v3326_v58, %v3325_v57 }
  0x94   :  { %1580 = vrot.lane.b32.xlu0 %v1579_v47, %s3735_s16  ;;  %394 = vst.msk [vmem:[#allocation2 + $0x20] sm:$0x3] %vm392_vm3, %v391_v62   ;;  %396 = vst.msk [vmem:[#allocation2 + $0x66] sm:$0xc] %vm392_vm3, %v391_v62   ;;  %s3738_s16 = smov 58   ;;  %v1746_v47 = vsel %vm14_vm2, %v3308_v36, %v1742_v35  ;;  %vm621_vm5 = vcmask 950104  }
  0x95   :  { %1601 = vrot.lane.b32.xlu1 %v1600_v59, %s3736_s27  ;;  %v1767_v59 = vsel %vm14_vm2, %v3312_v49, %v1763_v48  ;;  %v3330_v61 = vld [vmem:[%s6015_s0 + $0x176] sm:$0x2]   ;;  %v3320_v1 = vld [vmem:[%s6015_s0 + $0x19f] sm:$0x8]   ;;  %v3324_v4 = vld [vmem:[%s6015_s0 + $0x166] sm:$0x8]  }
  0x96   :  { %v412_v2 = vpop.permute.xlu0 %411   ;;  %v3327_v6 = vld [vmem:[%s6015_s0 + $0x2e] sm:$0x4]   ;;  %v1864_v7 = vsel %vm6_vm0, %v3330_v61, %v3329_v60  ;;  %v3331_v8 = vld [vmem:[%s6015_s0 + $0xf5] sm:$0x4]   ;;  %v3333_v9 = vld [vmem:[%s6015_s0 + $0x3e] sm:$0x1]  }
  0x97   :  { %414 = vst.msk [vmem:[#allocation2] sm:$0x3] %vm413_vm9, %v412_v2   ;;  %416 = vst.msk [vmem:[#allocation2 + $0x46] sm:$0xc] %vm413_vm9, %v412_v2   ;;  %v432_v14 = vpop.permute.xlu1 %431   ;;  %v3334_v10 = vld [vmem:[%s6015_s0 + $0x13d] sm:$0x2]   ;;  %v1847_v16 = vsel %vm10_vm1, %v3327_v6, %v1843_v5  ;;  %v1868_v19 = vsel %vm10_vm1, %v3331_v8, %v1864_v7 }
  0x98   :  { %1622 = vrot.lane.b32.xlu0 %v1621_v63, %s3737_s5  ;;  %435 = vst.msk [vmem:[#allocation2 + $0x28] sm:$0x3] %vm433_vm10, %v432_v14   ;;  %437 = vst.msk [vmem:[#allocation2 + $0x6e] sm:$0xc] %vm433_vm10, %v432_v14   ;;  %s3740_s5 = smov 56   ;;  %v1788_v63 = vsel %vm14_vm2, %v3316_v52, %v1784_v51  ;;  %vm642_vm8 = vcmask 941904   ;;  %v1885_v21 = vsel %vm6_vm0, %v3334_v10, %v3333_v9 }
  0x99   :  { %1643 = vrot.lane.b32.xlu1 %v1642_v11, %s3738_s16  ;;  %v1809_v11 = vsel %vm14_vm2, %v3320_v1, %v1805_v0  ;;  %v3337_v12 = vld [vmem:[%s6015_s0 + $0x5] sm:$0x1]   ;;  %v3328_v17 = vld [vmem:[%s6015_s0 + $0x12d] sm:$0x8]   ;;  %v3332_v20 = vld [vmem:[%s6015_s0 + $0x1f4] sm:$0x8]  }
  0x9a   :  { %v453_v18 = vpop.permute.xlu0 %452   ;;  %v3338_v13 = vld [vmem:[%s6015_s0 + $0x104] sm:$0x2]   ;;  %v3335_v22 = vld [vmem:[%s6015_s0 + $0xbc] sm:$0x4]   ;;  %v3341_v25 = vld [vmem:[%s6015_s0 + $0x4c] sm:$0x1]  }
  0x9b   :  { %456 = vst.msk [vmem:[#allocation2 + $0x8] sm:$0x3] %vm454_vm11, %v453_v18   ;;  %458 = vst.msk [vmem:[#allocation2 + $0x4e] sm:$0xc] %vm454_vm11, %v453_v18   ;;  %v474_v30 = vpop.permute.xlu1 %473   ;;  %v1906_v23 = vsel %vm6_vm0, %v3338_v13, %v3337_v12  ;;  %v3339_v24 = vld [vmem:[%s6015_s0 + $0x83] sm:$0x4]   ;;  %v1889_v32 = vsel %vm10_vm1, %v3335_v22, %v1885_v21 }
  0x9c   :  { %1664 = vrot.lane.b32.xlu0 %v1663_v15, %s3739_s23  ;;  %477 = vst.msk [vmem:[#allocation2 + $0x30] sm:$0x3] %vm475_vm12, %v474_v30   ;;  %479 = vst.msk [vmem:[#allocation2 + $0x76] sm:$0xc] %vm475_vm12, %v474_v30   ;;  %s3742_s23 = smov 54   ;;  %v1830_v15 = vsel %vm14_vm2, %v3324_v4, %v1826_v3  ;;  %vm663_vm3 = vcmask 933704   ;;  %v1910_v35 = vsel %vm10_vm1, %v3339_v24, %v1906_v23 }
  0x9d   :  { %1685 = vrot.lane.b32.xlu1 %v1684_v27, %s3740_s5  ;;  %v3342_v26 = vld [vmem:[%s6015_s0 + $0x14b] sm:$0x2]   ;;  %v1851_v27 = vsel %vm14_vm2, %v3328_v17, %v1847_v16  ;;  %v3345_v28 = vld [vmem:[%s6015_s0 + $0x13] sm:$0x1]   ;;  %v3336_v33 = vld [vmem:[%s6015_s0 + $0x1bb] sm:$0x8]  }
  0x9e   :  { %v495_v34 = vpop.permute.xlu0 %494   ;;  %v3346_v29 = vld [vmem:[%s6015_s0 + $0x112] sm:$0x2]   ;;  %vm684_vm9 = vcmask 925504   ;;  %v3340_v36 = vld [vmem:[%s6015_s0 + $0x182] sm:$0x8]   ;;  %v1926_v37 = vsel %vm6_vm0, %v3342_v26, %v3341_v25  ;;  %vm705_vm10 = vcmask 917304  }
  0x9f   :  { %498 = vst.msk [vmem:[#allocation2 + $0x10] sm:$0x3] %vm496_vm13, %v495_v34   ;;  %500 = vst.msk [vmem:[#allocation2 + $0x56] sm:$0xc] %vm496_vm13, %v495_v34   ;;  %v516_v46 = vpop.permute.xlu1 %515   ;;  %v3343_v38 = vld [vmem:[%s6015_s0 + $0xca] sm:$0x4]   ;;  %v1947_v39 = vsel %vm6_vm0, %v3346_v29, %v3345_v28 }
  0xa0   :  { %1706 = vrot.lane.b32.xlu0 %v1705_v31, %s3741_s12  ;;  %519 = vst.msk [vmem:[#allocation2 + $0x80] sm:$0x3] %vm517_vm14, %v516_v46   ;;  %521 = vst.msk [vmem:[#allocation2 + $0x36] sm:$0xc] %vm517_vm14, %v516_v46   ;;  %s3744_s12 = smov 52   ;;  %v1872_v31 = vsel %vm14_vm2, %v3332_v20, %v1868_v19  ;;  %v1930_v48 = vsel %vm10_vm1, %v3343_v38, %v1926_v37  ;;  %vm726_vm11 = vcmask 909104  }
  0xa1   :  { %1727 = vrot.lane.b32.xlu1 %v1726_v43, %s3742_s23  ;;  %v3347_v40 = vld [vmem:[%s6015_s0 + $0x91] sm:$0x4]   ;;  %v3349_v41 = vld [vmem:[%s6015_s0 + $0x5a] sm:$0x1]   ;;  %v1893_v43 = vsel %vm14_vm2, %v3336_v33, %v1889_v32  ;;  %v3353_v44 = vld [vmem:[%s6015_s0 + $0x21] sm:$0x1]  }
  0xa2   :  { %v537_v50 = vpop.permute.xlu0 %536   ;;  %v3350_v42 = vld [vmem:[%s6015_s0 + $0x159] sm:$0x2]   ;;  %v3354_v45 = vld [vmem:[%s6015_s0 + $0x120] sm:$0x2]   ;;  %v3344_v49 = vld [vmem:[%s6015_s0 + $0x1c9] sm:$0x8]   ;;  %v1951_v51 = vsel %vm10_vm1, %v3347_v40, %v1947_v39 }
  0xa3   :  { %540 = vst.msk [vmem:[#allocation2 + $0x60] sm:$0x3] %vm538_vm15, %v537_v50   ;;  %542 = vst.msk [vmem:[#allocation2 + $0x16] sm:$0xc] %vm538_vm15, %v537_v50   ;;  %v558_v62 = vpop.permute.xlu1 %557   ;;  %v3348_v52 = vld [vmem:[%s6015_s0 + $0x190] sm:$0x8]   ;;  %v1968_v53 = vsel %vm6_vm0, %v3350_v42, %v3349_v41  ;;  %v1989_v55 = vsel %vm6_vm0, %v3354_v45, %v3353_v44 }
  0xa4   :  { %1747 = vrot.lane.b32.xlu0 %v1746_v47, %s3743_s30  ;;  %561 = vst.msk [vmem:[#allocation2 + $0x40] sm:$0x3] %vm559_vm7, %v558_v62   ;;  %563 = vst.msk [vmem:[#allocation2 + $0x86] sm:$0xc] %vm559_vm7, %v558_v62   ;;  %s3746_s30 = smov 50   ;;  %v1914_v47 = vsel %vm14_vm2, %v3340_v36, %v1910_v35  ;;  %vm747_vm12 = vcmask 900904  }
  0xa5   :  { %1768 = vrot.lane.b32.xlu1 %v1767_v59, %s3744_s12  ;;  %v3351_v54 = vld [vmem:[%s6015_s0 + $0xd8] sm:$0x4]   ;;  %v3355_v56 = vld [vmem:[%s6015_s0 + $0x9f] sm:$0x4]   ;;  %v3357_v57 = vld [vmem:[%s6015_s0 + $0xe8] sm:$0x1]   ;;  %v1934_v59 = vsel %vm14_vm2, %v3344_v49, %v1930_v48 }
  0xa6   :  { %v579_v2 = vpop.permute.xlu0 %578   ;;  %v3358_v58 = vld [vmem:[%s6015_s0 + $0x1e7] sm:$0x2]   ;;  %v3361_v60 = vld [vmem:[%s6015_s0 + $0xaf] sm:$0x1]   ;;  %v1972_v0 = vsel %vm10_vm1, %v3351_v54, %v1968_v53  ;;  %v3352_v1 = vld [vmem:[%s6015_s0 + $0x1d7] sm:$0x8]   ;;  %v1993_v3 = vsel %vm10_vm1, %v3355_v56, %v1989_v55 }
  0xa7   :  { %582 = vst.msk [vmem:[#allocation2 + $0x20] sm:$0x3] %vm580_vm6, %v579_v2   ;;  %584 = vst.msk [vmem:[#allocation2 + $0x66] sm:$0xc] %vm580_vm6, %v579_v2   ;;  %v600_v14 = vpop.permute.xlu1 %599   ;;  %v3362_v61 = vld [vmem:[%s6015_s0 + $0x1ae] sm:$0x2]   ;;  %v2010_v5 = vsel %vm6_vm0, %v3358_v58, %v3357_v57 }
  0xa8   :  { %1789 = vrot.lane.b32.xlu0 %v1788_v63, %s3745_s19  ;;  %602 = vst.msk [vmem:[#allocation2] sm:$0x3] %vm601_vm4, %v600_v14   ;;  %604 = vst.msk [vmem:[#allocation2 + $0x46] sm:$0xc] %vm601_vm4, %v600_v14   ;;  %s3748_s19 = smov 48   ;;  %v1955_v63 = vsel %vm14_vm2, %v3348_v52, %v1951_v51  ;;  %vm768_vm13 = vcmask 892704   ;;  %v2031_v7 = vsel %vm6_vm0, %v3362_v61, %v3361_v60 }
  0xa9   :  { %1810 = vrot.lane.b32.xlu1 %v1809_v11, %s3746_s30  ;;  %v3356_v4 = vld [vmem:[%s6015_s0 + $0x19e] sm:$0x8]   ;;  %v3359_v6 = vld [vmem:[%s6015_s0 + $0x66] sm:$0x4]   ;;  %v3363_v8 = vld [vmem:[%s6015_s0 + $0x2d] sm:$0x4]   ;;  %v1976_v11 = vsel %vm14_vm2, %v3352_v1, %v1972_v0 }
  0xaa   :  { %v620_v18 = vpop.permute.xlu0 %619   ;;  %v3365_v9 = vld [vmem:[%s6015_s0 + $0x76] sm:$0x1]   ;;  %s3753_s4 = smov 43   ;;  %vm789_vm14 = vcmask 884504   ;;  %v3369_v12 = vld [vmem:[%s6015_s0 + $0x3d] sm:$0x1]   ;;  %v2014_v16 = vsel %vm10_vm1, %v3359_v6, %v2010_v5  ;;  %v2035_v19 = vsel %vm10_vm1, %v3363_v8, %v2031_v7 }
  0xab   :  { %623 = vst.msk [vmem:[#allocation2 + $0x28] sm:$0x3] %vm621_vm5, %v620_v18   ;;  %625 = vst.msk [vmem:[#allocation2 + $0x6e] sm:$0xc] %vm621_vm5, %v620_v18   ;;  %v641_v30 = vpop.permute.xlu1 %640   ;;  %v3366_v10 = vld [vmem:[%s6015_s0 + $0x175] sm:$0x2]  }
  0xac   :  { %1831 = vrot.lane.b32.xlu0 %v1830_v15, %s3747_s8  ;;  %644 = vst.msk [vmem:[#allocation2 + $0x8] sm:$0x3] %vm642_vm8, %v641_v30   ;;  %646 = vst.msk [vmem:[#allocation2 + $0x4e] sm:$0xc] %vm642_vm8, %v641_v30   ;;  %s3750_s8 = smov 46   ;;  %v1997_v15 = vsel %vm14_vm2, %v3356_v4, %v1993_v3  ;;  %vm809_vm15 = vcmask 876304   ;;  %v2052_v21 = vsel %vm6_vm0, %v3366_v10, %v3365_v9 }
  0xad   :  { %1852 = vrot.lane.b32.xlu1 %v1851_v27, %s3748_s19  ;;  %v3370_v13 = vld [vmem:[%s6015_s0 + $0x13c] sm:$0x2]   ;;  %v3360_v17 = vld [vmem:[%s6015_s0 + $0x165] sm:$0x8]   ;;  %v3364_v20 = vld [vmem:[%s6015_s0 + $0x12c] sm:$0x8]  }
  0xae   :  { %v662_v34 = vpop.permute.xlu0 %661   ;;  %v3367_v22 = vld [vmem:[%s6015_s0 + $0xf4] sm:$0x4]   ;;  %v2073_v23 = vsel %vm6_vm0, %v3370_v13, %v3369_v12  ;;  %v3371_v24 = vld [vmem:[%s6015_s0 + $0xbb] sm:$0x4]   ;;  %v3373_v25 = vld [vmem:[%s6015_s0 + $0x4] sm:$0x1]   ;;  %v2018_v27 = vsel %vm14_vm2, %v3360_v17, %v2014_v16 }
  0xaf   :  { %665 = vst.msk [vmem:[#allocation2 + $0x30] sm:$0x3] %vm663_vm3, %v662_v34   ;;  %667 = vst.msk [vmem:[#allocation2 + $0x76] sm:$0xc] %vm663_vm3, %v662_v34   ;;  %v683_v46 = vpop.permute.xlu1 %682   ;;  %v3374_v26 = vld [vmem:[%s6015_s0 + $0x103] sm:$0x2]   ;;  %v2056_v32 = vsel %vm10_vm1, %v3367_v22, %v2052_v21  ;;  %v2077_v35 = vsel %vm10_vm1, %v3371_v24, %v2073_v23 }
  0xb0   :  { %1873 = vrot.lane.b32.xlu0 %v1872_v31, %s3749_s26  ;;  %686 = vst.msk [vmem:[#allocation2 + $0x10] sm:$0x3] %vm684_vm9, %v683_v46   ;;  %688 = vst.msk [vmem:[#allocation2 + $0x56] sm:$0xc] %vm684_vm9, %v683_v46   ;;  %s3752_s26 = smov 44   ;;  %s3755_s22 = smov 41   ;;  %v2039_v31 = vsel %vm14_vm2, %v3364_v20, %v2035_v19  ;;  %v2094_v37 = vsel %vm6_vm0, %v3374_v26, %v3373_v25 }
  0xb1   :  { %1894 = vrot.lane.b32.xlu1 %v1893_v43, %s3750_s8  ;;  %vm830_vm7 = vcmask 868104   ;;  %v3377_v28 = vld [vmem:[%s6015_s0 + $0x4b] sm:$0x1]   ;;  %v3368_v33 = vld [vmem:[%s6015_s0 + $0x1f3] sm:$0x8]   ;;  %vm851_vm6 = vcmask 859904  }
  0xb2   :  { %v704_v50 = vpop.permute.xlu0 %703   ;;  %v3378_v29 = vld [vmem:[%s6015_s0 + $0x14a] sm:$0x2]   ;;  %v3372_v36 = vld [vmem:[%s6015_s0 + $0x1ba] sm:$0x8]   ;;  %v3375_v38 = vld [vmem:[%s6015_s0 + $0x82] sm:$0x4]   ;;  %v2060_v43 = vsel %vm14_vm2, %v3368_v33, %v2056_v32 }
  0xb3   :  { %707 = vst.msk [vmem:[#allocation2 + $0x80] sm:$0x3] %vm705_vm10, %v704_v50   ;;  %709 = vst.msk [vmem:[#allocation2 + $0x36] sm:$0xc] %vm705_vm10, %v704_v50   ;;  %v725_v62 = vpop.permute.xlu1 %724   ;;  %v2114_v39 = vsel %vm6_vm0, %v3378_v29, %v3377_v28  ;;  %v3379_v40 = vld [vmem:[%s6015_s0 + $0xc9] sm:$0x4]   ;;  %v2098_v48 = vsel %vm10_vm1, %v3375_v38, %v2094_v37 }
  0xb4   :  { %1915 = vrot.lane.b32.xlu0 %v1914_v47, %s3751_s15  ;;  %728 = vst.msk [vmem:[#allocation2 + $0x60] sm:$0x3] %vm726_vm11, %v725_v62   ;;  %730 = vst.msk [vmem:[#allocation2 + $0x16] sm:$0xc] %vm726_vm11, %v725_v62   ;;  %s3754_s15 = smov 42   ;;  %s3757_s11 = smov 39   ;;  %v2081_v47 = vsel %vm14_vm2, %v3372_v36, %v2077_v35  ;;  %v2118_v51 = vsel %vm10_vm1, %v3379_v40, %v2114_v39 }
  0xb5   :  { %1935 = vrot.lane.b32.xlu1 %v1934_v59, %s3752_s26  ;;  %v3381_v41 = vld [vmem:[%s6015_s0 + $0x12] sm:$0x1]   ;;  %vm872_vm4 = vcmask 851704   ;;  %v3385_v44 = vld [vmem:[%s6015_s0 + $0x59] sm:$0x1]   ;;  %vm893_vm5 = vcmask 843504  }
  0xb6   :  { %v746_v2 = vpop.permute.xlu0 %745   ;;  %v3382_v42 = vld [vmem:[%s6015_s0 + $0x111] sm:$0x2]   ;;  %v3386_v45 = vld [vmem:[%s6015_s0 + $0x158] sm:$0x2]   ;;  %v3376_v49 = vld [vmem:[%s6015_s0 + $0x181] sm:$0x8]  }
  0xb7   :  { %749 = vst.msk [vmem:[#allocation2 + $0x40] sm:$0x3] %vm747_vm12, %v746_v2   ;;  %751 = vst.msk [vmem:[#allocation2 + $0x86] sm:$0xc] %vm747_vm12, %v746_v2   ;;  %v767_v14 = vpop.permute.xlu1 %766   ;;  %v3380_v52 = vld [vmem:[%s6015_s0 + $0x1c8] sm:$0x8]   ;;  %v2135_v53 = vsel %vm6_vm0, %v3382_v42, %v3381_v41  ;;  %v2156_v55 = vsel %vm6_vm0, %v3386_v45, %v3385_v44  ;;  %v2102_v59 = vsel %vm14_vm2, %v3376_v49, %v2098_v48 }
  0xb8   :  { %1956 = vrot.lane.b32.xlu0 %v1955_v63, %s3753_s4  ;;  %770 = vst.msk [vmem:[#allocation2 + $0x20] sm:$0x3] %vm768_vm13, %v767_v14   ;;  %772 = vst.msk [vmem:[#allocation2 + $0x66] sm:$0xc] %vm768_vm13, %v767_v14   ;;  %s3756_s4 = smov 40   ;;  %s3759_s29 = smov 37   ;;  %v2122_v63 = vsel %vm14_vm2, %v3380_v52, %v2118_v51 }
  0xb9   :  { %1977 = vrot.lane.b32.xlu1 %v1976_v11, %s3754_s15  ;;  %v3383_v54 = vld [vmem:[%s6015_s0 + $0x90] sm:$0x4]   ;;  %v3387_v56 = vld [vmem:[%s6015_s0 + $0xd7] sm:$0x4]   ;;  %v3389_v57 = vld [vmem:[%s6015_s0 + $0x20] sm:$0x1]  }
  0xba   :  { %v788_v18 = vpop.permute.xlu0 %787   ;;  %v3390_v58 = vld [vmem:[%s6015_s0 + $0x11f] sm:$0x2]   ;;  %vm914_vm8 = vcmask 835304   ;;  %v3393_v60 = vld [vmem:[%s6015_s0 + $0xe7] sm:$0x1]   ;;  %v2139_v0 = vsel %vm10_vm1, %v3383_v54, %v2135_v53  ;;  %vm935_vm3 = vcmask 827104   ;;  %v2160_v3 = vsel %vm10_vm1, %v3387_v56, %v2156_v55 }
  0xbb   :  { %790 = vst.msk [vmem:[#allocation2] sm:$0x3] %vm789_vm14, %v788_v18   ;;  %792 = vst.msk [vmem:[#allocation2 + $0x46] sm:$0xc] %vm789_vm14, %v788_v18   ;;  %v808_v30 = vpop.permute.xlu1 %807   ;;  %v3394_v61 = vld [vmem:[%s6015_s0 + $0x1e6] sm:$0x2]   ;;  %v2177_v5 = vsel %vm6_vm0, %v3390_v58, %v3389_v57 }
  0xbc   :  { %1998 = vrot.lane.b32.xlu0 %v1997_v15, %s3755_s22  ;;  %811 = vst.msk [vmem:[#allocation2 + $0x28] sm:$0x3] %vm809_vm15, %v808_v30   ;;  %813 = vst.msk [vmem:[#allocation2 + $0x6e] sm:$0xc] %vm809_vm15, %v808_v30   ;;  %s3758_s22 = smov 38   ;;  %v2198_v7 = vsel %vm6_vm0, %v3394_v61, %v3393_v60  ;;  %s3761_s18 = smov 35  }
  0xbd   :  { %2019 = vrot.lane.b32.xlu1 %v2018_v27, %s3756_s4  ;;  %v3384_v1 = vld [vmem:[%s6015_s0 + $0x18f] sm:$0x8]   ;;  %v3388_v4 = vld [vmem:[%s6015_s0 + $0x1d6] sm:$0x8]   ;;  %v3391_v6 = vld [vmem:[%s6015_s0 + $0x9e] sm:$0x4]  }
  0xbe   :  { %v829_v34 = vpop.permute.xlu0 %828   ;;  %v3395_v8 = vld [vmem:[%s6015_s0 + $0x65] sm:$0x4]   ;;  %v3397_v9 = vld [vmem:[%s6015_s0 + $0xae] sm:$0x1]   ;;  %vm956_vm9 = vcmask 818904   ;;  %v2143_v11 = vsel %vm14_vm2, %v3384_v1, %v2139_v0  ;;  %v2164_v15 = vsel %vm14_vm2, %v3388_v4, %v2160_v3  ;;  %v2181_v16 = vsel %vm10_vm1, %v3391_v6, %v2177_v5  ;;  %s3763_s7 = smov 33  }
  0xbf   :  { %832 = vst.msk [vmem:[#allocation2 + $0x8] sm:$0x3] %vm830_vm7, %v829_v34   ;;  %834 = vst.msk [vmem:[#allocation2 + $0x4e] sm:$0xc] %vm830_vm7, %v829_v34   ;;  %v850_v46 = vpop.permute.xlu1 %849   ;;  %v3398_v10 = vld [vmem:[%s6015_s0 + $0x1ad] sm:$0x2]   ;;  %v2202_v19 = vsel %vm10_vm1, %v3395_v8, %v2198_v7 }
  0xc0   :  { %2040 = vrot.lane.b32.xlu0 %v2039_v31, %s3757_s11  ;;  %853 = vst.msk [vmem:[#allocation2 + $0x30] sm:$0x3] %vm851_vm6, %v850_v46   ;;  %855 = vst.msk [vmem:[#allocation2 + $0x76] sm:$0xc] %vm851_vm6, %v850_v46   ;;  %s3760_s11 = smov 36   ;;  %vm977_vm10 = vcmask 810704   ;;  %v2219_v21 = vsel %vm6_vm0, %v3398_v10, %v3397_v9 }
  0xc1   :  { %2061 = vrot.lane.b32.xlu1 %v2060_v43, %s3758_s22  ;;  %v3401_v12 = vld [vmem:[%s6015_s0 + $0x75] sm:$0x1]   ;;  %v3392_v17 = vld [vmem:[%s6015_s0 + $0x19d] sm:$0x8]   ;;  %v3396_v20 = vld [vmem:[%s6015_s0 + $0x164] sm:$0x8]  }
  0xc2   :  { %v871_v50 = vpop.permute.xlu0 %870   ;;  %v3402_v13 = vld [vmem:[%s6015_s0 + $0x174] sm:$0x2]   ;;  %v3399_v22 = vld [vmem:[%s6015_s0 + $0x2c] sm:$0x4]   ;;  %v3405_v25 = vld [vmem:[%s6015_s0 + $0x3c] sm:$0x1]   ;;  %v2185_v27 = vsel %vm14_vm2, %v3392_v17, %v2181_v16  ;;  %v2206_v31 = vsel %vm14_vm2, %v3396_v20, %v2202_v19 }
  0xc3   :  { %874 = vst.msk [vmem:[#allocation2 + $0x10] sm:$0x3] %vm872_vm4, %v871_v50   ;;  %876 = vst.msk [vmem:[#allocation2 + $0x56] sm:$0xc] %vm872_vm4, %v871_v50   ;;  %v892_v62 = vpop.permute.xlu1 %891   ;;  %v2240_v23 = vsel %vm6_vm0, %v3402_v13, %v3401_v12  ;;  %v3403_v24 = vld [vmem:[%s6015_s0 + $0xf3] sm:$0x4]   ;;  %v2223_v32 = vsel %vm10_vm1, %v3399_v22, %v2219_v21 }
  0xc4   :  { %2082 = vrot.lane.b32.xlu0 %v2081_v47, %s3759_s29  ;;  %895 = vst.msk [vmem:[#allocation2 + $0x80] sm:$0x3] %vm893_vm5, %v892_v62   ;;  %897 = vst.msk [vmem:[#allocation2 + $0x36] sm:$0xc] %vm893_vm5, %v892_v62   ;;  %s3762_s29 = smov 34   ;;  %vm997_vm11 = vcmask 802504   ;;  %v2244_v35 = vsel %vm10_vm1, %v3403_v24, %v2240_v23 }
  0xc5   :  { %2103 = vrot.lane.b32.xlu1 %v2102_v59, %s3760_s11  ;;  %v3406_v26 = vld [vmem:[%s6015_s0 + $0x13b] sm:$0x2]   ;;  %v3409_v28 = vld [vmem:[%s6015_s0 + $0x3] sm:$0x1]   ;;  %v3400_v33 = vld [vmem:[%s6015_s0 + $0x12b] sm:$0x8]  }
  0xc6   :  { %v913_v2 = vpop.permute.xlu0 %912   ;;  %v3410_v29 = vld [vmem:[%s6015_s0 + $0x102] sm:$0x2]   ;;  %vm1018_vm12 = vcmask 794304   ;;  %v3404_v36 = vld [vmem:[%s6015_s0 + $0x1f2] sm:$0x8]   ;;  %v2261_v37 = vsel %vm6_vm0, %v3406_v26, %v3405_v25  ;;  %s3765_s25 = smov 31   ;;  %v2227_v43 = vsel %vm14_vm2, %v3400_v33, %v2223_v32 }
  0xc7   :  { %916 = vst.msk [vmem:[#allocation2 + $0x60] sm:$0x3] %vm914_vm8, %v913_v2   ;;  %918 = vst.msk [vmem:[#allocation2 + $0x16] sm:$0xc] %vm914_vm8, %v913_v2   ;;  %v934_v14 = vpop.permute.xlu1 %933   ;;  %v3407_v38 = vld [vmem:[%s6015_s0 + $0xba] sm:$0x4]   ;;  %v2282_v39 = vsel %vm6_vm0, %v3410_v29, %v3409_v28  ;;  %v2248_v47 = vsel %vm14_vm2, %v3404_v36, %v2244_v35 }
  0xc8   :  { %2123 = vrot.lane.b32.xlu0 %v2122_v63, %s3761_s18  ;;  %937 = vst.msk [vmem:[#allocation2 + $0x40] sm:$0x3] %vm935_vm3, %v934_v14   ;;  %939 = vst.msk [vmem:[#allocation2 + $0x86] sm:$0xc] %vm935_vm3, %v934_v14   ;;  %s3764_s18 = smov 32   ;;  %vm1039_vm13 = vcmask 786104   ;;  %v2265_v48 = vsel %vm10_vm1, %v3407_v38, %v2261_v37 }
  0xc9   :  { %2144 = vrot.lane.b32.xlu1 %v2143_v11, %s3762_s29  ;;  %v3411_v40 = vld [vmem:[%s6015_s0 + $0x81] sm:$0x4]   ;;  %v3413_v41 = vld [vmem:[%s6015_s0 + $0x4a] sm:$0x1]   ;;  %v3417_v44 = vld [vmem:[%s6015_s0 + $0x11] sm:$0x1]  }
  0xca   :  { %v955_v18 = vpop.permute.xlu0 %954   ;;  %v3414_v42 = vld [vmem:[%s6015_s0 + $0x149] sm:$0x2]   ;;  %v3418_v45 = vld [vmem:[%s6015_s0 + $0x110] sm:$0x2]   ;;  %v3408_v49 = vld [vmem:[%s6015_s0 + $0x1b9] sm:$0x8]   ;;  %v2286_v51 = vsel %vm10_vm1, %v3411_v40, %v2282_v39 }
  0xcb   :  { %958 = vst.msk [vmem:[#allocation2 + $0x20] sm:$0x3] %vm956_vm9, %v955_v18   ;;  %960 = vst.msk [vmem:[#allocation2 + $0x66] sm:$0xc] %vm956_vm9, %v955_v18   ;;  %v976_v30 = vpop.permute.xlu1 %975   ;;  %vm1060_vm14 = vcmask 777904   ;;  %v2302_v53 = vsel %vm6_vm0, %v3414_v42, %v3413_v41  ;;  %v2323_v55 = vsel %vm6_vm0, %v3418_v45, %v3417_v44  ;;  %s3767_s14 = smov 29   ;;  %v2269_v59 = vsel %vm14_vm2, %v3408_v49, %v2265_v48 }
  0xcc   :  { %2165 = vrot.lane.b32.xlu0 %v2164_v15, %s3763_s7  ;;  %978 = vst.msk [vmem:[#allocation2] sm:$0x3] %vm977_vm10, %v976_v30   ;;  %980 = vst.msk [vmem:[#allocation2 + $0x46] sm:$0xc] %vm977_vm10, %v976_v30   ;;  %v3412_v52 = vld [vmem:[%s6015_s0 + $0x180] sm:$0x8]  }
  0xcd   :  { %2186 = vrot.lane.b32.xlu1 %v2185_v27, %s3764_s18  ;;  %v3415_v54 = vld [vmem:[%s6015_s0 + $0xc8] sm:$0x4]   ;;  %s3766_s7 = smov 30   ;;  %v3419_v56 = vld [vmem:[%s6015_s0 + $0x8f] sm:$0x4]   ;;  %vm1081_vm15 = vcmask 769704   ;;  %v2290_v63 = vsel %vm14_vm2, %v3412_v52, %v2286_v51 }
  0xce   :  { %v996_v34 = vpop.permute.xlu0 %995   ;;  %v3421_v57 = vld [vmem:[%s6015_s0 + $0x58] sm:$0x1]   ;;  %v3425_v60 = vld [vmem:[%s6015_s0 + $0x1f] sm:$0x1]   ;;  %v2306_v0 = vsel %vm10_vm1, %v3415_v54, %v2302_v53  ;;  %v3416_v1 = vld [vmem:[%s6015_s0 + $0x1c7] sm:$0x8]   ;;  %v2327_v3 = vsel %vm10_vm1, %v3419_v56, %v2323_v55 }
  0xcf   :  { %999 = vst.msk [vmem:[#allocation2 + $0x28] sm:$0x3] %vm997_vm11, %v996_v34   ;;  %1001 = vst.msk [vmem:[#allocation2 + $0x6e] sm:$0xc] %vm997_vm11, %v996_v34   ;;  %v1017_v46 = vpop.permute.xlu1 %1016   ;;  %v3422_v58 = vld [vmem:[%s6015_s0 + $0x157] sm:$0x2]   ;;  %v2310_v11 = vsel %vm14_vm2, %v3416_v1, %v2306_v0 }
  0xd0   :  { %2207 = vrot.lane.b32.xlu0 %v2206_v31, %s3765_s25  ;;  %1020 = vst.msk [vmem:[#allocation2 + $0x8] sm:$0x3] %vm1018_vm12, %v1017_v46   ;;  %1022 = vst.msk [vmem:[#allocation2 + $0x4e] sm:$0xc] %vm1018_vm12, %v1017_v46   ;;  %v3426_v61 = vld [vmem:[%s6015_s0 + $0x11e] sm:$0x2]   ;;  %v2344_v5 = vsel %vm6_vm0, %v3422_v58, %v3421_v57 }
  0xd1   :  { %2228 = vrot.lane.b32.xlu1 %v2227_v43, %s3766_s7  ;;  %vm1102_vm7 = vcmask 761504   ;;  %v3420_v4 = vld [vmem:[%s6015_s0 + $0x18e] sm:$0x8]   ;;  %v3423_v6 = vld [vmem:[%s6015_s0 + $0xd6] sm:$0x4]   ;;  %s3768_s25 = smov 28   ;;  %v2365_v7 = vsel %vm6_vm0, %v3426_v61, %v3425_v60 }
  0xd2   :  { %v1038_v50 = vpop.permute.xlu0 %1037   ;;  %v3427_v8 = vld [vmem:[%s6015_s0 + $0x9d] sm:$0x4]   ;;  %v3429_v9 = vld [vmem:[%s6015_s0 + $0xe6] sm:$0x1]   ;;  %s3769_s3 = smov 27   ;;  %vm1123_vm6 = vcmask 753304   ;;  %v2331_v15 = vsel %vm14_vm2, %v3420_v4, %v2327_v3  ;;  %v2348_v16 = vsel %vm10_vm1, %v3423_v6, %v2344_v5 }
  0xd3   :  { %1041 = vst.msk [vmem:[#allocation2 + $0x30] sm:$0x3] %vm1039_vm13, %v1038_v50   ;;  %1043 = vst.msk [vmem:[#allocation2 + $0x76] sm:$0xc] %vm1039_vm13, %v1038_v50   ;;  %v1059_v62 = vpop.permute.xlu1 %1058   ;;  %v3430_v10 = vld [vmem:[%s6015_s0 + $0x1e5] sm:$0x2]   ;;  %v2369_v19 = vsel %vm10_vm1, %v3427_v8, %v2365_v7 }
  0xd4   :  { %2249 = vrot.lane.b32.xlu0 %v2248_v47, %s3767_s14  ;;  %1062 = vst.msk [vmem:[#allocation2 + $0x10] sm:$0x3] %vm1060_vm14, %v1059_v62   ;;  %1064 = vst.msk [vmem:[#allocation2 + $0x56] sm:$0xc] %vm1060_vm14, %v1059_v62   ;;  %v3433_v12 = vld [vmem:[%s6015_s0 + $0xad] sm:$0x1]   ;;  %v2386_v21 = vsel %vm6_vm0, %v3430_v10, %v3429_v9 }
  0xd5   :  { %2270 = vrot.lane.b32.xlu1 %v2269_v59, %s3768_s25  ;;  %v3434_v13 = vld [vmem:[%s6015_s0 + $0x1ac] sm:$0x2]   ;;  %vm1144_vm4 = vcmask 745104   ;;  %v3424_v17 = vld [vmem:[%s6015_s0 + $0x1d5] sm:$0x8]   ;;  %s3770_s16 = smov 26  }
  0xd6   :  { %v1080_v2 = vpop.permute.xlu0 %1079   ;;  %v3428_v20 = vld [vmem:[%s6015_s0 + $0x19c] sm:$0x8]   ;;  %v3431_v22 = vld [vmem:[%s6015_s0 + $0x64] sm:$0x4]   ;;  %v3435_v23 = vld [vmem:[%s6015_s0 + $0x2b] sm:$0x4]   ;;  %v2407_v24 = vsel %vm6_vm0, %v3434_v13, %v3433_v12 }
  0xd7   :  { %1083 = vst.msk [vmem:[#allocation2 + $0x80] sm:$0x3] %vm1081_vm15, %v1080_v2   ;;  %1085 = vst.msk [vmem:[#allocation2 + $0x36] sm:$0xc] %vm1081_vm15, %v1080_v2   ;;  %v1101_v14 = vpop.permute.xlu1 %1100   ;;  %v3437_v25 = vld [vmem:[%s6015_s0 + $0x74] sm:$0x1]  }
  0xd8   :  { %2291 = vrot.lane.b32.xlu0 %v2290_v63, %s3769_s3  ;;  %1104 = vst.msk [vmem:[#allocation2 + $0x60] sm:$0x3] %vm1102_vm7, %v1101_v14   ;;  %1106 = vst.msk [vmem:[#allocation2 + $0x16] sm:$0xc] %vm1102_vm7, %v1101_v14   ;;  %v3438_v26 = vld [vmem:[%s6015_s0 + $0x173] sm:$0x2]  }
  0xd9   :  { %2311 = vrot.lane.b32.xlu1 %v2310_v11, %s3770_s16 }
  0xda   :  { %v1122_v18 = vpop.permute.xlu0 %1121  }
  0xdb   :  { %1125 = vst.msk [vmem:[#allocation2 + $0x40] sm:$0x3] %vm1123_vm6, %v1122_v18   ;;  %1127 = vst.msk [vmem:[#allocation2 + $0x86] sm:$0xc] %vm1123_vm6, %v1122_v18  }
  0xdc   :  { %2 = vsyncpa [#allocation1], 0  ;;  %s3771_s21 = smov 25   ;;  %vm1165_vm5 = vcmask 736904   ;;  %v2352_v27 = vsel %vm14_vm2, %v3424_v17, %v2348_v16  ;;  %v3441_v28 = vld [vmem:[%s6015_s0 + $0x3b] sm:$0x1]   ;;  %v1143_v30 = vpop.permute.xlu1 %1142   ;;  %v2373_v31 = vsel %vm14_vm2, %v3428_v20, %v2369_v19  ;;  %v2390_v32 = vsel %vm10_vm1, %v3431_v22, %v2386_v21 }
  0xdd   :  { %2332 = vrot.lane.b32.xlu0 %v2331_v15, %s3771_s21  ;;  %v3442_v29 = vld [vmem:[%s6015_s0 + $0x13a] sm:$0x2]   ;;  %v3432_v33 = vld [vmem:[%s6015_s0 + $0x163] sm:$0x8]   ;;  %1146 = vst.msk [vmem:[#allocation2 + $0x20] sm:$0x3] %vm1144_vm4, %v1143_v30   ;;  %v2411_v35 = vsel %vm10_vm1, %v3435_v23, %v2407_v24  ;;  %v2428_v37 = vsel %vm6_vm0, %v3438_v26, %v3437_v25 }
  0xde   :  { %1148 = vst.msk [vmem:[#allocation2 + $0x66] sm:$0xc] %vm1144_vm4, %v1143_v30   ;;  %v1164_v34 = vpop.permute.xlu0 %1163   ;;  %vm1185_vm8 = vcmask 728704   ;;  %v3436_v36 = vld [vmem:[%s6015_s0 + $0x12a] sm:$0x8]   ;;  %s3772_s3 = smov 24   ;;  %v2449_v39 = vsel %vm6_vm0, %v3442_v29, %v3441_v28  ;;  %v2394_v43 = vsel %vm14_vm2, %v3432_v33, %v2390_v32 }
  0xdf   :  { %v3439_v38 = vld [vmem:[%s6015_s0 + $0xf2] sm:$0x4]   ;;  %1166 = vst.msk [vmem:[#allocation2] sm:$0x3] %vm1165_vm5, %v1164_v34   ;;  %1168 = vst.msk [vmem:[#allocation2 + $0x46] sm:$0xc] %vm1165_vm5, %v1164_v34   ;;  %2353 = vrot.lane.b32.xlu1 %v2352_v27, %s3772_s3  ;;  %v2415_v47 = vsel %vm14_vm2, %v3436_v36, %v2411_v35 }
  0xe0   :  { %v3443_v40 = vld [vmem:[%s6015_s0 + $0xb9] sm:$0x4]   ;;  %v3445_v41 = vld [vmem:[%s6015_s0 + $0x2] sm:$0x1]   ;;  %s3773_s10 = smov 23   ;;  %vm1206_vm3 = vcmask 720504   ;;  %v1184_v46 = vpop.permute.xlu1 %1183   ;;  %v2432_v48 = vsel %vm10_vm1, %v3439_v38, %v2428_v37 }
  0xe1   :  { %v3446_v42 = vld [vmem:[%s6015_s0 + $0x101] sm:$0x2]   ;;  %2374 = vrot.lane.b32.xlu0 %v2373_v31, %s3773_s10  ;;  %v3449_v44 = vld [vmem:[%s6015_s0 + $0x49] sm:$0x1]   ;;  %v3440_v49 = vld [vmem:[%s6015_s0 + $0x1f1] sm:$0x8]   ;;  %v2453_v51 = vsel %vm10_vm1, %v3443_v40, %v2449_v39 }
  0xe2   :  { %v3450_v45 = vld [vmem:[%s6015_s0 + $0x148] sm:$0x2]   ;;  %1187 = vst.msk [vmem:[#allocation2 + $0x28] sm:$0x3] %vm1185_vm8, %v1184_v46   ;;  %1189 = vst.msk [vmem:[#allocation2 + $0x6e] sm:$0xc] %vm1185_vm8, %v1184_v46   ;;  %v1205_v50 = vpop.permute.xlu0 %1204   ;;  %v2470_v53 = vsel %vm6_vm0, %v3446_v42, %v3445_v41  ;;  %v2436_v59 = vsel %vm14_vm2, %v3440_v49, %v2432_v48 }
  0xe3   :  { %vm1227_vm9 = vcmask 712304   ;;  %v3444_v52 = vld [vmem:[%s6015_s0 + $0x1b8] sm:$0x8]   ;;  %v3447_v54 = vld [vmem:[%s6015_s0 + $0x80] sm:$0x4]   ;;  %s3774_s21 = smov 22   ;;  %v2490_v55 = vsel %vm6_vm0, %v3450_v45, %v3449_v44 }
  0xe4   :  { %1208 = vst.msk [vmem:[#allocation2 + $0x8] sm:$0x3] %vm1206_vm3, %v1205_v50   ;;  %1210 = vst.msk [vmem:[#allocation2 + $0x4e] sm:$0xc] %vm1206_vm3, %v1205_v50   ;;  %2395 = vrot.lane.b32.xlu1 %v2394_v43, %s3774_s21  ;;  %v3451_v56 = vld [vmem:[%s6015_s0 + $0xc7] sm:$0x4]   ;;  %v1226_v62 = vpop.permute.xlu1 %1225   ;;  %v2457_v63 = vsel %vm14_vm2, %v3444_v52, %v2453_v51  ;;  %v2474_v0 = vsel %vm10_vm1, %v3447_v54, %v2470_v53 }
  0xe5   :  { %v3453_v57 = vld [vmem:[%s6015_s0 + $0x10] sm:$0x1]   ;;  %s3775_s28 = smov 21   ;;  %vm1248_vm10 = vcmask 704104   ;;  %v3457_v60 = vld [vmem:[%s6015_s0 + $0x57] sm:$0x1]   ;;  %v2494_v3 = vsel %vm10_vm1, %v3451_v56, %v2490_v55 }
  0xe6   :  { %v3454_v58 = vld [vmem:[%s6015_s0 + $0x10f] sm:$0x2]   ;;  %2416 = vrot.lane.b32.xlu0 %v2415_v47, %s3775_s28  ;;  %v3458_v61 = vld [vmem:[%s6015_s0 + $0x156] sm:$0x2]   ;;  %v3448_v1 = vld [vmem:[%s6015_s0 + $0x17f] sm:$0x8]   ;;  %v1247_v2 = vpop.permute.xlu0 %1246  }
  0xe7   :  { %1229 = vst.msk [vmem:[#allocation2 + $0x30] sm:$0x3] %vm1227_vm9, %v1226_v62   ;;  %1231 = vst.msk [vmem:[#allocation2 + $0x76] sm:$0xc] %vm1227_vm9, %v1226_v62   ;;  %vm1269_vm11 = vcmask 695904   ;;  %v2511_v5 = vsel %vm6_vm0, %v3454_v58, %v3453_v57  ;;  %s3776_s10 = smov 20   ;;  %v2532_v7 = vsel %vm6_vm0, %v3458_v61, %v3457_v60  ;;  %v2478_v11 = vsel %vm14_vm2, %v3448_v1, %v2474_v0 }
  0xe8   :  { %v3452_v4 = vld [vmem:[%s6015_s0 + $0x1c6] sm:$0x8]   ;;  %v3455_v6 = vld [vmem:[%s6015_s0 + $0x8e] sm:$0x4]   ;;  %1250 = vst.msk [vmem:[#allocation2 + $0x10] sm:$0x3] %vm1248_vm10, %v1247_v2   ;;  %2437 = vrot.lane.b32.xlu1 %v2436_v59, %s3776_s10  ;;  %v1268_v14 = vpop.permute.xlu1 %1267  }
  0xe9   :  { %1252 = vst.msk [vmem:[#allocation2 + $0x56] sm:$0xc] %vm1248_vm10, %v1247_v2   ;;  %v3459_v8 = vld [vmem:[%s6015_s0 + $0xd5] sm:$0x4]   ;;  %v3461_v9 = vld [vmem:[%s6015_s0 + $0x1e] sm:$0x1]   ;;  %v2498_v15 = vsel %vm14_vm2, %v3452_v4, %v2494_v3  ;;  %v2515_v16 = vsel %vm10_vm1, %v3455_v6, %v2511_v5 }
  0xea   :  { %v3462_v10 = vld [vmem:[%s6015_s0 + $0x11d] sm:$0x2]   ;;  %s3777_s17 = smov 19   ;;  %vm1290_vm12 = vcmask 687704   ;;  %v3465_v12 = vld [vmem:[%s6015_s0 + $0xe5] sm:$0x1]   ;;  %v1289_v18 = vpop.permute.xlu0 %1288   ;;  %v2536_v19 = vsel %vm10_vm1, %v3459_v8, %v2532_v7 }
  0xeb   :  { %2458 = vrot.lane.b32.xlu0 %v2457_v63, %s3777_s17  ;;  %v3466_v13 = vld [vmem:[%s6015_s0 + $0x1e4] sm:$0x2]   ;;  %v3456_v17 = vld [vmem:[%s6015_s0 + $0x18d] sm:$0x8]   ;;  %1271 = vst.msk [vmem:[#allocation2 + $0x80] sm:$0x3] %vm1269_vm11, %v1268_v14   ;;  %v2553_v21 = vsel %vm6_vm0, %v3462_v10, %v3461_v9 }
  0xec   :  { %1273 = vst.msk [vmem:[#allocation2 + $0x36] sm:$0xc] %vm1269_vm11, %v1268_v14   ;;  %vm1311_vm13 = vcmask 679504   ;;  %v3460_v20 = vld [vmem:[%s6015_s0 + $0x1d4] sm:$0x8]   ;;  %s3778_s28 = smov 18   ;;  %v2574_v23 = vsel %vm6_vm0, %v3466_v13, %v3465_v12  ;;  %v2519_v27 = vsel %vm14_vm2, %v3456_v17, %v2515_v16  ;;  %v1310_v30 = vpop.permute.xlu1 %1309  }
  0xed   :  { %v3463_v22 = vld [vmem:[%s6015_s0 + $0x9c] sm:$0x4]   ;;  %1292 = vst.msk [vmem:[#allocation2 + $0x60] sm:$0x3] %vm1290_vm12, %v1289_v18   ;;  %1294 = vst.msk [vmem:[#allocation2 + $0x16] sm:$0xc] %vm1290_vm12, %v1289_v18   ;;  %2479 = vrot.lane.b32.xlu1 %v2478_v11, %s3778_s28  ;;  %v2540_v31 = vsel %vm14_vm2, %v3460_v20, %v2536_v19 }
  0xee   :  { %v3467_v24 = vld [vmem:[%s6015_s0 + $0x63] sm:$0x4]   ;;  %v3469_v25 = vld [vmem:[%s6015_s0 + $0xac] sm:$0x1]   ;;  %s3779_s6 = smov 17   ;;  %vm1332_vm14 = vcmask 671304   ;;  %v2557_v32 = vsel %vm10_vm1, %v3463_v22, %v2553_v21  ;;  %v1331_v34 = vpop.permute.xlu0 %1330  }
  0xef   :  { %v3470_v26 = vld [vmem:[%s6015_s0 + $0x1ab] sm:$0x2]   ;;  %2499 = vrot.lane.b32.xlu0 %v2498_v15, %s3779_s6  ;;  %v3473_v28 = vld [vmem:[%s6015_s0 + $0x73] sm:$0x1]   ;;  %v3464_v33 = vld [vmem:[%s6015_s0 + $0x19b] sm:$0x8]   ;;  %v2578_v35 = vsel %vm10_vm1, %v3467_v24, %v2574_v23 }
  0xf0   :  { %v3474_v29 = vld [vmem:[%s6015_s0 + $0x172] sm:$0x2]   ;;  %1313 = vst.msk [vmem:[#allocation2 + $0x40] sm:$0x3] %vm1311_vm13, %v1310_v30   ;;  %1315 = vst.msk [vmem:[#allocation2 + $0x86] sm:$0xc] %vm1311_vm13, %v1310_v30   ;;  %v2595_v37 = vsel %vm6_vm0, %v3470_v26, %v3469_v25  ;;  %v2561_v43 = vsel %vm14_vm2, %v3464_v33, %v2557_v32  ;;  %v1352_v46 = vpop.permute.xlu1 %1351  }
  0xf1   :  { %vm1353_vm15 = vcmask 663104   ;;  %v3468_v36 = vld [vmem:[%s6015_s0 + $0x162] sm:$0x8]   ;;  %v3471_v38 = vld [vmem:[%s6015_s0 + $0x2a] sm:$0x4]   ;;  %s3780_s17 = smov 16   ;;  %v2616_v39 = vsel %vm6_vm0, %v3474_v29, %v3473_v28 }
  0xf2   :  { %1334 = vst.msk [vmem:[#allocation2 + $0x20] sm:$0x3] %vm1332_vm14, %v1331_v34   ;;  %1336 = vst.msk [vmem:[#allocation2 + $0x66] sm:$0xc] %vm1332_vm14, %v1331_v34   ;;  %2520 = vrot.lane.b32.xlu1 %v2519_v27, %s3780_s17  ;;  %v3475_v40 = vld [vmem:[%s6015_s0 + $0xf1] sm:$0x4]   ;;  %v2582_v47 = vsel %vm14_vm2, %v3468_v36, %v2578_v35  ;;  %v2599_v48 = vsel %vm10_vm1, %v3471_v38, %v2595_v37  ;;  %v1372_v50 = vpop.permute.xlu0 %1371  }
  0xf3   :  { %v3477_v41 = vld [vmem:[%s6015_s0 + $0x3a] sm:$0x1]   ;;  %s3781_s24 = smov 15   ;;  %vm1373_vm7 = vcmask 654904   ;;  %v3481_v44 = vld [vmem:[%s6015_s0 + $0x1] sm:$0x1]   ;;  %v2620_v51 = vsel %vm10_vm1, %v3475_v40, %v2616_v39 }
  0xf4   :  { %v3478_v42 = vld [vmem:[%s6015_s0 + $0x139] sm:$0x2]   ;;  %2541 = vrot.lane.b32.xlu0 %v2540_v31, %s3781_s24  ;;  %v3482_v45 = vld [vmem:[%s6015_s0 + $0x100] sm:$0x2]   ;;  %v3472_v49 = vld [vmem:[%s6015_s0 + $0x129] sm:$0x8]   ;;  %v1393_v62 = vpop.permute.xlu1 %1392  }
  0xf5   :  { %1354 = vst.msk [vmem:[#allocation2] sm:$0x3] %vm1353_vm15, %v1352_v46   ;;  %1356 = vst.msk [vmem:[#allocation2 + $0x46] sm:$0xc] %vm1353_vm15, %v1352_v46   ;;  %vm1394_vm6 = vcmask 646704   ;;  %v2637_v53 = vsel %vm6_vm0, %v3478_v42, %v3477_v41  ;;  %s3782_s6 = smov 14   ;;  %v2658_v55 = vsel %vm6_vm0, %v3482_v45, %v3481_v44  ;;  %v2603_v59 = vsel %vm14_vm2, %v3472_v49, %v2599_v48 }
  0xf6   :  { %v3476_v52 = vld [vmem:[%s6015_s0 + $0x1f0] sm:$0x8]   ;;  %v3479_v54 = vld [vmem:[%s6015_s0 + $0xb8] sm:$0x4]   ;;  %1375 = vst.msk [vmem:[#allocation2 + $0x28] sm:$0x3] %vm1373_vm7, %v1372_v50   ;;  %2562 = vrot.lane.b32.xlu1 %v2561_v43, %s3782_s6  ;;  %v1414_v2 = vpop.permute.xlu0 %1413  }
  0xf7   :  { %1377 = vst.msk [vmem:[#allocation2 + $0x6e] sm:$0xc] %vm1373_vm7, %v1372_v50   ;;  %v3483_v56 = vld [vmem:[%s6015_s0 + $0x7f] sm:$0x4]   ;;  %v3485_v57 = vld [vmem:[%s6015_s0 + $0x48] sm:$0x1]   ;;  %v2624_v63 = vsel %vm14_vm2, %v3476_v52, %v2620_v51  ;;  %v2641_v0 = vsel %vm10_vm1, %v3479_v54, %v2637_v53 }
  0xf8   :  { %v3486_v58 = vld [vmem:[%s6015_s0 + $0x147] sm:$0x2]   ;;  %s3783_s13 = smov 13   ;;  %vm1415_vm4 = vcmask 638504   ;;  %v3489_v60 = vld [vmem:[%s6015_s0 + $0xf] sm:$0x1]   ;;  %v2662_v3 = vsel %vm10_vm1, %v3483_v56, %v2658_v55  ;;  %v1435_v14 = vpop.permute.xlu1 %1434  }
  0xf9   :  { %2583 = vrot.lane.b32.xlu0 %v2582_v47, %s3783_s13  ;;  %v3490_v61 = vld [vmem:[%s6015_s0 + $0x10e] sm:$0x2]   ;;  %v3480_v1 = vld [vmem:[%s6015_s0 + $0x1b7] sm:$0x8]   ;;  %1396 = vst.msk [vmem:[#allocation2 + $0x8] sm:$0x3] %vm1394_vm6, %v1393_v62   ;;  %v2678_v5 = vsel %vm6_vm0, %v3486_v58, %v3485_v57 }
  0xfa   :  { %1398 = vst.msk [vmem:[#allocation2 + $0x4e] sm:$0xc] %vm1394_vm6, %v1393_v62   ;;  %vm1436_vm5 = vcmask 630304   ;;  %v3484_v4 = vld [vmem:[%s6015_s0 + $0x17e] sm:$0x8]   ;;  %s3784_s24 = smov 12   ;;  %v2699_v7 = vsel %vm6_vm0, %v3490_v61, %v3489_v60  ;;  %v2645_v11 = vsel %vm14_vm2, %v3480_v1, %v2641_v0  ;;  %v1456_v18 = vpop.permute.xlu0 %1455  }
  0xfb   :  { %v3487_v6 = vld [vmem:[%s6015_s0 + $0xc6] sm:$0x4]   ;;  %1417 = vst.msk [vmem:[#allocation2 + $0x30] sm:$0x3] %vm1415_vm4, %v1414_v2   ;;  %1419 = vst.msk [vmem:[#allocation2 + $0x76] sm:$0xc] %vm1415_vm4, %v1414_v2   ;;  %2604 = vrot.lane.b32.xlu1 %v2603_v59, %s3784_s24  ;;  %v2666_v15 = vsel %vm14_vm2, %v3484_v4, %v2662_v3 }
  0xfc   :  { %v3491_v8 = vld [vmem:[%s6015_s0 + $0x8d] sm:$0x4]   ;;  %v3493_v9 = vld [vmem:[%s6015_s0 + $0x56] sm:$0x1]   ;;  %s3785_s2 = smov 11   ;;  %vm1457_vm8 = vcmask 622104   ;;  %v2682_v16 = vsel %vm10_vm1, %v3487_v6, %v2678_v5  ;;  %v1477_v30 = vpop.permute.xlu1 %1476  }
  0xfd   :  { %v3494_v10 = vld [vmem:[%s6015_s0 + $0x155] sm:$0x2]   ;;  %2625 = vrot.lane.b32.xlu0 %v2624_v63, %s3785_s2  ;;  %v3497_v12 = vld [vmem:[%s6015_s0 + $0x1d] sm:$0x1]   ;;  %v3488_v17 = vld [vmem:[%s6015_s0 + $0x1c5] sm:$0x8]   ;;  %v2703_v19 = vsel %vm10_vm1, %v3491_v8, %v2699_v7 }
  0xfe   :  { %v3498_v13 = vld [vmem:[%s6015_s0 + $0x11c] sm:$0x2]   ;;  %1438 = vst.msk [vmem:[#allocation2 + $0x10] sm:$0x3] %vm1436_vm5, %v1435_v14   ;;  %1440 = vst.msk [vmem:[#allocation2 + $0x56] sm:$0xc] %vm1436_vm5, %v1435_v14   ;;  %v2720_v21 = vsel %vm6_vm0, %v3494_v10, %v3493_v9  ;;  %v2686_v27 = vsel %vm14_vm2, %v3488_v17, %v2682_v16  ;;  %v1498_v34 = vpop.permute.xlu0 %1497  }
  0xff   :  { %vm1478_vm3 = vcmask 613904   ;;  %v3492_v20 = vld [vmem:[%s6015_s0 + $0x18c] sm:$0x8]   ;;  %v3495_v22 = vld [vmem:[%s6015_s0 + $0xd4] sm:$0x4]   ;;  %s3786_s13 = smov 10   ;;  %v2741_v23 = vsel %vm6_vm0, %v3498_v13, %v3497_v12 }
 0x100   :  { %1459 = vst.msk [vmem:[#allocation2 + $0x80] sm:$0x3] %vm1457_vm8, %v1456_v18   ;;  %1461 = vst.msk [vmem:[#allocation2 + $0x36] sm:$0xc] %vm1457_vm8, %v1456_v18   ;;  %2646 = vrot.lane.b32.xlu1 %v2645_v11, %s3786_s13  ;;  %v3499_v24 = vld [vmem:[%s6015_s0 + $0x9b] sm:$0x4]   ;;  %v2707_v31 = vsel %vm14_vm2, %v3492_v20, %v2703_v19  ;;  %v2724_v32 = vsel %vm10_vm1, %v3495_v22, %v2720_v21  ;;  %v1519_v46 = vpop.permute.xlu1 %1518  }
 0x101   :  { %v3501_v25 = vld [vmem:[%s6015_s0 + $0xe4] sm:$0x1]   ;;  %s3787_s20 = smov 9   ;;  %vm1499_vm9 = vcmask 605704   ;;  %v3505_v28 = vld [vmem:[%s6015_s0 + $0xab] sm:$0x1]   ;;  %v2745_v35 = vsel %vm10_vm1, %v3499_v24, %v2741_v23 }
 0x102   :  { %v3502_v26 = vld [vmem:[%s6015_s0 + $0x1e3] sm:$0x2]   ;;  %2667 = vrot.lane.b32.xlu0 %v2666_v15, %s3787_s20  ;;  %v3506_v29 = vld [vmem:[%s6015_s0 + $0x1aa] sm:$0x2]   ;;  %v3496_v33 = vld [vmem:[%s6015_s0 + $0x1d3] sm:$0x8]   ;;  %v1540_v50 = vpop.permute.xlu0 %1539  }
 0x103   :  { %1480 = vst.msk [vmem:[#allocation2 + $0x60] sm:$0x3] %vm1478_vm3, %v1477_v30   ;;  %1482 = vst.msk [vmem:[#allocation2 + $0x16] sm:$0xc] %vm1478_vm3, %v1477_v30   ;;  %vm1520_vm10 = vcmask 597504   ;;  %v2762_v37 = vsel %vm6_vm0, %v3502_v26, %v3501_v25  ;;  %s3788_s2 = smov 8   ;;  %v2783_v39 = vsel %vm6_vm0, %v3506_v29, %v3505_v28  ;;  %v2728_v43 = vsel %vm14_vm2, %v3496_v33, %v2724_v32 }
 0x104   :  { %v3500_v36 = vld [vmem:[%s6015_s0 + $0x19a] sm:$0x8]   ;;  %v3503_v38 = vld [vmem:[%s6015_s0 + $0x62] sm:$0x4]   ;;  %1501 = vst.msk [vmem:[#allocation2 + $0x40] sm:$0x3] %vm1499_vm9, %v1498_v34   ;;  %2687 = vrot.lane.b32.xlu1 %v2686_v27, %s3788_s2  ;;  %v1560_v58 = vpop.permute.xlu1 %1559  }
 0x105   :  { %1503 = vst.msk [vmem:[#allocation2 + $0x86] sm:$0xc] %vm1499_vm9, %v1498_v34   ;;  %v3507_v40 = vld [vmem:[%s6015_s0 + $0x29] sm:$0x4]   ;;  %v3509_v41 = vld [vmem:[%s6015_s0 + $0x72] sm:$0x1]   ;;  %v2749_v47 = vsel %vm14_vm2, %v3500_v36, %v2745_v35  ;;  %v2766_v48 = vsel %vm10_vm1, %v3503_v38, %v2762_v37 }
 0x106   :  { %v3510_v42 = vld [vmem:[%s6015_s0 + $0x171] sm:$0x2]   ;;  %s3789_s9 = smov 7   ;;  %vm1541_vm11 = vcmask 589304   ;;  %v3513_v44 = vld [vmem:[%s6015_s0 + $0x39] sm:$0x1]   ;;  %v2787_v51 = vsel %vm10_vm1, %v3507_v40, %v2783_v39  ;;  %v1581_v62 = vpop.permute.xlu0 %1580  }
 0x107   :  { %2708 = vrot.lane.b32.xlu0 %v2707_v31, %s3789_s9  ;;  %v3514_v45 = vld [vmem:[%s6015_s0 + $0x138] sm:$0x2]   ;;  %v3504_v49 = vld [vmem:[%s6015_s0 + $0x161] sm:$0x8]   ;;  %1522 = vst.msk [vmem:[#allocation2 + $0x20] sm:$0x3] %vm1520_vm10, %v1519_v46   ;;  %v2804_v53 = vsel %vm6_vm0, %v3510_v42, %v3509_v41 }
 0x108   :  { %1524 = vst.msk [vmem:[#allocation2 + $0x66] sm:$0xc] %vm1520_vm10, %v1519_v46   ;;  %v3508_v52 = vld [vmem:[%s6015_s0 + $0x128] sm:$0x8]   ;;  %v3511_v54 = vld [vmem:[%s6015_s0 + $0xf0] sm:$0x4]   ;;  %v2825_v55 = vsel %vm6_vm0, %v3514_v45, %v3513_v44  ;;  %v2770_v57 = vsel %vm14_vm2, %v3504_v49, %v2766_v48  ;;  %v1602_v2 = vpop.permute.xlu1 %1601  }
 0x109   :  { %1542 = vst.msk [vmem:[#allocation2] sm:$0x3] %vm1541_vm11, %v1540_v50   ;;  %1544 = vst.msk [vmem:[#allocation2 + $0x46] sm:$0xc] %vm1541_vm11, %v1540_v50   ;;  %s3790_s20 = smov 6   ;;  %vm1561_vm12 = vcmask 581104   ;;  %v2791_v59 = vsel %vm14_vm2, %v3508_v52, %v2787_v51  ;;  %v2808_v60 = vsel %vm10_vm1, %v3511_v54, %v2804_v53 }
 0x10a   :  { %2729 = vrot.lane.b32.xlu1 %v2728_v43, %s3790_s20  ;;  %v3515_v56 = vld [vmem:[%s6015_s0 + $0xb7] sm:$0x4]   ;;  %s3791_s23 = smov 5   ;;  %vm1582_vm0 = vcmask 572904   ;;  %v3512_v61 = vld [vmem:[%s6015_s0 + $0x1ef] sm:$0x8]   ;;  %v1623_v4 = vpop.permute.xlu0 %1622  }
 0x10b   :  { %2750 = vrot.lane.b32.xlu0 %v2749_v47, %s3791_s23  ;;  %1563 = vst.msk [vmem:[#allocation2 + $0x28] sm:$0x3] %vm1561_vm12, %v1560_v58   ;;  %1565 = vst.msk [vmem:[#allocation2 + $0x6e] sm:$0xc] %vm1561_vm12, %v1560_v58   ;;  %v2829_v63 = vsel %vm10_vm1, %v3515_v56, %v2825_v55  ;;  %v3516_v0 = vld [vmem:[%s6015_s0 + $0x1b6] sm:$0x8]   ;;  %v2812_v1 = vsel %vm14_vm2, %v3512_v61, %v2808_v60 }
 0x10c   :  { %1584 = vst.msk [vmem:[#allocation2 + $0x8] sm:$0x3] %vm1582_vm0, %v1581_v62   ;;  %1586 = vst.msk [vmem:[#allocation2 + $0x4e] sm:$0xc] %vm1582_vm0, %v1581_v62   ;;  %s3792_s0 = smov 4   ;;  %vm1603_vm1 = vcmask 564704   ;;  %v2833_v3 = vsel %vm14_vm2, %v3516_v0, %v2829_v63  ;;  %v1644_v5 = vpop.permute.xlu1 %1643  }
 0x10d   :  { %s3793_s28 = smov 3   ;;  %vm1624_vm13 = vcmask 556504   ;;  %1605 = vst.msk [vmem:[#allocation2 + $0x30] sm:$0x3] %vm1603_vm1, %v1602_v2   ;;  %1607 = vst.msk [vmem:[#allocation2 + $0x76] sm:$0xc] %vm1603_vm1, %v1602_v2  }
 0x10e   :  { %2771 = vrot.lane.b32.xlu1 %v2770_v57, %s3792_s0  ;;  %1626 = vst.msk [vmem:[#allocation2 + $0x10] sm:$0x3] %vm1624_vm13, %v1623_v4   ;;  %1628 = vst.msk [vmem:[#allocation2 + $0x56] sm:$0xc] %vm1624_vm13, %v1623_v4   ;;  %s3794_s29 = smov 2   ;;  %vm1645_vm2 = vcmask 548304   ;;  %v1665_v6 = vpop.permute.xlu0 %1664  }
 0x10f   :  { %2792 = vrot.lane.b32.xlu0 %v2791_v59, %s3793_s28  ;;  %s3795_s30 = smov 1   ;;  %vm1666_vm14 = vcmask 540104   ;;  %1647 = vst.msk [vmem:[#allocation2 + $0x80] sm:$0x3] %vm1645_vm2, %v1644_v5   ;;  %1649 = vst.msk [vmem:[#allocation2 + $0x36] sm:$0xc] %vm1645_vm2, %v1644_v5  }
 0x110   :  { %1668 = vst.msk [vmem:[#allocation2 + $0x60] sm:$0x3] %vm1666_vm14, %v1665_v6   ;;  %1670 = vst.msk [vmem:[#allocation2 + $0x16] sm:$0xc] %vm1666_vm14, %v1665_v6   ;;  %vm1687_vm15 = vcmask 531904   ;;  %vm1708_vm7 = vcmask 523704   ;;  %v1686_v7 = vpop.permute.xlu1 %1685  }
 0x111   :  { %1689 = vst.msk [vmem:[#allocation2 + $0x40] sm:$0x3] %vm1687_vm15, %v1686_v7   ;;  %1691 = vst.msk [vmem:[#allocation2 + $0x86] sm:$0xc] %vm1687_vm15, %v1686_v7   ;;  %vm1729_vm6 = vcmask 515504   ;;  %vm1749_vm4 = vcmask 507304  }
 0x112   :  { %2813 = vrot.lane.b32.xlu1 %v2812_v1, %s3794_s29  ;;  %v1707_v8 = vpop.permute.xlu0 %1706   ;;  %vm1770_vm5 = vcmask 499104   ;;  %vm1791_vm8 = vcmask 490904   ;;  %vm1812_vm3 = vcmask 482704   ;;  %vm1833_vm9 = vcmask 474504   ;;  %s3796_s2 = smov [#allocation0]  }
 0x113   :  { %2834 = vrot.lane.b32.xlu0 %v2833_v3, %s3795_s30  ;;  %1710 = vst.msk [vmem:[#allocation2 + $0x20] sm:$0x3] %vm1708_vm7, %v1707_v8   ;;  %1712 = vst.msk [vmem:[#allocation2 + $0x66] sm:$0xc] %vm1708_vm7, %v1707_v8   ;;  %vm1854_vm10 = vcmask 466304   ;;  %vm1875_vm11 = vcmask 458104  }
 0x114   :  { %v1728_v9 = vpop.permute.xlu1 %1727   ;;  %vm1896_vm12 = vcmask 449904   ;;  %vm1917_vm0 = vcmask 441704   ;;  %vm1937_vm1 = vcmask 433504   ;;  %vm1958_vm13 = vcmask 425304   ;;  %s2952_s3 = sshll.u32 %s3796_s2, 4  ;;  %s2953_s3 = int_to_ptr.vmem [resolvable:$true] %s2952_s3 }
 0x115   :  { %1730 = vst.msk [vmem:[#allocation2] sm:$0x3] %vm1729_vm6, %v1728_v9   ;;  %1732 = vst.msk [vmem:[#allocation2 + $0x46] sm:$0xc] %vm1729_vm6, %v1728_v9   ;;  %vm1979_vm2 = vcmask 417104   ;;  %vm2000_vm14 = vcmask 408904   ;;  %p3650_p1 = scmp.lt.s32.totalorder %s2953_s3, %s2953_s3 }
 0x116   :  { %v1748_v10 = vpop.permute.xlu0 %1747   ;;  %vm2021_vm15 = vcmask 400704   ;;  %vm2042_vm7 = vcmask 392504   ;;  %vm2063_vm6 = vcmask 384304   ;;  %s3645_s4 = scalar_lea.vmem %s2953_s3, 576 }
 0x117   :  { %1751 = vst.msk [vmem:[#allocation2 + $0x28] sm:$0x3] %vm1749_vm4, %v1748_v10   ;;  %1753 = vst.msk [vmem:[#allocation2 + $0x6e] sm:$0xc] %vm1749_vm4, %v1748_v10   ;;  %vm2084_vm4 = vcmask 376104   ;;  %p3646_p0 = scmp.ne.s32.totalorder %s2953_s3, %s3645_s4  ;;  %p3651_p2 = scmp.lt.s32.totalorder %s3645_s4, %s3645_s4 }
 0x118   :  { %v1769_v11 = vpop.permute.xlu1 %1768  }
 0x119   :  { %1772 = vst.msk [vmem:[#allocation2 + $0x8] sm:$0x3] %vm1770_vm5, %v1769_v11   ;;  %1774 = vst.msk [vmem:[#allocation2 + $0x4e] sm:$0xc] %vm1770_vm5, %v1769_v11   ;;  %vm2105_vm5 = vcmask 367904   ;;  %p3652_p3 = por %p3651_p2, %p3650_p1 }
 0x11a   :  { %v1790_v12 = vpop.permute.xlu0 %1789  }
 0x11b   :  { %1793 = vst.msk [vmem:[#allocation2 + $0x30] sm:$0x3] %vm1791_vm8, %v1790_v12   ;;  %1795 = vst.msk [vmem:[#allocation2 + $0x76] sm:$0xc] %vm1791_vm8, %v1790_v12   ;;  %vm2125_vm8 = vcmask 359704   ;;  %p3653_p4 = pnand %p3652_p3, %p3646_p0 }
 0x11c   :  { %v1811_v13 = vpop.permute.xlu1 %1810  }
 0x11d   :  { %1814 = vst.msk [vmem:[#allocation2 + $0x10] sm:$0x3] %vm1812_vm3, %v1811_v13   ;;  %1816 = vst.msk [vmem:[#allocation2 + $0x56] sm:$0xc] %vm1812_vm3, %v1811_v13   ;;  %vm2146_vm3 = vcmask 351504  }
 0x11e   :  { %v1832_v14 = vpop.permute.xlu0 %1831  }
 0x11f   :  { %1835 = vst.msk [vmem:[#allocation2 + $0x80] sm:$0x3] %vm1833_vm9, %v1832_v14   ;;  %1837 = vst.msk [vmem:[#allocation2 + $0x36] sm:$0xc] %vm1833_vm9, %v1832_v14   ;;  %vm2167_vm9 = vcmask 343304  }
 0x120   :  { %v1853_v15 = vpop.permute.xlu1 %1852  }
 0x121   :  { %1856 = vst.msk [vmem:[#allocation2 + $0x60] sm:$0x3] %vm1854_vm10, %v1853_v15   ;;  %1858 = vst.msk [vmem:[#allocation2 + $0x16] sm:$0xc] %vm1854_vm10, %v1853_v15   ;;  %vm2188_vm10 = vcmask 335104  }
 0x122   :  { %v1874_v16 = vpop.permute.xlu0 %1873  }
 0x123   :  { %1877 = vst.msk [vmem:[#allocation2 + $0x40] sm:$0x3] %vm1875_vm11, %v1874_v16   ;;  %1879 = vst.msk [vmem:[#allocation2 + $0x86] sm:$0xc] %vm1875_vm11, %v1874_v16   ;;  %vm2209_vm11 = vcmask 326904  }
 0x124   :  { %v1895_v17 = vpop.permute.xlu1 %1894  }
 0x125   :  { %1898 = vst.msk [vmem:[#allocation2 + $0x20] sm:$0x3] %vm1896_vm12, %v1895_v17   ;;  %1900 = vst.msk [vmem:[#allocation2 + $0x66] sm:$0xc] %vm1896_vm12, %v1895_v17   ;;  %vm2230_vm12 = vcmask 318704  }
 0x126   :  { %v1916_v18 = vpop.permute.xlu0 %1915  }
 0x127   :  { %1918 = vst.msk [vmem:[#allocation2] sm:$0x3] %vm1917_vm0, %v1916_v18   ;;  %1920 = vst.msk [vmem:[#allocation2 + $0x46] sm:$0xc] %vm1917_vm0, %v1916_v18   ;;  %vm2251_vm0 = vcmask 310504  }
 0x128   :  { %v1936_v19 = vpop.permute.xlu1 %1935  }
 0x129   :  { %1939 = vst.msk [vmem:[#allocation2 + $0x28] sm:$0x3] %vm1937_vm1, %v1936_v19   ;;  %1941 = vst.msk [vmem:[#allocation2 + $0x6e] sm:$0xc] %vm1937_vm1, %v1936_v19   ;;  %vm2272_vm1 = vcmask 302304  }
 0x12a   :  { %v1957_v20 = vpop.permute.xlu0 %1956  }
 0x12b   :  { %1960 = vst.msk [vmem:[#allocation2 + $0x8] sm:$0x3] %vm1958_vm13, %v1957_v20   ;;  %1962 = vst.msk [vmem:[#allocation2 + $0x4e] sm:$0xc] %vm1958_vm13, %v1957_v20   ;;  %vm2293_vm13 = vcmask 294104  }
 0x12c   :  { %v1978_v21 = vpop.permute.xlu1 %1977  }
 0x12d   :  { %1981 = vst.msk [vmem:[#allocation2 + $0x30] sm:$0x3] %vm1979_vm2, %v1978_v21   ;;  %1983 = vst.msk [vmem:[#allocation2 + $0x76] sm:$0xc] %vm1979_vm2, %v1978_v21   ;;  %vm2313_vm2 = vcmask 285904  }
 0x12e   :  { %v1999_v22 = vpop.permute.xlu0 %1998  }
 0x12f   :  { %2002 = vst.msk [vmem:[#allocation2 + $0x10] sm:$0x3] %vm2000_vm14, %v1999_v22   ;;  %2004 = vst.msk [vmem:[#allocation2 + $0x56] sm:$0xc] %vm2000_vm14, %v1999_v22   ;;  %vm2334_vm14 = vcmask 277704  }
 0x130   :  { %v2020_v23 = vpop.permute.xlu1 %2019  }
 0x131   :  { %2023 = vst.msk [vmem:[#allocation2 + $0x80] sm:$0x3] %vm2021_vm15, %v2020_v23   ;;  %2025 = vst.msk [vmem:[#allocation2 + $0x36] sm:$0xc] %vm2021_vm15, %v2020_v23   ;;  %vm2355_vm15 = vcmask 269504  }
 0x132   :  { %v2041_v24 = vpop.permute.xlu0 %2040  }
 0x133   :  { %2044 = vst.msk [vmem:[#allocation2 + $0x60] sm:$0x3] %vm2042_vm7, %v2041_v24   ;;  %2046 = vst.msk [vmem:[#allocation2 + $0x16] sm:$0xc] %vm2042_vm7, %v2041_v24   ;;  %vm2376_vm7 = vcmask 261304  }
 0x134   :  { %v2062_v25 = vpop.permute.xlu1 %2061  }
 0x135   :  { %2065 = vst.msk [vmem:[#allocation2 + $0x40] sm:$0x3] %vm2063_vm6, %v2062_v25   ;;  %2067 = vst.msk [vmem:[#allocation2 + $0x86] sm:$0xc] %vm2063_vm6, %v2062_v25   ;;  %vm2397_vm6 = vcmask 253104  }
 0x136   :  { %v2083_v26 = vpop.permute.xlu0 %2082  }
 0x137   :  { %2086 = vst.msk [vmem:[#allocation2 + $0x20] sm:$0x3] %vm2084_vm4, %v2083_v26   ;;  %2088 = vst.msk [vmem:[#allocation2 + $0x66] sm:$0xc] %vm2084_vm4, %v2083_v26   ;;  %vm2418_vm4 = vcmask 244904  }
 0x138   :  { %v2104_v27 = vpop.permute.xlu1 %2103  }
 0x139   :  { %2106 = vst.msk [vmem:[#allocation2] sm:$0x3] %vm2105_vm5, %v2104_v27   ;;  %2108 = vst.msk [vmem:[#allocation2 + $0x46] sm:$0xc] %vm2105_vm5, %v2104_v27   ;;  %vm2439_vm5 = vcmask 236704  }
 0x13a   :  { %v2124_v28 = vpop.permute.xlu0 %2123  }
 0x13b   :  { %2127 = vst.msk [vmem:[#allocation2 + $0x28] sm:$0x3] %vm2125_vm8, %v2124_v28   ;;  %2129 = vst.msk [vmem:[#allocation2 + $0x6e] sm:$0xc] %vm2125_vm8, %v2124_v28   ;;  %vm2460_vm8 = vcmask 228504  }
 0x13c   :  { %v2145_v29 = vpop.permute.xlu1 %2144  }
 0x13d   :  { %2148 = vst.msk [vmem:[#allocation2 + $0x8] sm:$0x3] %vm2146_vm3, %v2145_v29   ;;  %2150 = vst.msk [vmem:[#allocation2 + $0x4e] sm:$0xc] %vm2146_vm3, %v2145_v29   ;;  %vm2481_vm3 = vcmask 220304  }
 0x13e   :  { %v2166_v30 = vpop.permute.xlu0 %2165  }
 0x13f   :  { %2169 = vst.msk [vmem:[#allocation2 + $0x30] sm:$0x3] %vm2167_vm9, %v2166_v30   ;;  %2171 = vst.msk [vmem:[#allocation2 + $0x76] sm:$0xc] %vm2167_vm9, %v2166_v30   ;;  %vm2501_vm9 = vcmask 212104  }
 0x140   :  { %v2187_v31 = vpop.permute.xlu1 %2186  }
 0x141   :  { %2190 = vst.msk [vmem:[#allocation2 + $0x10] sm:$0x3] %vm2188_vm10, %v2187_v31   ;;  %2192 = vst.msk [vmem:[#allocation2 + $0x56] sm:$0xc] %vm2188_vm10, %v2187_v31   ;;  %vm2522_vm10 = vcmask 203904  }
 0x142   :  { %v2208_v32 = vpop.permute.xlu0 %2207  }
 0x143   :  { %2211 = vst.msk [vmem:[#allocation2 + $0x80] sm:$0x3] %vm2209_vm11, %v2208_v32   ;;  %2213 = vst.msk [vmem:[#allocation2 + $0x36] sm:$0xc] %vm2209_vm11, %v2208_v32   ;;  %vm2543_vm11 = vcmask 195704  }
 0x144   :  { %v2229_v33 = vpop.permute.xlu1 %2228  }
 0x145   :  { %2232 = vst.msk [vmem:[#allocation2 + $0x60] sm:$0x3] %vm2230_vm12, %v2229_v33   ;;  %2234 = vst.msk [vmem:[#allocation2 + $0x16] sm:$0xc] %vm2230_vm12, %v2229_v33   ;;  %vm2564_vm12 = vcmask 187504  }
 0x146   :  { %v2250_v34 = vpop.permute.xlu0 %2249  }
 0x147   :  { %2253 = vst.msk [vmem:[#allocation2 + $0x40] sm:$0x3] %vm2251_vm0, %v2250_v34   ;;  %2255 = vst.msk [vmem:[#allocation2 + $0x86] sm:$0xc] %vm2251_vm0, %v2250_v34   ;;  %vm2585_vm0 = vcmask 179304  }
 0x148   :  { %v2271_v35 = vpop.permute.xlu1 %2270  }
 0x149   :  { %2274 = vst.msk [vmem:[#allocation2 + $0x20] sm:$0x3] %vm2272_vm1, %v2271_v35   ;;  %2276 = vst.msk [vmem:[#allocation2 + $0x66] sm:$0xc] %vm2272_vm1, %v2271_v35   ;;  %vm2606_vm1 = vcmask 171104  }
 0x14a   :  { %v2292_v36 = vpop.permute.xlu0 %2291  }
 0x14b   :  { %2294 = vst.msk [vmem:[#allocation2] sm:$0x3] %vm2293_vm13, %v2292_v36   ;;  %2296 = vst.msk [vmem:[#allocation2 + $0x46] sm:$0xc] %vm2293_vm13, %v2292_v36   ;;  %vm2627_vm13 = vcmask 162904  }
 0x14c   :  { %v2312_v37 = vpop.permute.xlu1 %2311  }
 0x14d   :  { %2315 = vst.msk [vmem:[#allocation2 + $0x28] sm:$0x3] %vm2313_vm2, %v2312_v37   ;;  %2317 = vst.msk [vmem:[#allocation2 + $0x6e] sm:$0xc] %vm2313_vm2, %v2312_v37   ;;  %vm2648_vm2 = vcmask 154704  }
 0x14f   :  { %v2333_v38 = vpop.permute.xlu0 %2332  }
 0x150   :  { %2336 = vst.msk [vmem:[#allocation2 + $0x8] sm:$0x3] %vm2334_vm14, %v2333_v38   ;;  %2338 = vst.msk [vmem:[#allocation2 + $0x4e] sm:$0xc] %vm2334_vm14, %v2333_v38   ;;  %vm2669_vm14 = vcmask 146504  }
 0x151   :  { %v2354_v39 = vpop.permute.xlu1 %2353  }
 0x152   :  { %2357 = vst.msk [vmem:[#allocation2 + $0x30] sm:$0x3] %vm2355_vm15, %v2354_v39   ;;  %2359 = vst.msk [vmem:[#allocation2 + $0x76] sm:$0xc] %vm2355_vm15, %v2354_v39   ;;  %vm2689_vm15 = vcmask 138304  }
 0x153   :  { %v2375_v40 = vpop.permute.xlu0 %2374  }
 0x154   :  { %2378 = vst.msk [vmem:[#allocation2 + $0x10] sm:$0x3] %vm2376_vm7, %v2375_v40   ;;  %2380 = vst.msk [vmem:[#allocation2 + $0x56] sm:$0xc] %vm2376_vm7, %v2375_v40   ;;  %vm2710_vm7 = vcmask 130104  }
 0x156   :  { %v2396_v41 = vpop.permute.xlu1 %2395  }
 0x157   :  { %2399 = vst.msk [vmem:[#allocation2 + $0x80] sm:$0x3] %vm2397_vm6, %v2396_v41   ;;  %2401 = vst.msk [vmem:[#allocation2 + $0x36] sm:$0xc] %vm2397_vm6, %v2396_v41   ;;  %vm2731_vm6 = vcmask 121904  }
 0x158   :  { %v2417_v42 = vpop.permute.xlu0 %2416  }
 0x159   :  { %2420 = vst.msk [vmem:[#allocation2 + $0x60] sm:$0x3] %vm2418_vm4, %v2417_v42   ;;  %2422 = vst.msk [vmem:[#allocation2 + $0x16] sm:$0xc] %vm2418_vm4, %v2417_v42   ;;  %vm2752_vm4 = vcmask 113704  }
 0x15a   :  { %v2438_v43 = vpop.permute.xlu1 %2437  }
 0x15b   :  { %2441 = vst.msk [vmem:[#allocation2 + $0x40] sm:$0x3] %vm2439_vm5, %v2438_v43   ;;  %2443 = vst.msk [vmem:[#allocation2 + $0x86] sm:$0xc] %vm2439_vm5, %v2438_v43   ;;  %vm2773_vm5 = vcmask 105504  }
 0x15d   :  { %v2459_v44 = vpop.permute.xlu0 %2458  }
 0x15e   :  { %2462 = vst.msk [vmem:[#allocation2 + $0x20] sm:$0x3] %vm2460_vm8, %v2459_v44   ;;  %2464 = vst.msk [vmem:[#allocation2 + $0x66] sm:$0xc] %vm2460_vm8, %v2459_v44   ;;  %vm2794_vm8 = vcmask 97304  }
 0x15f   :  { %v2480_v45 = vpop.permute.xlu1 %2479  }
 0x160   :  { %2482 = vst.msk [vmem:[#allocation2] sm:$0x3] %vm2481_vm3, %v2480_v45   ;;  %2484 = vst.msk [vmem:[#allocation2 + $0x46] sm:$0xc] %vm2481_vm3, %v2480_v45   ;;  %vm2815_vm3 = vcmask 89104  }
 0x161   :  { %v2500_v46 = vpop.permute.xlu0 %2499  }
 0x162   :  { %2503 = vst.msk [vmem:[#allocation2 + $0x28] sm:$0x3] %vm2501_vm9, %v2500_v46   ;;  %2505 = vst.msk [vmem:[#allocation2 + $0x6e] sm:$0xc] %vm2501_vm9, %v2500_v46   ;;  %vm2836_vm9 = vcmask 80904  }
 0x164   :  { %v2521_v47 = vpop.permute.xlu1 %2520  }
 0x165   :  { %2524 = vst.msk [vmem:[#allocation2 + $0x8] sm:$0x3] %vm2522_vm10, %v2521_v47   ;;  %2526 = vst.msk [vmem:[#allocation2 + $0x4e] sm:$0xc] %vm2522_vm10, %v2521_v47  }
 0x166   :  { %v2542_v48 = vpop.permute.xlu0 %2541  }
 0x167   :  { %2545 = vst.msk [vmem:[#allocation2 + $0x30] sm:$0x3] %vm2543_vm11, %v2542_v48   ;;  %2547 = vst.msk [vmem:[#allocation2 + $0x76] sm:$0xc] %vm2543_vm11, %v2542_v48  }
 0x168   :  { %v2563_v49 = vpop.permute.xlu1 %2562  }
 0x169   :  { %2566 = vst.msk [vmem:[#allocation2 + $0x10] sm:$0x3] %vm2564_vm12, %v2563_v49   ;;  %2568 = vst.msk [vmem:[#allocation2 + $0x56] sm:$0xc] %vm2564_vm12, %v2563_v49  }
 0x16b   :  { %v2584_v50 = vpop.permute.xlu0 %2583  }
 0x16c   :  { %2587 = vst.msk [vmem:[#allocation2 + $0x80] sm:$0x3] %vm2585_vm0, %v2584_v50   ;;  %2589 = vst.msk [vmem:[#allocation2 + $0x36] sm:$0xc] %vm2585_vm0, %v2584_v50  }
 0x16d   :  { %v2605_v51 = vpop.permute.xlu1 %2604  }
 0x16e   :  { %2608 = vst.msk [vmem:[#allocation2 + $0x60] sm:$0x3] %vm2606_vm1, %v2605_v51   ;;  %2610 = vst.msk [vmem:[#allocation2 + $0x16] sm:$0xc] %vm2606_vm1, %v2605_v51  }
 0x16f   :  { %v2626_v52 = vpop.permute.xlu0 %2625  }
 0x170   :  { %2629 = vst.msk [vmem:[#allocation2 + $0x40] sm:$0x3] %vm2627_vm13, %v2626_v52   ;;  %2631 = vst.msk [vmem:[#allocation2 + $0x86] sm:$0xc] %vm2627_vm13, %v2626_v52  }
 0x172   :  { %v2647_v53 = vpop.permute.xlu1 %2646  }
 0x173   :  { %2650 = vst.msk [vmem:[#allocation2 + $0x20] sm:$0x3] %vm2648_vm2, %v2647_v53   ;;  %2652 = vst.msk [vmem:[#allocation2 + $0x66] sm:$0xc] %vm2648_vm2, %v2647_v53  }
 0x174   :  { %v2668_v54 = vpop.permute.xlu0 %2667  }
 0x175   :  { %2670 = vst.msk [vmem:[#allocation2] sm:$0x3] %vm2669_vm14, %v2668_v54   ;;  %2672 = vst.msk [vmem:[#allocation2 + $0x46] sm:$0xc] %vm2669_vm14, %v2668_v54  }
 0x176   :  { %v2688_v55 = vpop.permute.xlu1 %2687  }
 0x177   :  { %2691 = vst.msk [vmem:[#allocation2 + $0x28] sm:$0x3] %vm2689_vm15, %v2688_v55   ;;  %2693 = vst.msk [vmem:[#allocation2 + $0x6e] sm:$0xc] %vm2689_vm15, %v2688_v55  }
 0x179   :  { %v2709_v56 = vpop.permute.xlu0 %2708  }
 0x17a   :  { %2712 = vst.msk [vmem:[#allocation2 + $0x8] sm:$0x3] %vm2710_vm7, %v2709_v56   ;;  %2714 = vst.msk [vmem:[#allocation2 + $0x4e] sm:$0xc] %vm2710_vm7, %v2709_v56  }
 0x17c   :  { %v2730_v57 = vpop.permute.xlu1 %2729   ;;  %v2844_v58 = vld [vmem:[#allocation2] sm:$0x3]  ;;  %v2895_v59 = vld [vmem:[#allocation2 + $0x48] sm:$0x3] }
 0x17d   :  { %2733 = vst.msk [vmem:[#allocation2 + $0x30] sm:$0x3] %vm2731_vm6, %v2730_v57   ;;  %2735 = vst.msk [vmem:[#allocation2 + $0x76] sm:$0xc] %vm2731_vm6, %v2730_v57   ;;  %v2751_v60 = vpop.permute.xlu0 %2750  }
 0x17e   :  { %2846 = vst [vmem:[#allocation0] sm:$0x3] %v2844_v58  ;;  %2899 = vst [vmem:[#allocation0 + $0x12] sm:$0x3] %v2895_v59  ;;  %v2871_v61 = vld [vmem:[#allocation2 + $0x28] sm:$0x3] }
 0x17f   :  { %2754 = vst.msk [vmem:[#allocation2 + $0x10] sm:$0x3] %vm2752_vm4, %v2751_v60   ;;  %2756 = vst.msk [vmem:[#allocation2 + $0x56] sm:$0xc] %vm2752_vm4, %v2751_v60   ;;  %v2925_v62 = vld [vmem:[#allocation2 + $0x70] sm:$0x3] }
 0x180   :  { %v2772_v63 = vpop.permute.xlu1 %2771   ;;  %2875 = vst [vmem:[#allocation0 + $0xa] sm:$0x3] %v2871_v61  ;;  %2929 = vst [vmem:[#allocation0 + $0x1c] sm:$0x3] %v2925_v62 }
 0x181   :  { %v2848_v0 = vld [vmem:[#allocation2 + $0x8] sm:$0x3]  ;;  %v2901_v1 = vld [vmem:[#allocation2 + $0x50] sm:$0x3]  ;;  %2775 = vst.msk [vmem:[#allocation2 + $0x80] sm:$0x3] %vm2773_vm5, %v2772_v63   ;;  %v2793_v2 = vpop.permute.xlu0 %2792  }
 0x182   :  { %2777 = vst.msk [vmem:[#allocation2 + $0x36] sm:$0xc] %vm2773_vm5, %v2772_v63   ;;  %2851 = vst [vmem:[#allocation0 + $0x2] sm:$0x3] %v2848_v0 }
 0x183   :  { %2905 = vst [vmem:[#allocation0 + $0x14] sm:$0x3] %v2901_v1  ;;  %2796 = vst.msk [vmem:[#allocation2 + $0x60] sm:$0x3] %vm2794_vm8, %v2793_v2  }
 0x184   :  { %2798 = vst.msk [vmem:[#allocation2 + $0x16] sm:$0xc] %vm2794_vm8, %v2793_v2   ;;  %v2877_v3 = vld [vmem:[#allocation2 + $0x30] sm:$0x3]  ;;  %v2931_v4 = vld [vmem:[#allocation2 + $0x78] sm:$0x3]  ;;  %v2814_v5 = vpop.permute.xlu1 %2813  }
 0x185   :  { %2881 = vst [vmem:[#allocation0 + $0xc] sm:$0x3] %v2877_v3  ;;  %2935 = vst [vmem:[#allocation0 + $0x1e] sm:$0x3] %v2931_v4  ;;  %v2835_v8 = vpop.permute.xlu0 %2834  }
 0x186   :  { %v2853_v6 = vld [vmem:[#allocation2 + $0x10] sm:$0x3]  ;;  %v2907_v7 = vld [vmem:[#allocation2 + $0x58] sm:$0x3]  ;;  %2817 = vst.msk [vmem:[#allocation2 + $0x40] sm:$0x3] %vm2815_vm3, %v2814_v5  }
 0x187   :  { %2819 = vst.msk [vmem:[#allocation2 + $0x86] sm:$0xc] %vm2815_vm3, %v2814_v5   ;;  %2857 = vst [vmem:[#allocation0 + $0x4] sm:$0x3] %v2853_v6 }
 0x188   :  { %2911 = vst [vmem:[#allocation0 + $0x16] sm:$0x3] %v2907_v7  ;;  %2838 = vst.msk [vmem:[#allocation2 + $0x20] sm:$0x3] %vm2836_vm9, %v2835_v8   ;;  %v2937_v10 = vld [vmem:[#allocation2 + $0x80] sm:$0x3] }
 0x189   :  { %2840 = vst.msk [vmem:[#allocation2 + $0x66] sm:$0xc] %vm2836_vm9, %v2835_v8   ;;  %v2883_v9 = vld [vmem:[#allocation2 + $0x38] sm:$0x3]  ;;  %2941 = vst [vmem:[#allocation0 + $0x20] sm:$0x3] %v2937_v10 }
 0x18a   :  { %2887 = vst [vmem:[#allocation0 + $0xe] sm:$0x3] %v2883_v9  ;;  %v2913_v12 = vld [vmem:[#allocation2 + $0x60] sm:$0x3] }
 0x18b   :  { %v2859_v11 = vld [vmem:[#allocation2 + $0x18] sm:$0x3]  ;;  %2917 = vst [vmem:[#allocation0 + $0x18] sm:$0x3] %v2913_v12 }
 0x18c   :  { %2863 = vst [vmem:[#allocation0 + $0x6] sm:$0x3] %v2859_v11 }
 0x18d   :  { %v2889_v13 = vld [vmem:[#allocation2 + $0x40] sm:$0x3] }
 0x18e   :  { %v2943_v14 = vld [vmem:[#allocation2 + $0x88] sm:$0x3]  ;;  %2893 = vst [vmem:[#allocation0 + $0x10] sm:$0x3] %v2889_v13 }
 0x18f   :  { %2947 = vst [vmem:[#allocation0 + $0x22] sm:$0x3] %v2943_v14  ;;  %v2865_v15 = vld [vmem:[#allocation2 + $0x20] sm:$0x3] }
 0x190   :  { %v2919_v16 = vld [vmem:[#allocation2 + $0x68] sm:$0x3]  ;;  %2869 = vst [vmem:[#allocation0 + $0x8] sm:$0x3] %v2865_v15 }
 0x191   :  { %2923 = vst [vmem:[#allocation0 + $0x1a] sm:$0x3] %v2919_v16 }
 0x192   :  { %3656 = shalt.err (!%p3653_p4)
}
 0x193   :  { %s3657_s7 = scalar_lea.hbm %s6016_s1, 576 }
 0x194   :  { %p3658_p5 = scmp.ne.s32.totalorder %s6016_s1, %s3657_s7  ;;  %p3661_p6 = scmp.lt.u32.totalorder %s3657_s7, %s6016_s1 }
 0x196   :  { %p3663_p7 = pnand %p3661_p6, %p3658_p5 }
 0x198   :  { %3666 = shalt.err (!%p3663_p7)
}
 0x199   :  { %2955 = dma.vmem_to_hbm [thread:$0]  %s2953_s3, 576, %s6016_s1, [#allocation1]  }
 0x19a   :  { %3667 = dma.done.wait [#allocation1], 576  }
 0x19b   :  { %3668 = vsyncadd [#allocation1], 4294966720 }
 0x19c   :  { %2957 = vsyncpa [#allocation1], 1 }

// kernel: _forward_impl.3
= control target key start
LH: loop header
LB: loop body
LE: loop exit
PB: predicated region body
PF: predicated region fallthrough
CT: control target
= control target key end

     0   :  { %s832_s12 = smov 0   ;;  %s834_s13 = smov 0   ;;  %s924_s0 = inlined_call_operand.vmem [shape: bf16[512,128], index: 0, kind: input, shape index: {}]   ;;  %s925_s1 = inlined_call_operand.vmem [shape: bf16[128,128], index: 1, kind: input, shape index: {}]   ;;  %s926_s2 = inlined_call_operand.vmem [shape: f32[1,128], index: 2, kind: input, shape index: {}]   ;;  %s927_s3 = inlined_call_operand.vmem [shape: f32[512,128], index: 3, kind: output, shape index: {}]  }
   0x1   :  { %s836_s14 = smov 0  }
   0x2 LB: > { %s25_s15 = sadd.s32 1, %s806_s13  ;;  %p659_p0 = scmp.ge.s32.totalorder %s810_s14, 1  ;;  %s810_s14 = sphi %s836_s14, %s13_s14   ;;  %s806_s13 = sphi %s834_s13, %s929_s13   ;;  %s802_s12 = sphi %s832_s12, %s928_s12  }
   0x3   : > { %p27_p1 = scmp.ge.s32.totalorder %s25_s15, 4  ;;  %p166_p2 = scmp.lt.s32.totalorder %s810_s14, 5 }
   0x5   : > { %s931_s15 = smov (%p27_p1, %s25_s15), 0  ;;  %p167_p3 = pnand %p659_p0, %p166_p2 }
   0x6   : > { %v772_v0 = vld [vmem:[%s925_s1] sm:$0xff] (!%p167_p3)   ;;  %s660_s18 = sshll.u32 (!%p167_p3), %s802_s12, 4  ;;  %v773_v1 = vld [vmem:[%s925_s1 + $0x8] sm:$0xff] (!%p167_p3)   ;;  %v774_v2 = vld [vmem:[%s925_s1 + $0x10] sm:$0xff] (!%p167_p3)  }
   0x7   : > { %170 = sbr.rel (%p167_p3) target bundleno = 265 (0x109), region = 32  ;;  %p199_p4 = scmp.lt.s32.totalorder (!%p167_p3), %s660_s18, 63  ;;  %699 = vmatprep.subr.bf16.mxu0 (!%p167_p3), %v772_v0  ;;  %731 = vmatprep.subr.bf16.mxu1 (!%p167_p3), %v772_v0  ;;  %v775_v3 = vld [vmem:[%s925_s1 + $0x18] sm:$0xff] (!%p167_p3)   ;;  %v776_v6 = vld [vmem:[%s925_s1 + $0x20] sm:$0xff] (!%p167_p3)   ;;  %v777_v7 = vld [vmem:[%s925_s1 + $0x28] sm:$0xff] (!%p167_p3)  }
   0x8   : > { %700 = vmatpush3.bf16.msra.mxu0 (!%p167_p3), %v772_v0  ;;  %739 = vmatpush3.bf16.msra.mxu1 (!%p167_p3), %v772_v0  ;;  %v778_v8 = vld [vmem:[%s925_s1 + $0x30] sm:$0xff] (!%p167_p3)   ;;  %v779_v9 = vld [vmem:[%s925_s1 + $0x38] sm:$0xff] (!%p167_p3)   ;;  %v680_v17 = vld [vmem:[%s926_s2] ss:$0 sm:$0xff] (!%p167_p3) }
   0x9   : > { %701 = vmatprep.subr.bf16.mxu0 (!%p167_p3), %v773_v1  ;;  %732 = vmatprep.subr.bf16.mxu1 (!%p167_p3), %v773_v1 }
   0xc   : > { %702 = vmatpush3.bf16.msra.mxu0 (!%p167_p3), %v773_v1  ;;  %740 = vmatpush3.bf16.msra.mxu1 (!%p167_p3), %v773_v1 }
   0xd   : > { %703 = vmatprep.subr.bf16.mxu0 (!%p167_p3), %v774_v2  ;;  %733 = vmatprep.subr.bf16.mxu1 (!%p167_p3), %v774_v2 }
   0xe   : > { %s933_s18 = smov (!%p199_p4, %s660_s18), 63 }
   0xf   : > { %s661_s23 = sshll.u32 %s933_s18, 2  ;;  %s663_s10 = sshll.u32 %s933_s18, 3 }
  0x10   : > { %s865_s26 = scalar_lea.vmem %s924_s0, %s661_s23  ;;  %704 = vmatpush3.bf16.msra.mxu0 %v774_v2  ;;  %741 = vmatpush3.bf16.msra.mxu1 %v774_v2  ;;  %s897_s19 = scalar_lea.vmem %s927_s3, %s663_s10 }
  0x11   : > { %v780_v4 = vld [vmem:[%s865_s26] sm:$0xff]   ;;  %705 = vmatprep.subr.bf16.mxu0 %v775_v3  ;;  %734 = vmatprep.subr.bf16.mxu1 %v775_v3  ;;  %v782_v10 = vld [vmem:[%s865_s26 + $0x8] sm:$0xff]   ;;  %v784_v12 = vld [vmem:[%s865_s26 + $0x10] sm:$0xff]  }
  0x12   : > { %v781_v5 = vld [vmem:[%s865_s26 + $0x20] sm:$0xff]   ;;  %715 = vmatprep.mubr.bf16.mxu0 %v780_v4  ;;  %v783_v11 = vld [vmem:[%s865_s26 + $0x28] sm:$0xff]   ;;  %v785_v13 = vld [vmem:[%s865_s26 + $0x30] sm:$0xff]  }
  0x13   : > { %723 = vmatprep.mubr.bf16.mxu1 %v781_v5  ;;  %v786_v14 = vld [vmem:[%s865_s26 + $0x18] sm:$0xff]  }
  0x14   : > { %706 = vmatpush3.bf16.msra.mxu0 %v775_v3  ;;  %742 = vmatpush3.bf16.msra.mxu1 %v775_v3  ;;  %v787_v15 = vld [vmem:[%s865_s26 + $0x38] sm:$0xff]  }
  0x15   : > { %707 = vmatprep.subr.bf16.mxu0 %v776_v6  ;;  %735 = vmatprep.subr.bf16.mxu1 %v776_v6 }
  0x18   : > { %708 = vmatpush3.bf16.msra.mxu0 %v776_v6  ;;  %743 = vmatpush3.bf16.msra.mxu1 %v776_v6 }
  0x19   : > { %709 = vmatprep.subr.bf16.mxu0 %v777_v7  ;;  %736 = vmatprep.subr.bf16.mxu1 %v777_v7 }
  0x1c   : > { %710 = vmatpush3.bf16.msra.mxu0 %v777_v7  ;;  %744 = vmatpush3.bf16.msra.mxu1 %v777_v7 }
  0x1d   : > { %711 = vmatprep.subr.bf16.mxu0 %v778_v8  ;;  %737 = vmatprep.subr.bf16.mxu1 %v778_v8 }
  0x20   : > { %712 = vmatpush3.bf16.msra.mxu0 %v778_v8  ;;  %745 = vmatpush3.bf16.msra.mxu1 %v778_v8 }
  0x21   : > { %713 = vmatprep.subr.bf16.mxu0 %v779_v9  ;;  %738 = vmatprep.subr.bf16.mxu1 %v779_v9 }
  0x24   : > { %714 = vmatpush3.bf16.msra.mxu0 %v779_v9  ;;  %746 = vmatpush3.bf16.msra.mxu1 %v779_v9 }
  0x27   : > { %716 = vmatmul.mubr.bf16.vlgmr.msra.gmra.mrb[0].mxu0 %v782_v10  ;;  %724 = vmatmul.mubr.bf16.vlgmr.msra.gmra.mrb[0].mxu1 %v783_v11 }
  0x28   : > { %719 = vmatprep.mubr.bf16.mxu0 %v784_v12  ;;  %727 = vmatprep.mubr.bf16.mxu1 %v785_v13 }
  0x2f   : > { %720 = vmatmul.mubr.bf16.gmra.mrb[4].mxu0 %v786_v14  ;;  %728 = vmatmul.mubr.bf16.gmra.mrb[4].mxu1 %v787_v15 }
  0xfa   : > { %v717_v16 = vpop.f32.mrb[0].mxu0  ;;  %v725_v18 = vpop.f32.mrb[0].mxu1 }
  0xfb   : > { %v418_v19 = vpop.f32.mrb[1].mxu0  ;;  %v450_v20 = vpop.f32.mrb[1].mxu1  ;;  %v541_v23 = vadd.f32 %v717_v16, %v680_v17  ;;  %v549_v24 = vadd.f32 %v725_v18, %v680_v17 }
  0xfc   : > { %v718_v21 = vpop.f32.mrb[2].mxu0  ;;  %v726_v22 = vpop.f32.mrb[2].mxu1  ;;  %v539_v27 = vadd.f32 %v680_v17, %v418_v19  ;;  %v547_v28 = vadd.f32 %v680_v17, %v450_v20 }
  0xfd   : > { %v421_v25 = vpop.f32.mrb[3].mxu0  ;;  %v453_v26 = vpop.f32.mrb[3].mxu1  ;;  %557 = vst [vmem:[%s897_s19 + $0x10] sm:$0xff] %v541_v23  ;;  %565 = vst [vmem:[%s897_s19 + $0x50] sm:$0xff] %v549_v24  ;;  %v542_v29 = vadd.f32 %v718_v21, %v680_v17  ;;  %v550_v30 = vadd.f32 %v726_v22, %v680_v17 }
  0xfe   : > { %555 = vst [vmem:[%s897_s19] sm:$0xff] %v539_v27  ;;  %563 = vst [vmem:[%s897_s19 + $0x40] sm:$0xff] %v547_v28  ;;  %v540_v31 = vadd.f32 %v680_v17, %v421_v25  ;;  %v548_v32 = vadd.f32 %v680_v17, %v453_v26 }
  0xff   : > { %558 = vst [vmem:[%s897_s19 + $0x18] sm:$0xff] %v542_v29  ;;  %566 = vst [vmem:[%s897_s19 + $0x58] sm:$0xff] %v550_v30 }
 0x100   : > { %556 = vst [vmem:[%s897_s19 + $0x8] sm:$0xff] %v540_v31  ;;  %564 = vst [vmem:[%s897_s19 + $0x48] sm:$0xff] %v548_v32 }
 0x102   : > { %v721_v33 = vpop.f32.mrb[4].mxu0  ;;  %v729_v34 = vpop.f32.mrb[4].mxu1 }
 0x103   : > { %v434_v35 = vpop.f32.mrb[5].mxu0  ;;  %v466_v36 = vpop.f32.mrb[5].mxu1  ;;  %v545_v39 = vadd.f32 %v721_v33, %v680_v17  ;;  %v553_v40 = vadd.f32 %v729_v34, %v680_v17 }
 0x104   : > { %v722_v37 = vpop.f32.mrb[6].mxu0  ;;  %v730_v38 = vpop.f32.mrb[6].mxu1  ;;  %v543_v43 = vadd.f32 %v680_v17, %v434_v35  ;;  %v551_v44 = vadd.f32 %v680_v17, %v466_v36 }
 0x105   : > { %v437_v41 = vpop.f32.mrb[7].mxu0  ;;  %v469_v42 = vpop.f32.mrb[7].mxu1  ;;  %561 = vst [vmem:[%s897_s19 + $0x30] sm:$0xff] %v545_v39  ;;  %569 = vst [vmem:[%s897_s19 + $0x70] sm:$0xff] %v553_v40  ;;  %v546_v45 = vadd.f32 %v722_v37, %v680_v17  ;;  %v554_v46 = vadd.f32 %v730_v38, %v680_v17 }
 0x106   : > { %559 = vst [vmem:[%s897_s19 + $0x20] sm:$0xff] %v543_v43  ;;  %567 = vst [vmem:[%s897_s19 + $0x60] sm:$0xff] %v551_v44  ;;  %v544_v47 = vadd.f32 %v680_v17, %v437_v41  ;;  %v552_v48 = vadd.f32 %v680_v17, %v469_v42 }
 0x107   : > { %562 = vst [vmem:[%s897_s19 + $0x38] sm:$0xff] %v546_v45  ;;  %570 = vst [vmem:[%s897_s19 + $0x78] sm:$0xff] %v554_v46 }
 0x108   : > { %560 = vst [vmem:[%s897_s19 + $0x28] sm:$0xff] %v544_v47  ;;  %568 = vst [vmem:[%s897_s19 + $0x68] sm:$0xff] %v552_v48 }
 0x109 PF: > { %s13_s14 = sadd.s32 1, %s810_s14   ;;  %s928_s12 = smov %s806_s13 }
 0x10a   : > { %p10_p5 = scmp.ge.s32.totalorder %s13_s14, 6   ;;  %s929_s13 = smov %s931_s15 }
 0x10c   :  { %12 = sbr.rel (!%p10_p5) target bundleno = 2 (0x2), region = 73 }

</bundles_post_ra>
